<compile_context>
chip_gen: v6e
topology: v6e:2x2x1
jax: 0.10.0
libtpu: 0.0.40
codegen_flags: <defaults>
</compile_context>

<pallas_src>
import jax
import jax.numpy as jnp
from jax.experimental import pallas as pl
from jax.experimental.pallas import tpu as pltpu


def bottleneck_kernel(x_ref, w1_ref, b1_ref, w2_ref, b2_ref, w3_ref, b3_ref,
                      out_ref, pad_ref):
    B, H, W, Cin = x_ref.shape
    P = w1_ref.shape[1]          # planes
    Cout = w3_ref.shape[1]       # planes * 4 (== Cin for the identity residual)

    x = x_ref[...].reshape(B * H * W, Cin)

    # conv1 (1x1) + folded bn1 + relu  -> (B*H*W, P)
    y1 = jnp.dot(x, w1_ref[...], preferred_element_type=jnp.float32) + b1_ref[...]
    y1 = jnp.maximum(y1, 0.0)

    # Stage the activation with a 1-pixel zero halo for the 3x3 conv.
    pad_ref[...] = jnp.zeros(pad_ref.shape, pad_ref.dtype)
    pad_ref[:, pl.ds(1, H), pl.ds(1, W), :] = y1.reshape(B, H, W, P)

    # conv2 (3x3, stride=1, pad=1) + folded bn2 + relu, as 9 shifted matmuls.
    # All slice offsets are static -> cheap VMEM sub-slice loads.
    acc = None
    for ky in range(3):
        for kx in range(3):
            win = pad_ref[:, pl.ds(ky, H), pl.ds(kx, W), :].reshape(B * H * W, P)
            part = jnp.dot(win, w2_ref[ky * 3 + kx],
                           preferred_element_type=jnp.float32)
            acc = part if acc is None else acc + part
    y2 = jnp.maximum(acc + b2_ref[...], 0.0)

    # conv3 (1x1) + folded bn3
    y3 = jnp.dot(y2, w3_ref[...], preferred_element_type=jnp.float32) + b3_ref[...]

    # identity residual (downsample=None) + relu
    out = jnp.maximum(y3 + x, 0.0)
    out_ref[...] = out.reshape(B, H, W, Cout)


def _fold_bn(gamma, beta, mean, var, eps):
    scale = gamma / jnp.sqrt(var + eps)
    return scale, beta - mean * scale


def prepare_params(w1, bn1, w2, bn2, w3, bn3, eps=1e-5):
    """One-time weight prep (do at model init, not per forward call)."""
    s1, b1 = _fold_bn(*bn1, eps)
    s2, b2 = _fold_bn(*bn2, eps)
    s3, b3 = _fold_bn(*bn3, eps)
    P, Cin = w1.shape[0], w1.shape[1]        # w1: (P, Cin, 1, 1)
    Cout = w3.shape[0]                       # w3: (Cout, P, 1, 1)
    w1f = w1.reshape(P, Cin).T * s1[None, :]                        # (Cin, P)
    w2f = (jnp.transpose(w2, (2, 3, 1, 0)) * s2[None, None, None, :]
           ).reshape(9, P, P)                                       # (9, Pin, Pout)
    w3f = w3.reshape(Cout, P).T * s3[None, :]                       # (P, Cout)
    return (w1f, b1.reshape(1, P), w2f, b2.reshape(1, P),
            w3f, b3.reshape(1, Cout))


def _forward_impl(x_nchw, w1f, b1, w2f, b2, w3f, b3):
    B, Cin, H, W = x_nchw.shape
    P = w1f.shape[1]
    Cout = w3f.shape[1]

    # NHWC so channels sit on the lane axis (layout plumbing, once per call).
    x = jnp.transpose(x_nchw, (0, 2, 3, 1)).astype(jnp.float32)

    vmem = pl.BlockSpec(memory_space=pltpu.MemorySpace.VMEM)
    out = pl.pallas_call(
        bottleneck_kernel,
        out_shape=jax.ShapeDtypeStruct((B, H, W, Cout), jnp.float32),
        in_specs=[vmem] * 7,
        out_specs=vmem,
        scratch_shapes=[pltpu.VMEM((B, H + 2, W + 2, P), jnp.float32)],
    )(x, w1f, b1, w2f, b2, w3f, b3)

    return jnp.transpose(out, (0, 3, 1, 2))  # back to NCHW to match PyTorch


_forward_jit = jax.jit(_forward_impl)


def bottleneck_forward(x_nchw, params):
    """x_nchw: (B, Cin, H, W) with Cin == planes*4. Returns (B, Cout, H, W)."""
    w1f, b1, w2f, b2, w3f, b3 = params
    assert x_nchw.shape[1] == w3f.shape[1], \
        "identity residual requires inplanes == planes * 4"
    return _forward_jit(x_nchw, w1f, b1, w2f, b2, w3f, b3)


def _reference(x_nchw, w1, bn1, w2, bn2, w3, bn3, eps=1e-5):
    """Independent pure-JAX reference: lax conv + explicit eval-mode BN."""
    def bn(y, p):
        gamma, beta, mean, var = p
        return (y - mean) / jnp.sqrt(var + eps) * gamma + beta

    def conv(x, w_oihw, pad):
        w = jnp.transpose(w_oihw, (2, 3, 1, 0))  # OIHW -> HWIO
        return jax.lax.conv_general_dilated(
            x, w, window_strides=(1, 1), padding=pad,
            dimension_numbers=('NHWC', 'HWIO', 'NHWC'))

    x = jnp.transpose(x_nchw, (0, 2, 3, 1))
    y = jax.nn.relu(bn(conv(x, w1, 'VALID'), bn1))
    y = jax.nn.relu(bn(conv(y, w2, ((1, 1), (1, 1))), bn2))
    y = bn(conv(y, w3, 'VALID'), bn3)
    y = jax.nn.relu(y + x)
    return jnp.transpose(y, (0, 3, 1, 2))


if __name__ == "__main__":
    B, planes, H, W = 2, 4, 16, 16
    inplanes = planes * 4          # 16, so the identity residual applies

    key = jax.random.PRNGKey(0)
    ks = jax.random.split(key, 15)

    x = jax.random.normal(ks[0], (B, inplanes, H, W), jnp.float32)

    # Conv weights in PyTorch layout (Cout, Cin, kH, kW), no bias.
    w1 = jax.random.normal(ks[1], (planes, inplanes, 1, 1), jnp.float32) * 0.2
    w2 = jax.random.normal(ks[2], (planes, planes, 3, 3), jnp.float32) * 0.2
    w3 = jax.random.normal(ks[3], (planes * 4, planes, 1, 1), jnp.float32) * 0.2

    def make_bn(k, c):
        k1, k2, k3, k4 = jax.random.split(k, 4)
        gamma = jax.random.uniform(k1, (c,), jnp.float32, 0.5, 1.5)
        beta = jax.random.normal(k2, (c,), jnp.float32) * 0.1
        mean = jax.random.normal(k3, (c,), jnp.float32) * 0.1
        var = jax.random.uniform(k4, (c,), jnp.float32, 0.5, 1.5)
        return (gamma, beta, mean, var)

    bn1 = make_bn(ks[4], planes)
    bn2 = make_bn(ks[5], planes)
    bn3 = make_bn(ks[6], planes * 4)

    params = prepare_params(w1, bn1, w2, bn2, w3, bn3)   # one-time weight prep

    out = bottleneck_forward(x, params)
    jax.block_until_ready(out)

    ref = _reference(x, w1, bn1, w2, bn2, w3, bn3)
    assert out.shape == (B, planes * 4, H, W)
    assert jnp.allclose(out, ref, atol=1e-4, rtol=1e-4), \
        f"max abs diff = {jnp.max(jnp.abs(out - ref))}"

    print("KERNEL_OK")
</pallas_src>

<mosaic_0001>
module attributes {stable_mosaic.version = 11 : i64} {
  func.func @bottleneck_kernel(%arg0: memref<2x16x16x16xf32, #tpu.memory_space<vmem>>, %arg1: memref<16x4xf32, #tpu.memory_space<vmem>>, %arg2: memref<1x4xf32, #tpu.memory_space<vmem>>, %arg3: memref<9x4x4xf32, #tpu.memory_space<vmem>>, %arg4: memref<1x4xf32, #tpu.memory_space<vmem>>, %arg5: memref<4x16xf32, #tpu.memory_space<vmem>>, %arg6: memref<1x16xf32, #tpu.memory_space<vmem>>, %arg7: memref<2x16x16x16xf32, #tpu.memory_space<vmem>>, %arg8: memref<2x18x18x4xf32, #tpu.memory_space<vmem>>) attributes {dimension_semantics = [], scalar_prefetch = 0 : i64, scratch_operands = 1 : i64, tpu.core_type = #tpu.core_type<tc>} {
    %c0 = arith.constant 0 : index
    %c0_0 = arith.constant 0 : index
    %c0_1 = arith.constant 0 : index
    %c0_2 = arith.constant 0 : index
    %0 = vector.load %arg0[%c0, %c0_0, %c0_1, %c0_2] : memref<2x16x16x16xf32, #tpu.memory_space<vmem>>, vector<2x16x16x16xf32>
    %1 = vector.shape_cast %0 : vector<2x16x16x16xf32> to vector<512x16xf32>
    %c0_3 = arith.constant 0 : index
    %c0_4 = arith.constant 0 : index
    %2 = vector.load %arg1[%c0_3, %c0_4] : memref<16x4xf32, #tpu.memory_space<vmem>>, vector<16x4xf32>
    %cst = arith.constant dense<0.000000e+00> : vector<512x4xf32>
    %3 = tpu.matmul %1, %2, %cst {dimension_numbers = #tpu.dot_dimension_numbers<[1], [0], [0], [1], [0, 0, 1, 1], [], []>} : vector<512x16xf32>, vector<16x4xf32>, vector<512x4xf32> -> vector<512x4xf32>
    %c0_5 = arith.constant 0 : index
    %c0_6 = arith.constant 0 : index
    %4 = vector.load %arg2[%c0_5, %c0_6] : memref<1x4xf32, #tpu.memory_space<vmem>>, vector<1x4xf32>
    %5 = vector.broadcast %4 : vector<1x4xf32> to vector<512x4xf32>
    %6 = arith.addf %3, %5 : vector<512x4xf32>
    %cst_7 = arith.constant 0.000000e+00 : f32
    %7 = vector.broadcast %cst_7 : f32 to vector<512x4xf32>
    %8 = arith.maximumf %6, %7 : vector<512x4xf32>
    %cst_8 = arith.constant 0.000000e+00 : f32
    %9 = vector.broadcast %cst_8 : f32 to vector<2x18x18x4xf32>
    %c0_9 = arith.constant 0 : index
    %c0_10 = arith.constant 0 : index
    %c0_11 = arith.constant 0 : index
    %c0_12 = arith.constant 0 : index
    %10 = vector.load %arg8[%c0_9, %c0_10, %c0_11, %c0_12] : memref<2x18x18x4xf32, #tpu.memory_space<vmem>>, vector<2x18x18x4xf32>
    tpu.vector_store %arg8[%c0_9, %c0_10, %c0_11, %c0_12], %9 {strides = array<i32>} : memref<2x18x18x4xf32, #tpu.memory_space<vmem>>, vector<2x18x18x4xf32>,
    %11 = vector.shape_cast %8 : vector<512x4xf32> to vector<2x16x16x4xf32>
    %c0_13 = arith.constant 0 : index
    %c1 = arith.constant 1 : index
    %c1_14 = arith.constant 1 : index
    %c0_15 = arith.constant 0 : index
    %12 = vector.load %arg8[%c0_13, %c1, %c1_14, %c0_15] : memref<2x18x18x4xf32, #tpu.memory_space<vmem>>, vector<2x16x16x4xf32>
    tpu.vector_store %arg8[%c0_13, %c1, %c1_14, %c0_15], %11 {strides = array<i32>} : memref<2x18x18x4xf32, #tpu.memory_space<vmem>>, vector<2x16x16x4xf32>,
    %c0_16 = arith.constant 0 : index
    %c0_17 = arith.constant 0 : index
    %c0_18 = arith.constant 0 : index
    %c0_19 = arith.constant 0 : index
    %13 = vector.load %arg8[%c0_16, %c0_17, %c0_18, %c0_19] : memref<2x18x18x4xf32, #tpu.memory_space<vmem>>, vector<2x16x16x4xf32>
    %14 = vector.shape_cast %13 : vector<2x16x16x4xf32> to vector<512x4xf32>
    %c0_20 = arith.constant 0 : index
    %c0_21 = arith.constant 0 : index
    %c0_22 = arith.constant 0 : index
    %15 = vector.load %arg3[%c0_20, %c0_21, %c0_22] : memref<9x4x4xf32, #tpu.memory_space<vmem>>, vector<1x4x4xf32>
    %16 = vector.shape_cast %15 : vector<1x4x4xf32> to vector<4x4xf32>
    %cst_23 = arith.constant dense<0.000000e+00> : vector<512x4xf32>
    %17 = tpu.matmul %14, %16, %cst_23 {dimension_numbers = #tpu.dot_dimension_numbers<[1], [0], [0], [1], [0, 0, 1, 1], [], []>} : vector<512x4xf32>, vector<4x4xf32>, vector<512x4xf32> -> vector<512x4xf32>
    %c0_24 = arith.constant 0 : index
    %c0_25 = arith.constant 0 : index
    %c1_26 = arith.constant 1 : index
    %c0_27 = arith.constant 0 : index
    %18 = vector.load %arg8[%c0_24, %c0_25, %c1_26, %c0_27] : memref<2x18x18x4xf32, #tpu.memory_space<vmem>>, vector<2x16x16x4xf32>
    %19 = vector.shape_cast %18 : vector<2x16x16x4xf32> to vector<512x4xf32>
    %c1_28 = arith.constant 1 : index
    %c0_29 = arith.constant 0 : index
    %c0_30 = arith.constant 0 : index
    %20 = vector.load %arg3[%c1_28, %c0_29, %c0_30] : memref<9x4x4xf32, #tpu.memory_space<vmem>>, vector<1x4x4xf32>
    %21 = vector.shape_cast %20 : vector<1x4x4xf32> to vector<4x4xf32>
    %cst_31 = arith.constant dense<0.000000e+00> : vector<512x4xf32>
    %22 = tpu.matmul %19, %21, %cst_31 {dimension_numbers = #tpu.dot_dimension_numbers<[1], [0], [0], [1], [0, 0, 1, 1], [], []>} : vector<512x4xf32>, vector<4x4xf32>, vector<512x4xf32> -> vector<512x4xf32>
    %23 = arith.addf %17, %22 : vector<512x4xf32>
    %c0_32 = arith.constant 0 : index
    %c0_33 = arith.constant 0 : index
    %c2 = arith.constant 2 : index
    %c0_34 = arith.constant 0 : index
    %24 = vector.load %arg8[%c0_32, %c0_33, %c2, %c0_34] : memref<2x18x18x4xf32, #tpu.memory_space<vmem>>, vector<2x16x16x4xf32>
    %25 = vector.shape_cast %24 : vector<2x16x16x4xf32> to vector<512x4xf32>
    %c2_35 = arith.constant 2 : index
    %c0_36 = arith.constant 0 : index
    %c0_37 = arith.constant 0 : index
    %26 = vector.load %arg3[%c2_35, %c0_36, %c0_37] : memref<9x4x4xf32, #tpu.memory_space<vmem>>, vector<1x4x4xf32>
    %27 = vector.shape_cast %26 : vector<1x4x4xf32> to vector<4x4xf32>
    %cst_38 = arith.constant dense<0.000000e+00> : vector<512x4xf32>
    %28 = tpu.matmul %25, %27, %cst_38 {dimension_numbers = #tpu.dot_dimension_numbers<[1], [0], [0], [1], [0, 0, 1, 1], [], []>} : vector<512x4xf32>, vector<4x4xf32>, vector<512x4xf32> -> vector<512x4xf32>
    %29 = arith.addf %23, %28 : vector<512x4xf32>
    %c0_39 = arith.constant 0 : index
    %c1_40 = arith.constant 1 : index
    %c0_41 = arith.constant 0 : index
    %c0_42 = arith.constant 0 : index
    %30 = vector.load %arg8[%c0_39, %c1_40, %c0_41, %c0_42] : memref<2x18x18x4xf32, #tpu.memory_space<vmem>>, vector<2x16x16x4xf32>
    %31 = vector.shape_cast %30 : vector<2x16x16x4xf32> to vector<512x4xf32>
    %c3 = arith.constant 3 : index
    %c0_43 = arith.constant 0 : index
    %c0_44 = arith.constant 0 : index
    %32 = vector.load %arg3[%c3, %c0_43, %c0_44] : memref<9x4x4xf32, #tpu.memory_space<vmem>>, vector<1x4x4xf32>
    %33 = vector.shape_cast %32 : vector<1x4x4xf32> to vector<4x4xf32>
    %cst_45 = arith.constant dense<0.000000e+00> : vector<512x4xf32>
    %34 = tpu.matmul %31, %33, %cst_45 {dimension_numbers = #tpu.dot_dimension_numbers<[1], [0], [0], [1], [0, 0, 1, 1], [], []>} : vector<512x4xf32>, vector<4x4xf32>, vector<512x4xf32> -> vector<512x4xf32>
    %35 = arith.addf %29, %34 : vector<512x4xf32>
    %c0_46 = arith.constant 0 : index
    %c1_47 = arith.constant 1 : index
    %c1_48 = arith.constant 1 : index
    %c0_49 = arith.constant 0 : index
    %36 = vector.load %arg8[%c0_46, %c1_47, %c1_48, %c0_49] : memref<2x18x18x4xf32, #tpu.memory_space<vmem>>, vector<2x16x16x4xf32>
    %37 = vector.shape_cast %36 : vector<2x16x16x4xf32> to vector<512x4xf32>
    %c4 = arith.constant 4 : index
    %c0_50 = arith.constant 0 : index
    %c0_51 = arith.constant 0 : index
    %38 = vector.load %arg3[%c4, %c0_50, %c0_51] : memref<9x4x4xf32, #tpu.memory_space<vmem>>, vector<1x4x4xf32>
    %39 = vector.shape_cast %38 : vector<1x4x4xf32> to vector<4x4xf32>
    %cst_52 = arith.constant dense<0.000000e+00> : vector<512x4xf32>
    %40 = tpu.matmul %37, %39, %cst_52 {dimension_numbers = #tpu.dot_dimension_numbers<[1], [0], [0], [1], [0, 0, 1, 1], [], []>} : vector<512x4xf32>, vector<4x4xf32>, vector<512x4xf32> -> vector<512x4xf32>
    %41 = arith.addf %35, %40 : vector<512x4xf32>
    %c0_53 = arith.constant 0 : index
    %c1_54 = arith.constant 1 : index
    %c2_55 = arith.constant 2 : index
    %c0_56 = arith.constant 0 : index
    %42 = vector.load %arg8[%c0_53, %c1_54, %c2_55, %c0_56] : memref<2x18x18x4xf32, #tpu.memory_space<vmem>>, vector<2x16x16x4xf32>
    %43 = vector.shape_cast %42 : vector<2x16x16x4xf32> to vector<512x4xf32>
    %c5 = arith.constant 5 : index
    %c0_57 = arith.constant 0 : index
    %c0_58 = arith.constant 0 : index
    %44 = vector.load %arg3[%c5, %c0_57, %c0_58] : memref<9x4x4xf32, #tpu.memory_space<vmem>>, vector<1x4x4xf32>
    %45 = vector.shape_cast %44 : vector<1x4x4xf32> to vector<4x4xf32>
    %cst_59 = arith.constant dense<0.000000e+00> : vector<512x4xf32>
    %46 = tpu.matmul %43, %45, %cst_59 {dimension_numbers = #tpu.dot_dimension_numbers<[1], [0], [0], [1], [0, 0, 1, 1], [], []>} : vector<512x4xf32>, vector<4x4xf32>, vector<512x4xf32> -> vector<512x4xf32>
    %47 = arith.addf %41, %46 : vector<512x4xf32>
    %c0_60 = arith.constant 0 : index
    %c2_61 = arith.constant 2 : index
    %c0_62 = arith.constant 0 : index
    %c0_63 = arith.constant 0 : index
    %48 = vector.load %arg8[%c0_60, %c2_61, %c0_62, %c0_63] : memref<2x18x18x4xf32, #tpu.memory_space<vmem>>, vector<2x16x16x4xf32>
    %49 = vector.shape_cast %48 : vector<2x16x16x4xf32> to vector<512x4xf32>
    %c6 = arith.constant 6 : index
    %c0_64 = arith.constant 0 : index
    %c0_65 = arith.constant 0 : index
    %50 = vector.load %arg3[%c6, %c0_64, %c0_65] : memref<9x4x4xf32, #tpu.memory_space<vmem>>, vector<1x4x4xf32>
    %51 = vector.shape_cast %50 : vector<1x4x4xf32> to vector<4x4xf32>
    %cst_66 = arith.constant dense<0.000000e+00> : vector<512x4xf32>
    %52 = tpu.matmul %49, %51, %cst_66 {dimension_numbers = #tpu.dot_dimension_numbers<[1], [0], [0], [1], [0, 0, 1, 1], [], []>} : vector<512x4xf32>, vector<4x4xf32>, vector<512x4xf32> -> vector<512x4xf32>
    %53 = arith.addf %47, %52 : vector<512x4xf32>
    %c0_67 = arith.constant 0 : index
    %c2_68 = arith.constant 2 : index
    %c1_69 = arith.constant 1 : index
    %c0_70 = arith.constant 0 : index
    %54 = vector.load %arg8[%c0_67, %c2_68, %c1_69, %c0_70] : memref<2x18x18x4xf32, #tpu.memory_space<vmem>>, vector<2x16x16x4xf32>
    %55 = vector.shape_cast %54 : vector<2x16x16x4xf32> to vector<512x4xf32>
    %c7 = arith.constant 7 : index
    %c0_71 = arith.constant 0 : index
    %c0_72 = arith.constant 0 : index
    %56 = vector.load %arg3[%c7, %c0_71, %c0_72] : memref<9x4x4xf32, #tpu.memory_space<vmem>>, vector<1x4x4xf32>
    %57 = vector.shape_cast %56 : vector<1x4x4xf32> to vector<4x4xf32>
    %cst_73 = arith.constant dense<0.000000e+00> : vector<512x4xf32>
    %58 = tpu.matmul %55, %57, %cst_73 {dimension_numbers = #tpu.dot_dimension_numbers<[1], [0], [0], [1], [0, 0, 1, 1], [], []>} : vector<512x4xf32>, vector<4x4xf32>, vector<512x4xf32> -> vector<512x4xf32>
    %59 = arith.addf %53, %58 : vector<512x4xf32>
    %c0_74 = arith.constant 0 : index
    %c2_75 = arith.constant 2 : index
    %c2_76 = arith.constant 2 : index
    %c0_77 = arith.constant 0 : index
    %60 = vector.load %arg8[%c0_74, %c2_75, %c2_76, %c0_77] : memref<2x18x18x4xf32, #tpu.memory_space<vmem>>, vector<2x16x16x4xf32>
    %61 = vector.shape_cast %60 : vector<2x16x16x4xf32> to vector<512x4xf32>
    %c8 = arith.constant 8 : index
    %c0_78 = arith.constant 0 : index
    %c0_79 = arith.constant 0 : index
    %62 = vector.load %arg3[%c8, %c0_78, %c0_79] : memref<9x4x4xf32, #tpu.memory_space<vmem>>, vector<1x4x4xf32>
    %63 = vector.shape_cast %62 : vector<1x4x4xf32> to vector<4x4xf32>
    %cst_80 = arith.constant dense<0.000000e+00> : vector<512x4xf32>
    %64 = tpu.matmul %61, %63, %cst_80 {dimension_numbers = #tpu.dot_dimension_numbers<[1], [0], [0], [1], [0, 0, 1, 1], [], []>} : vector<512x4xf32>, vector<4x4xf32>, vector<512x4xf32> -> vector<512x4xf32>
    %65 = arith.addf %59, %64 : vector<512x4xf32>
    %c0_81 = arith.constant 0 : index
    %c0_82 = arith.constant 0 : index
    %66 = vector.load %arg4[%c0_81, %c0_82] : memref<1x4xf32, #tpu.memory_space<vmem>>, vector<1x4xf32>
    %67 = vector.broadcast %66 : vector<1x4xf32> to vector<512x4xf32>
    %68 = arith.addf %65, %67 : vector<512x4xf32>
    %cst_83 = arith.constant 0.000000e+00 : f32
    %69 = vector.broadcast %cst_83 : f32 to vector<512x4xf32>
    %70 = arith.maximumf %68, %69 : vector<512x4xf32>
    %c0_84 = arith.constant 0 : index
    %c0_85 = arith.constant 0 : index
    %71 = vector.load %arg5[%c0_84, %c0_85] : memref<4x16xf32, #tpu.memory_space<vmem>>, vector<4x16xf32>
    %cst_86 = arith.constant dense<0.000000e+00> : vector<512x16xf32>
    %72 = tpu.matmul %70, %71, %cst_86 {dimension_numbers = #tpu.dot_dimension_numbers<[1], [0], [0], [1], [0, 0, 1, 1], [], []>} : vector<512x4xf32>, vector<4x16xf32>, vector<512x16xf32> -> vector<512x16xf32>
    %c0_87 = arith.constant 0 : index
    %c0_88 = arith.constant 0 : index
    %73 = vector.load %arg6[%c0_87, %c0_88] : memref<1x16xf32, #tpu.memory_space<vmem>>, vector<1x16xf32>
    %74 = vector.broadcast %73 : vector<1x16xf32> to vector<512x16xf32>
    %75 = arith.addf %72, %74 : vector<512x16xf32>
    %76 = arith.addf %75, %1 : vector<512x16xf32>
    %cst_89 = arith.constant 0.000000e+00 : f32
    %77 = vector.broadcast %cst_89 : f32 to vector<512x16xf32>
    %78 = arith.maximumf %76, %77 : vector<512x16xf32>
    %79 = vector.shape_cast %78 : vector<512x16xf32> to vector<2x16x16x16xf32>
    %c0_90 = arith.constant 0 : index
    %c0_91 = arith.constant 0 : index
    %c0_92 = arith.constant 0 : index
    %c0_93 = arith.constant 0 : index
    %80 = vector.load %arg7[%c0_90, %c0_91, %c0_92, %c0_93] : memref<2x16x16x16xf32, #tpu.memory_space<vmem>>, vector<2x16x16x16xf32>
    tpu.vector_store %arg7[%c0_90, %c0_91, %c0_92, %c0_93], %79 {strides = array<i32>} : memref<2x16x16x16xf32, #tpu.memory_space<vmem>>, vector<2x16x16x16xf32>,
    return
  }
}

</mosaic_0001>

<bundles_post_ra>
// kernel: _forward_impl.1
= control target key start
LH: loop header
LB: loop body
LE: loop exit
PB: predicated region body
PF: predicated region fallthrough
CT: control target
= control target key end

     0   :  { %vm99_vm0 = vcmask 130048   ;;  %vm1239_vm1 = vcmask 1043456   ;;  %vm741_vm2 = vcmask 31744   ;;  %vm744_vm3 = vcmask 25600   ;;  %s14800_s1 = inlined_call_operand.vmem [shape: f32[16,4], index: 1, kind: input, shape index: {}]   ;;  %s14801_s0 = inlined_call_operand.vmem [shape: f32[2,16,16,16], index: 0, kind: input, shape index: {}]   ;;  %s14802_s3 = inlined_call_operand.vmem [shape: f32[9,4,4], index: 3, kind: input, shape index: {}]   ;;  %s14803_s2 = inlined_call_operand.vmem [shape: f32[1,4], index: 2, kind: input, shape index: {}]   ;;  %s14804_s5 = inlined_call_operand.vmem [shape: f32[4,16], index: 5, kind: input, shape index: {}]   ;;  %s14805_s4 = inlined_call_operand.vmem [shape: f32[1,4], index: 4, kind: input, shape index: {}]   ;;  %s14806_s6 = inlined_call_operand.vmem [shape: f32[1,16], index: 6, kind: input, shape index: {}]   ;;  %s14807_s7 = inlined_call_operand.vmem [shape: f32[2,16,16,16], index: 7, kind: output, shape index: {}]  }
   0x1   :  { %v91_v0 = vld [vmem:[%s14800_s1 + $0x8] sm:$0xff]  ;;  %v90_v1 = vld [vmem:[%s14800_s1] sm:$0xff]  ;;  %v28_v4 = vld [vmem:[%s14801_s0 + $0x10] sm:$0xff]  ;;  %v10688_v40 = vmov 0.0  }
   0x2   :  { %v26_v2 = vld [vmem:[%s14801_s0] sm:$0xff]  ;;  %9539 = vmatprep.subr.mxu0 %v91_v0  ;;  %v27_v3 = vld [vmem:[%s14801_s0 + $0x8] sm:$0xff]  ;;  %v29_v5 = vld [vmem:[%s14801_s0 + $0x18] sm:$0xff]  ;;  %747 = vst.msk [vmem:[#allocation2 + $0x20] sm:$0xff] %vm741_vm2, %v10688_v40 }
   0x3   :  { %9543 = vmatprep.mubr.msk.f32.mxu0 %vm99_vm0, %v26_v2  ;;  %9540 = vmatpush3.msra.mxu0 %v91_v0  ;;  %v30_v6 = vld [vmem:[%s14801_s0 + $0x20] sm:$0xff]  ;;  %v31_v7 = vld [vmem:[%s14801_s0 + $0x28] sm:$0xff]  ;;  %v32_v8 = vld [vmem:[%s14801_s0 + $0x30] sm:$0xff]  ;;  %742 = vst.msk [vmem:[#allocation2] sm:$0xff] %vm741_vm2, %v10688_v40 }
   0x4   :  { %9541 = vmatprep.subr.mxu0 %v90_v1  ;;  %v33_v9 = vld [vmem:[%s14801_s0 + $0x38] sm:$0xff]  ;;  %v34_v10 = vld [vmem:[%s14801_s0 + $0x40] sm:$0xff]  ;;  %v35_v11 = vld [vmem:[%s14801_s0 + $0x48] sm:$0xff]  ;;  %743 = vst.msk [vmem:[#allocation2 + $0x8] sm:$0xff] %vm741_vm2, %v10688_v40 }
   0x5   :  { %9542 = vmatpush3.msra.mxu0 %v90_v1  ;;  %v36_v12 = vld [vmem:[%s14801_s0 + $0x50] sm:$0xff]  ;;  %v8163_v13 = vld [vmem:[%s14802_s3 + $0x4] sm:$0xf]  ;;  %v37_v14 = vld [vmem:[%s14801_s0 + $0x58] sm:$0xff]  ;;  %746 = vst.msk [vmem:[#allocation2 + $0x18] sm:$0xff] %vm741_vm2, %v10688_v40 }
   0x6   :  { %9544 = vmatmul.mubr.msk.f32.vlgmr.msra.gmra.mxu0 %vm99_vm0, %v27_v3  ;;  %9639 = vmatprep.subr.msk.mxu0 %vm1239_vm1, %v8163_v13  ;;  %v38_v15 = vld [vmem:[%s14801_s0 + $0x60] sm:$0xff]  ;;  %v39_v16 = vld [vmem:[%s14801_s0 + $0x68] sm:$0xff]  ;;  %v40_v17 = vld [vmem:[%s14801_s0 + $0x70] sm:$0xff]  ;;  %749 = vst.msk [vmem:[#allocation2 + $0x30] sm:$0xff] %vm741_vm2, %v10688_v40 }
   0x7   :  { %9546 = vmatprep.mubr.msk.f32.mxu0 %vm99_vm0, %v28_v4  ;;  %9640 = vmatpush3.msk.msra.mxu0 %vm1239_vm1, %v8163_v13  ;;  %v41_v18 = vld [vmem:[%s14801_s0 + $0x78] sm:$0xff]  ;;  %v42_v19 = vld [vmem:[%s14801_s0 + $0x80] sm:$0xff]  ;;  %v43_v20 = vld [vmem:[%s14801_s0 + $0x88] sm:$0xff]  ;;  %750 = vst.msk [vmem:[#allocation2 + $0x38] sm:$0xff] %vm741_vm2, %v10688_v40 }
   0x8   :  { %10619 = vmatprep.subr.msk.mxu1 %vm1239_vm1, %v8163_v13  ;;  %v44_v21 = vld [vmem:[%s14801_s0 + $0x90] sm:$0xff]  ;;  %v45_v22 = vld [vmem:[%s14801_s0 + $0x98] sm:$0xff]  ;;  %v46_v23 = vld [vmem:[%s14801_s0 + $0xa0] sm:$0xff]  ;;  %752 = vst.msk [vmem:[#allocation2 + $0x48] sm:$0xff] %vm741_vm2, %v10688_v40 }
   0x9   :  { %10620 = vmatpush3.msk.msra.mxu1 %vm1239_vm1, %v8163_v13  ;;  %v47_v24 = vld [vmem:[%s14801_s0 + $0xa8] sm:$0xff]  ;;  %v48_v25 = vld [vmem:[%s14801_s0 + $0xb0] sm:$0xff]  ;;  %v49_v26 = vld [vmem:[%s14801_s0 + $0xb8] sm:$0xff]  ;;  %753 = vst.msk [vmem:[#allocation2 + $0x50] sm:$0xff] %vm741_vm2, %v10688_v40 }
   0xa   :  { %9547 = vmatmul.mubr.msk.f32.gmra.mxu0 %vm99_vm0, %v29_v5  ;;  %v50_v27 = vld [vmem:[%s14801_s0 + $0xc0] sm:$0xff]  ;;  %v51_v28 = vld [vmem:[%s14801_s0 + $0xc8] sm:$0xff]  ;;  %v52_v29 = vld [vmem:[%s14801_s0 + $0xd0] sm:$0xff]  ;;  %755 = vst.msk [vmem:[#allocation2 + $0x60] sm:$0xff] %vm741_vm2, %v10688_v40 }
   0xb   :  { %9549 = vmatprep.mubr.msk.f32.mxu0 %vm99_vm0, %v30_v6  ;;  %v53_v30 = vld [vmem:[%s14801_s0 + $0xd8] sm:$0xff]  ;;  %v54_v31 = vld [vmem:[%s14801_s0 + $0xe0] sm:$0xff]  ;;  %v55_v32 = vld [vmem:[%s14801_s0 + $0xe8] sm:$0xff]  ;;  %756 = vst.msk [vmem:[#allocation2 + $0x68] sm:$0xff] %vm741_vm2, %v10688_v40 }
   0xc   :  { %v56_v33 = vld [vmem:[%s14801_s0 + $0xf0] sm:$0xff]  ;;  %v57_v34 = vld [vmem:[%s14801_s0 + $0xf8] sm:$0xff]  ;;  %v58_v35 = vld [vmem:[%s14801_s0 + $0x100] sm:$0xff]  ;;  %758 = vst.msk [vmem:[#allocation2 + $0x78] sm:$0xff] %vm741_vm2, %v10688_v40 }
   0xd   :  { %v59_v36 = vld [vmem:[%s14801_s0 + $0x108] sm:$0xff]  ;;  %v60_v37 = vld [vmem:[%s14801_s0 + $0x110] sm:$0xff]  ;;  %v10885_v38 = vld [vmem:[%s14801_s0 + $0x118] sm:$0xff]  ;;  %759 = vst.msk [vmem:[#allocation2 + $0x80] sm:$0xff] %vm741_vm2, %v10688_v40 }
   0xe   :  { %9550 = vmatmul.mubr.msk.f32.gmra.mxu0 %vm99_vm0, %v31_v7  ;;  %v10890_v39 = vld [vmem:[%s14801_s0 + $0x120] sm:$0xff]  ;;  %761 = vst.msk [vmem:[#allocation2 + $0x90] sm:$0xff] %vm741_vm2, %v10688_v40  ;;  %762 = vst.msk [vmem:[#allocation2 + $0x98] sm:$0xff] %vm741_vm2, %v10688_v40  ;;  %v63_v41 = vld [vmem:[%s14801_s0 + $0x128] sm:$0xff] }
   0xf   :  { %9552 = vmatprep.mubr.msk.f32.mxu0 %vm99_vm0, %v32_v8  ;;  %764 = vst.msk [vmem:[#allocation2 + $0xa8] sm:$0xff] %vm741_vm2, %v10688_v40  ;;  %765 = vst.msk [vmem:[#allocation2 + $0xb0] sm:$0xff] %vm741_vm2, %v10688_v40  ;;  %v64_v42 = vld [vmem:[%s14801_s0 + $0x130] sm:$0xff]  ;;  %v65_v43 = vld [vmem:[%s14801_s0 + $0x138] sm:$0xff] }
  0x10   :  { %767 = vst.msk [vmem:[#allocation2 + $0xc0] sm:$0xff] %vm741_vm2, %v10688_v40  ;;  %768 = vst.msk [vmem:[#allocation2 + $0xc8] sm:$0xff] %vm741_vm2, %v10688_v40  ;;  %v66_v44 = vld [vmem:[%s14801_s0 + $0x140] sm:$0xff]  ;;  %v67_v45 = vld [vmem:[%s14801_s0 + $0x148] sm:$0xff] }
  0x11   :  { %770 = vst.msk [vmem:[#allocation2 + $0xd8] sm:$0xff] %vm741_vm2, %v10688_v40  ;;  %771 = vst.msk [vmem:[#allocation2 + $0xe0] sm:$0xff] %vm741_vm2, %v10688_v40  ;;  %v68_v46 = vld [vmem:[%s14801_s0 + $0x150] sm:$0xff]  ;;  %v69_v47 = vld [vmem:[%s14801_s0 + $0x158] sm:$0xff] }
  0x12   :  { %9553 = vmatmul.mubr.msk.f32.gmra.mxu0 %vm99_vm0, %v33_v9  ;;  %773 = vst.msk [vmem:[#allocation2 + $0xf0] sm:$0xff] %vm741_vm2, %v10688_v40  ;;  %774 = vst.msk [vmem:[#allocation2 + $0xf8] sm:$0xff] %vm741_vm2, %v10688_v40  ;;  %v70_v48 = vld [vmem:[%s14801_s0 + $0x160] sm:$0xff]  ;;  %v71_v49 = vld [vmem:[%s14801_s0 + $0x168] sm:$0xff] }
  0x13   :  { %9555 = vmatprep.mubr.msk.f32.mxu0 %vm99_vm0, %v34_v10  ;;  %776 = vst.msk [vmem:[#allocation2 + $0x108] sm:$0xff] %vm741_vm2, %v10688_v40  ;;  %777 = vst.msk [vmem:[#allocation2 + $0x110] sm:$0xff] %vm741_vm2, %v10688_v40  ;;  %v72_v50 = vld [vmem:[%s14801_s0 + $0x170] sm:$0xff]  ;;  %v73_v51 = vld [vmem:[%s14801_s0 + $0x178] sm:$0xff] }
  0x14   :  { %779 = vst.msk [vmem:[#allocation2 + $0x120] sm:$0xff] %vm741_vm2, %v10688_v40  ;;  %780 = vst.msk [vmem:[#allocation2 + $0x128] sm:$0xff] %vm741_vm2, %v10688_v40  ;;  %v74_v52 = vld [vmem:[%s14801_s0 + $0x180] sm:$0xff]  ;;  %v75_v53 = vld [vmem:[%s14801_s0 + $0x188] sm:$0xff] }
  0x15   :  { %782 = vst.msk [vmem:[#allocation2 + $0x138] sm:$0xff] %vm741_vm2, %v10688_v40  ;;  %783 = vst.msk [vmem:[#allocation2 + $0x140] sm:$0xff] %vm741_vm2, %v10688_v40  ;;  %v76_v54 = vld [vmem:[%s14801_s0 + $0x190] sm:$0xff]  ;;  %v77_v55 = vld [vmem:[%s14801_s0 + $0x198] sm:$0xff] }
  0x16   :  { %9556 = vmatmul.mubr.msk.f32.gmra.mxu0 %vm99_vm0, %v35_v11  ;;  %785 = vst.msk [vmem:[#allocation2 + $0x150] sm:$0xff] %vm741_vm2, %v10688_v40  ;;  %786 = vst.msk [vmem:[#allocation2 + $0x158] sm:$0xff] %vm741_vm2, %v10688_v40  ;;  %v78_v56 = vld [vmem:[%s14801_s0 + $0x1a0] sm:$0xff]  ;;  %v79_v57 = vld [vmem:[%s14801_s0 + $0x1a8] sm:$0xff] }
  0x17   :  { %9558 = vmatprep.mubr.msk.f32.mxu0 %vm99_vm0, %v36_v12  ;;  %788 = vst.msk [vmem:[#allocation2 + $0x168] sm:$0xff] %vm741_vm2, %v10688_v40  ;;  %789 = vst.msk [vmem:[#allocation2 + $0x170] sm:$0xff] %vm741_vm2, %v10688_v40  ;;  %v80_v58 = vld [vmem:[%s14801_s0 + $0x1b0] sm:$0xff]  ;;  %v81_v59 = vld [vmem:[%s14801_s0 + $0x1b8] sm:$0xff] }
  0x18   :  { %791 = vst.msk [vmem:[#allocation2 + $0x180] sm:$0xff] %vm741_vm2, %v10688_v40  ;;  %792 = vst.msk [vmem:[#allocation2 + $0x188] sm:$0xff] %vm741_vm2, %v10688_v40  ;;  %v82_v60 = vld [vmem:[%s14801_s0 + $0x1c0] sm:$0xff]  ;;  %v83_v61 = vld [vmem:[%s14801_s0 + $0x1c8] sm:$0xff] }
  0x19   :  { %794 = vst.msk [vmem:[#allocation2 + $0x198] sm:$0xff] %vm741_vm2, %v10688_v40  ;;  %795 = vst.msk [vmem:[#allocation2 + $0x1a0] sm:$0xff] %vm741_vm2, %v10688_v40  ;;  %v84_v62 = vld [vmem:[%s14801_s0 + $0x1d0] sm:$0xff]  ;;  %v85_v63 = vld [vmem:[%s14801_s0 + $0x1d8] sm:$0xff] }
  0x1a   :  { %9559 = vmatmul.mubr.msk.f32.gmra.mxu0 %vm99_vm0, %v37_v14  ;;  %797 = vst.msk [vmem:[#allocation2 + $0x1b0] sm:$0xff] %vm741_vm2, %v10688_v40  ;;  %798 = vst.msk [vmem:[#allocation2 + $0x1b8] sm:$0xff] %vm741_vm2, %v10688_v40  ;;  %v86_v0 = vld [vmem:[%s14801_s0 + $0x1e0] sm:$0xff]  ;;  %v87_v1 = vld [vmem:[%s14801_s0 + $0x1e8] sm:$0xff] }
  0x1b   :  { %9561 = vmatprep.mubr.msk.f32.mxu0 %vm99_vm0, %v38_v15  ;;  %800 = vst.msk [vmem:[#allocation2 + $0x1c8] sm:$0xff] %vm741_vm2, %v10688_v40  ;;  %801 = vst.msk [vmem:[#allocation2 + $0x1d0] sm:$0xff] %vm741_vm2, %v10688_v40  ;;  %v88_v2 = vld [vmem:[%s14801_s0 + $0x1f0] sm:$0xff]  ;;  %v89_v3 = vld [vmem:[%s14801_s0 + $0x1f8] sm:$0xff] }
  0x1c   :  { %803 = vst.msk [vmem:[#allocation2 + $0x1e0] sm:$0xff] %vm741_vm2, %v10688_v40  ;;  %804 = vst.msk [vmem:[#allocation2 + $0x1e8] sm:$0xff] %vm741_vm2, %v10688_v40  ;;  %v981_v4 = vld [vmem:[#allocation2 + $0x1] sm:$0xff]  ;;  %v11237_v8 = vld [vmem:[%s14803_s2] ss:$0 sm:$0xff] }
  0x1d   :  { %806 = vst.msk [vmem:[#allocation2 + $0x1f8] sm:$0xff] %vm741_vm2, %v10688_v40  ;;  %807 = vst.msk [vmem:[#allocation2 + $0x200] sm:$0xff] %vm741_vm2, %v10688_v40  ;;  %v8294_v6 = vld [vmem:[%s14802_s3 + $0x8] sm:$0xf]  ;;  %v11230_v7 = vld [vmem:[%s14802_s3] sm:$0xf] }
  0x1e   :  { %9562 = vmatmul.mubr.msk.f32.gmra.mxu0 %vm99_vm0, %v39_v16  ;;  %809 = vst.msk [vmem:[#allocation2 + $0x210] sm:$0xff] %vm741_vm2, %v10688_v40  ;;  %810 = vst.msk [vmem:[#allocation2 + $0x218] sm:$0xff] %vm741_vm2, %v10688_v40  ;;  %9835 = vmatprep.subr.msk.mxu0 %vm1239_vm1, %v8294_v6 }
  0x1f   :  { %9564 = vmatprep.mubr.msk.f32.mxu0 %vm99_vm0, %v40_v17  ;;  %812 = vst.msk [vmem:[#allocation2 + $0x228] sm:$0xff] %vm741_vm2, %v10688_v40  ;;  %813 = vst.msk [vmem:[#allocation2 + $0x230] sm:$0xff] %vm741_vm2, %v10688_v40  ;;  %9737 = vmatprep.subr.msk.mxu1 %vm1239_vm1, %v11230_v7 }
  0x20   :  { %815 = vst.msk [vmem:[#allocation2 + $0x240] sm:$0xff] %vm741_vm2, %v10688_v40  ;;  %816 = vst.msk [vmem:[#allocation2 + $0x248] sm:$0xff] %vm741_vm2, %v10688_v40 }
  0x21   :  { %818 = vst.msk [vmem:[#allocation2 + $0x258] sm:$0xff] %vm741_vm2, %v10688_v40  ;;  %819 = vst.msk [vmem:[#allocation2 + $0x260] sm:$0xff] %vm741_vm2, %v10688_v40 }
  0x22   :  { %9565 = vmatmul.mubr.msk.f32.gmra.mxu0 %vm99_vm0, %v41_v18  ;;  %821 = vst.msk [vmem:[#allocation2 + $0x270] sm:$0xff] %vm741_vm2, %v10688_v40  ;;  %822 = vst.msk [vmem:[#allocation2 + $0x278] sm:$0xff] %vm741_vm2, %v10688_v40 }
  0x23   :  { %9567 = vmatprep.mubr.msk.f32.mxu0 %vm99_vm0, %v42_v19  ;;  %824 = vst.msk [vmem:[#allocation2 + $0x288] sm:$0xff] %vm741_vm2, %v10688_v40  ;;  %825 = vst.msk [vmem:[#allocation2 + $0x290] sm:$0xff] %vm741_vm2, %v10688_v40 }
  0x24   :  { %827 = vst.msk [vmem:[#allocation2 + $0x2a0] sm:$0xff] %vm741_vm2, %v10688_v40  ;;  %828 = vst.msk [vmem:[#allocation2 + $0x2a8] sm:$0xff] %vm741_vm2, %v10688_v40 }
  0x25   :  { %830 = vst.msk [vmem:[#allocation2 + $0x2b8] sm:$0xff] %vm741_vm2, %v10688_v40  ;;  %831 = vst.msk [vmem:[#allocation2 + $0x2c0] sm:$0xff] %vm741_vm2, %v10688_v40 }
  0x26   :  { %9568 = vmatmul.mubr.msk.f32.gmra.mxu0 %vm99_vm0, %v43_v20  ;;  %833 = vst.msk [vmem:[#allocation2 + $0x2d0] sm:$0xff] %vm741_vm2, %v10688_v40  ;;  %834 = vst.msk [vmem:[#allocation2 + $0x2d8] sm:$0xff] %vm741_vm2, %v10688_v40 }
  0x27   :  { %9570 = vmatprep.mubr.msk.f32.mxu0 %vm99_vm0, %v44_v21  ;;  %836 = vst.msk [vmem:[#allocation2 + $0x2e8] sm:$0xff] %vm741_vm2, %v10688_v40  ;;  %837 = vst.msk [vmem:[#allocation2 + $0x2f0] sm:$0xff] %vm741_vm2, %v10688_v40 }
  0x28   :  { %839 = vst.msk [vmem:[#allocation2 + $0x300] sm:$0xff] %vm741_vm2, %v10688_v40  ;;  %840 = vst.msk [vmem:[#allocation2 + $0x308] sm:$0xff] %vm741_vm2, %v10688_v40 }
  0x29   :  { %842 = vst.msk [vmem:[#allocation2 + $0x318] sm:$0xff] %vm741_vm2, %v10688_v40  ;;  %843 = vst.msk [vmem:[#allocation2 + $0x320] sm:$0xff] %vm741_vm2, %v10688_v40 }
  0x2a   :  { %9571 = vmatmul.mubr.msk.f32.gmra.mxu0 %vm99_vm0, %v45_v22  ;;  %845 = vst.msk [vmem:[#allocation2 + $0x330] sm:$0xff] %vm741_vm2, %v10688_v40  ;;  %846 = vst.msk [vmem:[#allocation2 + $0x338] sm:$0xff] %vm741_vm2, %v10688_v40 }
  0x2b   :  { %9573 = vmatprep.mubr.msk.f32.mxu0 %vm99_vm0, %v46_v23  ;;  %848 = vst.msk [vmem:[#allocation2 + $0x348] sm:$0xff] %vm741_vm2, %v10688_v40  ;;  %849 = vst.msk [vmem:[#allocation2 + $0x350] sm:$0xff] %vm741_vm2, %v10688_v40 }
  0x2c   :  { %748 = vst.msk [vmem:[#allocation2 + $0x28] sm:$0x3] %vm744_vm3, %v10688_v40  ;;  %745 = vst.msk [vmem:[#allocation2 + $0x10] sm:$0x3] %vm744_vm3, %v10688_v40 }
  0x2d   :  { %751 = vst.msk [vmem:[#allocation2 + $0x40] sm:$0x3] %vm744_vm3, %v10688_v40  ;;  %754 = vst.msk [vmem:[#allocation2 + $0x58] sm:$0x3] %vm744_vm3, %v10688_v40 }
  0x2e   :  { %9574 = vmatmul.mubr.msk.f32.gmra.mxu0 %vm99_vm0, %v47_v24  ;;  %757 = vst.msk [vmem:[#allocation2 + $0x70] sm:$0x3] %vm744_vm3, %v10688_v40  ;;  %760 = vst.msk [vmem:[#allocation2 + $0x88] sm:$0x3] %vm744_vm3, %v10688_v40 }
  0x2f   :  { %9576 = vmatprep.mubr.msk.f32.mxu0 %vm99_vm0, %v48_v25  ;;  %763 = vst.msk [vmem:[#allocation2 + $0xa0] sm:$0x3] %vm744_vm3, %v10688_v40  ;;  %766 = vst.msk [vmem:[#allocation2 + $0xb8] sm:$0x3] %vm744_vm3, %v10688_v40 }
  0x30   :  { %769 = vst.msk [vmem:[#allocation2 + $0xd0] sm:$0x3] %vm744_vm3, %v10688_v40  ;;  %772 = vst.msk [vmem:[#allocation2 + $0xe8] sm:$0x3] %vm744_vm3, %v10688_v40 }
  0x31   :  { %775 = vst.msk [vmem:[#allocation2 + $0x100] sm:$0x3] %vm744_vm3, %v10688_v40  ;;  %778 = vst.msk [vmem:[#allocation2 + $0x118] sm:$0x3] %vm744_vm3, %v10688_v40 }
  0x32   :  { %9577 = vmatmul.mubr.msk.f32.gmra.mxu0 %vm99_vm0, %v49_v26  ;;  %781 = vst.msk [vmem:[#allocation2 + $0x130] sm:$0x3] %vm744_vm3, %v10688_v40  ;;  %784 = vst.msk [vmem:[#allocation2 + $0x148] sm:$0x3] %vm744_vm3, %v10688_v40 }
  0x33   :  { %9579 = vmatprep.mubr.msk.f32.mxu0 %vm99_vm0, %v50_v27  ;;  %787 = vst.msk [vmem:[#allocation2 + $0x160] sm:$0x3] %vm744_vm3, %v10688_v40  ;;  %790 = vst.msk [vmem:[#allocation2 + $0x178] sm:$0x3] %vm744_vm3, %v10688_v40  ;;  %v982_v5 = vld [vmem:[#allocation2 + $0x9] sm:$0xff] }
  0x34   :  { %793 = vst.msk [vmem:[#allocation2 + $0x190] sm:$0x3] %vm744_vm3, %v10688_v40  ;;  %796 = vst.msk [vmem:[#allocation2 + $0x1a8] sm:$0x3] %vm744_vm3, %v10688_v40 }
  0x35   :  { %799 = vst.msk [vmem:[#allocation2 + $0x1c0] sm:$0x3] %vm744_vm3, %v10688_v40  ;;  %802 = vst.msk [vmem:[#allocation2 + $0x1d8] sm:$0x3] %vm744_vm3, %v10688_v40 }
  0x36   :  { %9580 = vmatmul.mubr.msk.f32.gmra.mxu0 %vm99_vm0, %v51_v28  ;;  %805 = vst.msk [vmem:[#allocation2 + $0x1f0] sm:$0x3] %vm744_vm3, %v10688_v40  ;;  %808 = vst.msk [vmem:[#allocation2 + $0x208] sm:$0x3] %vm744_vm3, %v10688_v40 }
  0x37   :  { %9582 = vmatprep.mubr.msk.f32.mxu0 %vm99_vm0, %v52_v29  ;;  %811 = vst.msk [vmem:[#allocation2 + $0x220] sm:$0x3] %vm744_vm3, %v10688_v40  ;;  %814 = vst.msk [vmem:[#allocation2 + $0x238] sm:$0x3] %vm744_vm3, %v10688_v40 }
  0x38   :  { %817 = vst.msk [vmem:[#allocation2 + $0x250] sm:$0x3] %vm744_vm3, %v10688_v40  ;;  %820 = vst.msk [vmem:[#allocation2 + $0x268] sm:$0x3] %vm744_vm3, %v10688_v40 }
  0x39   :  { %823 = vst.msk [vmem:[#allocation2 + $0x280] sm:$0x3] %vm744_vm3, %v10688_v40  ;;  %826 = vst.msk [vmem:[#allocation2 + $0x298] sm:$0x3] %vm744_vm3, %v10688_v40 }
  0x3a   :  { %9583 = vmatmul.mubr.msk.f32.gmra.mxu0 %vm99_vm0, %v53_v30  ;;  %829 = vst.msk [vmem:[#allocation2 + $0x2b0] sm:$0x3] %vm744_vm3, %v10688_v40  ;;  %832 = vst.msk [vmem:[#allocation2 + $0x2c8] sm:$0x3] %vm744_vm3, %v10688_v40 }
  0x3b   :  { %9585 = vmatprep.mubr.msk.f32.mxu0 %vm99_vm0, %v54_v31  ;;  %835 = vst.msk [vmem:[#allocation2 + $0x2e0] sm:$0x3] %vm744_vm3, %v10688_v40  ;;  %838 = vst.msk [vmem:[#allocation2 + $0x2f8] sm:$0x3] %vm744_vm3, %v10688_v40 }
  0x3c   :  { %841 = vst.msk [vmem:[#allocation2 + $0x310] sm:$0x3] %vm744_vm3, %v10688_v40  ;;  %844 = vst.msk [vmem:[#allocation2 + $0x328] sm:$0x3] %vm744_vm3, %v10688_v40 }
  0x3d   :  { %847 = vst.msk [vmem:[#allocation2 + $0x340] sm:$0x3] %vm744_vm3, %v10688_v40  ;;  %850 = vst.msk [vmem:[#allocation2 + $0x358] sm:$0x3] %vm744_vm3, %v10688_v40 }
  0x3e   :  { %9586 = vmatmul.mubr.msk.f32.gmra.mxu0 %vm99_vm0, %v55_v32 }
  0x3f   :  { %9588 = vmatprep.mubr.msk.f32.mxu0 %vm99_vm0, %v56_v33 }
  0x42   :  { %9589 = vmatmul.mubr.msk.f32.gmra.mxu0 %vm99_vm0, %v57_v34  ;;  %v11257_v34 = vld [vmem:[%s14802_s3 + $0x10] sm:$0xf] }
  0x43   :  { %9591 = vmatprep.mubr.msk.f32.mxu0 %vm99_vm0, %v58_v35 }
  0x46   :  { %9592 = vmatmul.mubr.msk.f32.gmra.mxu0 %vm99_vm0, %v59_v36 }
  0x47   :  { %9594 = vmatprep.mubr.msk.f32.mxu0 %vm99_vm0, %v60_v37 }
  0x4a   :  { %9595 = vmatmul.mubr.msk.f32.gmra.mxu0 %vm99_vm0, %v10885_v38 }
  0x4b   :  { %9597 = vmatprep.mubr.msk.f32.mxu0 %vm99_vm0, %v10890_v39 }
  0x4e   :  { %9598 = vmatmul.mubr.msk.f32.gmra.mxu0 %vm99_vm0, %v63_v41 }
  0x4f   :  { %9600 = vmatprep.mubr.msk.f32.mxu0 %vm99_vm0, %v64_v42 }
  0x52   :  { %9601 = vmatmul.mubr.msk.f32.gmra.mxu0 %vm99_vm0, %v65_v43 }
  0x53   :  { %9603 = vmatprep.mubr.msk.f32.mxu0 %vm99_vm0, %v66_v44 }
  0x56   :  { %9604 = vmatmul.mubr.msk.f32.gmra.mxu0 %vm99_vm0, %v67_v45 }
  0x57   :  { %9606 = vmatprep.mubr.msk.f32.mxu0 %vm99_vm0, %v68_v46 }
  0x5a   :  { %9607 = vmatmul.mubr.msk.f32.gmra.mxu0 %vm99_vm0, %v69_v47 }
  0x5b   :  { %9609 = vmatprep.mubr.msk.f32.mxu0 %vm99_vm0, %v70_v48 }
  0x5e   :  { %9610 = vmatmul.mubr.msk.f32.gmra.mxu0 %vm99_vm0, %v71_v49 }
  0x5f   :  { %9612 = vmatprep.mubr.msk.f32.mxu0 %vm99_vm0, %v72_v50 }
  0x62   :  { %9613 = vmatmul.mubr.msk.f32.gmra.mxu0 %vm99_vm0, %v73_v51 }
  0x63   :  { %9615 = vmatprep.mubr.msk.f32.mxu0 %vm99_vm0, %v74_v52 }
  0x66   :  { %9616 = vmatmul.mubr.msk.f32.gmra.mxu0 %vm99_vm0, %v75_v53 }
  0x67   :  { %9618 = vmatprep.mubr.msk.f32.mxu0 %vm99_vm0, %v76_v54 }
  0x6a   :  { %9619 = vmatmul.mubr.msk.f32.gmra.mxu0 %vm99_vm0, %v77_v55 }
  0x6b   :  { %9621 = vmatprep.mubr.msk.f32.mxu0 %vm99_vm0, %v78_v56 }
  0x6e   :  { %9622 = vmatmul.mubr.msk.f32.gmra.mxu0 %vm99_vm0, %v79_v57 }
  0x6f   :  { %9624 = vmatprep.mubr.msk.f32.mxu0 %vm99_vm0, %v80_v58 }
  0x72   :  { %9625 = vmatmul.mubr.msk.f32.gmra.mxu0 %vm99_vm0, %v81_v59 }
  0x73   :  { %9627 = vmatprep.mubr.msk.f32.mxu0 %vm99_vm0, %v82_v60 }
  0x76   :  { %9628 = vmatmul.mubr.msk.f32.gmra.mxu0 %vm99_vm0, %v83_v61 }
  0x77   :  { %9630 = vmatprep.mubr.msk.f32.mxu0 %vm99_vm0, %v84_v62 }
  0x7a   :  { %9631 = vmatmul.mubr.msk.f32.gmra.mxu0 %vm99_vm0, %v85_v63 }
  0x7b   :  { %9633 = vmatprep.mubr.msk.f32.mxu0 %vm99_vm0, %v86_v0 }
  0x7e   :  { %9634 = vmatmul.mubr.msk.f32.gmra.mxu0 %vm99_vm0, %v87_v1 }
  0x7f   :  { %9636 = vmatprep.mubr.msk.f32.mxu0 %vm99_vm0, %v88_v2 }
  0x82   :  { %9637 = vmatmul.mubr.msk.f32.gmra.mxu0 %vm99_vm0, %v89_v3 }
  0x83   :  { %9641 = vmatprep.mubr.msk.f32.mxu0 %vm741_vm2, %v981_v4 }
  0x86   :  { %9642 = vmatmul.mubr.msk.f32.vlgmr.msra.gmra.mxu0 %vm741_vm2, %v982_v5 }
  0x87   :  { %9836 = vmatpush3.msk.msra.mxu0 %vm1239_vm1, %v8294_v6 }
  0x88   :  { %10031 = vmatprep.subr.msk.mxu0 %vm1239_vm1, %v11257_v34 }
  0xc6   :  { %v9545_v9 = vpop.f32.mrf.mxu0 }
  0xc7   :  { %v364_v10 = vadd.f32 %v9545_v9, %v11237_v8 }
  0xc8   :  { %v358_v11 = vpop.f32.mrf.mxu0 }
  0xc9   :  { %v678_v12 = vmax.f32 %v364_v10, 0.0  ;;  %v359_v13 = vadd.f32 %v11237_v8, %v358_v11 }
  0xca   :  { %v9548_v14 = vpop.f32.mrf.mxu0 }
  0xcb   :  { %853 = vst.msk [vmem:[#allocation2 + $0x21] sm:$0xff] %vm741_vm2, %v678_v12  ;;  %v677_v15 = vmax.f32 %v359_v13, 0.0  ;;  %v374_v16 = vadd.f32 %v9548_v14, %v11237_v8 }
  0xcc   :  { %v368_v17 = vpop.f32.mrf.mxu0 }
  0xcd   :  { %852 = vst.msk [vmem:[#allocation2 + $0x19] sm:$0xff] %vm741_vm2, %v677_v15  ;;  %v680_v18 = vmax.f32 %v374_v16, 0.0  ;;  %v369_v19 = vadd.f32 %v11237_v8, %v368_v17 }
  0xce   :  { %v9551_v20 = vpop.f32.mrf.mxu0 }
  0xcf   :  { %855 = vst.msk [vmem:[#allocation2 + $0x39] sm:$0xff] %vm741_vm2, %v680_v18  ;;  %v679_v21 = vmax.f32 %v369_v19, 0.0  ;;  %v384_v22 = vadd.f32 %v9551_v20, %v11237_v8 }
  0xd0   :  { %v378_v23 = vpop.f32.mrf.mxu0 }
  0xd1   :  { %854 = vst.msk [vmem:[#allocation2 + $0x31] sm:$0xff] %vm741_vm2, %v679_v21  ;;  %v682_v24 = vmax.f32 %v384_v22, 0.0  ;;  %v379_v25 = vadd.f32 %v11237_v8, %v378_v23 }
  0xd2   :  { %v9554_v26 = vpop.f32.mrf.mxu0  ;;  %v984_v33 = vld [vmem:[#allocation2 + $0x21] sm:$0xff] }
  0xd3   :  { %857 = vst.msk [vmem:[#allocation2 + $0x51] sm:$0xff] %vm741_vm2, %v682_v24  ;;  %v681_v27 = vmax.f32 %v379_v25, 0.0  ;;  %v394_v28 = vadd.f32 %v9554_v26, %v11237_v8 }
  0xd4   :  { %v388_v29 = vpop.f32.mrf.mxu0  ;;  %v983_v30 = vld [vmem:[#allocation2 + $0x19] sm:$0xff] }
  0xd5   :  { %856 = vst.msk [vmem:[#allocation2 + $0x49] sm:$0xff] %vm741_vm2, %v681_v27  ;;  %v684_v31 = vmax.f32 %v394_v28, 0.0  ;;  %v389_v32 = vadd.f32 %v11237_v8, %v388_v29  ;;  %9644 = vmatprep.mubr.msk.f32.mxu0 %vm741_vm2, %v983_v30 }
  0xd6   :  { %v9557_v35 = vpop.f32.mrf.mxu0  ;;  %9645 = vmatmul.mubr.msk.f32.gmra.mxu0 %vm741_vm2, %v984_v33  ;;  %v986_v42 = vld [vmem:[#allocation2 + $0x39] sm:$0xff] }
  0xd7   :  { %859 = vst.msk [vmem:[#allocation2 + $0x69] sm:$0xff] %vm741_vm2, %v684_v31  ;;  %v683_v36 = vmax.f32 %v389_v32, 0.0  ;;  %v404_v37 = vadd.f32 %v9557_v35, %v11237_v8 }
  0xd8   :  { %v398_v38 = vpop.f32.mrf.mxu0  ;;  %v985_v39 = vld [vmem:[#allocation2 + $0x31] sm:$0xff] }
  0xd9   :  { %858 = vst.msk [vmem:[#allocation2 + $0x61] sm:$0xff] %vm741_vm2, %v683_v36  ;;  %v686_v40 = vmax.f32 %v404_v37, 0.0  ;;  %v399_v41 = vadd.f32 %v11237_v8, %v398_v38  ;;  %9647 = vmatprep.mubr.msk.f32.mxu0 %vm741_vm2, %v985_v39 }
  0xda   :  { %v9560_v43 = vpop.f32.mrf.mxu0  ;;  %9648 = vmatmul.mubr.msk.f32.gmra.mxu0 %vm741_vm2, %v986_v42  ;;  %v988_v50 = vld [vmem:[#allocation2 + $0x51] sm:$0xff] }
  0xdb   :  { %861 = vst.msk [vmem:[#allocation2 + $0x81] sm:$0xff] %vm741_vm2, %v686_v40  ;;  %v685_v44 = vmax.f32 %v399_v41, 0.0  ;;  %v414_v45 = vadd.f32 %v9560_v43, %v11237_v8 }
  0xdc   :  { %v408_v46 = vpop.f32.mrf.mxu0  ;;  %v987_v47 = vld [vmem:[#allocation2 + $0x49] sm:$0xff] }
  0xdd   :  { %860 = vst.msk [vmem:[#allocation2 + $0x79] sm:$0xff] %vm741_vm2, %v685_v44  ;;  %v688_v48 = vmax.f32 %v414_v45, 0.0  ;;  %v409_v49 = vadd.f32 %v11237_v8, %v408_v46  ;;  %9650 = vmatprep.mubr.msk.f32.mxu0 %vm741_vm2, %v987_v47 }
  0xde   :  { %v9563_v51 = vpop.f32.mrf.mxu0  ;;  %9651 = vmatmul.mubr.msk.f32.gmra.mxu0 %vm741_vm2, %v988_v50  ;;  %v990_v58 = vld [vmem:[#allocation2 + $0x69] sm:$0xff] }
  0xdf   :  { %863 = vst.msk [vmem:[#allocation2 + $0x99] sm:$0xff] %vm741_vm2, %v688_v48  ;;  %v687_v52 = vmax.f32 %v409_v49, 0.0  ;;  %v424_v53 = vadd.f32 %v9563_v51, %v11237_v8 }
  0xe0   :  { %v418_v54 = vpop.f32.mrf.mxu0  ;;  %v989_v55 = vld [vmem:[#allocation2 + $0x61] sm:$0xff] }
  0xe1   :  { %862 = vst.msk [vmem:[#allocation2 + $0x91] sm:$0xff] %vm741_vm2, %v687_v52  ;;  %v690_v56 = vmax.f32 %v424_v53, 0.0  ;;  %v419_v57 = vadd.f32 %v11237_v8, %v418_v54  ;;  %9653 = vmatprep.mubr.msk.f32.mxu0 %vm741_vm2, %v989_v55 }
  0xe2   :  { %v9566_v59 = vpop.f32.mrf.mxu0  ;;  %9654 = vmatmul.mubr.msk.f32.gmra.mxu0 %vm741_vm2, %v990_v58  ;;  %v992_v2 = vld [vmem:[#allocation2 + $0x81] sm:$0xff] }
  0xe3   :  { %865 = vst.msk [vmem:[#allocation2 + $0xb1] sm:$0xff] %vm741_vm2, %v690_v56  ;;  %v689_v60 = vmax.f32 %v419_v57, 0.0  ;;  %v434_v61 = vadd.f32 %v9566_v59, %v11237_v8 }
  0xe4   :  { %v428_v62 = vpop.f32.mrf.mxu0  ;;  %v991_v63 = vld [vmem:[#allocation2 + $0x79] sm:$0xff] }
  0xe5   :  { %864 = vst.msk [vmem:[#allocation2 + $0xa9] sm:$0xff] %vm741_vm2, %v689_v60  ;;  %v692_v0 = vmax.f32 %v434_v61, 0.0  ;;  %v429_v1 = vadd.f32 %v11237_v8, %v428_v62  ;;  %9656 = vmatprep.mubr.msk.f32.mxu0 %vm741_vm2, %v991_v63 }
  0xe6   :  { %v9569_v3 = vpop.f32.mrf.mxu0  ;;  %9657 = vmatmul.mubr.msk.f32.gmra.mxu0 %vm741_vm2, %v992_v2  ;;  %v994_v12 = vld [vmem:[#allocation2 + $0x99] sm:$0xff] }
  0xe7   :  { %867 = vst.msk [vmem:[#allocation2 + $0xc9] sm:$0xff] %vm741_vm2, %v692_v0  ;;  %v691_v4 = vmax.f32 %v429_v1, 0.0  ;;  %v444_v5 = vadd.f32 %v9569_v3, %v11237_v8 }
  0xe8   :  { %v438_v6 = vpop.f32.mrf.mxu0  ;;  %v993_v9 = vld [vmem:[#allocation2 + $0x91] sm:$0xff] }
  0xe9   :  { %866 = vst.msk [vmem:[#allocation2 + $0xc1] sm:$0xff] %vm741_vm2, %v691_v4  ;;  %v694_v10 = vmax.f32 %v444_v5, 0.0  ;;  %v439_v11 = vadd.f32 %v11237_v8, %v438_v6  ;;  %9659 = vmatprep.mubr.msk.f32.mxu0 %vm741_vm2, %v993_v9 }
  0xea   :  { %v9572_v13 = vpop.f32.mrf.mxu0  ;;  %9660 = vmatmul.mubr.msk.f32.gmra.mxu0 %vm741_vm2, %v994_v12  ;;  %v996_v20 = vld [vmem:[#allocation2 + $0xb1] sm:$0xff] }
  0xeb   :  { %869 = vst.msk [vmem:[#allocation2 + $0xe1] sm:$0xff] %vm741_vm2, %v694_v10  ;;  %v693_v14 = vmax.f32 %v439_v11, 0.0  ;;  %v454_v15 = vadd.f32 %v9572_v13, %v11237_v8  ;;  %v2208_v13 = vld [vmem:[#allocation2 + $0x2] sm:$0xff] }
  0xec   :  { %v448_v16 = vpop.f32.mrf.mxu0  ;;  %v995_v17 = vld [vmem:[#allocation2 + $0xa9] sm:$0xff] }
  0xed   :  { %868 = vst.msk [vmem:[#allocation2 + $0xd9] sm:$0xff] %vm741_vm2, %v693_v14  ;;  %v696_v18 = vmax.f32 %v454_v15, 0.0  ;;  %v449_v19 = vadd.f32 %v11237_v8, %v448_v16  ;;  %9662 = vmatprep.mubr.msk.f32.mxu0 %vm741_vm2, %v995_v17 }
  0xee   :  { %v9575_v21 = vpop.f32.mrf.mxu0  ;;  %9663 = vmatmul.mubr.msk.f32.gmra.mxu0 %vm741_vm2, %v996_v20  ;;  %v998_v28 = vld [vmem:[#allocation2 + $0xc9] sm:$0xff] }
  0xef   :  { %871 = vst.msk [vmem:[#allocation2 + $0xf9] sm:$0xff] %vm741_vm2, %v696_v18  ;;  %v695_v22 = vmax.f32 %v449_v19, 0.0  ;;  %v464_v23 = vadd.f32 %v9575_v21, %v11237_v8  ;;  %v2209_v20 = vld [vmem:[#allocation2 + $0xa] sm:$0xff] }
  0xf0   :  { %v458_v24 = vpop.f32.mrf.mxu0  ;;  %v997_v25 = vld [vmem:[#allocation2 + $0xc1] sm:$0xff] }
  0xf1   :  { %870 = vst.msk [vmem:[#allocation2 + $0xf1] sm:$0xff] %vm741_vm2, %v695_v22  ;;  %v698_v26 = vmax.f32 %v464_v23, 0.0  ;;  %v459_v27 = vadd.f32 %v11237_v8, %v458_v24  ;;  %9665 = vmatprep.mubr.msk.f32.mxu0 %vm741_vm2, %v997_v25 }
  0xf2   :  { %v9578_v29 = vpop.f32.mrf.mxu0  ;;  %9666 = vmatmul.mubr.msk.f32.gmra.mxu0 %vm741_vm2, %v998_v28  ;;  %v1000_v37 = vld [vmem:[#allocation2 + $0xe1] sm:$0xff] }
  0xf3   :  { %873 = vst.msk [vmem:[#allocation2 + $0x111] sm:$0xff] %vm741_vm2, %v698_v26  ;;  %v697_v30 = vmax.f32 %v459_v27, 0.0  ;;  %v474_v31 = vadd.f32 %v9578_v29, %v11237_v8  ;;  %v1013_v26 = vld [vmem:[#allocation2 + $0x1b1] sm:$0xff]  ;;  %v11349_v27 = vld [vmem:[%s14802_s3 + $0xc] sm:$0xf]  ;;  %v2210_v29 = vld [vmem:[#allocation2 + $0x1a] sm:$0xff] }
  0xf4   :  { %v468_v32 = vpop.f32.mrf.mxu0  ;;  %v999_v33 = vld [vmem:[#allocation2 + $0xd9] sm:$0xff] }
  0xf5   :  { %872 = vst.msk [vmem:[#allocation2 + $0x109] sm:$0xff] %vm741_vm2, %v697_v30  ;;  %v700_v35 = vmax.f32 %v474_v31, 0.0  ;;  %v469_v36 = vadd.f32 %v11237_v8, %v468_v32  ;;  %9668 = vmatprep.mubr.msk.f32.mxu0 %vm741_vm2, %v999_v33  ;;  %v1014_v32 = vld [vmem:[#allocation2 + $0x1b9] sm:$0xff] }
  0xf6   :  { %v9581_v38 = vpop.f32.mrf.mxu0  ;;  %9669 = vmatmul.mubr.msk.f32.gmra.mxu0 %vm741_vm2, %v1000_v37  ;;  %v1002_v45 = vld [vmem:[#allocation2 + $0xf9] sm:$0xff]  ;;  %v2211_v37 = vld [vmem:[#allocation2 + $0x22] sm:$0xff] }
  0xf7   :  { %875 = vst.msk [vmem:[#allocation2 + $0x129] sm:$0xff] %vm741_vm2, %v700_v35  ;;  %v699_v39 = vmax.f32 %v469_v36, 0.0  ;;  %v484_v40 = vadd.f32 %v9581_v38, %v11237_v8 }
  0xf8   :  { %v478_v41 = vpop.f32.mrf.mxu0  ;;  %v1001_v42 = vld [vmem:[#allocation2 + $0xf1] sm:$0xff] }
  0xf9   :  { %874 = vst.msk [vmem:[#allocation2 + $0x121] sm:$0xff] %vm741_vm2, %v699_v39  ;;  %v702_v43 = vmax.f32 %v484_v40, 0.0  ;;  %v479_v44 = vadd.f32 %v11237_v8, %v478_v41  ;;  %9671 = vmatprep.mubr.msk.f32.mxu0 %vm741_vm2, %v1001_v42 }
  0xfa   :  { %v9584_v46 = vpop.f32.mrf.mxu0  ;;  %9672 = vmatmul.mubr.msk.f32.gmra.mxu0 %vm741_vm2, %v1002_v45  ;;  %v1004_v53 = vld [vmem:[#allocation2 + $0x111] sm:$0xff]  ;;  %v2213_v45 = vld [vmem:[#allocation2 + $0x3a] sm:$0xff] }
  0xfb   :  { %877 = vst.msk [vmem:[#allocation2 + $0x141] sm:$0xff] %vm741_vm2, %v702_v43  ;;  %v701_v47 = vmax.f32 %v479_v44, 0.0  ;;  %v494_v48 = vadd.f32 %v9584_v46, %v11237_v8 }
  0xfc   :  { %v488_v49 = vpop.f32.mrf.mxu0  ;;  %v1003_v50 = vld [vmem:[#allocation2 + $0x109] sm:$0xff] }
  0xfd   :  { %876 = vst.msk [vmem:[#allocation2 + $0x139] sm:$0xff] %vm741_vm2, %v701_v47  ;;  %v704_v51 = vmax.f32 %v494_v48, 0.0  ;;  %v489_v52 = vadd.f32 %v11237_v8, %v488_v49  ;;  %9674 = vmatprep.mubr.msk.f32.mxu0 %vm741_vm2, %v1003_v50  ;;  %v2214_v47 = vld [vmem:[#allocation2 + $0x4a] sm:$0xff] }
  0xfe   :  { %v9587_v54 = vpop.f32.mrf.mxu0  ;;  %9675 = vmatmul.mubr.msk.f32.gmra.mxu0 %vm741_vm2, %v1004_v53  ;;  %v1006_v61 = vld [vmem:[#allocation2 + $0x129] sm:$0xff] }
  0xff   :  { %879 = vst.msk [vmem:[#allocation2 + $0x159] sm:$0xff] %vm741_vm2, %v704_v51  ;;  %v703_v55 = vmax.f32 %v489_v52, 0.0  ;;  %v504_v56 = vadd.f32 %v9587_v54, %v11237_v8 }
 0x100   :  { %v498_v57 = vpop.f32.mrf.mxu0  ;;  %v1005_v58 = vld [vmem:[#allocation2 + $0x121] sm:$0xff] }
 0x101   :  { %878 = vst.msk [vmem:[#allocation2 + $0x151] sm:$0xff] %vm741_vm2, %v703_v55  ;;  %v706_v59 = vmax.f32 %v504_v56, 0.0  ;;  %v499_v60 = vadd.f32 %v11237_v8, %v498_v57  ;;  %9677 = vmatprep.mubr.msk.f32.mxu0 %vm741_vm2, %v1005_v58  ;;  %v2215_v55 = vld [vmem:[#allocation2 + $0x52] sm:$0xff]  ;;  %v2216_v57 = vld [vmem:[#allocation2 + $0x62] sm:$0xff] }
 0x102   :  { %v9590_v62 = vpop.f32.mrf.mxu0  ;;  %9678 = vmatmul.mubr.msk.f32.gmra.mxu0 %vm741_vm2, %v1006_v61  ;;  %v1008_v5 = vld [vmem:[#allocation2 + $0x141] sm:$0xff] }
 0x103   :  { %881 = vst.msk [vmem:[#allocation2 + $0x171] sm:$0xff] %vm741_vm2, %v706_v59  ;;  %v705_v63 = vmax.f32 %v499_v60, 0.0  ;;  %v514_v0 = vadd.f32 %v9590_v62, %v11237_v8 }
 0x104   :  { %v508_v1 = vpop.f32.mrf.mxu0  ;;  %v1007_v2 = vld [vmem:[#allocation2 + $0x139] sm:$0xff] }
 0x105   :  { %880 = vst.msk [vmem:[#allocation2 + $0x169] sm:$0xff] %vm741_vm2, %v705_v63  ;;  %v708_v3 = vmax.f32 %v514_v0, 0.0  ;;  %v509_v4 = vadd.f32 %v11237_v8, %v508_v1  ;;  %9680 = vmatprep.mubr.msk.f32.mxu0 %vm741_vm2, %v1007_v2  ;;  %v2217_v1 = vld [vmem:[#allocation2 + $0x6a] sm:$0xff] }
 0x106   :  { %v9593_v6 = vpop.f32.mrf.mxu0  ;;  %9681 = vmatmul.mubr.msk.f32.gmra.mxu0 %vm741_vm2, %v1008_v5  ;;  %v1010_v16 = vld [vmem:[#allocation2 + $0x159] sm:$0xff] }
 0x107   :  { %883 = vst.msk [vmem:[#allocation2 + $0x189] sm:$0xff] %vm741_vm2, %v708_v3  ;;  %v707_v9 = vmax.f32 %v509_v4, 0.0  ;;  %v524_v10 = vadd.f32 %v9593_v6, %v11237_v8  ;;  %v2218_v3 = vld [vmem:[#allocation2 + $0x7a] sm:$0xff] }
 0x108   :  { %v518_v11 = vpop.f32.mrf.mxu0  ;;  %v1009_v12 = vld [vmem:[#allocation2 + $0x151] sm:$0xff] }
 0x109   :  { %882 = vst.msk [vmem:[#allocation2 + $0x181] sm:$0xff] %vm741_vm2, %v707_v9  ;;  %v710_v14 = vmax.f32 %v524_v10, 0.0  ;;  %v519_v15 = vadd.f32 %v11237_v8, %v518_v11  ;;  %9683 = vmatprep.mubr.msk.f32.mxu0 %vm741_vm2, %v1009_v12 }
 0x10a   :  { %v9596_v17 = vpop.f32.mrf.mxu0  ;;  %9684 = vmatmul.mubr.msk.f32.gmra.mxu0 %vm741_vm2, %v1010_v16  ;;  %v1012_v25 = vld [vmem:[#allocation2 + $0x171] sm:$0xff] }
 0x10b   :  { %885 = vst.msk [vmem:[#allocation2 + $0x1d1] sm:$0xff] %vm741_vm2, %v710_v14  ;;  %v709_v18 = vmax.f32 %v519_v15, 0.0  ;;  %v534_v19 = vadd.f32 %v9596_v17, %v11237_v8  ;;  %9837 = vmatprep.mubr.msk.f32.mxu0 %vm741_vm2, %v2208_v13  ;;  %v2219_v13 = vld [vmem:[#allocation2 + $0x82] sm:$0xff]  ;;  %v2220_v15 = vld [vmem:[#allocation2 + $0x92] sm:$0xff] }
 0x10c   :  { %v528_v21 = vpop.f32.mrf.mxu0  ;;  %v1011_v22 = vld [vmem:[#allocation2 + $0x169] sm:$0xff] }
 0x10d   :  { %884 = vst.msk [vmem:[#allocation2 + $0x1c9] sm:$0xff] %vm741_vm2, %v709_v18  ;;  %v712_v23 = vmax.f32 %v534_v19, 0.0  ;;  %v529_v24 = vadd.f32 %v11237_v8, %v528_v21  ;;  %9686 = vmatprep.mubr.msk.f32.mxu1 %vm741_vm2, %v1011_v22 }
 0x10e   :  { %v9599_v28 = vpop.f32.mrf.mxu0  ;;  %9687 = vmatmul.mubr.msk.f32.vlgmr.msra.gmra.mxu1 %vm741_vm2, %v1012_v25  ;;  %9838 = vmatmul.mubr.msk.f32.vlgmr.msra.gmra.mxu0 %vm741_vm2, %v2209_v20  ;;  %v2222_v25 = vld [vmem:[#allocation2 + $0xaa] sm:$0xff] }
 0x10f   :  { %887 = vst.msk [vmem:[#allocation2 + $0x1e9] sm:$0xff] %vm741_vm2, %v712_v23  ;;  %v711_v30 = vmax.f32 %v529_v24, 0.0  ;;  %v544_v31 = vadd.f32 %v9599_v28, %v11237_v8  ;;  %9738 = vmatpush3.msk.msra.mxu1 %vm1239_vm1, %v11230_v7  ;;  %9840 = vmatprep.mubr.msk.f32.mxu0 %vm741_vm2, %v2210_v29  ;;  %v2212_v7 = vld [vmem:[#allocation2 + $0x32] sm:$0xff]  ;;  %v2221_v23 = vld [vmem:[#allocation2 + $0x9a] sm:$0xff] }
 0x110   :  { %v538_v33 = vpop.f32.mrf.mxu0  ;;  %9689 = vmatprep.mubr.msk.f32.mxu1 %vm741_vm2, %v1013_v26  ;;  %9933 = vmatprep.subr.msk.mxu1 %vm1239_vm1, %v11349_v27 }
 0x111   :  { %886 = vst.msk [vmem:[#allocation2 + $0x1e1] sm:$0xff] %vm741_vm2, %v711_v30  ;;  %v714_v35 = vmax.f32 %v544_v31, 0.0  ;;  %v539_v36 = vadd.f32 %v11237_v8, %v538_v33  ;;  %10032 = vmatpush3.msk.msra.mxu0 %vm1239_vm1, %v11257_v34 }
 0x112   :  { %v9602_v38 = vpop.f32.mrf.mxu0  ;;  %9690 = vmatmul.mubr.msk.f32.gmra.mxu1 %vm741_vm2, %v1014_v32  ;;  %9841 = vmatmul.mubr.msk.f32.gmra.mxu0 %vm741_vm2, %v2211_v37  ;;  %v11376_v44 = vld [vmem:[#allocation2 + $0x1d1] sm:$0xff]  ;;  %v2224_v37 = vld [vmem:[#allocation2 + $0xc2] sm:$0xff] }
 0x113   :  { %889 = vst.msk [vmem:[#allocation2 + $0x201] sm:$0xff] %vm741_vm2, %v714_v35  ;;  %v713_v39 = vmax.f32 %v539_v36, 0.0  ;;  %v554_v40 = vadd.f32 %v9602_v38, %v11237_v8  ;;  %9843 = vmatprep.mubr.msk.f32.mxu0 %vm741_vm2, %v2212_v7  ;;  %v2223_v35 = vld [vmem:[#allocation2 + $0xb2] sm:$0xff] }
 0x114   :  { %v548_v41 = vpop.f32.mrf.mxu0  ;;  %v11370_v42 = vld [vmem:[#allocation2 + $0x1c9] sm:$0xff] }
 0x115   :  { %888 = vst.msk [vmem:[#allocation2 + $0x1f9] sm:$0xff] %vm741_vm2, %v713_v39  ;;  %v716_v43 = vmax.f32 %v554_v40, 0.0  ;;  %v549_v34 = vadd.f32 %v11237_v8, %v548_v41  ;;  %9692 = vmatprep.mubr.msk.f32.mxu1 %vm741_vm2, %v11370_v42 }
 0x116   :  { %v9605_v46 = vpop.f32.mrf.mxu0  ;;  %9693 = vmatmul.mubr.msk.f32.gmra.mxu1 %vm741_vm2, %v11376_v44  ;;  %9844 = vmatmul.mubr.msk.f32.gmra.mxu0 %vm741_vm2, %v2213_v45  ;;  %v11390_v54 = vld [vmem:[#allocation2 + $0x1e9] sm:$0xff] }
 0x117   :  { %891 = vst.msk [vmem:[#allocation2 + $0x219] sm:$0xff] %vm741_vm2, %v716_v43  ;;  %v715_v48 = vmax.f32 %v549_v34, 0.0  ;;  %v564_v49 = vadd.f32 %v9605_v46, %v11237_v8  ;;  %9846 = vmatprep.mubr.msk.f32.mxu0 %vm741_vm2, %v2214_v47  ;;  %v2225_v45 = vld [vmem:[#allocation2 + $0xca] sm:$0xff]  ;;  %v2226_v47 = vld [vmem:[#allocation2 + $0xda] sm:$0xff] }
 0x118   :  { %v558_v50 = vpop.f32.mrf.mxu0  ;;  %v11384_v51 = vld [vmem:[#allocation2 + $0x1e1] sm:$0xff] }
 0x119   :  { %890 = vst.msk [vmem:[#allocation2 + $0x211] sm:$0xff] %vm741_vm2, %v715_v48  ;;  %v718_v52 = vmax.f32 %v564_v49, 0.0  ;;  %v559_v53 = vadd.f32 %v11237_v8, %v558_v50  ;;  %9695 = vmatprep.mubr.msk.f32.mxu1 %vm741_vm2, %v11384_v51 }
 0x11a   :  { %v9608_v56 = vpop.f32.mrf.mxu0  ;;  %9696 = vmatmul.mubr.msk.f32.gmra.mxu1 %vm741_vm2, %v11390_v54  ;;  %9847 = vmatmul.mubr.msk.f32.gmra.mxu0 %vm741_vm2, %v2215_v55  ;;  %v11404_v0 = vld [vmem:[#allocation2 + $0x201] sm:$0xff] }
 0x11b   :  { %893 = vst.msk [vmem:[#allocation2 + $0x231] sm:$0xff] %vm741_vm2, %v718_v52  ;;  %v717_v58 = vmax.f32 %v559_v53, 0.0  ;;  %v574_v59 = vadd.f32 %v9608_v56, %v11237_v8  ;;  %9849 = vmatprep.mubr.msk.f32.mxu0 %vm741_vm2, %v2216_v57  ;;  %v2227_v57 = vld [vmem:[#allocation2 + $0xe2] sm:$0xff] }
 0x11c   :  { %v568_v60 = vpop.f32.mrf.mxu0  ;;  %v11398_v61 = vld [vmem:[#allocation2 + $0x1f9] sm:$0xff] }
 0x11d   :  { %892 = vst.msk [vmem:[#allocation2 + $0x229] sm:$0xff] %vm741_vm2, %v717_v58  ;;  %v720_v62 = vmax.f32 %v574_v59, 0.0  ;;  %v569_v63 = vadd.f32 %v11237_v8, %v568_v60  ;;  %9698 = vmatprep.mubr.msk.f32.mxu1 %vm741_vm2, %v11398_v61  ;;  %v2228_v59 = vld [vmem:[#allocation2 + $0xf2] sm:$0xff] }
 0x11e   :  { %v9611_v2 = vpop.f32.mrf.mxu0  ;;  %9699 = vmatmul.mubr.msk.f32.gmra.mxu1 %vm741_vm2, %v11404_v0  ;;  %9850 = vmatmul.mubr.msk.f32.gmra.mxu0 %vm741_vm2, %v2217_v1  ;;  %v11418_v12 = vld [vmem:[#allocation2 + $0x219] sm:$0xff] }
 0x11f   :  { %895 = vst.msk [vmem:[#allocation2 + $0x249] sm:$0xff] %vm741_vm2, %v720_v62  ;;  %v719_v4 = vmax.f32 %v569_v63, 0.0  ;;  %v584_v5 = vadd.f32 %v9611_v2, %v11237_v8  ;;  %9852 = vmatprep.mubr.msk.f32.mxu0 %vm741_vm2, %v2218_v3 }
 0x120   :  { %v578_v6 = vpop.f32.mrf.mxu0  ;;  %v11412_v9 = vld [vmem:[#allocation2 + $0x211] sm:$0xff] }
 0x121   :  { %894 = vst.msk [vmem:[#allocation2 + $0x241] sm:$0xff] %vm741_vm2, %v719_v4  ;;  %v722_v10 = vmax.f32 %v584_v5, 0.0  ;;  %v579_v11 = vadd.f32 %v11237_v8, %v578_v6  ;;  %9701 = vmatprep.mubr.msk.f32.mxu1 %vm741_vm2, %v11412_v9  ;;  %v2229_v5 = vld [vmem:[#allocation2 + $0xfa] sm:$0xff] }
 0x122   :  { %v9614_v14 = vpop.f32.mrf.mxu0  ;;  %9702 = vmatmul.mubr.msk.f32.gmra.mxu1 %vm741_vm2, %v11418_v12  ;;  %9853 = vmatmul.mubr.msk.f32.gmra.mxu0 %vm741_vm2, %v2219_v13  ;;  %v11432_v22 = vld [vmem:[#allocation2 + $0x231] sm:$0xff] }
 0x123   :  { %897 = vst.msk [vmem:[#allocation2 + $0x261] sm:$0xff] %vm741_vm2, %v722_v10  ;;  %v721_v16 = vmax.f32 %v579_v11, 0.0  ;;  %v594_v17 = vadd.f32 %v9614_v14, %v11237_v8  ;;  %9855 = vmatprep.mubr.msk.f32.mxu0 %vm741_vm2, %v2220_v15  ;;  %v2230_v10 = vld [vmem:[#allocation2 + $0x10a] sm:$0xff] }
 0x124   :  { %v588_v18 = vpop.f32.mrf.mxu0  ;;  %v11426_v19 = vld [vmem:[#allocation2 + $0x229] sm:$0xff] }
 0x125   :  { %896 = vst.msk [vmem:[#allocation2 + $0x259] sm:$0xff] %vm741_vm2, %v721_v16  ;;  %v724_v20 = vmax.f32 %v594_v17, 0.0  ;;  %v589_v21 = vadd.f32 %v11237_v8, %v588_v18  ;;  %9704 = vmatprep.mubr.msk.f32.mxu1 %vm741_vm2, %v11426_v19 }
 0x126   :  { %v9617_v24 = vpop.f32.mrf.mxu0  ;;  %9705 = vmatmul.mubr.msk.f32.gmra.mxu1 %vm741_vm2, %v11432_v22  ;;  %9856 = vmatmul.mubr.msk.f32.gmra.mxu0 %vm741_vm2, %v2221_v23  ;;  %v11446_v33 = vld [vmem:[#allocation2 + $0x249] sm:$0xff] }
 0x127   :  { %899 = vst.msk [vmem:[#allocation2 + $0x279] sm:$0xff] %vm741_vm2, %v724_v20  ;;  %v723_v26 = vmax.f32 %v589_v21, 0.0  ;;  %v604_v28 = vadd.f32 %v9617_v24, %v11237_v8  ;;  %9858 = vmatprep.mubr.msk.f32.mxu0 %vm741_vm2, %v2222_v25  ;;  %v2231_v20 = vld [vmem:[#allocation2 + $0x112] sm:$0xff]  ;;  %v2232_v23 = vld [vmem:[#allocation2 + $0x122] sm:$0xff] }
 0x128   :  { %v598_v29 = vpop.f32.mrf.mxu0  ;;  %v11440_v30 = vld [vmem:[#allocation2 + $0x241] sm:$0xff] }
 0x129   :  { %898 = vst.msk [vmem:[#allocation2 + $0x271] sm:$0xff] %vm741_vm2, %v723_v26  ;;  %v726_v31 = vmax.f32 %v604_v28, 0.0  ;;  %v599_v32 = vadd.f32 %v11237_v8, %v598_v29  ;;  %9707 = vmatprep.mubr.msk.f32.mxu1 %vm741_vm2, %v11440_v30 }
 0x12a   :  { %v9620_v36 = vpop.f32.mrf.mxu0  ;;  %9708 = vmatmul.mubr.msk.f32.gmra.mxu1 %vm741_vm2, %v11446_v33  ;;  %9859 = vmatmul.mubr.msk.f32.gmra.mxu0 %vm741_vm2, %v2223_v35  ;;  %v11460_v34 = vld [vmem:[#allocation2 + $0x261] sm:$0xff]  ;;  %v2233_v35 = vld [vmem:[#allocation2 + $0x12a] sm:$0xff] }
 0x12b   :  { %901 = vst.msk [vmem:[#allocation2 + $0x291] sm:$0xff] %vm741_vm2, %v726_v31  ;;  %v725_v38 = vmax.f32 %v599_v32, 0.0  ;;  %v614_v7 = vadd.f32 %v9620_v36, %v11237_v8  ;;  %9861 = vmatprep.mubr.msk.f32.mxu0 %vm741_vm2, %v2224_v37  ;;  %v2234_v37 = vld [vmem:[#allocation2 + $0x13a] sm:$0xff] }
 0x12c   :  { %v608_v39 = vpop.f32.mrf.mxu0  ;;  %v11454_v40 = vld [vmem:[#allocation2 + $0x259] sm:$0xff] }
 0x12d   :  { %900 = vst.msk [vmem:[#allocation2 + $0x289] sm:$0xff] %vm741_vm2, %v725_v38  ;;  %v728_v41 = vmax.f32 %v614_v7, 0.0  ;;  %v609_v43 = vadd.f32 %v11237_v8, %v608_v39  ;;  %9710 = vmatprep.mubr.msk.f32.mxu1 %vm741_vm2, %v11454_v40 }
 0x12e   :  { %v9623_v46 = vpop.f32.mrf.mxu0  ;;  %9711 = vmatmul.mubr.msk.f32.gmra.mxu1 %vm741_vm2, %v11460_v34  ;;  %9862 = vmatmul.mubr.msk.f32.gmra.mxu0 %vm741_vm2, %v2225_v45  ;;  %v11474_v56 = vld [vmem:[#allocation2 + $0x279] sm:$0xff] }
 0x12f   :  { %903 = vst.msk [vmem:[#allocation2 + $0x2a9] sm:$0xff] %vm741_vm2, %v728_v41  ;;  %v727_v48 = vmax.f32 %v609_v43, 0.0  ;;  %v624_v49 = vadd.f32 %v9623_v46, %v11237_v8  ;;  %9864 = vmatprep.mubr.msk.f32.mxu0 %vm741_vm2, %v2226_v47  ;;  %v2235_v47 = vld [vmem:[#allocation2 + $0x142] sm:$0xff] }
 0x130   :  { %v618_v50 = vpop.f32.mrf.mxu0  ;;  %v11468_v52 = vld [vmem:[#allocation2 + $0x271] sm:$0xff] }
 0x131   :  { %902 = vst.msk [vmem:[#allocation2 + $0x2a1] sm:$0xff] %vm741_vm2, %v727_v48  ;;  %v730_v53 = vmax.f32 %v624_v49, 0.0  ;;  %v619_v55 = vadd.f32 %v11237_v8, %v618_v50  ;;  %9713 = vmatprep.mubr.msk.f32.mxu1 %vm741_vm2, %v11468_v52  ;;  %v2236_v48 = vld [vmem:[#allocation2 + $0x152] sm:$0xff] }
 0x132   :  { %v9626_v58 = vpop.f32.mrf.mxu0  ;;  %9714 = vmatmul.mubr.msk.f32.gmra.mxu1 %vm741_vm2, %v11474_v56  ;;  %9865 = vmatmul.mubr.msk.f32.gmra.mxu0 %vm741_vm2, %v2227_v57  ;;  %v11488_v4 = vld [vmem:[#allocation2 + $0x291] sm:$0xff] }
 0x133   :  { %905 = vst.msk [vmem:[#allocation2 + $0x2c1] sm:$0xff] %vm741_vm2, %v730_v53  ;;  %v729_v60 = vmax.f32 %v619_v55, 0.0  ;;  %v634_v62 = vadd.f32 %v9626_v58, %v11237_v8  ;;  %9867 = vmatprep.mubr.msk.f32.mxu0 %vm741_vm2, %v2228_v59  ;;  %v2237_v59 = vld [vmem:[#allocation2 + $0x15a] sm:$0xff] }
 0x134   :  { %v628_v63 = vpop.f32.mrf.mxu0  ;;  %v11482_v1 = vld [vmem:[#allocation2 + $0x289] sm:$0xff] }
 0x135   :  { %904 = vst.msk [vmem:[#allocation2 + $0x2b9] sm:$0xff] %vm741_vm2, %v729_v60  ;;  %v732_v2 = vmax.f32 %v634_v62, 0.0  ;;  %v629_v3 = vadd.f32 %v11237_v8, %v628_v63  ;;  %9716 = vmatprep.mubr.msk.f32.mxu1 %vm741_vm2, %v11482_v1  ;;  %v2238_v63 = vld [vmem:[#allocation2 + $0x16a] sm:$0xff] }
 0x136   :  { %v9629_v6 = vpop.f32.mrf.mxu0  ;;  %9717 = vmatmul.mubr.msk.f32.gmra.mxu1 %vm741_vm2, %v11488_v4  ;;  %9868 = vmatmul.mubr.msk.f32.gmra.mxu0 %vm741_vm2, %v2229_v5  ;;  %v11502_v18 = vld [vmem:[#allocation2 + $0x2a9] sm:$0xff]  ;;  %v2240_v5 = vld [vmem:[#allocation2 + $0x1b2] sm:$0xff] }
 0x137   :  { %907 = vst.msk [vmem:[#allocation2 + $0x2d9] sm:$0xff] %vm741_vm2, %v732_v2  ;;  %v731_v11 = vmax.f32 %v629_v3, 0.0  ;;  %v644_v13 = vadd.f32 %v9629_v6, %v11237_v8  ;;  %9870 = vmatprep.mubr.msk.f32.mxu0 %vm741_vm2, %v2230_v10  ;;  %v2241_v10 = vld [vmem:[#allocation2 + $0x1ba] sm:$0xff] }
 0x138   :  { %v638_v14 = vpop.f32.mrf.mxu0  ;;  %v11496_v15 = vld [vmem:[#allocation2 + $0x2a1] sm:$0xff] }
 0x139   :  { %906 = vst.msk [vmem:[#allocation2 + $0x2d1] sm:$0xff] %vm741_vm2, %v731_v11  ;;  %v734_v16 = vmax.f32 %v644_v13, 0.0  ;;  %v639_v17 = vadd.f32 %v11237_v8, %v638_v14  ;;  %9719 = vmatprep.mubr.msk.f32.mxu1 %vm741_vm2, %v11496_v15  ;;  %v916_v13 = vld [vmem:[#allocation2] sm:$0xff] }
 0x13a   :  { %v9632_v21 = vpop.f32.mrf.mxu0  ;;  %9720 = vmatmul.mubr.msk.f32.gmra.mxu1 %vm741_vm2, %v11502_v18  ;;  %9871 = vmatmul.mubr.msk.f32.gmra.mxu0 %vm741_vm2, %v2231_v20  ;;  %v11516_v32 = vld [vmem:[#allocation2 + $0x2c1] sm:$0xff]  ;;  %v2243_v20 = vld [vmem:[#allocation2 + $0x1d2] sm:$0xff] }
 0x13b   :  { %909 = vst.msk [vmem:[#allocation2 + $0x2f1] sm:$0xff] %vm741_vm2, %v734_v16  ;;  %v733_v24 = vmax.f32 %v639_v17, 0.0  ;;  %v654_v25 = vadd.f32 %v9632_v21, %v11237_v8  ;;  %9873 = vmatprep.mubr.msk.f32.mxu0 %vm741_vm2, %v2232_v23  ;;  %v2242_v16 = vld [vmem:[#allocation2 + $0x1ca] sm:$0xff]  ;;  %v11576_v21 = vld [vmem:[%s14802_s3 + $0x14] sm:$0xf]  ;;  %v11580_v23 = vld [vmem:[#allocation2 + $0x18] sm:$0xff] }
 0x13c   :  { %v648_v26 = vpop.f32.mrf.mxu0  ;;  %v11510_v28 = vld [vmem:[#allocation2 + $0x2b9] sm:$0xff]  ;;  %v917_v17 = vld [vmem:[#allocation2 + $0x8] sm:$0xff] }
 0x13d   :  { %908 = vst.msk [vmem:[#allocation2 + $0x2e9] sm:$0xff] %vm741_vm2, %v733_v24  ;;  %v736_v29 = vmax.f32 %v654_v25, 0.0  ;;  %v649_v31 = vadd.f32 %v11237_v8, %v648_v26  ;;  %9722 = vmatprep.mubr.msk.f32.mxu1 %vm741_vm2, %v11510_v28  ;;  %v2244_v24 = vld [vmem:[#allocation2 + $0x1e2] sm:$0xff]  ;;  %v11592_v25 = vld [vmem:[%s14802_s3 + $0x18] sm:$0xf] }
 0x13e   :  { %v9635_v36 = vpop.f32.mrf.mxu0  ;;  %9723 = vmatmul.mubr.msk.f32.gmra.mxu1 %vm741_vm2, %v11516_v32  ;;  %9874 = vmatmul.mubr.msk.f32.gmra.mxu0 %vm741_vm2, %v2233_v35  ;;  %v11530_v46 = vld [vmem:[#allocation2 + $0x2d9] sm:$0xff] }
 0x13f   :  { %911 = vst.msk [vmem:[#allocation2 + $0x309] sm:$0xff] %vm741_vm2, %v736_v29  ;;  %v735_v38 = vmax.f32 %v649_v31, 0.0  ;;  %v664_v7 = vadd.f32 %v9635_v36, %v11237_v8  ;;  %9876 = vmatprep.mubr.msk.f32.mxu0 %vm741_vm2, %v2234_v37  ;;  %v11594_v26 = vld [vmem:[#allocation2 + $0x20] sm:$0xff]  ;;  %v2245_v29 = vld [vmem:[#allocation2 + $0x1ea] sm:$0xff]  ;;  %10227 = vmatprep.subr.msk.mxu0 %vm1239_vm1, %v11592_v25  ;;  %v11606_v35 = vld [vmem:[#allocation2 + $0x38] sm:$0xff] }
 0x140   :  { %v658_v39 = vpop.f32.mrf.mxu0  ;;  %v11524_v41 = vld [vmem:[#allocation2 + $0x2d1] sm:$0xff]  ;;  %v2246_v31 = vld [vmem:[#allocation2 + $0x1fa] sm:$0xff]  ;;  %v2247_v36 = vld [vmem:[#allocation2 + $0x202] sm:$0xff] }
 0x141   :  { %910 = vst.msk [vmem:[#allocation2 + $0x301] sm:$0xff] %vm741_vm2, %v735_v38  ;;  %v738_v43 = vmax.f32 %v664_v7, 0.0  ;;  %v659_v45 = vadd.f32 %v11237_v8, %v658_v39  ;;  %9725 = vmatprep.mubr.msk.f32.mxu1 %vm741_vm2, %v11524_v41  ;;  %v11611_v37 = vld [vmem:[#allocation2 + $0x48] sm:$0xff]  ;;  %v2248_v38 = vld [vmem:[#allocation2 + $0x212] sm:$0xff]  ;;  %v2249_v39 = vld [vmem:[#allocation2 + $0x21a] sm:$0xff] }
 0x142   :  { %9726 = vmatmul.mubr.msk.f32.gmra.mxu1 %vm741_vm2, %v11530_v46  ;;  %9877 = vmatmul.mubr.msk.f32.gmra.mxu0 %vm741_vm2, %v2235_v47  ;;  %v9638_v49 = vpop.f32.mrf.mxu0  ;;  %v11543_v58 = vld [vmem:[#allocation2 + $0x2f1] sm:$0xff]  ;;  %v11626_v47 = vld [vmem:[#allocation2 + $0x68] sm:$0xff] }
 0x143   :  { %913 = vst.msk [vmem:[#allocation2 + $0x321] sm:$0xff] %vm741_vm2, %v738_v43  ;;  %v737_v50 = vmax.f32 %v659_v45, 0.0  ;;  %9879 = vmatprep.mubr.msk.f32.mxu0 %vm741_vm2, %v2236_v48  ;;  %v674_v53 = vadd.f32 %v9638_v49, %v11237_v8  ;;  %v11616_v7 = vld [vmem:[#allocation2 + $0x50] sm:$0xff]  ;;  %v11621_v43 = vld [vmem:[#allocation2 + $0x60] sm:$0xff]  ;;  %v11631_v49 = vld [vmem:[#allocation2 + $0x78] sm:$0xff] }
 0x144   :  { %v11538_v55 = vld [vmem:[#allocation2 + $0x2e9] sm:$0xff]  ;;  %v668_v57 = vpop.f32.mrf.mxu0  ;;  %v2251_v48 = vld [vmem:[#allocation2 + $0x232] sm:$0xff] }
 0x145   :  { %912 = vst.msk [vmem:[#allocation2 + $0x319] sm:$0xff] %vm741_vm2, %v737_v50  ;;  %9728 = vmatprep.mubr.msk.f32.mxu1 %vm741_vm2, %v11538_v55  ;;  %v740_v60 = vmax.f32 %v674_v53, 0.0  ;;  %v669_v62 = vadd.f32 %v11237_v8, %v668_v57  ;;  %v2239_v8 = vld [vmem:[#allocation2 + $0x172] sm:$0xff]  ;;  %v2250_v45 = vld [vmem:[#allocation2 + $0x22a] sm:$0xff]  ;;  %v2252_v50 = vld [vmem:[#allocation2 + $0x242] sm:$0xff] }
 0x146   :  { %9729 = vmatmul.mubr.msk.f32.gmra.mxu1 %vm741_vm2, %v11543_v58  ;;  %9880 = vmatmul.mubr.msk.f32.gmra.mxu0 %vm741_vm2, %v2237_v59  ;;  %v11555_v6 = vld [vmem:[#allocation2 + $0x309] sm:$0xff]  ;;  %v11636_v53 = vld [vmem:[#allocation2 + $0x80] sm:$0xff] }
 0x147   :  { %9882 = vmatprep.mubr.msk.f32.mxu0 %vm741_vm2, %v2238_v63  ;;  %915 = vst.msk [vmem:[#allocation2 + $0x339] sm:$0xff] %vm741_vm2, %v740_v60  ;;  %v739_v2 = vmax.f32 %v669_v62, 0.0  ;;  %v2253_v57 = vld [vmem:[#allocation2 + $0x24a] sm:$0xff]  ;;  %v2254_v60 = vld [vmem:[#allocation2 + $0x25a] sm:$0xff]  ;;  %v2255_v63 = vld [vmem:[#allocation2 + $0x262] sm:$0xff] }
 0x148   :  { %v11551_v3 = vld [vmem:[#allocation2 + $0x301] sm:$0xff]  ;;  %v11641_v59 = vld [vmem:[#allocation2 + $0x90] sm:$0xff]  ;;  %v11646_v62 = vld [vmem:[#allocation2 + $0x98] sm:$0xff] }
 0x149   :  { %9731 = vmatprep.mubr.msk.f32.mxu1 %vm741_vm2, %v11551_v3  ;;  %914 = vst.msk [vmem:[#allocation2 + $0x331] sm:$0xff] %vm741_vm2, %v739_v2  ;;  %v11651_v2 = vld [vmem:[#allocation2 + $0xa8] sm:$0xff] }
 0x14a   :  { %9732 = vmatmul.mubr.msk.f32.gmra.mxu1 %vm741_vm2, %v11555_v6  ;;  %9883 = vmatmul.mubr.msk.f32.gmra.mxu0 %vm741_vm2, %v2239_v8  ;;  %v11566_v14 = vld [vmem:[#allocation2 + $0x321] sm:$0xff]  ;;  %v11656_v8 = vld [vmem:[#allocation2 + $0xb0] sm:$0xff] }
 0x14b   :  { %9885 = vmatprep.mubr.msk.f32.mxu0 %vm741_vm2, %v2240_v5  ;;  %14850 = vst [vmem:[#allocation4_spill] sm:$0xff] %v11566_v14  ;;  %v2256_v5 = vld [vmem:[#allocation2 + $0x272] sm:$0xff] }
 0x14c   :  { %v11562_v11 = vld [vmem:[#allocation2 + $0x319] sm:$0xff] }
 0x14d   :  { %14849 = vst [vmem:[#allocation3_spill] sm:$0xff] %v11562_v11  ;;  %9734 = vmatprep.mubr.msk.f32.mxu1 %vm741_vm2, %v11562_v11  ;;  %v11736_v11 = vld [vmem:[#allocation2 + $0x170] sm:$0xff] }
 0x14e   :  { %9735 = vmatmul.mubr.msk.f32.gmra.mxu1 %vm741_vm2, %v11566_v14  ;;  %9886 = vmatmul.mubr.msk.f32.gmra.mxu0 %vm741_vm2, %v2241_v10  ;;  %v2257_v10 = vld [vmem:[#allocation2 + $0x27a] sm:$0xff]  ;;  %14854 = vst [vmem:[#allocation8_spill] sm:$0xff] %v11736_v11 }
 0x14f   :  { %9888 = vmatprep.mubr.msk.f32.mxu0 %vm741_vm2, %v2242_v16  ;;  %9739 = vmatprep.mubr.msk.f32.mxu1 %vm741_vm2, %v916_v13  ;;  %v11661_v13 = vld [vmem:[#allocation2 + $0xc0] sm:$0xff]  ;;  %v2258_v16 = vld [vmem:[#allocation2 + $0x28a] sm:$0xff] }
 0x150   :  { %v3628_v14 = vld [vmem:[#allocation2 + $0x19] sm:$0xff] }
 0x152   :  { %9740 = vmatmul.mubr.msk.f32.vlgmr.msra.gmra.mxu1 %vm741_vm2, %v917_v17  ;;  %9889 = vmatmul.mubr.msk.f32.gmra.mxu0 %vm741_vm2, %v2243_v20  ;;  %v11666_v17 = vld [vmem:[#allocation2 + $0xc8] sm:$0xff]  ;;  %v2259_v20 = vld [vmem:[#allocation2 + $0x292] sm:$0xff] }
 0x153   :  { %9934 = vmatpush3.msk.msra.mxu1 %vm1239_vm1, %v11349_v27  ;;  %9742 = vmatprep.mubr.msk.f32.mxu1 %vm741_vm2, %v11580_v23  ;;  %v11601_v27 = vld [vmem:[#allocation2 + $0x30] sm:$0xff] }
 0x154   :  { %9891 = vmatprep.mubr.msk.f32.mxu0 %vm741_vm2, %v2244_v24  ;;  %10129 = vmatprep.subr.msk.mxu1 %vm1239_vm1, %v11576_v21  ;;  %v11671_v24 = vld [vmem:[#allocation2 + $0xd8] sm:$0xff] }
 0x156   :  { %9743 = vmatmul.mubr.msk.f32.gmra.mxu1 %vm741_vm2, %v11594_v26  ;;  %9892 = vmatmul.mubr.msk.f32.gmra.mxu0 %vm741_vm2, %v2245_v29  ;;  %v2260_v29 = vld [vmem:[#allocation2 + $0x2a2] sm:$0xff] }
 0x157   :  { %9745 = vmatprep.mubr.msk.f32.mxu1 %vm741_vm2, %v11601_v27  ;;  %9894 = vmatprep.mubr.msk.f32.mxu0 %vm741_vm2, %v2246_v31  ;;  %v11676_v31 = vld [vmem:[#allocation2 + $0xe0] sm:$0xff] }
 0x15a   :  { %9746 = vmatmul.mubr.msk.f32.gmra.mxu1 %vm741_vm2, %v11606_v35  ;;  %9895 = vmatmul.mubr.msk.f32.gmra.mxu0 %vm741_vm2, %v2247_v36  ;;  %v2261_v36 = vld [vmem:[#allocation2 + $0x2aa] sm:$0xff] }
 0x15b   :  { %9748 = vmatprep.mubr.msk.f32.mxu1 %vm741_vm2, %v11611_v37  ;;  %9897 = vmatprep.mubr.msk.f32.mxu0 %vm741_vm2, %v2248_v38  ;;  %v11681_v38 = vld [vmem:[#allocation2 + $0xf0] sm:$0xff] }
 0x15e   :  { %9749 = vmatmul.mubr.msk.f32.gmra.mxu1 %vm741_vm2, %v11616_v7  ;;  %9898 = vmatmul.mubr.msk.f32.gmra.mxu0 %vm741_vm2, %v2249_v39  ;;  %v2262_v39 = vld [vmem:[#allocation2 + $0x2ba] sm:$0xff] }
 0x15f   :  { %9751 = vmatprep.mubr.msk.f32.mxu1 %vm741_vm2, %v11621_v43  ;;  %9900 = vmatprep.mubr.msk.f32.mxu0 %vm741_vm2, %v2250_v45  ;;  %v11686_v45 = vld [vmem:[#allocation2 + $0xf8] sm:$0xff] }
 0x162   :  { %9752 = vmatmul.mubr.msk.f32.gmra.mxu1 %vm741_vm2, %v11626_v47  ;;  %9901 = vmatmul.mubr.msk.f32.gmra.mxu0 %vm741_vm2, %v2251_v48  ;;  %v2263_v48 = vld [vmem:[#allocation2 + $0x2c2] sm:$0xff] }
 0x163   :  { %9754 = vmatprep.mubr.msk.f32.mxu1 %vm741_vm2, %v11631_v49  ;;  %9903 = vmatprep.mubr.msk.f32.mxu0 %vm741_vm2, %v2252_v50  ;;  %v11691_v50 = vld [vmem:[#allocation2 + $0x108] sm:$0xff] }
 0x166   :  { %9755 = vmatmul.mubr.msk.f32.gmra.mxu1 %vm741_vm2, %v11636_v53  ;;  %9904 = vmatmul.mubr.msk.f32.gmra.mxu0 %vm741_vm2, %v2253_v57  ;;  %v2264_v57 = vld [vmem:[#allocation2 + $0x2d2] sm:$0xff] }
 0x167   :  { %9757 = vmatprep.mubr.msk.f32.mxu1 %vm741_vm2, %v11641_v59  ;;  %9906 = vmatprep.mubr.msk.f32.mxu0 %vm741_vm2, %v2254_v60  ;;  %v11696_v60 = vld [vmem:[#allocation2 + $0x110] sm:$0xff] }
 0x16a   :  { %9758 = vmatmul.mubr.msk.f32.gmra.mxu1 %vm741_vm2, %v11646_v62  ;;  %9907 = vmatmul.mubr.msk.f32.gmra.mxu0 %vm741_vm2, %v2255_v63  ;;  %v2265_v63 = vld [vmem:[#allocation2 + $0x2da] sm:$0xff] }
 0x16b   :  { %9760 = vmatprep.mubr.msk.f32.mxu1 %vm741_vm2, %v11651_v2  ;;  %9909 = vmatprep.mubr.msk.f32.mxu0 %vm741_vm2, %v2256_v5  ;;  %v11701_v5 = vld [vmem:[#allocation2 + $0x120] sm:$0xff] }
 0x16e   :  { %9761 = vmatmul.mubr.msk.f32.gmra.mxu1 %vm741_vm2, %v11656_v8  ;;  %9910 = vmatmul.mubr.msk.f32.gmra.mxu0 %vm741_vm2, %v2257_v10  ;;  %v2266_v10 = vld [vmem:[#allocation2 + $0x2ea] sm:$0xff] }
 0x16f   :  { %9763 = vmatprep.mubr.msk.f32.mxu1 %vm741_vm2, %v11661_v13  ;;  %9912 = vmatprep.mubr.msk.f32.mxu0 %vm741_vm2, %v2258_v16  ;;  %v11706_v16 = vld [vmem:[#allocation2 + $0x128] sm:$0xff] }
 0x172   :  { %9764 = vmatmul.mubr.msk.f32.gmra.mxu1 %vm741_vm2, %v11666_v17  ;;  %9913 = vmatmul.mubr.msk.f32.gmra.mxu0 %vm741_vm2, %v2259_v20  ;;  %v2267_v20 = vld [vmem:[#allocation2 + $0x2f2] sm:$0xff] }
 0x173   :  { %9766 = vmatprep.mubr.msk.f32.mxu1 %vm741_vm2, %v11671_v24  ;;  %9915 = vmatprep.mubr.msk.f32.mxu0 %vm741_vm2, %v2260_v29  ;;  %v11711_v29 = vld [vmem:[#allocation2 + $0x138] sm:$0xff] }
 0x176   :  { %9767 = vmatmul.mubr.msk.f32.gmra.mxu1 %vm741_vm2, %v11676_v31  ;;  %9916 = vmatmul.mubr.msk.f32.gmra.mxu0 %vm741_vm2, %v2261_v36  ;;  %v2268_v36 = vld [vmem:[#allocation2 + $0x302] sm:$0xff] }
 0x177   :  { %9769 = vmatprep.mubr.msk.f32.mxu1 %vm741_vm2, %v11681_v38  ;;  %9918 = vmatprep.mubr.msk.f32.mxu0 %vm741_vm2, %v2262_v39  ;;  %v11716_v39 = vld [vmem:[#allocation2 + $0x140] sm:$0xff] }
 0x17a   :  { %9770 = vmatmul.mubr.msk.f32.gmra.mxu1 %vm741_vm2, %v11686_v45  ;;  %9919 = vmatmul.mubr.msk.f32.gmra.mxu0 %vm741_vm2, %v2263_v48  ;;  %v2269_v48 = vld [vmem:[#allocation2 + $0x30a] sm:$0xff] }
 0x17b   :  { %9772 = vmatprep.mubr.msk.f32.mxu1 %vm741_vm2, %v11691_v50  ;;  %9921 = vmatprep.mubr.msk.f32.mxu0 %vm741_vm2, %v2264_v57  ;;  %v11721_v57 = vld [vmem:[#allocation2 + $0x150] sm:$0xff] }
 0x17c   :  { %14851 = vst [vmem:[#allocation5_spill] sm:$0xff] %v11721_v57 }
 0x17e   :  { %9773 = vmatmul.mubr.msk.f32.gmra.mxu1 %vm741_vm2, %v11696_v60  ;;  %9922 = vmatmul.mubr.msk.f32.gmra.mxu0 %vm741_vm2, %v2265_v63  ;;  %v2270_v63 = vld [vmem:[#allocation2 + $0x31a] sm:$0xff] }
 0x17f   :  { %9775 = vmatprep.mubr.msk.f32.mxu1 %vm741_vm2, %v11701_v5  ;;  %9924 = vmatprep.mubr.msk.f32.mxu0 %vm741_vm2, %v2266_v10  ;;  %v11726_v10 = vld [vmem:[#allocation2 + $0x158] sm:$0xff] }
 0x180   :  { %14852 = vst [vmem:[#allocation6_spill] sm:$0xff] %v11726_v10 }
 0x182   :  { %9776 = vmatmul.mubr.msk.f32.gmra.mxu1 %vm741_vm2, %v11706_v16  ;;  %9925 = vmatmul.mubr.msk.f32.gmra.mxu0 %vm741_vm2, %v2267_v20  ;;  %v2271_v20 = vld [vmem:[#allocation2 + $0x322] sm:$0xff] }
 0x183   :  { %9778 = vmatprep.mubr.msk.f32.mxu1 %vm741_vm2, %v11711_v29  ;;  %9927 = vmatprep.mubr.msk.f32.mxu0 %vm741_vm2, %v2268_v36  ;;  %v11731_v36 = vld [vmem:[#allocation2 + $0x168] sm:$0xff] }
 0x184   :  { %14853 = vst [vmem:[#allocation7_spill] sm:$0xff] %v11731_v36 }
 0x186   :  { %9779 = vmatmul.mubr.msk.f32.gmra.mxu1 %vm741_vm2, %v11716_v39  ;;  %9928 = vmatmul.mubr.msk.f32.gmra.mxu0 %vm741_vm2, %v2269_v48  ;;  %v948_v48 = vld [vmem:[#allocation2 + $0x1b0] sm:$0xff] }
 0x187   :  { %9781 = vmatprep.mubr.msk.f32.mxu1 %vm741_vm2, %v11721_v57  ;;  %9930 = vmatprep.mubr.msk.f32.mxu0 %vm741_vm2, %v2270_v63  ;;  %v3629_v63 = vld [vmem:[#allocation2 + $0x21] sm:$0xff]  ;;  %v11741_v57 = vpop.f32.mrf.mxu0 }
 0x188   :  { %14855 = vst [vmem:[#allocation9_spill] sm:$0xff] %v11741_v57 }
 0x18a   :  { %9782 = vmatmul.mubr.msk.f32.gmra.mxu1 %vm741_vm2, %v11726_v10  ;;  %9931 = vmatmul.mubr.msk.f32.gmra.mxu0 %vm741_vm2, %v2271_v20  ;;  %v3630_v10 = vld [vmem:[#allocation2 + $0x31] sm:$0xff] }
 0x18b   :  { %9784 = vmatprep.mubr.msk.f32.mxu1 %vm741_vm2, %v11731_v36  ;;  %10033 = vmatprep.mubr.msk.f32.mxu0 %vm741_vm2, %v3628_v14  ;;  %v949_v20 = vld [vmem:[#allocation2 + $0x1b8] sm:$0xff]  ;;  %v11749_v36 = vld [vmem:[#allocation2 + $0x1c8] sm:$0xff] }
 0x18c   :  { %v3631_v14 = vld [vmem:[#allocation2 + $0x39] sm:$0xff]  ;;  %14856 = vst [vmem:[#allocation10_spill] sm:$0xff] %v11749_v36 }
 0x18e   :  { %9785 = vmatmul.mubr.msk.f32.gmra.mxu1 %vm741_vm2, %v11736_v11  ;;  %10034 = vmatmul.mubr.msk.f32.vlgmr.msra.gmra.mxu0 %vm741_vm2, %v3629_v63  ;;  %v3632_v11 = vld [vmem:[#allocation2 + $0x49] sm:$0xff]  ;;  %v11751_v63 = vpop.f32.mrf.mxu0 }
 0x18f   :  { %10036 = vmatprep.mubr.msk.f32.mxu0 %vm741_vm2, %v3630_v10  ;;  %9787 = vmatprep.mubr.msk.f32.mxu1 %vm741_vm2, %v948_v48  ;;  %14857 = vst [vmem:[#allocation11_spill] sm:$0xff] %v11751_v63  ;;  %v11756_v10 = vld [vmem:[#allocation2 + $0x1d0] sm:$0xff] }
 0x190   :  { %10228 = vmatpush3.msk.msra.mxu0 %vm1239_vm1, %v11592_v25  ;;  %14858 = vst [vmem:[#allocation12_spill] sm:$0xff] %v11756_v10  ;;  %v3633_v48 = vld [vmem:[#allocation2 + $0x51] sm:$0xff]  ;;  %v11763_v25 = vld [vmem:[#allocation2 + $0x1e0] sm:$0xff]  ;;  %v3635_v63 = vld [vmem:[#allocation2 + $0x69] sm:$0xff] }
 0x191   :  { %14860 = vst [vmem:[#allocation14_spill] sm:$0xff] %v11763_v25 }
 0x192   :  { %9788 = vmatmul.mubr.msk.f32.gmra.mxu1 %vm741_vm2, %v949_v20  ;;  %10037 = vmatmul.mubr.msk.f32.gmra.mxu0 %vm741_vm2, %v3631_v14  ;;  %v3634_v20 = vld [vmem:[#allocation2 + $0x61] sm:$0xff] }
 0x193   :  { %9790 = vmatprep.mubr.msk.f32.mxu1 %vm741_vm2, %v11749_v36  ;;  %10039 = vmatprep.mubr.msk.f32.mxu0 %vm741_vm2, %v3632_v11  ;;  %v11770_v11 = vld [vmem:[#allocation2 + $0x1e8] sm:$0xff] }
 0x194   :  { %14862 = vst [vmem:[#allocation16_spill] sm:$0xff] %v11770_v11 }
 0x196   :  { %v11758_v57 = vpop.f32.mrf.mxu0  ;;  %9791 = vmatmul.mubr.msk.f32.gmra.mxu1 %vm741_vm2, %v11756_v10  ;;  %10040 = vmatmul.mubr.msk.f32.gmra.mxu0 %vm741_vm2, %v3633_v48  ;;  %v11777_v48 = vld [vmem:[#allocation2 + $0x1f8] sm:$0xff] }
 0x197   :  { %14859 = vst [vmem:[#allocation13_spill] sm:$0xff] %v11758_v57  ;;  %9793 = vmatprep.mubr.msk.f32.mxu1 %vm741_vm2, %v11763_v25  ;;  %10042 = vmatprep.mubr.msk.f32.mxu0 %vm741_vm2, %v3634_v20  ;;  %14864 = vst [vmem:[#allocation18_spill] sm:$0xff] %v11777_v48  ;;  %v3636_v57 = vld [vmem:[#allocation2 + $0x79] sm:$0xff]  ;;  %v3637_v25 = vld [vmem:[#allocation2 + $0x81] sm:$0xff] }
 0x198   :  { %v11768_v14 = vpop.f32.mrf.mxu0 }
 0x199   :  { %14861 = vst [vmem:[#allocation15_spill] sm:$0xff] %v11768_v14  ;;  %v11784_v14 = vld [vmem:[#allocation2 + $0x200] sm:$0xff] }
 0x19a   :  { %v11772_v36 = vpop.f32.mrf.mxu0  ;;  %9794 = vmatmul.mubr.msk.f32.gmra.mxu1 %vm741_vm2, %v11770_v11  ;;  %10043 = vmatmul.mubr.msk.f32.gmra.mxu0 %vm741_vm2, %v3635_v63  ;;  %14866 = vst [vmem:[#allocation20_spill] sm:$0xff] %v11784_v14  ;;  %v11791_v63 = vld [vmem:[#allocation2 + $0x210] sm:$0xff] }
 0x19b   :  { %14863 = vst [vmem:[#allocation17_spill] sm:$0xff] %v11772_v36  ;;  %9796 = vmatprep.mubr.msk.f32.mxu1 %vm741_vm2, %v11777_v48  ;;  %10045 = vmatprep.mubr.msk.f32.mxu0 %vm741_vm2, %v3636_v57  ;;  %14868 = vst [vmem:[#allocation22_spill] sm:$0xff] %v11791_v63  ;;  %v3638_v36 = vld [vmem:[#allocation2 + $0x91] sm:$0xff]  ;;  %v3639_v48 = vld [vmem:[#allocation2 + $0x99] sm:$0xff] }
 0x19c   :  { %v11782_v20 = vpop.f32.mrf.mxu0 }
 0x19d   :  { %14865 = vst [vmem:[#allocation19_spill] sm:$0xff] %v11782_v20  ;;  %v11798_v20 = vld [vmem:[#allocation2 + $0x218] sm:$0xff] }
 0x19e   :  { %v11786_v10 = vpop.f32.mrf.mxu0  ;;  %9797 = vmatmul.mubr.msk.f32.gmra.mxu1 %vm741_vm2, %v11784_v14  ;;  %10046 = vmatmul.mubr.msk.f32.gmra.mxu0 %vm741_vm2, %v3637_v25  ;;  %14870 = vst [vmem:[#allocation24_spill] sm:$0xff] %v11798_v20  ;;  %v11805_v25 = vld [vmem:[#allocation2 + $0x228] sm:$0xff] }
 0x19f   :  { %14867 = vst [vmem:[#allocation21_spill] sm:$0xff] %v11786_v10  ;;  %9799 = vmatprep.mubr.msk.f32.mxu1 %vm741_vm2, %v11791_v63  ;;  %10048 = vmatprep.mubr.msk.f32.mxu0 %vm741_vm2, %v3638_v36  ;;  %14872 = vst [vmem:[#allocation26_spill] sm:$0xff] %v11805_v25  ;;  %v3640_v10 = vld [vmem:[#allocation2 + $0xa9] sm:$0xff]  ;;  %v3641_v63 = vld [vmem:[#allocation2 + $0xb1] sm:$0xff] }
 0x1a0   :  { %v11796_v57 = vpop.f32.mrf.mxu0 }
 0x1a1   :  { %14869 = vst [vmem:[#allocation23_spill] sm:$0xff] %v11796_v57  ;;  %v11812_v57 = vld [vmem:[#allocation2 + $0x230] sm:$0xff] }
 0x1a2   :  { %v11800_v11 = vpop.f32.mrf.mxu0  ;;  %9800 = vmatmul.mubr.msk.f32.gmra.mxu1 %vm741_vm2, %v11798_v20  ;;  %10049 = vmatmul.mubr.msk.f32.gmra.mxu0 %vm741_vm2, %v3639_v48  ;;  %14874 = vst [vmem:[#allocation28_spill] sm:$0xff] %v11812_v57  ;;  %v11819_v48 = vld [vmem:[#allocation2 + $0x240] sm:$0xff] }
 0x1a3   :  { %14871 = vst [vmem:[#allocation25_spill] sm:$0xff] %v11800_v11  ;;  %9802 = vmatprep.mubr.msk.f32.mxu1 %vm741_vm2, %v11805_v25  ;;  %10051 = vmatprep.mubr.msk.f32.mxu0 %vm741_vm2, %v3640_v10  ;;  %14876 = vst [vmem:[#allocation30_spill] sm:$0xff] %v11819_v48  ;;  %v3642_v11 = vld [vmem:[#allocation2 + $0xc1] sm:$0xff]  ;;  %v3643_v25 = vld [vmem:[#allocation2 + $0xc9] sm:$0xff] }
 0x1a4   :  { %v11810_v36 = vpop.f32.mrf.mxu0 }
 0x1a5   :  { %14873 = vst [vmem:[#allocation27_spill] sm:$0xff] %v11810_v36  ;;  %v11826_v36 = vld [vmem:[#allocation2 + $0x248] sm:$0xff] }
 0x1a6   :  { %v11814_v14 = vpop.f32.mrf.mxu0  ;;  %9803 = vmatmul.mubr.msk.f32.gmra.mxu1 %vm741_vm2, %v11812_v57  ;;  %10052 = vmatmul.mubr.msk.f32.gmra.mxu0 %vm741_vm2, %v3641_v63  ;;  %14878 = vst [vmem:[#allocation32_spill] sm:$0xff] %v11826_v36  ;;  %v11833_v63 = vld [vmem:[#allocation2 + $0x258] sm:$0xff] }
 0x1a7   :  { %14875 = vst [vmem:[#allocation29_spill] sm:$0xff] %v11814_v14  ;;  %9805 = vmatprep.mubr.msk.f32.mxu1 %vm741_vm2, %v11819_v48  ;;  %10054 = vmatprep.mubr.msk.f32.mxu0 %vm741_vm2, %v3642_v11  ;;  %14880 = vst [vmem:[#allocation34_spill] sm:$0xff] %v11833_v63  ;;  %v3644_v14 = vld [vmem:[#allocation2 + $0xd9] sm:$0xff]  ;;  %v3645_v48 = vld [vmem:[#allocation2 + $0xe1] sm:$0xff] }
 0x1a8   :  { %v11824_v10 = vpop.f32.mrf.mxu0 }
 0x1a9   :  { %14877 = vst [vmem:[#allocation31_spill] sm:$0xff] %v11824_v10  ;;  %v11840_v10 = vld [vmem:[#allocation2 + $0x260] sm:$0xff] }
 0x1aa   :  { %v11828_v20 = vpop.f32.mrf.mxu0  ;;  %9806 = vmatmul.mubr.msk.f32.gmra.mxu1 %vm741_vm2, %v11826_v36  ;;  %10055 = vmatmul.mubr.msk.f32.gmra.mxu0 %vm741_vm2, %v3643_v25  ;;  %14882 = vst [vmem:[#allocation36_spill] sm:$0xff] %v11840_v10  ;;  %v11847_v25 = vld [vmem:[#allocation2 + $0x270] sm:$0xff] }
 0x1ab   :  { %14879 = vst [vmem:[#allocation33_spill] sm:$0xff] %v11828_v20  ;;  %9808 = vmatprep.mubr.msk.f32.mxu1 %vm741_vm2, %v11833_v63  ;;  %10057 = vmatprep.mubr.msk.f32.mxu0 %vm741_vm2, %v3644_v14  ;;  %14884 = vst [vmem:[#allocation38_spill] sm:$0xff] %v11847_v25  ;;  %v3646_v20 = vld [vmem:[#allocation2 + $0xf1] sm:$0xff]  ;;  %v3647_v63 = vld [vmem:[#allocation2 + $0xf9] sm:$0xff] }
 0x1ac   :  { %v11838_v11 = vpop.f32.mrf.mxu0 }
 0x1ad   :  { %14881 = vst [vmem:[#allocation35_spill] sm:$0xff] %v11838_v11  ;;  %v11854_v11 = vld [vmem:[#allocation2 + $0x278] sm:$0xff] }
 0x1ae   :  { %v11842_v57 = vpop.f32.mrf.mxu0  ;;  %9809 = vmatmul.mubr.msk.f32.gmra.mxu1 %vm741_vm2, %v11840_v10  ;;  %10058 = vmatmul.mubr.msk.f32.gmra.mxu0 %vm741_vm2, %v3645_v48  ;;  %14886 = vst [vmem:[#allocation40_spill] sm:$0xff] %v11854_v11  ;;  %v11861_v48 = vld [vmem:[#allocation2 + $0x288] sm:$0xff] }
 0x1af   :  { %14883 = vst [vmem:[#allocation37_spill] sm:$0xff] %v11842_v57  ;;  %9811 = vmatprep.mubr.msk.f32.mxu1 %vm741_vm2, %v11847_v25  ;;  %10060 = vmatprep.mubr.msk.f32.mxu0 %vm741_vm2, %v3646_v20  ;;  %14888 = vst [vmem:[#allocation42_spill] sm:$0xff] %v11861_v48  ;;  %v3648_v57 = vld [vmem:[#allocation2 + $0x109] sm:$0xff]  ;;  %v3649_v25 = vld [vmem:[#allocation2 + $0x111] sm:$0xff] }
 0x1b0   :  { %v11852_v14 = vpop.f32.mrf.mxu0 }
 0x1b1   :  { %14885 = vst [vmem:[#allocation39_spill] sm:$0xff] %v11852_v14  ;;  %v11868_v14 = vld [vmem:[#allocation2 + $0x290] sm:$0xff] }
 0x1b2   :  { %v11856_v36 = vpop.f32.mrf.mxu0  ;;  %9812 = vmatmul.mubr.msk.f32.gmra.mxu1 %vm741_vm2, %v11854_v11  ;;  %10061 = vmatmul.mubr.msk.f32.gmra.mxu0 %vm741_vm2, %v3647_v63  ;;  %14890 = vst [vmem:[#allocation44_spill] sm:$0xff] %v11868_v14  ;;  %v11875_v63 = vld [vmem:[#allocation2 + $0x2a0] sm:$0xff] }
 0x1b3   :  { %14887 = vst [vmem:[#allocation41_spill] sm:$0xff] %v11856_v36  ;;  %9814 = vmatprep.mubr.msk.f32.mxu1 %vm741_vm2, %v11861_v48  ;;  %10063 = vmatprep.mubr.msk.f32.mxu0 %vm741_vm2, %v3648_v57  ;;  %14892 = vst [vmem:[#allocation46_spill] sm:$0xff] %v11875_v63  ;;  %v3650_v36 = vld [vmem:[#allocation2 + $0x121] sm:$0xff]  ;;  %v3651_v48 = vld [vmem:[#allocation2 + $0x129] sm:$0xff] }
 0x1b4   :  { %v11866_v20 = vpop.f32.mrf.mxu0 }
 0x1b5   :  { %14889 = vst [vmem:[#allocation43_spill] sm:$0xff] %v11866_v20  ;;  %v11882_v20 = vld [vmem:[#allocation2 + $0x2a8] sm:$0xff] }
 0x1b6   :  { %v11870_v10 = vpop.f32.mrf.mxu0  ;;  %9815 = vmatmul.mubr.msk.f32.gmra.mxu1 %vm741_vm2, %v11868_v14  ;;  %10064 = vmatmul.mubr.msk.f32.gmra.mxu0 %vm741_vm2, %v3649_v25  ;;  %14894 = vst [vmem:[#allocation48_spill] sm:$0xff] %v11882_v20  ;;  %v11889_v25 = vld [vmem:[#allocation2 + $0x2b8] sm:$0xff] }
 0x1b7   :  { %14891 = vst [vmem:[#allocation45_spill] sm:$0xff] %v11870_v10  ;;  %9817 = vmatprep.mubr.msk.f32.mxu1 %vm741_vm2, %v11875_v63  ;;  %10066 = vmatprep.mubr.msk.f32.mxu0 %vm741_vm2, %v3650_v36  ;;  %14896 = vst [vmem:[#allocation50_spill] sm:$0xff] %v11889_v25  ;;  %v3652_v10 = vld [vmem:[#allocation2 + $0x139] sm:$0xff]  ;;  %v3653_v63 = vld [vmem:[#allocation2 + $0x141] sm:$0xff] }
 0x1b8   :  { %v11880_v57 = vpop.f32.mrf.mxu0 }
 0x1b9   :  { %14893 = vst [vmem:[#allocation47_spill] sm:$0xff] %v11880_v57  ;;  %v11896_v57 = vld [vmem:[#allocation2 + $0x2c0] sm:$0xff] }
 0x1ba   :  { %v11884_v11 = vpop.f32.mrf.mxu0  ;;  %9818 = vmatmul.mubr.msk.f32.gmra.mxu1 %vm741_vm2, %v11882_v20  ;;  %10067 = vmatmul.mubr.msk.f32.gmra.mxu0 %vm741_vm2, %v3651_v48  ;;  %v11903_v48 = vld [vmem:[#allocation2 + $0x2d0] sm:$0xff] }
 0x1bb   :  { %14895 = vst [vmem:[#allocation49_spill] sm:$0xff] %v11884_v11  ;;  %9820 = vmatprep.mubr.msk.f32.mxu1 %vm741_vm2, %v11889_v25  ;;  %10069 = vmatprep.mubr.msk.f32.mxu0 %vm741_vm2, %v3652_v10  ;;  %14899 = vst [vmem:[#allocation53_spill] sm:$0xff] %v11903_v48  ;;  %v3654_v11 = vld [vmem:[#allocation2 + $0x151] sm:$0xff]  ;;  %v3655_v25 = vld [vmem:[#allocation2 + $0x159] sm:$0xff] }
 0x1bc   :  { %v11894_v36 = vpop.f32.mrf.mxu0 }
 0x1bd   :  { %14897 = vst [vmem:[#allocation51_spill] sm:$0xff] %v11894_v36  ;;  %v11910_v36 = vld [vmem:[#allocation2 + $0x2d8] sm:$0xff] }
 0x1be   :  { %v11898_v14 = vpop.f32.mrf.mxu0  ;;  %9821 = vmatmul.mubr.msk.f32.gmra.mxu1 %vm741_vm2, %v11896_v57  ;;  %10070 = vmatmul.mubr.msk.f32.gmra.mxu0 %vm741_vm2, %v3653_v63  ;;  %14901 = vst [vmem:[#allocation55_spill] sm:$0xff] %v11910_v36  ;;  %v11917_v63 = vld [vmem:[#allocation2 + $0x2e8] sm:$0xff] }
 0x1bf   :  { %14898 = vst [vmem:[#allocation52_spill] sm:$0xff] %v11898_v14  ;;  %9823 = vmatprep.mubr.msk.f32.mxu1 %vm741_vm2, %v11903_v48  ;;  %10072 = vmatprep.mubr.msk.f32.mxu0 %vm741_vm2, %v3654_v11  ;;  %14903 = vst [vmem:[#allocation57_spill] sm:$0xff] %v11917_v63  ;;  %v3656_v14 = vld [vmem:[#allocation2 + $0x169] sm:$0xff] }
 0x1c0   :  { %v11908_v10 = vpop.f32.mrf.mxu0 }
 0x1c1   :  { %14900 = vst [vmem:[#allocation54_spill] sm:$0xff] %v11908_v10  ;;  %v11924_v10 = vld [vmem:[#allocation2 + $0x2f0] sm:$0xff] }
 0x1c2   :  { %v11912_v20 = vpop.f32.mrf.mxu0  ;;  %9824 = vmatmul.mubr.msk.f32.gmra.mxu1 %vm741_vm2, %v11910_v36  ;;  %10073 = vmatmul.mubr.msk.f32.gmra.mxu0 %vm741_vm2, %v3655_v25  ;;  %v11931_v25 = vld [vmem:[#allocation2 + $0x300] sm:$0xff] }
 0x1c3   :  { %14902 = vst [vmem:[#allocation56_spill] sm:$0xff] %v11912_v20  ;;  %9826 = vmatprep.mubr.msk.f32.mxu1 %vm741_vm2, %v11917_v63  ;;  %10075 = vmatprep.mubr.msk.f32.mxu0 %vm741_vm2, %v3656_v14  ;;  %v10622_v20 = vld [vmem:[#allocation2 + $0x171] sm:$0xff]  ;;  %14906 = vst [vmem:[#allocation60_spill] sm:$0xff] %v11931_v25  ;;  %v3658_v36 = vld [vmem:[#allocation2 + $0x181] sm:$0xff] }
 0x1c4   :  { %v11922_v11 = vpop.f32.mrf.mxu0  ;;  %v3659_v63 = vld [vmem:[#allocation2 + $0x189] sm:$0xff] }
 0x1c5   :  { %14904 = vst [vmem:[#allocation58_spill] sm:$0xff] %v11922_v11  ;;  %v11938_v11 = vld [vmem:[#allocation2 + $0x308] sm:$0xff] }
 0x1c6   :  { %v11926_v48 = vpop.f32.mrf.mxu0  ;;  %9827 = vmatmul.mubr.msk.f32.gmra.mxu1 %vm741_vm2, %v11924_v10  ;;  %10076 = vmatmul.mubr.msk.f32.gmra.mxu0 %vm741_vm2, %v10622_v20  ;;  %v11945_v20 = vld [vmem:[#allocation2 + $0x318] sm:$0xff] }
 0x1c7   :  { %14905 = vst [vmem:[#allocation59_spill] sm:$0xff] %v11926_v48  ;;  %9829 = vmatprep.mubr.msk.f32.mxu1 %vm741_vm2, %v11931_v25  ;;  %10078 = vmatprep.mubr.msk.f32.mxu0 %vm741_vm2, %v3658_v36 }
 0x1c8   :  { %v11936_v14 = vpop.f32.mrf.mxu0 }
 0x1c9   :  { %14907 = vst [vmem:[#allocation61_spill] sm:$0xff] %v11936_v14  ;;  %v11953_v14 = vld [vmem:[#allocation2 + $0x320] sm:$0xff] }
 0x1ca   :  { %v11940_v48 = vpop.f32.mrf.mxu0  ;;  %9830 = vmatmul.mubr.msk.f32.gmra.mxu1 %vm741_vm2, %v11938_v11  ;;  %10079 = vmatmul.mubr.msk.f32.gmra.mxu0 %vm741_vm2, %v3659_v63 }
 0x1cb   :  { %14908 = vst [vmem:[#allocation62_spill] sm:$0xff] %v11940_v48  ;;  %9832 = vmatprep.mubr.msk.f32.mxu1 %vm741_vm2, %v11945_v20  ;;  %10081 = vmatprep.mubr.msk.f32.mxu0 %vm741_vm2, %v11370_v42 }
 0x1cc   :  { %v11951_v36 = vpop.f32.mrf.mxu0 }
 0x1cd   :  { %14909 = vst [vmem:[#allocation63_spill] sm:$0xff] %v11951_v36 }
 0x1ce   :  { %v11955_v25 = vpop.f32.mrf.mxu1  ;;  %9833 = vmatmul.mubr.msk.f32.gmra.mxu1 %vm741_vm2, %v11953_v14  ;;  %v11959_v48 = vpop.f32.mrf.mxu0  ;;  %10082 = vmatmul.mubr.msk.f32.gmra.mxu0 %vm741_vm2, %v11376_v44 }
 0x1cf   :  { %14910 = vst [vmem:[#allocation64_spill] sm:$0xff] %v11955_v25  ;;  %14911 = vst [vmem:[#allocation65_spill] sm:$0xff] %v11959_v48  ;;  %9935 = vmatprep.mubr.msk.f32.mxu1 %vm741_vm2, %v11580_v23  ;;  %10084 = vmatprep.mubr.msk.f32.mxu0 %vm741_vm2, %v11384_v51  ;;  %v11974_v25 = vld [vmem:[%s14802_s3 + $0x1c] sm:$0xf] }
 0x1d0   :  { %v11967_v42 = vpop.f32.mrf.mxu1  ;;  %v11969_v63 = vpop.f32.mrf.mxu0 }
 0x1d1   :  { %14912 = vst [vmem:[#allocation66_spill] sm:$0xff] %v11967_v42 }
 0x1d2   :  { %v11976_v36 = vpop.f32.mrf.mxu1  ;;  %v11978_v48 = vpop.f32.mrf.mxu0  ;;  %9936 = vmatmul.mubr.msk.f32.vlgmr.msra.gmra.mxu1 %vm741_vm2, %v11594_v26  ;;  %10085 = vmatmul.mubr.msk.f32.gmra.mxu0 %vm741_vm2, %v11390_v54  ;;  %v11999_v54 = vld [vmem:[%s14802_s3 + $0x20] sm:$0xf] }
 0x1d3   :  { %14913 = vst [vmem:[#allocation67_spill] sm:$0xff] %v11976_v36  ;;  %10130 = vmatpush3.msk.msra.mxu1 %vm1239_vm1, %v11576_v21  ;;  %9938 = vmatprep.mubr.msk.f32.mxu1 %vm741_vm2, %v11601_v27 }
 0x1d4   :  { %10087 = vmatprep.mubr.msk.f32.mxu0 %vm741_vm2, %v11398_v61  ;;  %v11990_v44 = vpop.f32.mrf.mxu1  ;;  %v11992_v51 = vpop.f32.mrf.mxu0  ;;  %10325 = vmatprep.subr.msk.mxu1 %vm1239_vm1, %v11974_v25 }
 0x1d5   :  { %14914 = vst [vmem:[#allocation68_spill] sm:$0xff] %v11990_v44  ;;  %10423 = vmatprep.subr.msk.mxu0 %vm1239_vm1, %v11999_v54 }
 0x1d6   :  { %v12003_v21 = vpop.f32.mrf.mxu1  ;;  %v12005_v23 = vpop.f32.mrf.mxu0  ;;  %9939 = vmatmul.mubr.msk.f32.gmra.mxu1 %vm741_vm2, %v11606_v35  ;;  %10088 = vmatmul.mubr.msk.f32.gmra.mxu0 %vm741_vm2, %v11404_v0 }
 0x1d7   :  { %14915 = vst [vmem:[#allocation69_spill] sm:$0xff] %v12003_v21  ;;  %9941 = vmatprep.mubr.msk.f32.mxu1 %vm741_vm2, %v11611_v37  ;;  %10090 = vmatprep.mubr.msk.f32.mxu0 %vm741_vm2, %v11412_v9 }
 0x1d8   :  { %v12015_v61 = vpop.f32.mrf.mxu1  ;;  %v12017_v26 = vpop.f32.mrf.mxu0 }
 0x1d9   :  { %14916 = vst [vmem:[#allocation70_spill] sm:$0xff] %v12015_v61 }
 0x1da   :  { %v12019_v44 = vpop.f32.mrf.mxu1  ;;  %v12021_v21 = vpop.f32.mrf.mxu0  ;;  %9942 = vmatmul.mubr.msk.f32.gmra.mxu1 %vm741_vm2, %v11616_v7  ;;  %10091 = vmatmul.mubr.msk.f32.gmra.mxu0 %vm741_vm2, %v11418_v12 }
 0x1db   :  { %14917 = vst [vmem:[#allocation71_spill] sm:$0xff] %v12019_v44  ;;  %9944 = vmatprep.mubr.msk.f32.mxu1 %vm741_vm2, %v11621_v43  ;;  %10093 = vmatprep.mubr.msk.f32.mxu0 %vm741_vm2, %v11426_v19 }
 0x1dc   :  { %v12031_v0 = vpop.f32.mrf.mxu1  ;;  %v12033_v9 = vpop.f32.mrf.mxu0 }
 0x1dd   :  { %14918 = vst [vmem:[#allocation72_spill] sm:$0xff] %v12031_v0 }
 0x1de   :  { %v12035_v61 = vpop.f32.mrf.mxu1  ;;  %v12037_v44 = vpop.f32.mrf.mxu0  ;;  %9945 = vmatmul.mubr.msk.f32.gmra.mxu1 %vm741_vm2, %v11626_v47  ;;  %10094 = vmatmul.mubr.msk.f32.gmra.mxu0 %vm741_vm2, %v11432_v22 }
 0x1df   :  { %14919 = vst [vmem:[#allocation73_spill] sm:$0xff] %v12035_v61  ;;  %9947 = vmatprep.mubr.msk.f32.mxu1 %vm741_vm2, %v11631_v49  ;;  %10096 = vmatprep.mubr.msk.f32.mxu0 %vm741_vm2, %v11440_v30 }
 0x1e0   :  { %v12047_v12 = vpop.f32.mrf.mxu1  ;;  %v12049_v19 = vpop.f32.mrf.mxu0 }
 0x1e1   :  { %14920 = vst [vmem:[#allocation74_spill] sm:$0xff] %v12047_v12 }
 0x1e2   :  { %v12051_v0 = vpop.f32.mrf.mxu1  ;;  %v12053_v61 = vpop.f32.mrf.mxu0  ;;  %9948 = vmatmul.mubr.msk.f32.gmra.mxu1 %vm741_vm2, %v11636_v53  ;;  %10097 = vmatmul.mubr.msk.f32.gmra.mxu0 %vm741_vm2, %v11446_v33 }
 0x1e3   :  { %14921 = vst [vmem:[#allocation75_spill] sm:$0xff] %v12051_v0  ;;  %9950 = vmatprep.mubr.msk.f32.mxu1 %vm741_vm2, %v11641_v59  ;;  %10099 = vmatprep.mubr.msk.f32.mxu0 %vm741_vm2, %v11454_v40 }
 0x1e4   :  { %v12063_v22 = vpop.f32.mrf.mxu1  ;;  %v12065_v30 = vpop.f32.mrf.mxu0 }
 0x1e5   :  { %14922 = vst [vmem:[#allocation76_spill] sm:$0xff] %v12063_v22 }
 0x1e6   :  { %v12067_v12 = vpop.f32.mrf.mxu1  ;;  %v12069_v0 = vpop.f32.mrf.mxu0  ;;  %9951 = vmatmul.mubr.msk.f32.gmra.mxu1 %vm741_vm2, %v11646_v62  ;;  %10100 = vmatmul.mubr.msk.f32.gmra.mxu0 %vm741_vm2, %v11460_v34 }
 0x1e7   :  { %14923 = vst [vmem:[#allocation77_spill] sm:$0xff] %v12067_v12  ;;  %9953 = vmatprep.mubr.msk.f32.mxu1 %vm741_vm2, %v11651_v2  ;;  %10102 = vmatprep.mubr.msk.f32.mxu0 %vm741_vm2, %v11468_v52 }
 0x1e8   :  { %v12079_v33 = vpop.f32.mrf.mxu1  ;;  %v12081_v40 = vpop.f32.mrf.mxu0 }
 0x1e9   :  { %14924 = vst [vmem:[#allocation78_spill] sm:$0xff] %v12079_v33 }
 0x1ea   :  { %v12083_v22 = vpop.f32.mrf.mxu1  ;;  %v12085_v12 = vpop.f32.mrf.mxu0  ;;  %9954 = vmatmul.mubr.msk.f32.gmra.mxu1 %vm741_vm2, %v11656_v8  ;;  %10103 = vmatmul.mubr.msk.f32.gmra.mxu0 %vm741_vm2, %v11474_v56 }
 0x1eb   :  { %14925 = vst [vmem:[#allocation79_spill] sm:$0xff] %v12083_v22  ;;  %9956 = vmatprep.mubr.msk.f32.mxu1 %vm741_vm2, %v11661_v13  ;;  %10105 = vmatprep.mubr.msk.f32.mxu0 %vm741_vm2, %v11482_v1 }
 0x1ec   :  { %v12095_v34 = vpop.f32.mrf.mxu1  ;;  %v12097_v52 = vpop.f32.mrf.mxu0 }
 0x1ed   :  { %14926 = vst [vmem:[#allocation80_spill] sm:$0xff] %v12095_v34 }
 0x1ee   :  { %v12099_v33 = vpop.f32.mrf.mxu1  ;;  %v12101_v22 = vpop.f32.mrf.mxu0  ;;  %9957 = vmatmul.mubr.msk.f32.gmra.mxu1 %vm741_vm2, %v11666_v17  ;;  %10106 = vmatmul.mubr.msk.f32.gmra.mxu0 %vm741_vm2, %v11488_v4 }
 0x1ef   :  { %14927 = vst [vmem:[#allocation81_spill] sm:$0xff] %v12099_v33  ;;  %14928 = vst [vmem:[#allocation82_spill] sm:$0xff] %v12101_v22  ;;  %9959 = vmatprep.mubr.msk.f32.mxu1 %vm741_vm2, %v11671_v24  ;;  %10108 = vmatprep.mubr.msk.f32.mxu0 %vm741_vm2, %v11496_v15  ;;  %v5105_v22 = vld [vmem:[#allocation2 + $0x300] sm:$0xff] }
 0x1f0   :  { %v12111_v56 = vpop.f32.mrf.mxu1  ;;  %v12113_v1 = vpop.f32.mrf.mxu0 }
 0x1f1   :  { %14929 = vst [vmem:[#allocation83_spill] sm:$0xff] %v12111_v56  ;;  %14930 = vst [vmem:[#allocation84_spill] sm:$0xff] %v12113_v1  ;;  %v5103_v1 = vld [vmem:[#allocation2 + $0x2e8] sm:$0xff] }
 0x1f2   :  { %v12115_v34 = vpop.f32.mrf.mxu1  ;;  %v12117_v33 = vpop.f32.mrf.mxu0  ;;  %9960 = vmatmul.mubr.msk.f32.gmra.mxu1 %vm741_vm2, %v11676_v31  ;;  %10109 = vmatmul.mubr.msk.f32.gmra.mxu0 %vm741_vm2, %v11502_v18 }
 0x1f3   :  { %14931 = vst [vmem:[#allocation85_spill] sm:$0xff] %v12115_v34  ;;  %14932 = vst [vmem:[#allocation86_spill] sm:$0xff] %v12117_v33  ;;  %9962 = vmatprep.mubr.msk.f32.mxu1 %vm741_vm2, %v11681_v38  ;;  %10111 = vmatprep.mubr.msk.f32.mxu0 %vm741_vm2, %v11510_v28  ;;  %v5101_v33 = vld [vmem:[#allocation2 + $0x2d0] sm:$0xff] }
 0x1f4   :  { %v12127_v4 = vpop.f32.mrf.mxu1  ;;  %v12129_v15 = vpop.f32.mrf.mxu0 }
 0x1f5   :  { %14933 = vst [vmem:[#allocation87_spill] sm:$0xff] %v12127_v4  ;;  %14934 = vst [vmem:[#allocation88_spill] sm:$0xff] %v12129_v15  ;;  %v14975_v4 = vld [vmem:[#allocation16_spill] sm:$0xff]  ;;  %v5099_v15 = vld [vmem:[#allocation2 + $0x2b8] sm:$0xff] }
 0x1f6   :  { %v12131_v56 = vpop.f32.mrf.mxu1  ;;  %v12133_v34 = vpop.f32.mrf.mxu0  ;;  %9963 = vmatmul.mubr.msk.f32.gmra.mxu1 %vm741_vm2, %v11686_v45  ;;  %10112 = vmatmul.mubr.msk.f32.gmra.mxu0 %vm741_vm2, %v11516_v32 }
 0x1f7   :  { %14935 = vst [vmem:[#allocation89_spill] sm:$0xff] %v12131_v56  ;;  %14936 = vst [vmem:[#allocation90_spill] sm:$0xff] %v12133_v34  ;;  %9965 = vmatprep.mubr.msk.f32.mxu1 %vm741_vm2, %v11691_v50  ;;  %10114 = vmatprep.mubr.msk.f32.mxu0 %vm741_vm2, %v11524_v41  ;;  %v14971_v56 = vld [vmem:[#allocation12_spill] sm:$0xff]  ;;  %v5097_v34 = vld [vmem:[#allocation2 + $0x2a0] sm:$0xff] }
 0x1f8   :  { %v12143_v18 = vpop.f32.mrf.mxu1  ;;  %v12145_v28 = vpop.f32.mrf.mxu0 }
 0x1f9   :  { %14937 = vst [vmem:[#allocation91_spill] sm:$0xff] %v12143_v18  ;;  %14938 = vst [vmem:[#allocation92_spill] sm:$0xff] %v12145_v28  ;;  %v14962_v18 = vld [vmem:[#allocation8_spill] sm:$0xff] }
 0x1fa   :  { %v12147_v31 = vpop.f32.mrf.mxu1  ;;  %v12149_v38 = vpop.f32.mrf.mxu0  ;;  %9966 = vmatmul.mubr.msk.f32.gmra.mxu1 %vm741_vm2, %v11696_v60  ;;  %10115 = vmatmul.mubr.msk.f32.gmra.mxu0 %vm741_vm2, %v11530_v46  ;;  %v5095_v28 = vld [vmem:[#allocation2 + $0x288] sm:$0xff] }
 0x1fb   :  { %14939 = vst [vmem:[#allocation93_spill] sm:$0xff] %v12147_v31  ;;  %14940 = vst [vmem:[#allocation94_spill] sm:$0xff] %v12149_v38  ;;  %9968 = vmatprep.mubr.msk.f32.mxu1 %vm741_vm2, %v11701_v5  ;;  %10117 = vmatprep.mubr.msk.f32.mxu0 %vm741_vm2, %v11538_v55  ;;  %v5093_v38 = vld [vmem:[#allocation2 + $0x270] sm:$0xff] }
 0x1fc   :  { %v12159_v32 = vpop.f32.mrf.mxu1  ;;  %v12161_v41 = vpop.f32.mrf.mxu0 }
 0x1fd   :  { %14941 = vst [vmem:[#allocation95_spill] sm:$0xff] %v12159_v32  ;;  %14942 = vst [vmem:[#allocation96_spill] sm:$0xff] %v12161_v41  ;;  %v14957_v32 = vld [vmem:[#allocation7_spill] sm:$0xff]  ;;  %v5091_v41 = vld [vmem:[#allocation2 + $0x258] sm:$0xff] }
 0x1fe   :  { %v12163_v45 = vpop.f32.mrf.mxu1  ;;  %v12165_v50 = vpop.f32.mrf.mxu0  ;;  %9969 = vmatmul.mubr.msk.f32.gmra.mxu1 %vm741_vm2, %v11706_v16  ;;  %10118 = vmatmul.mubr.msk.f32.gmra.mxu0 %vm741_vm2, %v11543_v58  ;;  %v14949_v58 = vld [vmem:[#allocation5_spill] sm:$0xff]  ;;  %v14950_v16 = vld [vmem:[#allocation3_spill] sm:$0xff] }
 0x1ff   :  { %14943 = vst [vmem:[#allocation97_spill] sm:$0xff] %v12163_v45  ;;  %14944 = vst [vmem:[#allocation98_spill] sm:$0xff] %v12165_v50  ;;  %9971 = vmatprep.mubr.msk.f32.mxu1 %vm741_vm2, %v11711_v29  ;;  %10120 = vmatprep.mubr.msk.f32.mxu0 %vm741_vm2, %v11551_v3  ;;  %v14955_v45 = vld [vmem:[#allocation6_spill] sm:$0xff]  ;;  %v5089_v50 = vld [vmem:[#allocation2 + $0x240] sm:$0xff] }
 0x200   :  { %v12175_v46 = vpop.f32.mrf.mxu1  ;;  %v12177_v55 = vpop.f32.mrf.mxu0 }
 0x201   :  { %14945 = vst [vmem:[#allocation99_spill] sm:$0xff] %v12175_v46  ;;  %14946 = vst [vmem:[#allocation100_spill] sm:$0xff] %v12177_v55 }
 0x202   :  { %v12179_v60 = vpop.f32.mrf.mxu1  ;;  %v12181_v5 = vpop.f32.mrf.mxu0  ;;  %9972 = vmatmul.mubr.msk.f32.gmra.mxu1 %vm741_vm2, %v11716_v39  ;;  %10121 = vmatmul.mubr.msk.f32.gmra.mxu0 %vm741_vm2, %v11555_v6  ;;  %v14956_v39 = vld [vmem:[#allocation4_spill] sm:$0xff]  ;;  %v3690_v6 = vld [vmem:[#allocation2 + $0x331] sm:$0xff] }
 0x203   :  { %14947 = vst [vmem:[#allocation101_spill] sm:$0xff] %v12179_v60  ;;  %14948 = vst [vmem:[#allocation102_spill] sm:$0xff] %v12181_v5  ;;  %9974 = vmatprep.mubr.msk.f32.mxu1 %vm741_vm2, %v14949_v58  ;;  %10123 = vmatprep.mubr.msk.f32.mxu0 %vm741_vm2, %v14950_v16 }
 0x204   :  { %v12191_v3 = vpop.f32.mrf.mxu1  ;;  %v12193_v29 = vpop.f32.mrf.mxu0 }
 0x205   :  { %14951 = vst [vmem:[#allocation5_spill] sm:$0xff] %v12191_v3  ;;  %14952 = vst [vmem:[#allocation3_spill] sm:$0xff] %v12193_v29  ;;  %v3691_v3 = vld [vmem:[#allocation2 + $0x339] sm:$0xff] }
 0x206   :  { %v12195_v46 = vpop.f32.mrf.mxu1  ;;  %v12197_v60 = vpop.f32.mrf.mxu0  ;;  %9975 = vmatmul.mubr.msk.f32.gmra.mxu1 %vm741_vm2, %v14955_v45  ;;  %10124 = vmatmul.mubr.msk.f32.gmra.mxu0 %vm741_vm2, %v14956_v39  ;;  %v12217_v45 = vld [vmem:[#allocation2 + $0x180] sm:$0xff] }
 0x207   :  { %14953 = vst [vmem:[#allocation103_spill] sm:$0xff] %v12195_v46  ;;  %14954 = vst [vmem:[#allocation104_spill] sm:$0xff] %v12197_v60  ;;  %9977 = vmatprep.mubr.msk.f32.mxu1 %vm741_vm2, %v14957_v32  ;;  %10126 = vmatprep.mubr.msk.f32.mxu0 %vm741_vm2, %v3690_v6  ;;  %v12227_v6 = vld [vmem:[#allocation2 + $0x188] sm:$0xff] }
 0x208   :  { %v12206_v58 = vpop.f32.mrf.mxu1  ;;  %v12208_v16 = vpop.f32.mrf.mxu0 }
 0x209   :  { %14958 = vst [vmem:[#allocation6_spill] sm:$0xff] %v12206_v58  ;;  %14959 = vst [vmem:[#allocation4_spill] sm:$0xff] %v12208_v16 }
 0x20a   :  { %v12210_v46 = vpop.f32.mrf.mxu1  ;;  %v12212_v31 = vpop.f32.mrf.mxu0  ;;  %9978 = vmatmul.mubr.msk.f32.gmra.mxu1 %vm741_vm2, %v14962_v18  ;;  %10127 = vmatmul.mubr.msk.f32.gmra.mxu0 %vm741_vm2, %v3691_v3  ;;  %v14967_v18 = vld [vmem:[#allocation10_spill] sm:$0xff] }
 0x20b   :  { %14960 = vst [vmem:[#allocation7_spill] sm:$0xff] %v12210_v46  ;;  %14961 = vst [vmem:[#allocation105_spill] sm:$0xff] %v12212_v31  ;;  %9980 = vmatprep.mubr.msk.f32.mxu1 %vm741_vm2, %v12217_v45  ;;  %10229 = vmatprep.mubr.msk.f32.mxu0 %vm741_vm2, %v11601_v27 }
 0x20c   :  { %v12223_v32 = vpop.f32.mrf.mxu1  ;;  %v12225_v39 = vpop.f32.mrf.mxu0 }
 0x20d   :  { %14963 = vst [vmem:[#allocation8_spill] sm:$0xff] %v12223_v32  ;;  %14964 = vst [vmem:[#allocation106_spill] sm:$0xff] %v12225_v39 }
 0x20e   :  { %v12229_v46 = vpop.f32.mrf.mxu1  ;;  %v12231_v58 = vpop.f32.mrf.mxu0  ;;  %9981 = vmatmul.mubr.msk.f32.gmra.mxu1 %vm741_vm2, %v12227_v6  ;;  %10230 = vmatmul.mubr.msk.f32.vlgmr.msra.gmra.mxu0 %vm741_vm2, %v11606_v35  ;;  %v14972_v35 = vld [vmem:[#allocation14_spill] sm:$0xff] }
 0x20f   :  { %14965 = vst [vmem:[#allocation107_spill] sm:$0xff] %v12229_v46  ;;  %14966 = vst [vmem:[#allocation108_spill] sm:$0xff] %v12231_v58  ;;  %9983 = vmatprep.mubr.msk.f32.mxu1 %vm741_vm2, %v14967_v18  ;;  %10232 = vmatprep.mubr.msk.f32.mxu0 %vm741_vm2, %v11611_v37 }
 0x210   :  { %v12241_v27 = vpop.f32.mrf.mxu1  ;;  %v12243_v3 = vpop.f32.mrf.mxu0  ;;  %10424 = vmatpush3.msk.msra.mxu0 %vm1239_vm1, %v11999_v54 }
 0x211   :  { %14968 = vst [vmem:[#allocation10_spill] sm:$0xff] %v12241_v27  ;;  %14969 = vst [vmem:[#allocation109_spill] sm:$0xff] %v12243_v3 }
 0x212   :  { %v12247_v46 = vpop.f32.mrf.mxu1  ;;  %v12249_v32 = vpop.f32.mrf.mxu0  ;;  %9984 = vmatmul.mubr.msk.f32.gmra.mxu1 %vm741_vm2, %v14971_v56  ;;  %10233 = vmatmul.mubr.msk.f32.gmra.mxu0 %vm741_vm2, %v11616_v7  ;;  %v14976_v7 = vld [vmem:[#allocation18_spill] sm:$0xff] }
 0x213   :  { %14970 = vst [vmem:[#allocation110_spill] sm:$0xff] %v12249_v32  ;;  %9986 = vmatprep.mubr.msk.f32.mxu1 %vm741_vm2, %v14972_v35  ;;  %10235 = vmatprep.mubr.msk.f32.mxu0 %vm741_vm2, %v11621_v43  ;;  %v14995_v32 = vld [vmem:[#allocation36_spill] sm:$0xff] }
 0x214   :  { %v12259_v37 = vpop.f32.mrf.mxu1  ;;  %v12261_v18 = vpop.f32.mrf.mxu0 }
 0x215   :  { %14973 = vst [vmem:[#allocation12_spill] sm:$0xff] %v12261_v18 }
 0x216   :  { %v12263_v54 = vpop.f32.mrf.mxu1  ;;  %v12265_v27 = vpop.f32.mrf.mxu0  ;;  %9987 = vmatmul.mubr.msk.f32.gmra.mxu1 %vm741_vm2, %v14975_v4  ;;  %10236 = vmatmul.mubr.msk.f32.gmra.mxu0 %vm741_vm2, %v11626_v47  ;;  %v14980_v47 = vld [vmem:[#allocation22_spill] sm:$0xff] }
 0x217   :  { %14974 = vst [vmem:[#allocation14_spill] sm:$0xff] %v12265_v27  ;;  %9989 = vmatprep.mubr.msk.f32.mxu1 %vm741_vm2, %v14976_v7  ;;  %10238 = vmatprep.mubr.msk.f32.mxu0 %vm741_vm2, %v11631_v49  ;;  %v14979_v27 = vld [vmem:[#allocation20_spill] sm:$0xff] }
 0x218   :  { %v12275_v43 = vpop.f32.mrf.mxu1  ;;  %v12277_v56 = vpop.f32.mrf.mxu0 }
 0x219   :  { %14977 = vst [vmem:[#allocation16_spill] sm:$0xff] %v12277_v56 }
 0x21a   :  { %v12279_v35 = vpop.f32.mrf.mxu1  ;;  %v12281_v18 = vpop.f32.mrf.mxu0  ;;  %9990 = vmatmul.mubr.msk.f32.gmra.mxu1 %vm741_vm2, %v14979_v27  ;;  %10239 = vmatmul.mubr.msk.f32.gmra.mxu0 %vm741_vm2, %v11636_v53  ;;  %v14984_v53 = vld [vmem:[#allocation26_spill] sm:$0xff] }
 0x21b   :  { %14978 = vst [vmem:[#allocation18_spill] sm:$0xff] %v12281_v18  ;;  %9992 = vmatprep.mubr.msk.f32.mxu1 %vm741_vm2, %v14980_v47  ;;  %10241 = vmatprep.mubr.msk.f32.mxu0 %vm741_vm2, %v11641_v59  ;;  %v14983_v18 = vld [vmem:[#allocation24_spill] sm:$0xff] }
 0x21c   :  { %v12291_v49 = vpop.f32.mrf.mxu1  ;;  %v12293_v4 = vpop.f32.mrf.mxu0 }
 0x21d   :  { %14981 = vst [vmem:[#allocation20_spill] sm:$0xff] %v12293_v4 }
 0x21e   :  { %v12295_v7 = vpop.f32.mrf.mxu1  ;;  %v12297_v56 = vpop.f32.mrf.mxu0  ;;  %9993 = vmatmul.mubr.msk.f32.gmra.mxu1 %vm741_vm2, %v14983_v18  ;;  %10242 = vmatmul.mubr.msk.f32.gmra.mxu0 %vm741_vm2, %v11646_v62  ;;  %v14988_v62 = vld [vmem:[#allocation30_spill] sm:$0xff] }
 0x21f   :  { %14982 = vst [vmem:[#allocation22_spill] sm:$0xff] %v12297_v56  ;;  %9995 = vmatprep.mubr.msk.f32.mxu1 %vm741_vm2, %v14984_v53  ;;  %10244 = vmatprep.mubr.msk.f32.mxu0 %vm741_vm2, %v11651_v2  ;;  %v14987_v56 = vld [vmem:[#allocation28_spill] sm:$0xff] }
 0x220   :  { %v12307_v59 = vpop.f32.mrf.mxu1  ;;  %v12309_v27 = vpop.f32.mrf.mxu0 }
 0x221   :  { %14985 = vst [vmem:[#allocation24_spill] sm:$0xff] %v12309_v27 }
 0x222   :  { %v12311_v47 = vpop.f32.mrf.mxu1  ;;  %v12313_v4 = vpop.f32.mrf.mxu0  ;;  %9996 = vmatmul.mubr.msk.f32.gmra.mxu1 %vm741_vm2, %v14987_v56  ;;  %10245 = vmatmul.mubr.msk.f32.gmra.mxu0 %vm741_vm2, %v11656_v8  ;;  %v14992_v8 = vld [vmem:[#allocation34_spill] sm:$0xff] }
 0x223   :  { %14986 = vst [vmem:[#allocation26_spill] sm:$0xff] %v12313_v4  ;;  %9998 = vmatprep.mubr.msk.f32.mxu1 %vm741_vm2, %v14988_v62  ;;  %10247 = vmatprep.mubr.msk.f32.mxu0 %vm741_vm2, %v11661_v13  ;;  %v14991_v4 = vld [vmem:[#allocation32_spill] sm:$0xff]  ;;  %v5064_v62 = vld [vmem:[#allocation2 + $0xe0] sm:$0xff] }
 0x224   :  { %v12323_v2 = vpop.f32.mrf.mxu1  ;;  %v12325_v18 = vpop.f32.mrf.mxu0 }
 0x225   :  { %14989 = vst [vmem:[#allocation28_spill] sm:$0xff] %v12325_v18 }
 0x226   :  { %v12327_v53 = vpop.f32.mrf.mxu1  ;;  %v12329_v27 = vpop.f32.mrf.mxu0  ;;  %9999 = vmatmul.mubr.msk.f32.gmra.mxu1 %vm741_vm2, %v14991_v4  ;;  %10248 = vmatmul.mubr.msk.f32.gmra.mxu0 %vm741_vm2, %v11666_v17  ;;  %v5065_v17 = vld [vmem:[#allocation2 + $0xf0] sm:$0xff]  ;;  %v14996_v4 = vld [vmem:[#allocation38_spill] sm:$0xff] }
 0x227   :  { %14990 = vst [vmem:[#allocation30_spill] sm:$0xff] %v12329_v27  ;;  %10001 = vmatprep.mubr.msk.f32.mxu1 %vm741_vm2, %v14992_v8  ;;  %10250 = vmatprep.mubr.msk.f32.mxu0 %vm741_vm2, %v11671_v24 }
 0x228   :  { %v12339_v13 = vpop.f32.mrf.mxu1  ;;  %v12341_v56 = vpop.f32.mrf.mxu0 }
 0x229   :  { %14993 = vst [vmem:[#allocation32_spill] sm:$0xff] %v12341_v56  ;;  %v5066_v56 = vld [vmem:[#allocation2 + $0xf8] sm:$0xff] }
 0x22a   :  { %v12343_v18 = vpop.f32.mrf.mxu1  ;;  %v12345_v27 = vpop.f32.mrf.mxu0  ;;  %10002 = vmatmul.mubr.msk.f32.gmra.mxu1 %vm741_vm2, %v14995_v32  ;;  %10251 = vmatmul.mubr.msk.f32.gmra.mxu0 %vm741_vm2, %v5064_v62  ;;  %v5067_v32 = vld [vmem:[#allocation2 + $0x108] sm:$0xff]  ;;  %v15000_v62 = vld [vmem:[#allocation42_spill] sm:$0xff] }
 0x22b   :  { %14994 = vst [vmem:[#allocation34_spill] sm:$0xff] %v12345_v27  ;;  %10004 = vmatprep.mubr.msk.f32.mxu1 %vm741_vm2, %v14996_v4  ;;  %10253 = vmatprep.mubr.msk.f32.mxu0 %vm741_vm2, %v5065_v17  ;;  %v14999_v27 = vld [vmem:[#allocation40_spill] sm:$0xff] }
 0x22c   :  { %v12353_v24 = vpop.f32.mrf.mxu1  ;;  %v12355_v8 = vpop.f32.mrf.mxu0 }
 0x22d   :  { %14997 = vst [vmem:[#allocation36_spill] sm:$0xff] %v12355_v8  ;;  %v5068_v8 = vld [vmem:[#allocation2 + $0x110] sm:$0xff] }
 0x22e   :  { %v12357_v3 = vpop.f32.mrf.mxu1  ;;  %v12359_v58 = vpop.f32.mrf.mxu0  ;;  %10005 = vmatmul.mubr.msk.f32.gmra.mxu1 %vm741_vm2, %v14999_v27  ;;  %10254 = vmatmul.mubr.msk.f32.gmra.mxu0 %vm741_vm2, %v5066_v56  ;;  %v5069_v27 = vld [vmem:[#allocation2 + $0x120] sm:$0xff]  ;;  %v15004_v56 = vld [vmem:[#allocation46_spill] sm:$0xff] }
 0x22f   :  { %14998 = vst [vmem:[#allocation38_spill] sm:$0xff] %v12359_v58  ;;  %10007 = vmatprep.mubr.msk.f32.mxu1 %vm741_vm2, %v15000_v62  ;;  %10256 = vmatprep.mubr.msk.f32.mxu0 %vm741_vm2, %v5067_v32  ;;  %v15003_v58 = vld [vmem:[#allocation44_spill] sm:$0xff] }
 0x230   :  { %v12367_v17 = vpop.f32.mrf.mxu1  ;;  %v12369_v4 = vpop.f32.mrf.mxu0 }
 0x231   :  { %15001 = vst [vmem:[#allocation40_spill] sm:$0xff] %v12369_v4  ;;  %v5070_v4 = vld [vmem:[#allocation2 + $0x128] sm:$0xff] }
 0x232   :  { %v12371_v39 = vpop.f32.mrf.mxu1  ;;  %v12373_v31 = vpop.f32.mrf.mxu0  ;;  %10008 = vmatmul.mubr.msk.f32.gmra.mxu1 %vm741_vm2, %v15003_v58  ;;  %10257 = vmatmul.mubr.msk.f32.gmra.mxu0 %vm741_vm2, %v5068_v8  ;;  %v5071_v58 = vld [vmem:[#allocation2 + $0x138] sm:$0xff] }
 0x233   :  { %15002 = vst [vmem:[#allocation42_spill] sm:$0xff] %v12373_v31  ;;  %10010 = vmatprep.mubr.msk.f32.mxu1 %vm741_vm2, %v15004_v56  ;;  %10259 = vmatprep.mubr.msk.f32.mxu0 %vm741_vm2, %v5069_v27  ;;  %v15007_v31 = vld [vmem:[#allocation48_spill] sm:$0xff]  ;;  %v15008_v8 = vld [vmem:[#allocation50_spill] sm:$0xff] }
 0x234   :  { %v12381_v32 = vpop.f32.mrf.mxu1  ;;  %v12383_v62 = vpop.f32.mrf.mxu0 }
 0x235   :  { %15005 = vst [vmem:[#allocation44_spill] sm:$0xff] %v12383_v62  ;;  %v5072_v62 = vld [vmem:[#allocation2 + $0x140] sm:$0xff] }
 0x236   :  { %v12385_v36 = vpop.f32.mrf.mxu1  ;;  %v12387_v16 = vpop.f32.mrf.mxu0  ;;  %10011 = vmatmul.mubr.msk.f32.gmra.mxu1 %vm741_vm2, %v15007_v31  ;;  %10260 = vmatmul.mubr.msk.f32.gmra.mxu0 %vm741_vm2, %v5070_v4  ;;  %v5073_v31 = vld [vmem:[#allocation2 + $0x150] sm:$0xff] }
 0x237   :  { %15006 = vst [vmem:[#allocation46_spill] sm:$0xff] %v12387_v16  ;;  %10013 = vmatprep.mubr.msk.f32.mxu1 %vm741_vm2, %v15008_v8  ;;  %10262 = vmatprep.mubr.msk.f32.mxu0 %vm741_vm2, %v5071_v58  ;;  %v15013_v4 = vld [vmem:[#allocation53_spill] sm:$0xff] }
 0x238   :  { %v12395_v27 = vpop.f32.mrf.mxu1  ;;  %v12397_v56 = vpop.f32.mrf.mxu0 }
 0x239   :  { %15009 = vst [vmem:[#allocation48_spill] sm:$0xff] %v12395_v27  ;;  %15010 = vst [vmem:[#allocation50_spill] sm:$0xff] %v12397_v56  ;;  %v5074_v56 = vld [vmem:[#allocation2 + $0x158] sm:$0xff] }
 0x23a   :  { %v12399_v42 = vpop.f32.mrf.mxu1  ;;  %v12401_v60 = vpop.f32.mrf.mxu0  ;;  %10014 = vmatmul.mubr.msk.f32.gmra.mxu1 %vm741_vm2, %v11896_v57  ;;  %10263 = vmatmul.mubr.msk.f32.gmra.mxu0 %vm741_vm2, %v5072_v62  ;;  %v5075_v57 = vld [vmem:[#allocation2 + $0x168] sm:$0xff]  ;;  %v15019_v62 = vld [vmem:[#allocation57_spill] sm:$0xff] }
 0x23b   :  { %15011 = vst [vmem:[#allocation111_spill] sm:$0xff] %v12399_v42  ;;  %15012 = vst [vmem:[#allocation112_spill] sm:$0xff] %v12401_v60  ;;  %10016 = vmatprep.mubr.msk.f32.mxu1 %vm741_vm2, %v15013_v4  ;;  %10265 = vmatprep.mubr.msk.f32.mxu0 %vm741_vm2, %v5073_v31  ;;  %v15018_v60 = vld [vmem:[#allocation55_spill] sm:$0xff] }
 0x23c   :  { %v12409_v58 = vpop.f32.mrf.mxu1  ;;  %v12411_v8 = vpop.f32.mrf.mxu0 }
 0x23d   :  { %15014 = vst [vmem:[#allocation53_spill] sm:$0xff] %v12409_v58  ;;  %15015 = vst [vmem:[#allocation113_spill] sm:$0xff] %v12411_v8  ;;  %v5076_v8 = vld [vmem:[#allocation2 + $0x170] sm:$0xff] }
 0x23e   :  { %v12413_v16 = vpop.f32.mrf.mxu1  ;;  %v12415_v29 = vpop.f32.mrf.mxu0  ;;  %10017 = vmatmul.mubr.msk.f32.gmra.mxu1 %vm741_vm2, %v15018_v60  ;;  %10266 = vmatmul.mubr.msk.f32.gmra.mxu0 %vm741_vm2, %v5074_v56  ;;  %v15024_v60 = vld [vmem:[#allocation60_spill] sm:$0xff] }
 0x23f   :  { %15016 = vst [vmem:[#allocation114_spill] sm:$0xff] %v12413_v16  ;;  %15017 = vst [vmem:[#allocation115_spill] sm:$0xff] %v12415_v29  ;;  %10019 = vmatprep.mubr.msk.f32.mxu1 %vm741_vm2, %v15019_v62  ;;  %10268 = vmatprep.mubr.msk.f32.mxu0 %vm741_vm2, %v5075_v57  ;;  %v5079_v62 = vld [vmem:[#allocation2 + $0x198] sm:$0xff] }
 0x240   :  { %v12423_v31 = vpop.f32.mrf.mxu1  ;;  %v12425_v4 = vpop.f32.mrf.mxu0 }
 0x241   :  { %15020 = vst [vmem:[#allocation55_spill] sm:$0xff] %v12423_v31  ;;  %15021 = vst [vmem:[#allocation57_spill] sm:$0xff] %v12425_v4 }
 0x242   :  { %v12427_v5 = vpop.f32.mrf.mxu1  ;;  %v12429_v55 = vpop.f32.mrf.mxu0  ;;  %10020 = vmatmul.mubr.msk.f32.gmra.mxu1 %vm741_vm2, %v11924_v10  ;;  %10269 = vmatmul.mubr.msk.f32.gmra.mxu0 %vm741_vm2, %v5076_v8  ;;  %v5080_v10 = vld [vmem:[#allocation2 + $0x1a0] sm:$0xff] }
 0x243   :  { %15022 = vst [vmem:[#allocation116_spill] sm:$0xff] %v12427_v5  ;;  %15023 = vst [vmem:[#allocation117_spill] sm:$0xff] %v12429_v55  ;;  %10022 = vmatprep.mubr.msk.f32.mxu1 %vm741_vm2, %v15024_v60  ;;  %10271 = vmatprep.mubr.msk.f32.mxu0 %vm741_vm2, %v12217_v45  ;;  %v5083_v55 = vld [vmem:[#allocation2 + $0x1f8] sm:$0xff] }
 0x244   :  { %v12438_v56 = vpop.f32.mrf.mxu1  ;;  %v12440_v57 = vpop.f32.mrf.mxu0 }
 0x245   :  { %15025 = vst [vmem:[#allocation60_spill] sm:$0xff] %v12438_v56  ;;  %15026 = vst [vmem:[#allocation118_spill] sm:$0xff] %v12440_v57 }
 0x246   :  { %v12442_v4 = vpop.f32.mrf.mxu1  ;;  %v12444_v29 = vpop.f32.mrf.mxu0  ;;  %10023 = vmatmul.mubr.msk.f32.gmra.mxu1 %vm741_vm2, %v11938_v11  ;;  %10272 = vmatmul.mubr.msk.f32.gmra.mxu0 %vm741_vm2, %v12227_v6  ;;  %v12464_v11 = vld [vmem:[#allocation2 + $0x330] sm:$0xff]  ;;  %v5081_v6 = vld [vmem:[#allocation2 + $0x1e0] sm:$0xff] }
 0x247   :  { %15027 = vst [vmem:[#allocation119_spill] sm:$0xff] %v12442_v4  ;;  %15028 = vst [vmem:[#allocation120_spill] sm:$0xff] %v12444_v29  ;;  %10025 = vmatprep.mubr.msk.f32.mxu1 %vm741_vm2, %v11945_v20  ;;  %10274 = vmatprep.mubr.msk.f32.mxu0 %vm741_vm2, %v5079_v62 }
 0x248   :  { %v12453_v45 = vpop.f32.mrf.mxu1  ;;  %v12455_v8 = vpop.f32.mrf.mxu0 }
 0x249   :  { %15029 = vst [vmem:[#allocation121_spill] sm:$0xff] %v12453_v45  ;;  %15030 = vst [vmem:[#allocation122_spill] sm:$0xff] %v12455_v8  ;;  %v12473_v8 = vld [vmem:[#allocation2 + $0x338] sm:$0xff] }
 0x24a   :  { %v12457_v60 = vpop.f32.mrf.mxu1  ;;  %v12459_v57 = vpop.f32.mrf.mxu0  ;;  %10026 = vmatmul.mubr.msk.f32.gmra.mxu1 %vm741_vm2, %v11953_v14  ;;  %10275 = vmatmul.mubr.msk.f32.gmra.mxu0 %vm741_vm2, %v5080_v10  ;;  %v4338_v10 = vld [vmem:[#allocation2 + $0x1a] sm:$0xff] }
 0x24b   :  { %15031 = vst [vmem:[#allocation123_spill] sm:$0xff] %v12457_v60  ;;  %15032 = vst [vmem:[#allocation124_spill] sm:$0xff] %v12459_v57  ;;  %10028 = vmatprep.mubr.msk.f32.mxu1 %vm741_vm2, %v12464_v11  ;;  %10277 = vmatprep.mubr.msk.f32.mxu0 %vm741_vm2, %v5081_v6  ;;  %v5082_v57 = vld [vmem:[#allocation2 + $0x1e8] sm:$0xff]  ;;  %v5084_v60 = vld [vmem:[#allocation2 + $0x200] sm:$0xff] }
 0x24c   :  { %v12469_v20 = vpop.f32.mrf.mxu1  ;;  %v12471_v62 = vpop.f32.mrf.mxu0 }
 0x24d   :  { %15033 = vst [vmem:[#allocation125_spill] sm:$0xff] %v12469_v20  ;;  %15034 = vst [vmem:[#allocation126_spill] sm:$0xff] %v12471_v62  ;;  %v4339_v20 = vld [vmem:[#allocation2 + $0x22] sm:$0xff] }
 0x24e   :  { %v12475_v29 = vpop.f32.mrf.mxu1  ;;  %10029 = vmatmul.mubr.msk.f32.gmra.mxu1 %vm741_vm2, %v12473_v8  ;;  %v12479_v14 = vpop.f32.mrf.mxu0  ;;  %10278 = vmatmul.mubr.msk.f32.gmra.mxu0 %vm741_vm2, %v5082_v57  ;;  %v12494_v57 = vld [vmem:[#allocation2 + $0x32] sm:$0xff] }
 0x24f   :  { %15035 = vst [vmem:[#allocation127_spill] sm:$0xff] %v12475_v29  ;;  %15036 = vst [vmem:[#allocation128_spill] sm:$0xff] %v12479_v14  ;;  %10131 = vmatprep.mubr.msk.f32.mxu1 %vm741_vm2, %v4338_v10  ;;  %10280 = vmatprep.mubr.msk.f32.mxu0 %vm741_vm2, %v5083_v55  ;;  %v5085_v55 = vld [vmem:[#allocation2 + $0x210] sm:$0xff] }
 0x250   :  { %v12484_v6 = vpop.f32.mrf.mxu1  ;;  %v12486_v62 = vpop.f32.mrf.mxu0 }
 0x251   :  { %15037 = vst [vmem:[#allocation129_spill] sm:$0xff] %v12484_v6  ;;  %15038 = vst [vmem:[#allocation130_spill] sm:$0xff] %v12486_v62 }
 0x252   :  { %v12488_v29 = vpop.f32.mrf.mxu1  ;;  %v12490_v45 = vpop.f32.mrf.mxu0  ;;  %10132 = vmatmul.mubr.msk.f32.vlgmr.msra.gmra.mxu1 %vm741_vm2, %v4339_v20  ;;  %10281 = vmatmul.mubr.msk.f32.gmra.mxu0 %vm741_vm2, %v5084_v60  ;;  %v5086_v20 = vld [vmem:[#allocation2 + $0x218] sm:$0xff] }
 0x253   :  { %15039 = vst [vmem:[#allocation131_spill] sm:$0xff] %v12488_v29  ;;  %15040 = vst [vmem:[#allocation132_spill] sm:$0xff] %v12490_v45  ;;  %10326 = vmatpush3.msk.msra.mxu1 %vm1239_vm1, %v11974_v25  ;;  %10134 = vmatprep.mubr.msk.f32.mxu1 %vm741_vm2, %v12494_v57  ;;  %v12505_v45 = vld [vmem:[#allocation2 + $0x3a] sm:$0xff]  ;;  %v12514_v25 = vld [vmem:[#allocation2 + $0x4a] sm:$0xff] }
 0x254   :  { %10283 = vmatprep.mubr.msk.f32.mxu0 %vm741_vm2, %v5085_v55  ;;  %v12501_v10 = vpop.f32.mrf.mxu1  ;;  %v12503_v62 = vpop.f32.mrf.mxu0  ;;  %v5087_v29 = vld [vmem:[#allocation2 + $0x228] sm:$0xff] }
 0x255   :  { %15041 = vst [vmem:[#allocation133_spill] sm:$0xff] %v12501_v10  ;;  %15042 = vst [vmem:[#allocation134_spill] sm:$0xff] %v12503_v62 }
 0x256   :  { %v12507_v14 = vpop.f32.mrf.mxu1  ;;  %v12509_v60 = vpop.f32.mrf.mxu0  ;;  %10135 = vmatmul.mubr.msk.f32.gmra.mxu1 %vm741_vm2, %v12505_v45  ;;  %10284 = vmatmul.mubr.msk.f32.gmra.mxu0 %vm741_vm2, %v5086_v20  ;;  %v12532_v20 = vld [vmem:[#allocation2 + $0x62] sm:$0xff] }
 0x257   :  { %15043 = vst [vmem:[#allocation135_spill] sm:$0xff] %v12507_v14  ;;  %15044 = vst [vmem:[#allocation136_spill] sm:$0xff] %v12509_v60  ;;  %10137 = vmatprep.mubr.msk.f32.mxu1 %vm741_vm2, %v12514_v25  ;;  %10286 = vmatprep.mubr.msk.f32.mxu0 %vm741_vm2, %v5087_v29  ;;  %v12523_v14 = vld [vmem:[#allocation2 + $0x52] sm:$0xff] }
 0x258   :  { %v12519_v55 = vpop.f32.mrf.mxu1  ;;  %v12521_v62 = vpop.f32.mrf.mxu0  ;;  %v5088_v60 = vld [vmem:[#allocation2 + $0x230] sm:$0xff] }
 0x259   :  { %15045 = vst [vmem:[#allocation137_spill] sm:$0xff] %v12519_v55  ;;  %15046 = vst [vmem:[#allocation138_spill] sm:$0xff] %v12521_v62 }
 0x25a   :  { %v12525_v10 = vpop.f32.mrf.mxu1  ;;  %v12527_v6 = vpop.f32.mrf.mxu0  ;;  %10138 = vmatmul.mubr.msk.f32.gmra.mxu1 %vm741_vm2, %v12523_v14  ;;  %10287 = vmatmul.mubr.msk.f32.gmra.mxu0 %vm741_vm2, %v5088_v60  ;;  %v12550_v60 = vld [vmem:[#allocation2 + $0x7a] sm:$0xff] }
 0x25b   :  { %15047 = vst [vmem:[#allocation139_spill] sm:$0xff] %v12525_v10  ;;  %15048 = vst [vmem:[#allocation140_spill] sm:$0xff] %v12527_v6  ;;  %10140 = vmatprep.mubr.msk.f32.mxu1 %vm741_vm2, %v12532_v20  ;;  %10289 = vmatprep.mubr.msk.f32.mxu0 %vm741_vm2, %v5089_v50  ;;  %v12541_v10 = vld [vmem:[#allocation2 + $0x6a] sm:$0xff] }
 0x25c   :  { %v12537_v29 = vpop.f32.mrf.mxu1  ;;  %v12539_v62 = vpop.f32.mrf.mxu0  ;;  %v5090_v6 = vld [vmem:[#allocation2 + $0x248] sm:$0xff] }
 0x25d   :  { %15049 = vst [vmem:[#allocation141_spill] sm:$0xff] %v12537_v29  ;;  %15050 = vst [vmem:[#allocation142_spill] sm:$0xff] %v12539_v62 }
 0x25e   :  { %v12543_v55 = vpop.f32.mrf.mxu1  ;;  %v12545_v4 = vpop.f32.mrf.mxu0  ;;  %10141 = vmatmul.mubr.msk.f32.gmra.mxu1 %vm741_vm2, %v12541_v10  ;;  %10290 = vmatmul.mubr.msk.f32.gmra.mxu0 %vm741_vm2, %v5090_v6  ;;  %v12568_v6 = vld [vmem:[#allocation2 + $0x92] sm:$0xff] }
 0x25f   :  { %15051 = vst [vmem:[#allocation143_spill] sm:$0xff] %v12543_v55  ;;  %15052 = vst [vmem:[#allocation144_spill] sm:$0xff] %v12545_v4  ;;  %10143 = vmatprep.mubr.msk.f32.mxu1 %vm741_vm2, %v12550_v60  ;;  %10292 = vmatprep.mubr.msk.f32.mxu0 %vm741_vm2, %v5091_v41  ;;  %v12559_v55 = vld [vmem:[#allocation2 + $0x82] sm:$0xff] }
 0x260   :  { %v12555_v50 = vpop.f32.mrf.mxu1  ;;  %v12557_v62 = vpop.f32.mrf.mxu0  ;;  %v5092_v4 = vld [vmem:[#allocation2 + $0x260] sm:$0xff] }
 0x261   :  { %15053 = vst [vmem:[#allocation145_spill] sm:$0xff] %v12555_v50  ;;  %15054 = vst [vmem:[#allocation146_spill] sm:$0xff] %v12557_v62 }
 0x262   :  { %v12561_v29 = vpop.f32.mrf.mxu1  ;;  %v12563_v56 = vpop.f32.mrf.mxu0  ;;  %10144 = vmatmul.mubr.msk.f32.gmra.mxu1 %vm741_vm2, %v12559_v55  ;;  %10293 = vmatmul.mubr.msk.f32.gmra.mxu0 %vm741_vm2, %v5092_v4  ;;  %v12586_v4 = vld [vmem:[#allocation2 + $0xaa] sm:$0xff] }
 0x263   :  { %15055 = vst [vmem:[#allocation147_spill] sm:$0xff] %v12561_v29  ;;  %15056 = vst [vmem:[#allocation148_spill] sm:$0xff] %v12563_v56  ;;  %10146 = vmatprep.mubr.msk.f32.mxu1 %vm741_vm2, %v12568_v6  ;;  %10295 = vmatprep.mubr.msk.f32.mxu0 %vm741_vm2, %v5093_v38  ;;  %v12577_v29 = vld [vmem:[#allocation2 + $0x9a] sm:$0xff] }
 0x264   :  { %v12573_v41 = vpop.f32.mrf.mxu1  ;;  %v12575_v62 = vpop.f32.mrf.mxu0  ;;  %v5094_v56 = vld [vmem:[#allocation2 + $0x278] sm:$0xff] }
 0x265   :  { %15057 = vst [vmem:[#allocation149_spill] sm:$0xff] %v12573_v41  ;;  %15058 = vst [vmem:[#allocation150_spill] sm:$0xff] %v12575_v62 }
 0x266   :  { %v12579_v50 = vpop.f32.mrf.mxu1  ;;  %v12581_v5 = vpop.f32.mrf.mxu0  ;;  %10147 = vmatmul.mubr.msk.f32.gmra.mxu1 %vm741_vm2, %v12577_v29  ;;  %10296 = vmatmul.mubr.msk.f32.gmra.mxu0 %vm741_vm2, %v5094_v56  ;;  %v12604_v56 = vld [vmem:[#allocation2 + $0xc2] sm:$0xff] }
 0x267   :  { %15059 = vst [vmem:[#allocation151_spill] sm:$0xff] %v12579_v50  ;;  %15060 = vst [vmem:[#allocation152_spill] sm:$0xff] %v12581_v5  ;;  %10149 = vmatprep.mubr.msk.f32.mxu1 %vm741_vm2, %v12586_v4  ;;  %10298 = vmatprep.mubr.msk.f32.mxu0 %vm741_vm2, %v5095_v28  ;;  %v12595_v50 = vld [vmem:[#allocation2 + $0xb2] sm:$0xff] }
 0x268   :  { %v12591_v38 = vpop.f32.mrf.mxu1  ;;  %v12593_v62 = vpop.f32.mrf.mxu0  ;;  %v5096_v5 = vld [vmem:[#allocation2 + $0x290] sm:$0xff] }
 0x269   :  { %15061 = vst [vmem:[#allocation153_spill] sm:$0xff] %v12591_v38  ;;  %15062 = vst [vmem:[#allocation154_spill] sm:$0xff] %v12593_v62 }
 0x26a   :  { %v12597_v41 = vpop.f32.mrf.mxu1  ;;  %v12599_v31 = vpop.f32.mrf.mxu0  ;;  %10150 = vmatmul.mubr.msk.f32.gmra.mxu1 %vm741_vm2, %v12595_v50  ;;  %10299 = vmatmul.mubr.msk.f32.gmra.mxu0 %vm741_vm2, %v5096_v5  ;;  %v12622_v5 = vld [vmem:[#allocation2 + $0xda] sm:$0xff] }
 0x26b   :  { %15063 = vst [vmem:[#allocation155_spill] sm:$0xff] %v12597_v41  ;;  %15064 = vst [vmem:[#allocation156_spill] sm:$0xff] %v12599_v31  ;;  %10152 = vmatprep.mubr.msk.f32.mxu1 %vm741_vm2, %v12604_v56  ;;  %10301 = vmatprep.mubr.msk.f32.mxu0 %vm741_vm2, %v5097_v34  ;;  %v12613_v41 = vld [vmem:[#allocation2 + $0xca] sm:$0xff] }
 0x26c   :  { %v12609_v28 = vpop.f32.mrf.mxu1  ;;  %v12611_v62 = vpop.f32.mrf.mxu0  ;;  %v5098_v31 = vld [vmem:[#allocation2 + $0x2a8] sm:$0xff] }
 0x26d   :  { %15065 = vst [vmem:[#allocation157_spill] sm:$0xff] %v12609_v28  ;;  %15066 = vst [vmem:[#allocation158_spill] sm:$0xff] %v12611_v62 }
 0x26e   :  { %v12615_v38 = vpop.f32.mrf.mxu1  ;;  %v12617_v16 = vpop.f32.mrf.mxu0  ;;  %10153 = vmatmul.mubr.msk.f32.gmra.mxu1 %vm741_vm2, %v12613_v41  ;;  %10302 = vmatmul.mubr.msk.f32.gmra.mxu0 %vm741_vm2, %v5098_v31  ;;  %v12640_v31 = vld [vmem:[#allocation2 + $0xf2] sm:$0xff] }
 0x26f   :  { %15067 = vst [vmem:[#allocation159_spill] sm:$0xff] %v12615_v38  ;;  %15068 = vst [vmem:[#allocation160_spill] sm:$0xff] %v12617_v16  ;;  %10155 = vmatprep.mubr.msk.f32.mxu1 %vm741_vm2, %v12622_v5  ;;  %10304 = vmatprep.mubr.msk.f32.mxu0 %vm741_vm2, %v5099_v15  ;;  %v12631_v38 = vld [vmem:[#allocation2 + $0xe2] sm:$0xff] }
 0x270   :  { %v12627_v34 = vpop.f32.mrf.mxu1  ;;  %v12629_v62 = vpop.f32.mrf.mxu0  ;;  %v5100_v16 = vld [vmem:[#allocation2 + $0x2c0] sm:$0xff] }
 0x271   :  { %15069 = vst [vmem:[#allocation161_spill] sm:$0xff] %v12627_v34  ;;  %15070 = vst [vmem:[#allocation162_spill] sm:$0xff] %v12629_v62 }
 0x272   :  { %v12633_v28 = vpop.f32.mrf.mxu1  ;;  %v12635_v58 = vpop.f32.mrf.mxu0  ;;  %10156 = vmatmul.mubr.msk.f32.gmra.mxu1 %vm741_vm2, %v12631_v38  ;;  %10305 = vmatmul.mubr.msk.f32.gmra.mxu0 %vm741_vm2, %v5100_v16  ;;  %v12658_v16 = vld [vmem:[#allocation2 + $0x10a] sm:$0xff] }
 0x273   :  { %15071 = vst [vmem:[#allocation163_spill] sm:$0xff] %v12633_v28  ;;  %15072 = vst [vmem:[#allocation164_spill] sm:$0xff] %v12635_v58  ;;  %10158 = vmatprep.mubr.msk.f32.mxu1 %vm741_vm2, %v12640_v31  ;;  %10307 = vmatprep.mubr.msk.f32.mxu0 %vm741_vm2, %v5101_v33  ;;  %v12649_v28 = vld [vmem:[#allocation2 + $0xfa] sm:$0xff] }
 0x274   :  { %v12645_v15 = vpop.f32.mrf.mxu1  ;;  %v12647_v62 = vpop.f32.mrf.mxu0  ;;  %v5102_v58 = vld [vmem:[#allocation2 + $0x2d8] sm:$0xff] }
 0x275   :  { %15073 = vst [vmem:[#allocation165_spill] sm:$0xff] %v12645_v15  ;;  %15074 = vst [vmem:[#allocation166_spill] sm:$0xff] %v12647_v62 }
 0x276   :  { %v12651_v34 = vpop.f32.mrf.mxu1  ;;  %v12653_v42 = vpop.f32.mrf.mxu0  ;;  %10159 = vmatmul.mubr.msk.f32.gmra.mxu1 %vm741_vm2, %v12649_v28  ;;  %10308 = vmatmul.mubr.msk.f32.gmra.mxu0 %vm741_vm2, %v5102_v58  ;;  %v12676_v58 = vld [vmem:[#allocation2 + $0x122] sm:$0xff] }
 0x277   :  { %15075 = vst [vmem:[#allocation167_spill] sm:$0xff] %v12651_v34  ;;  %15076 = vst [vmem:[#allocation168_spill] sm:$0xff] %v12653_v42  ;;  %10161 = vmatprep.mubr.msk.f32.mxu1 %vm741_vm2, %v12658_v16  ;;  %10310 = vmatprep.mubr.msk.f32.mxu0 %vm741_vm2, %v5103_v1  ;;  %v12667_v34 = vld [vmem:[#allocation2 + $0x112] sm:$0xff] }
 0x278   :  { %v12663_v33 = vpop.f32.mrf.mxu1  ;;  %v12665_v62 = vpop.f32.mrf.mxu0  ;;  %15079 = vst [vmem:[#allocation171_spill] sm:$0xff] %v12667_v34  ;;  %v5104_v42 = vld [vmem:[#allocation2 + $0x2f0] sm:$0xff]  ;;  %15082 = vst [vmem:[#allocation174_spill] sm:$0xff] %v12676_v58 }
 0x279   :  { %15077 = vst [vmem:[#allocation169_spill] sm:$0xff] %v12663_v33  ;;  %15078 = vst [vmem:[#allocation170_spill] sm:$0xff] %v12665_v62 }
 0x27a   :  { %v12669_v15 = vpop.f32.mrf.mxu1  ;;  %v12671_v27 = vpop.f32.mrf.mxu0  ;;  %10162 = vmatmul.mubr.msk.f32.gmra.mxu1 %vm741_vm2, %v12667_v34  ;;  %10311 = vmatmul.mubr.msk.f32.gmra.mxu0 %vm741_vm2, %v5104_v42  ;;  %v12694_v42 = vld [vmem:[#allocation2 + $0x13a] sm:$0xff] }
 0x27b   :  { %15080 = vst [vmem:[#allocation172_spill] sm:$0xff] %v12669_v15  ;;  %15081 = vst [vmem:[#allocation173_spill] sm:$0xff] %v12671_v27  ;;  %10164 = vmatprep.mubr.msk.f32.mxu1 %vm741_vm2, %v12676_v58  ;;  %10313 = vmatprep.mubr.msk.f32.mxu0 %vm741_vm2, %v5105_v22  ;;  %v12685_v15 = vld [vmem:[#allocation2 + $0x12a] sm:$0xff]  ;;  %v5107_v58 = vld [vmem:[#allocation2 + $0x318] sm:$0xff] }
 0x27c   :  { %v12681_v1 = vpop.f32.mrf.mxu1  ;;  %v12683_v62 = vpop.f32.mrf.mxu0  ;;  %15085 = vst [vmem:[#allocation177_spill] sm:$0xff] %v12685_v15  ;;  %v5106_v27 = vld [vmem:[#allocation2 + $0x308] sm:$0xff] }
 0x27d   :  { %15083 = vst [vmem:[#allocation175_spill] sm:$0xff] %v12681_v1  ;;  %15084 = vst [vmem:[#allocation176_spill] sm:$0xff] %v12683_v62 }
 0x27e   :  { %v12687_v33 = vpop.f32.mrf.mxu1  ;;  %v12689_v34 = vpop.f32.mrf.mxu0  ;;  %10165 = vmatmul.mubr.msk.f32.gmra.mxu1 %vm741_vm2, %v12685_v15  ;;  %10314 = vmatmul.mubr.msk.f32.gmra.mxu0 %vm741_vm2, %v5106_v27  ;;  %v12712_v27 = vld [vmem:[#allocation2 + $0x152] sm:$0xff] }
 0x27f   :  { %15086 = vst [vmem:[#allocation178_spill] sm:$0xff] %v12687_v33  ;;  %15087 = vst [vmem:[#allocation179_spill] sm:$0xff] %v12689_v34  ;;  %10167 = vmatprep.mubr.msk.f32.mxu1 %vm741_vm2, %v12694_v42  ;;  %10316 = vmatprep.mubr.msk.f32.mxu0 %vm741_vm2, %v5107_v58  ;;  %v12703_v33 = vld [vmem:[#allocation2 + $0x142] sm:$0xff] }
 0x280   :  { %v12699_v22 = vpop.f32.mrf.mxu1  ;;  %v12701_v62 = vpop.f32.mrf.mxu0  ;;  %15090 = vst [vmem:[#allocation182_spill] sm:$0xff] %v12703_v33  ;;  %v5108_v34 = vld [vmem:[#allocation2 + $0x320] sm:$0xff]  ;;  %15093 = vst [vmem:[#allocation185_spill] sm:$0xff] %v12712_v27 }
 0x281   :  { %15088 = vst [vmem:[#allocation180_spill] sm:$0xff] %v12699_v22  ;;  %15089 = vst [vmem:[#allocation181_spill] sm:$0xff] %v12701_v62  ;;  %v12722_v22 = vld [vmem:[#allocation2 + $0x15a] sm:$0xff] }
 0x282   :  { %v12705_v1 = vpop.f32.mrf.mxu1  ;;  %v12707_v15 = vpop.f32.mrf.mxu0  ;;  %10168 = vmatmul.mubr.msk.f32.gmra.mxu1 %vm741_vm2, %v12703_v33  ;;  %10317 = vmatmul.mubr.msk.f32.gmra.mxu0 %vm741_vm2, %v5108_v34  ;;  %15096 = vst [vmem:[#allocation188_spill] sm:$0xff] %v12722_v22  ;;  %v12732_v34 = vld [vmem:[#allocation2 + $0x16a] sm:$0xff] }
 0x283   :  { %15091 = vst [vmem:[#allocation183_spill] sm:$0xff] %v12705_v1  ;;  %15092 = vst [vmem:[#allocation184_spill] sm:$0xff] %v12707_v15  ;;  %10170 = vmatprep.mubr.msk.f32.mxu1 %vm741_vm2, %v12712_v27  ;;  %10319 = vmatprep.mubr.msk.f32.mxu0 %vm741_vm2, %v12464_v11  ;;  %v5111_v1 = vld [vmem:[#allocation2 + $0x348] sm:$0xff]  ;;  %v5112_v11 = vld [vmem:[#allocation2 + $0x350] sm:$0xff] }
 0x284   :  { %v12718_v58 = vpop.f32.mrf.mxu1  ;;  %v12720_v62 = vpop.f32.mrf.mxu0  ;;  %15099 = vst [vmem:[#allocation191_spill] sm:$0xff] %v12732_v34 }
 0x285   :  { %15094 = vst [vmem:[#allocation186_spill] sm:$0xff] %v12718_v58  ;;  %15095 = vst [vmem:[#allocation187_spill] sm:$0xff] %v12720_v62 }
 0x286   :  { %v12724_v15 = vpop.f32.mrf.mxu1  ;;  %v12726_v33 = vpop.f32.mrf.mxu0  ;;  %10171 = vmatmul.mubr.msk.f32.gmra.mxu1 %vm741_vm2, %v12722_v22  ;;  %10320 = vmatmul.mubr.msk.f32.gmra.mxu0 %vm741_vm2, %v12473_v8  ;;  %v12750_v8 = vld [vmem:[#allocation2 + $0x182] sm:$0xff] }
 0x287   :  { %15097 = vst [vmem:[#allocation189_spill] sm:$0xff] %v12724_v15  ;;  %15098 = vst [vmem:[#allocation190_spill] sm:$0xff] %v12726_v33  ;;  %10173 = vmatprep.mubr.msk.f32.mxu1 %vm741_vm2, %v12732_v34  ;;  %10322 = vmatprep.mubr.msk.f32.mxu0 %vm741_vm2, %v5111_v1  ;;  %v12741_v15 = vld [vmem:[#allocation2 + $0x172] sm:$0xff] }
 0x288   :  { %v12737_v62 = vpop.f32.mrf.mxu1  ;;  %v12739_v58 = vpop.f32.mrf.mxu0  ;;  %15102 = vst [vmem:[#allocation194_spill] sm:$0xff] %v12741_v15  ;;  %15105 = vst [vmem:[#allocation197_spill] sm:$0xff] %v12750_v8  ;;  %v4371_v34 = vld [vmem:[#allocation2 + $0x1d2] sm:$0xff] }
 0x289   :  { %15100 = vst [vmem:[#allocation192_spill] sm:$0xff] %v12737_v62  ;;  %15101 = vst [vmem:[#allocation193_spill] sm:$0xff] %v12739_v58  ;;  %v12762_v62 = vld [vmem:[#allocation2 + $0x18a] sm:$0xff] }
 0x28a   :  { %v12743_v33 = vpop.f32.mrf.mxu1  ;;  %v12745_v22 = vpop.f32.mrf.mxu0  ;;  %10174 = vmatmul.mubr.msk.f32.gmra.mxu1 %vm741_vm2, %v12741_v15  ;;  %10323 = vmatmul.mubr.msk.f32.gmra.mxu0 %vm741_vm2, %v5112_v11 }
 0x28b   :  { %15103 = vst [vmem:[#allocation195_spill] sm:$0xff] %v12743_v33  ;;  %15104 = vst [vmem:[#allocation196_spill] sm:$0xff] %v12745_v22  ;;  %10176 = vmatprep.mubr.msk.f32.mxu1 %vm741_vm2, %v12750_v8  ;;  %10425 = vmatprep.mubr.msk.f32.mxu0 %vm741_vm2, %v12494_v57  ;;  %v15108_v33 = vld [vmem:[#allocation9_spill] sm:$0xff]  ;;  %v15112_v8 = vld [vmem:[#allocation11_spill] sm:$0xff] }
 0x28c   :  { %v12756_v1 = vpop.f32.mrf.mxu1  ;;  %v12758_v58 = vpop.f32.mrf.mxu0  ;;  %v1895_v22 = vadd.f32 %v12247_v46, %v15108_v33  ;;  %15109 = vst [vmem:[#allocation9_spill] sm:$0xff] %v12762_v62  ;;  %v4370_v57 = vld [vmem:[#allocation2 + $0x1ca] sm:$0xff] }
 0x28d   :  { %15106 = vst [vmem:[#allocation198_spill] sm:$0xff] %v12756_v1  ;;  %15107 = vst [vmem:[#allocation199_spill] sm:$0xff] %v12758_v58  ;;  %v1890_v1 = vadd.f32 %v12259_v37, %v15112_v8  ;;  %v15114_v58 = vld [vmem:[#allocation13_spill] sm:$0xff]  ;;  %v12789_v37 = vld [vmem:[#allocation2 + $0x1e2] sm:$0xff] }
 0x28e   :  { %v12764_v15 = vpop.f32.mrf.mxu1  ;;  %v12766_v11 = vpop.f32.mrf.mxu0  ;;  %10177 = vmatmul.mubr.msk.f32.gmra.mxu1 %vm741_vm2, %v12762_v62  ;;  %10426 = vmatmul.mubr.msk.f32.vlgmr.msra.gmra.mxu0 %vm741_vm2, %v12505_v45 }
 0x28f   :  { %15110 = vst [vmem:[#allocation200_spill] sm:$0xff] %v12764_v15  ;;  %15111 = vst [vmem:[#allocation201_spill] sm:$0xff] %v12766_v11  ;;  %10179 = vmatprep.mubr.msk.f32.mxu1 %vm741_vm2, %v4370_v57  ;;  %10428 = vmatprep.mubr.msk.f32.mxu0 %vm741_vm2, %v12514_v25  ;;  %v1905_v11 = vadd.f32 %v12263_v54, %v15114_v58  ;;  %v15115_v15 = vld [vmem:[#allocation65_spill] sm:$0xff]  ;;  %v15117_v25 = vld [vmem:[#allocation15_spill] sm:$0xff]  ;;  %v2854_v54 = vadd.f32 %v11969_v63, %v1890_v1 }
 0x290   :  { %v12777_v46 = vpop.f32.mrf.mxu1  ;;  %v12779_v33 = vpop.f32.mrf.mxu0  ;;  %v2855_v62 = vadd.f32 %v15115_v15, %v1895_v22  ;;  %v1900_v8 = vadd.f32 %v12275_v43, %v15117_v25  ;;  %v15119_v58 = vld [vmem:[#allocation17_spill] sm:$0xff]  ;;  %v12815_v63 = vld [vmem:[#allocation2 + $0x1fa] sm:$0xff] }
 0x291   :  { %15113 = vst [vmem:[#allocation11_spill] sm:$0xff] %v12779_v33  ;;  %v2857_v43 = vadd.f32 %v11978_v48, %v1905_v11  ;;  %v15169_v33 = vld [vmem:[#allocation52_spill] sm:$0xff] }
 0x292   :  { %v9937_v45 = vpop.f32.mrf.mxu1  ;;  %v12784_v27 = vpop.f32.mrf.mxu0  ;;  %10180 = vmatmul.mubr.msk.f32.gmra.mxu1 %vm741_vm2, %v4371_v34  ;;  %10429 = vmatmul.mubr.msk.f32.gmra.mxu0 %vm741_vm2, %v12523_v14  ;;  %v1915_v14 = vadd.f32 %v12279_v35, %v15119_v58  ;;  %v2856_v48 = vadd.f32 %v11992_v51, %v1900_v8  ;;  %v12841_v51 = vld [vmem:[#allocation2 + $0x212] sm:$0xff] }
 0x293   :  { %15116 = vst [vmem:[#allocation13_spill] sm:$0xff] %v12784_v27  ;;  %v12793_v57 = vadd.f32 %v9937_v45, %v2855_v62  ;;  %10182 = vmatprep.mubr.msk.f32.mxu1 %vm741_vm2, %v12789_v37  ;;  %10431 = vmatprep.mubr.msk.f32.mxu0 %vm741_vm2, %v12532_v20  ;;  %v12807_v62 = vld [vmem:[#allocation2 + $0x1ea] sm:$0xff]  ;;  %v15121_v20 = vld [vmem:[#allocation19_spill] sm:$0xff] }
 0x294   :  { %v3245_v15 = vpop.f32.mrf.mxu1  ;;  %v12800_v22 = vpop.f32.mrf.mxu0  ;;  %v1910_v35 = vadd.f32 %v12291_v49, %v15121_v20  ;;  %v2859_v49 = vadd.f32 %v12005_v23, %v1915_v14 }
 0x295   :  { %15118 = vst [vmem:[#allocation65_spill] sm:$0xff] %v12800_v22  ;;  %v12804_v34 = vadd.f32 %v3245_v15, %v2854_v54  ;;  %v15123_v15 = vld [vmem:[#allocation21_spill] sm:$0xff]  ;;  %v15161_v22 = vld [vmem:[#allocation86_spill] sm:$0xff] }
 0x296   :  { %v9940_v45 = vpop.f32.mrf.mxu1  ;;  %v12809_v25 = vpop.f32.mrf.mxu0  ;;  %10183 = vmatmul.mubr.msk.f32.gmra.mxu1 %vm741_vm2, %v12807_v62  ;;  %10432 = vmatmul.mubr.msk.f32.gmra.mxu0 %vm741_vm2, %v12541_v10  ;;  %v1925_v10 = vadd.f32 %v12295_v7, %v15123_v15  ;;  %v2858_v23 = vadd.f32 %v12017_v26, %v1910_v35  ;;  %v12867_v26 = vld [vmem:[#allocation2 + $0x22a] sm:$0xff] }
 0x297   :  { %15120 = vst [vmem:[#allocation15_spill] sm:$0xff] %v12809_v25  ;;  %v12819_v1 = vadd.f32 %v9940_v45, %v2857_v43  ;;  %10185 = vmatprep.mubr.msk.f32.mxu1 %vm741_vm2, %v12815_v63  ;;  %10434 = vmatprep.mubr.msk.f32.mxu0 %vm741_vm2, %v12550_v60  ;;  %v12833_v43 = vld [vmem:[#allocation2 + $0x202] sm:$0xff] }
 0x298   :  { %v3255_v11 = vpop.f32.mrf.mxu1  ;;  %v12826_v54 = vpop.f32.mrf.mxu0  ;;  %v15125_v60 = vld [vmem:[#allocation23_spill] sm:$0xff] }
 0x299   :  { %15122 = vst [vmem:[#allocation17_spill] sm:$0xff] %v12826_v54  ;;  %v12830_v58 = vadd.f32 %v3255_v11, %v2856_v48  ;;  %v1920_v7 = vadd.f32 %v12307_v59, %v15125_v60  ;;  %v15127_v11 = vld [vmem:[#allocation25_spill] sm:$0xff]  ;;  %v2861_v59 = vadd.f32 %v12021_v21, %v1925_v10  ;;  %v15206_v25 = vld [vmem:[#allocation123_spill] sm:$0xff] }
 0x29a   :  { %v9943_v45 = vpop.f32.mrf.mxu1  ;;  %v12835_v20 = vpop.f32.mrf.mxu0  ;;  %10186 = vmatmul.mubr.msk.f32.gmra.mxu1 %vm741_vm2, %v12833_v43  ;;  %10435 = vmatmul.mubr.msk.f32.gmra.mxu0 %vm741_vm2, %v12559_v55  ;;  %v1935_v55 = vadd.f32 %v12311_v47, %v15127_v11  ;;  %v12872_v47 = vld [vmem:[%s14804_s5] sm:$0xf] }
 0x29b   :  { %15124 = vst [vmem:[#allocation19_spill] sm:$0xff] %v12835_v20  ;;  %v12845_v8 = vadd.f32 %v9943_v45, %v2859_v49  ;;  %10188 = vmatprep.mubr.msk.f32.mxu1 %vm741_vm2, %v12841_v51  ;;  %10437 = vmatprep.mubr.msk.f32.mxu0 %vm741_vm2, %v12568_v6  ;;  %v12859_v49 = vld [vmem:[#allocation2 + $0x21a] sm:$0xff] }
 0x29c   :  { %v3265_v14 = vpop.f32.mrf.mxu1  ;;  %v12852_v48 = vpop.f32.mrf.mxu0  ;;  %v15129_v6 = vld [vmem:[#allocation27_spill] sm:$0xff]  ;;  %10521 = vmatprep.subr.msk.mxu1 %vm1239_vm1, %v12872_v47  ;;  %v15196_v20 = vld [vmem:[#allocation98_spill] sm:$0xff] }
 0x29d   :  { %15126 = vst [vmem:[#allocation21_spill] sm:$0xff] %v12852_v48  ;;  %v12856_v15 = vadd.f32 %v3265_v14, %v2858_v23  ;;  %v1930_v21 = vadd.f32 %v12323_v2, %v15129_v6  ;;  %v15131_v14 = vld [vmem:[#allocation29_spill] sm:$0xff] }
 0x29e   :  { %v9946_v45 = vpop.f32.mrf.mxu1  ;;  %v12861_v60 = vpop.f32.mrf.mxu0  ;;  %10189 = vmatmul.mubr.msk.f32.gmra.mxu1 %vm741_vm2, %v12859_v49  ;;  %10438 = vmatmul.mubr.msk.f32.gmra.mxu0 %vm741_vm2, %v12577_v29  ;;  %v2860_v29 = vadd.f32 %v12033_v9, %v1920_v7  ;;  %v1945_v11 = vadd.f32 %v12327_v53, %v15131_v14  ;;  %v12900_v9 = vld [vmem:[#allocation2 + $0x242] sm:$0xff] }
 0x29f   :  { %15128 = vst [vmem:[#allocation23_spill] sm:$0xff] %v12861_v60  ;;  %v12876_v35 = vadd.f32 %v9946_v45, %v2861_v59  ;;  %10191 = vmatprep.mubr.msk.f32.mxu1 %vm741_vm2, %v12867_v26  ;;  %10440 = vmatprep.mubr.msk.f32.mxu0 %vm741_vm2, %v12586_v4  ;;  %v2863_v59 = vadd.f32 %v12037_v44, %v1935_v55  ;;  %v12892_v45 = vld [vmem:[#allocation2 + $0x232] sm:$0xff]  ;;  %v15133_v4 = vld [vmem:[#allocation31_spill] sm:$0xff] }
 0x2a0   :  { %v3275_v10 = vpop.f32.mrf.mxu1  ;;  %v12883_v23 = vpop.f32.mrf.mxu0  ;;  %v1940_v53 = vadd.f32 %v12339_v13, %v15133_v4  ;;  %v2862_v44 = vadd.f32 %v12049_v19, %v1930_v21  ;;  %v2865_v13 = vadd.f32 %v12053_v61, %v1945_v11  ;;  %v12926_v19 = vld [vmem:[#allocation2 + $0x25a] sm:$0xff] }
 0x2a1   :  { %15130 = vst [vmem:[#allocation25_spill] sm:$0xff] %v12883_v23  ;;  %v12889_v2 = vadd.f32 %v3275_v10, %v2860_v29  ;;  %v15135_v10 = vld [vmem:[#allocation33_spill] sm:$0xff] }
 0x2a2   :  { %v9949_v6 = vpop.f32.mrf.mxu1  ;;  %v12894_v48 = vpop.f32.mrf.mxu0  ;;  %10192 = vmatmul.mubr.msk.f32.gmra.mxu1 %vm741_vm2, %v12892_v45  ;;  %10441 = vmatmul.mubr.msk.f32.gmra.mxu0 %vm741_vm2, %v12595_v50  ;;  %v1955_v50 = vadd.f32 %v12343_v18, %v15135_v10  ;;  %v2864_v61 = vadd.f32 %v12065_v30, %v1940_v53  ;;  %v12952_v30 = vld [vmem:[#allocation2 + $0x272] sm:$0xff] }
 0x2a3   :  { %15132 = vst [vmem:[#allocation27_spill] sm:$0xff] %v12894_v48  ;;  %v12904_v7 = vadd.f32 %v9949_v6, %v2863_v59  ;;  %10194 = vmatprep.mubr.msk.f32.mxu1 %vm741_vm2, %v12900_v9  ;;  %10443 = vmatprep.mubr.msk.f32.mxu0 %vm741_vm2, %v12604_v56  ;;  %v12918_v59 = vld [vmem:[#allocation2 + $0x24a] sm:$0xff]  ;;  %v15137_v56 = vld [vmem:[#allocation35_spill] sm:$0xff] }
 0x2a4   :  { %v3285_v55 = vpop.f32.mrf.mxu1  ;;  %v12911_v29 = vpop.f32.mrf.mxu0  ;;  %v1950_v18 = vadd.f32 %v12353_v24, %v15137_v56  ;;  %v2867_v24 = vadd.f32 %v12069_v0, %v1955_v50 }
 0x2a5   :  { %15134 = vst [vmem:[#allocation29_spill] sm:$0xff] %v12911_v29  ;;  %v12915_v14 = vadd.f32 %v3285_v55, %v2862_v44  ;;  %v15139_v55 = vld [vmem:[#allocation37_spill] sm:$0xff] }
 0x2a6   :  { %v9952_v6 = vpop.f32.mrf.mxu1  ;;  %v12920_v4 = vpop.f32.mrf.mxu0  ;;  %10195 = vmatmul.mubr.msk.f32.gmra.mxu1 %vm741_vm2, %v12918_v59  ;;  %10444 = vmatmul.mubr.msk.f32.gmra.mxu0 %vm741_vm2, %v12613_v41  ;;  %v1965_v41 = vadd.f32 %v12357_v3, %v15139_v55  ;;  %v2866_v0 = vadd.f32 %v12081_v40, %v1950_v18  ;;  %v12978_v40 = vld [vmem:[#allocation2 + $0x28a] sm:$0xff] }
 0x2a7   :  { %15136 = vst [vmem:[#allocation31_spill] sm:$0xff] %v12920_v4  ;;  %v12930_v21 = vadd.f32 %v9952_v6, %v2865_v13  ;;  %10197 = vmatprep.mubr.msk.f32.mxu1 %vm741_vm2, %v12926_v19  ;;  %10446 = vmatprep.mubr.msk.f32.mxu0 %vm741_vm2, %v12622_v5  ;;  %v12944_v13 = vld [vmem:[#allocation2 + $0x262] sm:$0xff]  ;;  %v15158_v29 = vld [vmem:[#allocation49_spill] sm:$0xff]  ;;  %v15184_v4 = vld [vmem:[#allocation94_spill] sm:$0xff] }
 0x2a8   :  { %v3295_v11 = vpop.f32.mrf.mxu1  ;;  %v12937_v44 = vpop.f32.mrf.mxu0  ;;  %v15141_v5 = vld [vmem:[#allocation39_spill] sm:$0xff] }
 0x2a9   :  { %15138 = vst [vmem:[#allocation33_spill] sm:$0xff] %v12937_v44  ;;  %v12941_v10 = vadd.f32 %v3295_v11, %v2864_v61  ;;  %v1960_v3 = vadd.f32 %v12367_v17, %v15141_v5  ;;  %v15143_v11 = vld [vmem:[#allocation41_spill] sm:$0xff]  ;;  %v2869_v17 = vadd.f32 %v12085_v12, %v1965_v41 }
 0x2aa   :  { %v9955_v6 = vpop.f32.mrf.mxu1  ;;  %v12946_v56 = vpop.f32.mrf.mxu0  ;;  %10198 = vmatmul.mubr.msk.f32.gmra.mxu1 %vm741_vm2, %v12944_v13  ;;  %10447 = vmatmul.mubr.msk.f32.gmra.mxu0 %vm741_vm2, %v12631_v38  ;;  %v1975_v38 = vadd.f32 %v12371_v39, %v15143_v11 }
 0x2ab   :  { %15140 = vst [vmem:[#allocation35_spill] sm:$0xff] %v12946_v56  ;;  %v12956_v53 = vadd.f32 %v9955_v6, %v2867_v24  ;;  %10200 = vmatprep.mubr.msk.f32.mxu1 %vm741_vm2, %v12952_v30  ;;  %10449 = vmatprep.mubr.msk.f32.mxu0 %vm741_vm2, %v12640_v31  ;;  %v12970_v24 = vld [vmem:[#allocation2 + $0x27a] sm:$0xff]  ;;  %v2868_v12 = vadd.f32 %v12097_v52, %v1960_v3  ;;  %v13004_v52 = vld [vmem:[#allocation2 + $0x2a2] sm:$0xff] }
 0x2ac   :  { %v3305_v50 = vpop.f32.mrf.mxu1  ;;  %v12963_v61 = vpop.f32.mrf.mxu0  ;;  %v15145_v31 = vld [vmem:[#allocation43_spill] sm:$0xff] }
 0x2ad   :  { %15142 = vst [vmem:[#allocation37_spill] sm:$0xff] %v12963_v61  ;;  %v12967_v55 = vadd.f32 %v3305_v50, %v2866_v0  ;;  %v1970_v39 = vadd.f32 %v12381_v32, %v15145_v31  ;;  %v15147_v50 = vld [vmem:[#allocation45_spill] sm:$0xff]  ;;  %v15149_v61 = vld [vmem:[#allocation82_spill] sm:$0xff]  ;;  %v15152_v3 = vld [vmem:[#allocation47_spill] sm:$0xff] }
 0x2ae   :  { %v9958_v6 = vpop.f32.mrf.mxu1  ;;  %v12972_v5 = vpop.f32.mrf.mxu0  ;;  %10201 = vmatmul.mubr.msk.f32.gmra.mxu1 %vm741_vm2, %v12970_v24  ;;  %10450 = vmatmul.mubr.msk.f32.gmra.mxu0 %vm741_vm2, %v12649_v28  ;;  %v1985_v28 = vadd.f32 %v12385_v36, %v15147_v50  ;;  %v2871_v32 = vadd.f32 %v15149_v61, %v1975_v38  ;;  %v15155_v61 = vld [vmem:[#allocation174_spill] sm:$0xff]  ;;  %v15156_v38 = vld [vmem:[#allocation84_spill] sm:$0xff] }
 0x2af   :  { %15144 = vst [vmem:[#allocation39_spill] sm:$0xff] %v12972_v5  ;;  %v12982_v18 = vadd.f32 %v9958_v6, %v2869_v17  ;;  %10203 = vmatprep.mubr.msk.f32.mxu1 %vm741_vm2, %v12978_v40  ;;  %10452 = vmatprep.mubr.msk.f32.mxu0 %vm741_vm2, %v12658_v16  ;;  %v12996_v17 = vld [vmem:[#allocation2 + $0x292] sm:$0xff]  ;;  %v15151_v16 = vld [vmem:[#allocation171_spill] sm:$0xff] }
 0x2b0   :  { %v3315_v41 = vpop.f32.mrf.mxu1  ;;  %v12989_v0 = vpop.f32.mrf.mxu0 }
 0x2b1   :  { %15146 = vst [vmem:[#allocation41_spill] sm:$0xff] %v12989_v0  ;;  %v12993_v11 = vadd.f32 %v3315_v41, %v2868_v12  ;;  %v15153_v0 = vld [vmem:[#allocation48_spill] sm:$0xff]  ;;  %v2870_v41 = vadd.f32 %v15156_v38, %v1970_v39  ;;  %v13030_v39 = vld [vmem:[#allocation2 + $0x2ba] sm:$0xff] }
 0x2b2   :  { %v9961_v6 = vpop.f32.mrf.mxu1  ;;  %v12998_v31 = vpop.f32.mrf.mxu0  ;;  %10204 = vmatmul.mubr.msk.f32.gmra.mxu1 %vm741_vm2, %v12996_v17  ;;  %10453 = vmatmul.mubr.msk.f32.gmra.mxu0 %vm741_vm2, %v15151_v16  ;;  %v1980_v36 = vadd.f32 %v15153_v0, %v15152_v3  ;;  %v15159_v16 = vld [vmem:[#allocation111_spill] sm:$0xff]  ;;  %v2873_v0 = vadd.f32 %v15161_v22, %v1985_v28  ;;  %v15167_v22 = vld [vmem:[#allocation88_spill] sm:$0xff] }
 0x2b3   :  { %15148 = vst [vmem:[#allocation43_spill] sm:$0xff] %v12993_v11  ;;  %15150 = vst [vmem:[#allocation45_spill] sm:$0xff] %v12998_v31  ;;  %v13008_v12 = vadd.f32 %v9961_v6, %v2871_v32  ;;  %10206 = vmatprep.mubr.msk.f32.mxu1 %vm741_vm2, %v13004_v52  ;;  %10455 = vmatprep.mubr.msk.f32.mxu0 %vm741_vm2, %v15155_v61  ;;  %v1995_v23 = vadd.f32 %v15159_v16, %v15158_v29  ;;  %v13022_v32 = vld [vmem:[#allocation2 + $0x2aa] sm:$0xff]  ;;  %v15164_v38 = vld [vmem:[#allocation51_spill] sm:$0xff] }
 0x2b4   :  { %v3325_v50 = vpop.f32.mrf.mxu1  ;;  %v13015_v44 = vpop.f32.mrf.mxu0  ;;  %v15163_v61 = vld [vmem:[#allocation177_spill] sm:$0xff]  ;;  %v2872_v28 = vadd.f32 %v15167_v22, %v1980_v36  ;;  %v15172_v31 = vld [vmem:[#allocation90_spill] sm:$0xff] }
 0x2b5   :  { %15154 = vst [vmem:[#allocation82_spill] sm:$0xff] %v13008_v12  ;;  %15157 = vst [vmem:[#allocation171_spill] sm:$0xff] %v13015_v44  ;;  %v13019_v54 = vadd.f32 %v3325_v50, %v2870_v41  ;;  %v15165_v44 = vld [vmem:[#allocation53_spill] sm:$0xff]  ;;  %v15175_v22 = vld [vmem:[#allocation54_spill] sm:$0xff] }
 0x2b6   :  { %v9964_v6 = vpop.f32.mrf.mxu1  ;;  %v13024_v3 = vpop.f32.mrf.mxu0  ;;  %10207 = vmatmul.mubr.msk.f32.gmra.mxu1 %vm741_vm2, %v13022_v32  ;;  %10456 = vmatmul.mubr.msk.f32.gmra.mxu0 %vm741_vm2, %v15163_v61  ;;  %v1990_v29 = vadd.f32 %v15165_v44, %v15164_v38  ;;  %v15170_v61 = vld [vmem:[#allocation114_spill] sm:$0xff]  ;;  %v2875_v44 = vadd.f32 %v15172_v31, %v1995_v23  ;;  %v15178_v23 = vld [vmem:[#allocation185_spill] sm:$0xff]  ;;  %v15179_v31 = vld [vmem:[#allocation92_spill] sm:$0xff] }
 0x2b7   :  { %15160 = vst [vmem:[#allocation47_spill] sm:$0xff] %v13019_v54  ;;  %15162 = vst [vmem:[#allocation48_spill] sm:$0xff] %v13024_v3  ;;  %v13034_v41 = vadd.f32 %v9964_v6, %v2873_v0  ;;  %10209 = vmatprep.mubr.msk.f32.mxu1 %vm741_vm2, %v13030_v39  ;;  %10458 = vmatprep.mubr.msk.f32.mxu0 %vm741_vm2, %v12694_v42  ;;  %v2005_v54 = vadd.f32 %v15170_v61, %v15169_v33  ;;  %v13048_v0 = vld [vmem:[#allocation2 + $0x2c2] sm:$0xff]  ;;  %v15174_v42 = vld [vmem:[#allocation182_spill] sm:$0xff] }
 0x2b8   :  { %v3335_v50 = vpop.f32.mrf.mxu1  ;;  %v13041_v16 = vpop.f32.mrf.mxu0  ;;  %v13056_v36 = vld [vmem:[#allocation2 + $0x2d2] sm:$0xff]  ;;  %v15219_v12 = vld [vmem:[#allocation104_spill] sm:$0xff] }
 0x2b9   :  { %15166 = vst [vmem:[#allocation174_spill] sm:$0xff] %v13034_v41  ;;  %15168 = vst [vmem:[#allocation84_spill] sm:$0xff] %v13041_v16  ;;  %v13045_v3 = vadd.f32 %v3335_v50, %v2872_v28  ;;  %v15176_v16 = vld [vmem:[#allocation55_spill] sm:$0xff]  ;;  %v2874_v50 = vadd.f32 %v15179_v31, %v1990_v29  ;;  %v13082_v29 = vld [vmem:[#allocation2 + $0x2ea] sm:$0xff] }
 0x2ba   :  { %v9967_v6 = vpop.f32.mrf.mxu1  ;;  %v13050_v38 = vpop.f32.mrf.mxu0  ;;  %10210 = vmatmul.mubr.msk.f32.gmra.mxu1 %vm741_vm2, %v13048_v0  ;;  %10459 = vmatmul.mubr.msk.f32.gmra.mxu0 %vm741_vm2, %v15174_v42  ;;  %v2000_v33 = vadd.f32 %v15176_v16, %v15175_v22  ;;  %v15182_v42 = vld [vmem:[#allocation116_spill] sm:$0xff]  ;;  %v2877_v16 = vadd.f32 %v15184_v4, %v2005_v54  ;;  %v15187_v31 = vld [vmem:[#allocation58_spill] sm:$0xff]  ;;  %v15190_v54 = vld [vmem:[#allocation191_spill] sm:$0xff] }
 0x2bb   :  { %15171 = vst [vmem:[#allocation49_spill] sm:$0xff] %v13045_v3  ;;  %15173 = vst [vmem:[#allocation111_spill] sm:$0xff] %v13050_v38  ;;  %v13060_v28 = vadd.f32 %v9967_v6, %v2875_v44  ;;  %10212 = vmatprep.mubr.msk.f32.mxu1 %vm741_vm2, %v13056_v36  ;;  %10461 = vmatprep.mubr.msk.f32.mxu0 %vm741_vm2, %v15178_v23  ;;  %v15181_v38 = vld [vmem:[#allocation56_spill] sm:$0xff]  ;;  %v13074_v44 = vld [vmem:[#allocation2 + $0x2da] sm:$0xff] }
 0x2bc   :  { %v3345_v61 = vpop.f32.mrf.mxu1  ;;  %v13067_v3 = vpop.f32.mrf.mxu0  ;;  %v2015_v5 = vadd.f32 %v15182_v42, %v15181_v38  ;;  %v15186_v23 = vld [vmem:[#allocation188_spill] sm:$0xff] }
 0x2bd   :  { %15177 = vst [vmem:[#allocation86_spill] sm:$0xff] %v13060_v28  ;;  %15180 = vst [vmem:[#allocation177_spill] sm:$0xff] %v13067_v3  ;;  %v13071_v56 = vadd.f32 %v3345_v61, %v2874_v50  ;;  %v15188_v3 = vld [vmem:[#allocation60_spill] sm:$0xff] }
 0x2be   :  { %v9970_v6 = vpop.f32.mrf.mxu1  ;;  %v13076_v22 = vpop.f32.mrf.mxu0  ;;  %10213 = vmatmul.mubr.msk.f32.gmra.mxu1 %vm741_vm2, %v13074_v44  ;;  %10462 = vmatmul.mubr.msk.f32.gmra.mxu0 %vm741_vm2, %v15186_v23  ;;  %v2010_v38 = vadd.f32 %v15188_v3, %v15187_v31  ;;  %v15191_v4 = vld [vmem:[#allocation96_spill] sm:$0xff]  ;;  %v15194_v23 = vld [vmem:[#allocation119_spill] sm:$0xff]  ;;  %v2879_v3 = vadd.f32 %v15196_v20, %v2015_v5  ;;  %v15202_v20 = vld [vmem:[#allocation197_spill] sm:$0xff] }
 0x2bf   :  { %15183 = vst [vmem:[#allocation51_spill] sm:$0xff] %v13071_v56  ;;  %15185 = vst [vmem:[#allocation53_spill] sm:$0xff] %v13076_v22  ;;  %v13086_v50 = vadd.f32 %v9970_v6, %v2877_v16  ;;  %10215 = vmatprep.mubr.msk.f32.mxu1 %vm741_vm2, %v13082_v29  ;;  %10464 = vmatprep.mubr.msk.f32.mxu0 %vm741_vm2, %v15190_v54  ;;  %v2876_v61 = vadd.f32 %v15191_v4, %v2000_v33  ;;  %v15193_v22 = vld [vmem:[#allocation59_spill] sm:$0xff]  ;;  %v13100_v16 = vld [vmem:[#allocation2 + $0x2f2] sm:$0xff] }
 0x2c0   :  { %v3355_v42 = vpop.f32.mrf.mxu1  ;;  %v13093_v56 = vpop.f32.mrf.mxu0  ;;  %v2025_v48 = vadd.f32 %v15194_v23, %v15193_v22  ;;  %v15198_v54 = vld [vmem:[#allocation194_spill] sm:$0xff]  ;;  %v13108_v33 = vld [vmem:[#allocation2 + $0x302] sm:$0xff]  ;;  %v15199_v4 = vld [vmem:[#allocation61_spill] sm:$0xff] }
 0x2c1   :  { %15189 = vst [vmem:[#allocation88_spill] sm:$0xff] %v13086_v50  ;;  %15192 = vst [vmem:[#allocation52_spill] sm:$0xff] %v13093_v56  ;;  %v13097_v60 = vadd.f32 %v3355_v42, %v2876_v61  ;;  %v15200_v56 = vld [vmem:[#allocation121_spill] sm:$0xff]  ;;  %v15203_v5 = vld [vmem:[#allocation100_spill] sm:$0xff] }
 0x2c2   :  { %v9973_v6 = vpop.f32.mrf.mxu1  ;;  %v13102_v31 = vpop.f32.mrf.mxu0  ;;  %10216 = vmatmul.mubr.msk.f32.gmra.mxu1 %vm741_vm2, %v13100_v16  ;;  %10465 = vmatmul.mubr.msk.f32.gmra.mxu0 %vm741_vm2, %v15198_v54  ;;  %v2020_v22 = vadd.f32 %v15200_v56, %v15199_v4  ;;  %v2878_v42 = vadd.f32 %v15203_v5, %v2010_v38  ;;  %v15205_v54 = vld [vmem:[#allocation62_spill] sm:$0xff]  ;;  %v15210_v38 = vld [vmem:[#allocation9_spill] sm:$0xff]  ;;  %v15211_v5 = vld [vmem:[#allocation63_spill] sm:$0xff] }
 0x2c3   :  { %15195 = vst [vmem:[#allocation114_spill] sm:$0xff] %v13097_v60  ;;  %15197 = vst [vmem:[#allocation90_spill] sm:$0xff] %v13102_v31  ;;  %v13112_v61 = vadd.f32 %v9973_v6, %v2879_v3  ;;  %10218 = vmatprep.mubr.msk.f32.mxu1 %vm741_vm2, %v13108_v33  ;;  %10467 = vmatprep.mubr.msk.f32.mxu0 %vm741_vm2, %v15202_v20  ;;  %v6499_v31 = vld [vmem:[#allocation2 + $0x19a] sm:$0xff]  ;;  %v2035_v27 = vadd.f32 %v15206_v25, %v15205_v54  ;;  %v13126_v6 = vld [vmem:[#allocation2 + $0x30a] sm:$0xff] }
 0x2c4   :  { %v3365_v23 = vpop.f32.mrf.mxu1  ;;  %v13119_v60 = vpop.f32.mrf.mxu0  ;;  %v15208_v56 = vld [vmem:[#allocation102_spill] sm:$0xff]  ;;  %v6500_v54 = vld [vmem:[#allocation2 + $0x1a2] sm:$0xff] }
 0x2c5   :  { %15201 = vst [vmem:[#allocation182_spill] sm:$0xff] %v13112_v61  ;;  %15204 = vst [vmem:[#allocation54_spill] sm:$0xff] %v13119_v60  ;;  %v13123_v50 = vadd.f32 %v3365_v23, %v2878_v42  ;;  %v2881_v3 = vadd.f32 %v15208_v56, %v2025_v48  ;;  %v13134_v20 = vld [vmem:[#allocation2 + $0x31a] sm:$0xff]  ;;  %v15212_v60 = vld [vmem:[#allocation125_spill] sm:$0xff] }
 0x2c6   :  { %v9976_v4 = vpop.f32.mrf.mxu1  ;;  %v13128_v61 = vpop.f32.mrf.mxu0  ;;  %10219 = vmatmul.mubr.msk.f32.gmra.mxu1 %vm741_vm2, %v13126_v6  ;;  %10468 = vmatmul.mubr.msk.f32.gmra.mxu0 %vm741_vm2, %v15210_v38  ;;  %v2030_v25 = vadd.f32 %v15212_v60, %v15211_v5  ;;  %v15214_v48 = vld [vmem:[#allocation3_spill] sm:$0xff]  ;;  %v2883_v60 = vadd.f32 %v15219_v12, %v2035_v27  ;;  %v15224_v27 = vld [vmem:[#allocation4_spill] sm:$0xff] }
 0x2c7   :  { %15207 = vst [vmem:[#allocation55_spill] sm:$0xff] %v13123_v50  ;;  %15209 = vst [vmem:[#allocation185_spill] sm:$0xff] %v13128_v61  ;;  %v13138_v42 = vadd.f32 %v9976_v4, %v2881_v3  ;;  %10221 = vmatprep.mubr.msk.f32.mxu1 %vm741_vm2, %v13134_v20  ;;  %v2880_v23 = vadd.f32 %v15214_v48, %v2020_v22  ;;  %10470 = vmatprep.mubr.msk.f32.mxu0 %vm741_vm2, %v6499_v31  ;;  %v15216_v61 = vld [vmem:[#allocation64_spill] sm:$0xff]  ;;  %v15217_v38 = vld [vmem:[#allocation127_spill] sm:$0xff] }
 0x2c8   :  { %v3375_v56 = vpop.f32.mrf.mxu1  ;;  %v13144_v50 = vpop.f32.mrf.mxu0  ;;  %v2045_v28 = vadd.f32 %v15217_v38, %v15216_v61  ;;  %v13151_v3 = vld [vmem:[#allocation2 + $0x322] sm:$0xff]  ;;  %v13158_v31 = vld [vmem:[#allocation2 + $0x332] sm:$0xff]  ;;  %v2882_v12 = vadd.f32 %v15224_v27, %v2030_v25 }
 0x2c9   :  { %15213 = vst [vmem:[#allocation92_spill] sm:$0xff] %v13138_v42  ;;  %15215 = vst [vmem:[#allocation56_spill] sm:$0xff] %v13144_v50  ;;  %v13148_v41 = vadd.f32 %v3375_v56, %v2880_v23  ;;  %v15221_v22 = vld [vmem:[#allocation66_spill] sm:$0xff]  ;;  %v15222_v48 = vld [vmem:[#allocation129_spill] sm:$0xff] }
 0x2ca   :  { %v9979_v4 = vpop.f32.mrf.mxu1  ;;  %v13153_v5 = vpop.f32.mrf.mxu0  ;;  %10222 = vmatmul.mubr.msk.f32.gmra.mxu1 %vm741_vm2, %v13151_v3  ;;  %10471 = vmatmul.mubr.msk.f32.gmra.mxu0 %vm741_vm2, %v6500_v54  ;;  %v2040_v50 = vadd.f32 %v15222_v48, %v15221_v22  ;;  %v15226_v38 = vld [vmem:[#allocation67_spill] sm:$0xff]  ;;  %v15229_v42 = vld [vmem:[#allocation105_spill] sm:$0xff]  ;;  %v15231_v25 = vld [vmem:[#allocation68_spill] sm:$0xff] }
 0x2cb   :  { %15218 = vst [vmem:[#allocation116_spill] sm:$0xff] %v13148_v41  ;;  %15220 = vst [vmem:[#allocation94_spill] sm:$0xff] %v13153_v5  ;;  %v13162_v61 = vadd.f32 %v9979_v4, %v2883_v60  ;;  %10224 = vmatprep.mubr.msk.f32.mxu1 %vm741_vm2, %v13158_v31  ;;  %10473 = vmatprep.mubr.msk.f32.mxu0 %vm741_vm2, %v12789_v37  ;;  %v15227_v54 = vld [vmem:[#allocation131_spill] sm:$0xff]  ;;  %v2885_v22 = vadd.f32 %v15229_v42, %v2045_v28  ;;  %v5759_v37 = vld [vmem:[#allocation2 + $0x31] sm:$0xff] }
 0x2cc   :  { %v3385_v23 = vpop.f32.mrf.mxu1  ;;  %v13169_v56 = vpop.f32.mrf.mxu0  ;;  %v2055_v41 = vadd.f32 %v15227_v54, %v15226_v38  ;;  %v13176_v60 = vld [vmem:[#allocation2 + $0x33a] sm:$0xff]  ;;  %v15232_v27 = vld [vmem:[#allocation133_spill] sm:$0xff] }
 0x2cd   :  { %15223 = vst [vmem:[#allocation188_spill] sm:$0xff] %v13162_v61  ;;  %15225 = vst [vmem:[#allocation58_spill] sm:$0xff] %v13169_v56  ;;  %v13173_v5 = vadd.f32 %v3385_v23, %v2882_v12  ;;  %v2050_v56 = vadd.f32 %v15232_v27, %v15231_v25  ;;  %v15233_v28 = vld [vmem:[#allocation106_spill] sm:$0xff]  ;;  %v15234_v54 = vld [vmem:[#allocation69_spill] sm:$0xff] }
 0x2ce   :  { %v9982_v4 = vpop.f32.mrf.mxu1  ;;  %10225 = vmatmul.mubr.msk.f32.gmra.mxu1 %vm741_vm2, %v13176_v60  ;;  %v13180_v48 = vpop.f32.mrf.mxu0  ;;  %10474 = vmatmul.mubr.msk.f32.gmra.mxu0 %vm741_vm2, %v12807_v62  ;;  %v2884_v42 = vadd.f32 %v15233_v28, %v2040_v50  ;;  %v15237_v61 = vld [vmem:[#allocation108_spill] sm:$0xff]  ;;  %v5760_v25 = vld [vmem:[#allocation2 + $0x39] sm:$0xff] }
 0x2cf   :  { %15228 = vst [vmem:[#allocation60_spill] sm:$0xff] %v13173_v5  ;;  %15230 = vst [vmem:[#allocation191_spill] sm:$0xff] %v13180_v48  ;;  %v13186_v38 = vadd.f32 %v9982_v4, %v2885_v22  ;;  %10327 = vmatprep.mubr.msk.f32.mxu1 %vm741_vm2, %v5759_v37  ;;  %10476 = vmatprep.mubr.msk.f32.mxu0 %vm741_vm2, %v12815_v63  ;;  %v15235_v5 = vld [vmem:[#allocation135_spill] sm:$0xff]  ;;  %v2887_v11 = vadd.f32 %v15237_v61, %v2055_v41  ;;  %v5761_v63 = vld [vmem:[#allocation2 + $0x49] sm:$0xff] }
 0x2d0   :  { %v3395_v12 = vpop.f32.mrf.mxu1  ;;  %v13192_v23 = vpop.f32.mrf.mxu0  ;;  %v2065_v48 = vadd.f32 %v15235_v5, %v15234_v54  ;;  %v15238_v50 = vld [vmem:[#allocation70_spill] sm:$0xff]  ;;  %v15239_v37 = vld [vmem:[#allocation137_spill] sm:$0xff] }
 0x2d1   :  { %v13196_v62 = vadd.f32 %v3395_v12, %v2884_v42  ;;  %v2060_v27 = vadd.f32 %v15239_v37, %v15238_v50  ;;  %v15240_v41 = vld [vmem:[#allocation109_spill] sm:$0xff]  ;;  %v15242_v12 = vld [vmem:[#allocation139_spill] sm:$0xff] }
 0x2d2   :  { %v9985_v22 = vpop.f32.mrf.mxu1  ;;  %v13199_v4 = vpop.f32.mrf.mxu0  ;;  %10328 = vmatmul.mubr.msk.f32.vlgmr.msra.gmra.mxu1 %vm741_vm2, %v5760_v25  ;;  %10477 = vmatmul.mubr.msk.f32.gmra.mxu0 %vm741_vm2, %v12833_v43  ;;  %v2886_v5 = vadd.f32 %v15240_v41, %v2050_v56  ;;  %v15241_v43 = vld [vmem:[#allocation71_spill] sm:$0xff]  ;;  %v5762_v50 = vld [vmem:[#allocation2 + $0x51] sm:$0xff]  ;;  %v15246_v56 = vld [vmem:[#allocation72_spill] sm:$0xff] }
 0x2d3   :  { %15236 = vst [vmem:[#allocation96_spill] sm:$0xff] %v13196_v62  ;;  %v13206_v28 = vadd.f32 %v9985_v22, %v2887_v11  ;;  %10330 = vmatprep.mubr.msk.f32.mxu1 %vm741_vm2, %v5761_v63  ;;  %10479 = vmatprep.mubr.msk.f32.mxu0 %vm741_vm2, %v12841_v51  ;;  %v2075_v54 = vadd.f32 %v15242_v12, %v15241_v43  ;;  %v15244_v11 = vld [vmem:[#allocation110_spill] sm:$0xff]  ;;  %v5763_v51 = vld [vmem:[#allocation2 + $0x61] sm:$0xff]  ;;  %v15247_v41 = vld [vmem:[#allocation141_spill] sm:$0xff] }
 0x2d4   :  { %v3405_v61 = vpop.f32.mrf.mxu1  ;;  %v13212_v42 = vpop.f32.mrf.mxu0  ;;  %10522 = vmatpush3.msk.msra.mxu1 %vm1239_vm1, %v12872_v47  ;;  %v2889_v22 = vadd.f32 %v15244_v11, %v2065_v48  ;;  %v2070_v47 = vadd.f32 %v15247_v41, %v15246_v56  ;;  %v15248_v48 = vld [vmem:[#allocation12_spill] sm:$0xff]  ;;  %v15249_v12 = vld [vmem:[#allocation73_spill] sm:$0xff]  ;;  %v15250_v11 = vld [vmem:[#allocation143_spill] sm:$0xff] }
 0x2d5   :  { %v13218_v25 = vadd.f32 %v3405_v61, %v2886_v5  ;;  %v2888_v5 = vadd.f32 %v15248_v48, %v2060_v27  ;;  %v5764_v56 = vld [vmem:[#allocation2 + $0x69] sm:$0xff]  ;;  %v15254_v27 = vld [vmem:[#allocation74_spill] sm:$0xff] }
 0x2d6   :  { %v9988_v63 = vpop.f32.mrf.mxu1  ;;  %v13221_v37 = vpop.f32.mrf.mxu0  ;;  %10331 = vmatmul.mubr.msk.f32.gmra.mxu1 %vm741_vm2, %v5762_v50  ;;  %10480 = vmatmul.mubr.msk.f32.gmra.mxu0 %vm741_vm2, %v12859_v49  ;;  %v2085_v50 = vadd.f32 %v15250_v11, %v15249_v12  ;;  %v15257_v12 = vld [vmem:[#allocation75_spill] sm:$0xff] }
 0x2d7   :  { %15243 = vst [vmem:[#allocation59_spill] sm:$0xff] %v13218_v25  ;;  %15245 = vst [vmem:[#allocation119_spill] sm:$0xff] %v13221_v37  ;;  %v13228_v62 = vadd.f32 %v9988_v63, %v2889_v22  ;;  %10333 = vmatprep.mubr.msk.f32.mxu1 %vm741_vm2, %v5763_v51  ;;  %10482 = vmatprep.mubr.msk.f32.mxu0 %vm741_vm2, %v12867_v26  ;;  %v15252_v25 = vld [vmem:[#allocation14_spill] sm:$0xff]  ;;  %v15255_v51 = vld [vmem:[#allocation145_spill] sm:$0xff] }
 0x2d8   :  { %v3415_v61 = vpop.f32.mrf.mxu1  ;;  %v13234_v43 = vpop.f32.mrf.mxu0  ;;  %v2891_v37 = vadd.f32 %v15252_v25, %v2075_v54  ;;  %v5765_v26 = vld [vmem:[#allocation2 + $0x79] sm:$0xff]  ;;  %v2080_v41 = vadd.f32 %v15255_v51, %v15254_v27  ;;  %v15256_v54 = vld [vmem:[#allocation16_spill] sm:$0xff] }
 0x2d9   :  { %v13238_v49 = vadd.f32 %v3415_v61, %v2888_v5  ;;  %v2890_v25 = vadd.f32 %v15256_v54, %v2070_v47  ;;  %v15258_v11 = vld [vmem:[#allocation147_spill] sm:$0xff]  ;;  %v15262_v47 = vld [vmem:[#allocation76_spill] sm:$0xff] }
 0x2da   :  { %v9991_v22 = vpop.f32.mrf.mxu1  ;;  %v13241_v63 = vpop.f32.mrf.mxu0  ;;  %10334 = vmatmul.mubr.msk.f32.gmra.mxu1 %vm741_vm2, %v5764_v56  ;;  %10483 = vmatmul.mubr.msk.f32.gmra.mxu0 %vm741_vm2, %v12892_v45  ;;  %v2095_v56 = vadd.f32 %v15258_v11, %v15257_v12  ;;  %v5766_v27 = vld [vmem:[#allocation2 + $0x81] sm:$0xff]  ;;  %v15265_v12 = vld [vmem:[#allocation77_spill] sm:$0xff] }
 0x2db   :  { %15251 = vst [vmem:[#allocation98_spill] sm:$0xff] %v13238_v49  ;;  %15253 = vst [vmem:[#allocation194_spill] sm:$0xff] %v13241_v63  ;;  %v13248_v48 = vadd.f32 %v9991_v22, %v2891_v37  ;;  %10336 = vmatprep.mubr.msk.f32.mxu1 %vm741_vm2, %v5765_v26  ;;  %10485 = vmatprep.mubr.msk.f32.mxu0 %vm741_vm2, %v12900_v9  ;;  %v15260_v49 = vld [vmem:[#allocation18_spill] sm:$0xff]  ;;  %v15263_v26 = vld [vmem:[#allocation149_spill] sm:$0xff] }
 0x2dc   :  { %v3425_v5 = vpop.f32.mrf.mxu1  ;;  %v13254_v61 = vpop.f32.mrf.mxu0  ;;  %v2893_v63 = vadd.f32 %v15260_v49, %v2085_v50  ;;  %v5767_v9 = vld [vmem:[#allocation2 + $0x91] sm:$0xff]  ;;  %v2090_v51 = vadd.f32 %v15263_v26, %v15262_v47  ;;  %v15264_v50 = vld [vmem:[#allocation20_spill] sm:$0xff]  ;;  %v15266_v11 = vld [vmem:[#allocation151_spill] sm:$0xff] }
 0x2dd   :  { %v13258_v45 = vadd.f32 %v3425_v5, %v2890_v25  ;;  %v2892_v49 = vadd.f32 %v15264_v50, %v2080_v41  ;;  %v5768_v47 = vld [vmem:[#allocation2 + $0x99] sm:$0xff] }
 0x2de   :  { %v9994_v37 = vpop.f32.mrf.mxu1  ;;  %v13261_v22 = vpop.f32.mrf.mxu0  ;;  %10337 = vmatmul.mubr.msk.f32.gmra.mxu1 %vm741_vm2, %v5766_v27  ;;  %10486 = vmatmul.mubr.msk.f32.gmra.mxu0 %vm741_vm2, %v12918_v59  ;;  %v2105_v27 = vadd.f32 %v15266_v11, %v15265_v12  ;;  %v15270_v41 = vld [vmem:[#allocation78_spill] sm:$0xff]  ;;  %v15273_v12 = vld [vmem:[#allocation79_spill] sm:$0xff] }
 0x2df   :  { %15259 = vst [vmem:[#allocation61_spill] sm:$0xff] %v13258_v45  ;;  %15261 = vst [vmem:[#allocation121_spill] sm:$0xff] %v13261_v22  ;;  %v13268_v54 = vadd.f32 %v9994_v37, %v2893_v63  ;;  %10339 = vmatprep.mubr.msk.f32.mxu1 %vm741_vm2, %v5767_v9  ;;  %10488 = vmatprep.mubr.msk.f32.mxu0 %vm741_vm2, %v12926_v19  ;;  %v15268_v45 = vld [vmem:[#allocation22_spill] sm:$0xff]  ;;  %v5769_v19 = vld [vmem:[#allocation2 + $0xa9] sm:$0xff] }
 0x2e0   :  { %v3435_v25 = vpop.f32.mrf.mxu1  ;;  %v13274_v5 = vpop.f32.mrf.mxu0  ;;  %v2895_v22 = vadd.f32 %v15268_v45, %v2095_v56  ;;  %v15271_v9 = vld [vmem:[#allocation153_spill] sm:$0xff]  ;;  %v15272_v56 = vld [vmem:[#allocation24_spill] sm:$0xff]  ;;  %v15274_v11 = vld [vmem:[#allocation155_spill] sm:$0xff] }
 0x2e1   :  { %v13278_v59 = vadd.f32 %v3435_v25, %v2892_v49  ;;  %v2100_v26 = vadd.f32 %v15271_v9, %v15270_v41  ;;  %v2894_v45 = vadd.f32 %v15272_v56, %v2090_v51  ;;  %v5770_v41 = vld [vmem:[#allocation2 + $0xb1] sm:$0xff]  ;;  %v15278_v51 = vld [vmem:[#allocation80_spill] sm:$0xff] }
 0x2e2   :  { %v9997_v63 = vpop.f32.mrf.mxu1  ;;  %v13281_v37 = vpop.f32.mrf.mxu0  ;;  %10340 = vmatmul.mubr.msk.f32.gmra.mxu1 %vm741_vm2, %v5768_v47  ;;  %10489 = vmatmul.mubr.msk.f32.gmra.mxu0 %vm741_vm2, %v12944_v13  ;;  %v2115_v47 = vadd.f32 %v15274_v11, %v15273_v12  ;;  %v15281_v12 = vld [vmem:[#allocation81_spill] sm:$0xff]  ;;  %v15282_v11 = vld [vmem:[#allocation159_spill] sm:$0xff] }
 0x2e3   :  { %15267 = vst [vmem:[#allocation197_spill] sm:$0xff] %v13278_v59  ;;  %15269 = vst [vmem:[#allocation100_spill] sm:$0xff] %v13281_v37  ;;  %v13288_v50 = vadd.f32 %v9997_v63, %v2895_v22  ;;  %10342 = vmatprep.mubr.msk.f32.mxu1 %vm741_vm2, %v5769_v19  ;;  %10491 = vmatprep.mubr.msk.f32.mxu0 %vm741_vm2, %v12952_v30  ;;  %v15276_v59 = vld [vmem:[#allocation26_spill] sm:$0xff]  ;;  %v5771_v30 = vld [vmem:[#allocation2 + $0xc1] sm:$0xff] }
 0x2e4   :  { %v3445_v49 = vpop.f32.mrf.mxu1  ;;  %v13294_v25 = vpop.f32.mrf.mxu0  ;;  %v2897_v37 = vadd.f32 %v15276_v59, %v2105_v27  ;;  %v15279_v19 = vld [vmem:[#allocation157_spill] sm:$0xff]  ;;  %v15280_v27 = vld [vmem:[#allocation28_spill] sm:$0xff] }
 0x2e5   :  { %v13298_v13 = vadd.f32 %v3445_v49, %v2894_v45  ;;  %v2110_v9 = vadd.f32 %v15279_v19, %v15278_v51  ;;  %v2896_v59 = vadd.f32 %v15280_v27, %v2100_v26  ;;  %v5772_v51 = vld [vmem:[#allocation2 + $0xc9] sm:$0xff]  ;;  %v15286_v26 = vld [vmem:[#allocation83_spill] sm:$0xff] }
 0x2e6   :  { %v10000_v22 = vpop.f32.mrf.mxu1  ;;  %v13301_v63 = vpop.f32.mrf.mxu0  ;;  %10343 = vmatmul.mubr.msk.f32.gmra.mxu1 %vm741_vm2, %v5770_v41  ;;  %10492 = vmatmul.mubr.msk.f32.gmra.mxu0 %vm741_vm2, %v12970_v24  ;;  %v2125_v41 = vadd.f32 %v15282_v11, %v15281_v12  ;;  %v15289_v12 = vld [vmem:[#allocation85_spill] sm:$0xff]  ;;  %v15290_v11 = vld [vmem:[#allocation163_spill] sm:$0xff] }
 0x2e7   :  { %15275 = vst [vmem:[#allocation62_spill] sm:$0xff] %v13298_v13  ;;  %15277 = vst [vmem:[#allocation123_spill] sm:$0xff] %v13301_v63  ;;  %v13308_v56 = vadd.f32 %v10000_v22, %v2897_v37  ;;  %10345 = vmatprep.mubr.msk.f32.mxu1 %vm741_vm2, %v5771_v30  ;;  %10494 = vmatprep.mubr.msk.f32.mxu0 %vm741_vm2, %v12978_v40  ;;  %v15284_v13 = vld [vmem:[#allocation30_spill] sm:$0xff]  ;;  %v15287_v30 = vld [vmem:[#allocation161_spill] sm:$0xff] }
 0x2e8   :  { %v3455_v45 = vpop.f32.mrf.mxu1  ;;  %v13314_v49 = vpop.f32.mrf.mxu0  ;;  %v2899_v63 = vadd.f32 %v15284_v13, %v2115_v47  ;;  %v5773_v40 = vld [vmem:[#allocation2 + $0xd9] sm:$0xff]  ;;  %v2120_v19 = vadd.f32 %v15287_v30, %v15286_v26  ;;  %v15288_v47 = vld [vmem:[#allocation32_spill] sm:$0xff] }
 0x2e9   :  { %v13318_v24 = vadd.f32 %v3455_v45, %v2896_v59  ;;  %v2898_v13 = vadd.f32 %v15288_v47, %v2110_v9  ;;  %v5774_v26 = vld [vmem:[#allocation2 + $0xe1] sm:$0xff] }
 0x2ea   :  { %v10003_v37 = vpop.f32.mrf.mxu1  ;;  %v13321_v22 = vpop.f32.mrf.mxu0  ;;  %10346 = vmatmul.mubr.msk.f32.gmra.mxu1 %vm741_vm2, %v5772_v51  ;;  %10495 = vmatmul.mubr.msk.f32.gmra.mxu0 %vm741_vm2, %v12996_v17  ;;  %v2135_v51 = vadd.f32 %v15290_v11, %v15289_v12  ;;  %v15294_v9 = vld [vmem:[#allocation87_spill] sm:$0xff]  ;;  %v15298_v12 = vld [vmem:[#allocation89_spill] sm:$0xff] }
 0x2eb   :  { %15283 = vst [vmem:[#allocation102_spill] sm:$0xff] %v13318_v24  ;;  %15285 = vst [vmem:[#allocation9_spill] sm:$0xff] %v13321_v22  ;;  %v13328_v27 = vadd.f32 %v10003_v37, %v2899_v63  ;;  %10348 = vmatprep.mubr.msk.f32.mxu1 %vm741_vm2, %v5773_v40  ;;  %10497 = vmatprep.mubr.msk.f32.mxu0 %vm741_vm2, %v13004_v52  ;;  %v15292_v24 = vld [vmem:[#allocation34_spill] sm:$0xff]  ;;  %v15295_v40 = vld [vmem:[#allocation165_spill] sm:$0xff] }
 0x2ec   :  { %v3465_v59 = vpop.f32.mrf.mxu1  ;;  %v13334_v45 = vpop.f32.mrf.mxu0  ;;  %v2901_v22 = vadd.f32 %v15292_v24, %v2125_v41  ;;  %v5775_v52 = vld [vmem:[#allocation2 + $0xf1] sm:$0xff]  ;;  %v2130_v30 = vadd.f32 %v15295_v40, %v15294_v9  ;;  %v15296_v41 = vld [vmem:[#allocation36_spill] sm:$0xff]  ;;  %v15299_v11 = vld [vmem:[#allocation167_spill] sm:$0xff] }
 0x2ed   :  { %v13338_v17 = vadd.f32 %v3465_v59, %v2898_v13  ;;  %v2900_v24 = vadd.f32 %v15296_v41, %v2120_v19  ;;  %v5776_v9 = vld [vmem:[#allocation2 + $0xf9] sm:$0xff] }
 0x2ee   :  { %v10006_v63 = vpop.f32.mrf.mxu1  ;;  %v13341_v37 = vpop.f32.mrf.mxu0  ;;  %10349 = vmatmul.mubr.msk.f32.gmra.mxu1 %vm741_vm2, %v5774_v26  ;;  %10498 = vmatmul.mubr.msk.f32.gmra.mxu0 %vm741_vm2, %v13022_v32  ;;  %v2145_v26 = vadd.f32 %v15299_v11, %v15298_v12  ;;  %v15303_v19 = vld [vmem:[#allocation91_spill] sm:$0xff]  ;;  %v15307_v12 = vld [vmem:[#allocation93_spill] sm:$0xff]  ;;  %v15308_v11 = vld [vmem:[#allocation172_spill] sm:$0xff] }
 0x2ef   :  { %15291 = vst [vmem:[#allocation63_spill] sm:$0xff] %v13338_v17  ;;  %15293 = vst [vmem:[#allocation125_spill] sm:$0xff] %v13341_v37  ;;  %v13348_v47 = vadd.f32 %v10006_v63, %v2901_v22  ;;  %10351 = vmatprep.mubr.msk.f32.mxu1 %vm741_vm2, %v5775_v52  ;;  %10500 = vmatprep.mubr.msk.f32.mxu0 %vm741_vm2, %v13030_v39  ;;  %v15301_v17 = vld [vmem:[#allocation38_spill] sm:$0xff]  ;;  %v5777_v39 = vld [vmem:[#allocation2 + $0x109] sm:$0xff] }
 0x2f0   :  { %v3475_v13 = vpop.f32.mrf.mxu1  ;;  %v13354_v59 = vpop.f32.mrf.mxu0  ;;  %v2903_v37 = vadd.f32 %v15301_v17, %v2135_v51  ;;  %v15304_v52 = vld [vmem:[#allocation169_spill] sm:$0xff]  ;;  %v15305_v51 = vld [vmem:[#allocation40_spill] sm:$0xff] }
 0x2f1   :  { %15297 = vst [vmem:[#allocation3_spill] sm:$0xff] %v13354_v59  ;;  %v13358_v32 = vadd.f32 %v3475_v13, %v2900_v24  ;;  %v2140_v40 = vadd.f32 %v15304_v52, %v15303_v19  ;;  %v2902_v17 = vadd.f32 %v15305_v51, %v2130_v30  ;;  %v5778_v19 = vld [vmem:[#allocation2 + $0x111] sm:$0xff]  ;;  %v15312_v30 = vld [vmem:[#allocation95_spill] sm:$0xff] }
 0x2f2   :  { %v10009_v22 = vpop.f32.mrf.mxu1  ;;  %v13361_v63 = vpop.f32.mrf.mxu0  ;;  %10352 = vmatmul.mubr.msk.f32.gmra.mxu1 %vm741_vm2, %v5776_v9  ;;  %10501 = vmatmul.mubr.msk.f32.gmra.mxu0 %vm741_vm2, %v13048_v0  ;;  %v2155_v9 = vadd.f32 %v15308_v11, %v15307_v12  ;;  %v15316_v12 = vld [vmem:[#allocation97_spill] sm:$0xff]  ;;  %v15317_v11 = vld [vmem:[#allocation178_spill] sm:$0xff] }
 0x2f3   :  { %15300 = vst [vmem:[#allocation64_spill] sm:$0xff] %v13358_v32  ;;  %15302 = vst [vmem:[#allocation127_spill] sm:$0xff] %v13361_v63  ;;  %v13368_v41 = vadd.f32 %v10009_v22, %v2903_v37  ;;  %10354 = vmatprep.mubr.msk.f32.mxu1 %vm741_vm2, %v5777_v39  ;;  %10503 = vmatprep.mubr.msk.f32.mxu0 %vm741_vm2, %v13056_v36  ;;  %v15310_v32 = vld [vmem:[#allocation42_spill] sm:$0xff]  ;;  %v5779_v36 = vld [vmem:[#allocation2 + $0x121] sm:$0xff] }
 0x2f4   :  { %v3485_v24 = vpop.f32.mrf.mxu1  ;;  %v13374_v13 = vpop.f32.mrf.mxu0  ;;  %v2905_v63 = vadd.f32 %v15310_v32, %v2145_v26  ;;  %v15313_v39 = vld [vmem:[#allocation175_spill] sm:$0xff]  ;;  %v15314_v26 = vld [vmem:[#allocation44_spill] sm:$0xff] }
 0x2f5   :  { %15306 = vst [vmem:[#allocation104_spill] sm:$0xff] %v13374_v13  ;;  %v13378_v0 = vadd.f32 %v3485_v24, %v2902_v17  ;;  %v2150_v52 = vadd.f32 %v15313_v39, %v15312_v30  ;;  %v2904_v32 = vadd.f32 %v15314_v26, %v2140_v40  ;;  %v5780_v30 = vld [vmem:[#allocation2 + $0x129] sm:$0xff]  ;;  %v15321_v40 = vld [vmem:[#allocation99_spill] sm:$0xff] }
 0x2f6   :  { %v10012_v37 = vpop.f32.mrf.mxu1  ;;  %v13381_v22 = vpop.f32.mrf.mxu0  ;;  %10355 = vmatmul.mubr.msk.f32.gmra.mxu1 %vm741_vm2, %v5778_v19  ;;  %10504 = vmatmul.mubr.msk.f32.gmra.mxu0 %vm741_vm2, %v13074_v44  ;;  %v2165_v19 = vadd.f32 %v15317_v11, %v15316_v12  ;;  %v15325_v12 = vld [vmem:[#allocation101_spill] sm:$0xff]  ;;  %v15326_v11 = vld [vmem:[#allocation183_spill] sm:$0xff] }
 0x2f7   :  { %15309 = vst [vmem:[#allocation66_spill] sm:$0xff] %v13378_v0  ;;  %15311 = vst [vmem:[#allocation129_spill] sm:$0xff] %v13381_v22  ;;  %v13388_v51 = vadd.f32 %v10012_v37, %v2905_v63  ;;  %10357 = vmatprep.mubr.msk.f32.mxu1 %vm741_vm2, %v5779_v36  ;;  %10506 = vmatprep.mubr.msk.f32.mxu0 %vm741_vm2, %v13082_v29  ;;  %v15319_v0 = vld [vmem:[#allocation46_spill] sm:$0xff]  ;;  %v15322_v36 = vld [vmem:[#allocation180_spill] sm:$0xff] }
 0x2f8   :  { %v3495_v17 = vpop.f32.mrf.mxu1  ;;  %v13394_v24 = vpop.f32.mrf.mxu0  ;;  %v2907_v22 = vadd.f32 %v15319_v0, %v2155_v9  ;;  %v5781_v29 = vld [vmem:[#allocation2 + $0x139] sm:$0xff]  ;;  %v2160_v39 = vadd.f32 %v15322_v36, %v15321_v40  ;;  %v5782_v40 = vld [vmem:[#allocation2 + $0x141] sm:$0xff] }
 0x2f9   :  { %15315 = vst [vmem:[#allocation4_spill] sm:$0xff] %v13394_v24  ;;  %v13398_v44 = vadd.f32 %v3495_v17, %v2904_v32  ;;  %v15323_v9 = vld [vmem:[#allocation50_spill] sm:$0xff]  ;;  %v5816_v24 = vld [vmem:[#allocation2 + $0x309] sm:$0xff] }
 0x2fa   :  { %v10015_v63 = vpop.f32.mrf.mxu1  ;;  %v13401_v37 = vpop.f32.mrf.mxu0  ;;  %10358 = vmatmul.mubr.msk.f32.gmra.mxu1 %vm741_vm2, %v5780_v30  ;;  %10507 = vmatmul.mubr.msk.f32.gmra.mxu0 %vm741_vm2, %v13100_v16  ;;  %v2906_v0 = vadd.f32 %v15323_v9, %v2150_v52  ;;  %v2175_v30 = vadd.f32 %v15326_v11, %v15325_v12  ;;  %v15330_v52 = vld [vmem:[#allocation5_spill] sm:$0xff]  ;;  %v15334_v12 = vld [vmem:[#allocation103_spill] sm:$0xff] }
 0x2fb   :  { %15318 = vst [vmem:[#allocation67_spill] sm:$0xff] %v13398_v44  ;;  %15320 = vst [vmem:[#allocation131_spill] sm:$0xff] %v13401_v37  ;;  %v13408_v26 = vadd.f32 %v10015_v63, %v2907_v22  ;;  %10360 = vmatprep.mubr.msk.f32.mxu1 %vm741_vm2, %v5781_v29  ;;  %10509 = vmatprep.mubr.msk.f32.mxu0 %vm741_vm2, %v13108_v33  ;;  %v15328_v44 = vld [vmem:[#allocation112_spill] sm:$0xff]  ;;  %v5783_v33 = vld [vmem:[#allocation2 + $0x151] sm:$0xff] }
 0x2fc   :  { %v3505_v32 = vpop.f32.mrf.mxu1  ;;  %v13414_v17 = vpop.f32.mrf.mxu0  ;;  %v2909_v37 = vadd.f32 %v15328_v44, %v2165_v19  ;;  %v15331_v29 = vld [vmem:[#allocation186_spill] sm:$0xff]  ;;  %v15332_v19 = vld [vmem:[#allocation113_spill] sm:$0xff] }
 0x2fd   :  { %15324 = vst [vmem:[#allocation105_spill] sm:$0xff] %v13414_v17  ;;  %v13418_v16 = vadd.f32 %v3505_v32, %v2906_v0  ;;  %v2170_v36 = vadd.f32 %v15331_v29, %v15330_v52  ;;  %v2908_v44 = vadd.f32 %v15332_v19, %v2160_v39  ;;  %v15335_v11 = vld [vmem:[#allocation189_spill] sm:$0xff]  ;;  %v5784_v52 = vld [vmem:[#allocation2 + $0x159] sm:$0xff] }
 0x2fe   :  { %v10018_v22 = vpop.f32.mrf.mxu1  ;;  %v13421_v63 = vpop.f32.mrf.mxu0  ;;  %10361 = vmatmul.mubr.msk.f32.gmra.mxu1 %vm741_vm2, %v5782_v40  ;;  %10510 = vmatmul.mubr.msk.f32.gmra.mxu0 %vm741_vm2, %v13126_v6  ;;  %v2185_v40 = vadd.f32 %v15335_v11, %v15334_v12  ;;  %v15339_v39 = vld [vmem:[#allocation6_spill] sm:$0xff]  ;;  %v6531_v12 = vld [vmem:[#allocation2 + $0x34a] sm:$0xff]  ;;  %v15343_v11 = vld [vmem:[#allocation7_spill] sm:$0xff] }
 0x2ff   :  { %15327 = vst [vmem:[#allocation68_spill] sm:$0xff] %v13418_v16  ;;  %15329 = vst [vmem:[#allocation133_spill] sm:$0xff] %v13421_v63  ;;  %v13428_v9 = vadd.f32 %v10018_v22, %v2909_v37  ;;  %10363 = vmatprep.mubr.msk.f32.mxu1 %vm741_vm2, %v5783_v33  ;;  %10512 = vmatprep.mubr.msk.f32.mxu0 %vm741_vm2, %v13134_v20  ;;  %v15337_v16 = vld [vmem:[#allocation115_spill] sm:$0xff]  ;;  %v5785_v20 = vld [vmem:[#allocation2 + $0x169] sm:$0xff] }
 0x300   :  { %v3515_v0 = vpop.f32.mrf.mxu1  ;;  %v13434_v32 = vpop.f32.mrf.mxu0  ;;  %v2911_v63 = vadd.f32 %v15337_v16, %v2175_v30  ;;  %v15340_v33 = vld [vmem:[#allocation192_spill] sm:$0xff]  ;;  %v15341_v30 = vld [vmem:[#allocation57_spill] sm:$0xff] }
 0x301   :  { %15333 = vst [vmem:[#allocation106_spill] sm:$0xff] %v13434_v32  ;;  %v13438_v6 = vadd.f32 %v3515_v0, %v2908_v44  ;;  %v2180_v29 = vadd.f32 %v15340_v33, %v15339_v39  ;;  %v2910_v16 = vadd.f32 %v15341_v30, %v2170_v36  ;;  %v15348_v36 = vld [vmem:[#allocation8_spill] sm:$0xff] }
 0x302   :  { %v10021_v37 = vpop.f32.mrf.mxu1  ;;  %v13441_v22 = vpop.f32.mrf.mxu0  ;;  %10364 = vmatmul.mubr.msk.f32.gmra.mxu1 %vm741_vm2, %v5784_v52  ;;  %10513 = vmatmul.mubr.msk.f32.gmra.mxu0 %vm741_vm2, %v13151_v3  ;;  %v15344_v52 = vld [vmem:[#allocation195_spill] sm:$0xff]  ;;  %v15355_v32 = vld [vmem:[#allocation120_spill] sm:$0xff] }
 0x303   :  { %15336 = vst [vmem:[#allocation69_spill] sm:$0xff] %v13438_v6  ;;  %15338 = vst [vmem:[#allocation135_spill] sm:$0xff] %v13441_v22  ;;  %v13448_v19 = vadd.f32 %v10021_v37, %v2911_v63  ;;  %10366 = vmatprep.mubr.msk.f32.mxu1 %vm741_vm2, %v5785_v20  ;;  %10515 = vmatprep.mubr.msk.f32.mxu0 %vm741_vm2, %v13158_v31  ;;  %v2195_v3 = vadd.f32 %v15344_v52, %v15343_v11  ;;  %v15346_v22 = vld [vmem:[#allocation117_spill] sm:$0xff]  ;;  %v5787_v31 = vld [vmem:[#allocation2 + $0x181] sm:$0xff] }
 0x304   :  { %v3525_v44 = vpop.f32.mrf.mxu1  ;;  %v13454_v0 = vpop.f32.mrf.mxu0  ;;  %v2913_v39 = vadd.f32 %v15346_v22, %v2185_v40  ;;  %v5786_v63 = vld [vmem:[#allocation2 + $0x171] sm:$0xff]  ;;  %v5789_v52 = vld [vmem:[#allocation2 + $0x199] sm:$0xff] }
 0x305   :  { %15342 = vst [vmem:[#allocation108_spill] sm:$0xff] %v13454_v0  ;;  %v13458_v6 = vadd.f32 %v3525_v44, %v2910_v16  ;;  %v15349_v20 = vld [vmem:[#allocation198_spill] sm:$0xff] }
 0x306   :  { %v10024_v37 = vpop.f32.mrf.mxu1  ;;  %v13461_v33 = vpop.f32.mrf.mxu0  ;;  %10367 = vmatmul.mubr.msk.f32.gmra.mxu1 %vm741_vm2, %v5786_v63  ;;  %10516 = vmatmul.mubr.msk.f32.gmra.mxu0 %vm741_vm2, %v13176_v60  ;;  %v2190_v30 = vadd.f32 %v15349_v20, %v15348_v36  ;;  %v15350_v16 = vld [vmem:[#allocation118_spill] sm:$0xff]  ;;  %v15352_v63 = vld [vmem:[#allocation107_spill] sm:$0xff]  ;;  %v2915_v36 = vadd.f32 %v15355_v32, %v2195_v3 }
 0x307   :  { %15345 = vst [vmem:[#allocation70_spill] sm:$0xff] %v13458_v6  ;;  %15347 = vst [vmem:[#allocation137_spill] sm:$0xff] %v13461_v33  ;;  %v13468_v0 = vadd.f32 %v10024_v37, %v2913_v39  ;;  %10369 = vmatprep.mubr.msk.f32.mxu1 %vm741_vm2, %v5787_v31  ;;  %v2912_v44 = vadd.f32 %v15350_v16, %v2180_v29  ;;  %10518 = vmatprep.mubr.msk.f32.mxu0 %vm741_vm2, %v6531_v12  ;;  %v6532_v40 = vld [vmem:[#allocation2 + $0x352] sm:$0xff]  ;;  %v15353_v6 = vld [vmem:[#allocation200_spill] sm:$0xff] }
 0x308   :  { %v3535_v22 = vpop.f32.mrf.mxu1  ;;  %v13473_v11 = vpop.f32.mrf.mxu0  ;;  %v2205_v60 = vadd.f32 %v15353_v6, %v15352_v63  ;;  %v5788_v39 = vld [vmem:[#allocation2 + $0x189] sm:$0xff]  ;;  %v15357_v29 = vld [vmem:[#allocation10_spill] sm:$0xff]  ;;  %v5790_v6 = vld [vmem:[#allocation2 + $0x1a1] sm:$0xff] }
 0x309   :  { %15351 = vst [vmem:[#allocation109_spill] sm:$0xff] %v13473_v11  ;;  %v13477_v33 = vadd.f32 %v3535_v22, %v2912_v44  ;;  %v2200_v12 = vadd.f32 %v12777_v46, %v15357_v29  ;;  %v15358_v16 = vld [vmem:[#allocation122_spill] sm:$0xff]  ;;  %v15361_v22 = vld [vmem:[#allocation124_spill] sm:$0xff] }
 0x30a   :  { %v10027_v37 = vpop.f32.mrf.mxu1  ;;  %v13480_v20 = vpop.f32.mrf.mxu0  ;;  %10370 = vmatmul.mubr.msk.f32.gmra.mxu1 %vm741_vm2, %v5788_v39  ;;  %10519 = vmatmul.mubr.msk.f32.gmra.mxu0 %vm741_vm2, %v6532_v40  ;;  %v2914_v11 = vadd.f32 %v15358_v16, %v2190_v30  ;;  %v2917_v63 = vadd.f32 %v15361_v22, %v2205_v60  ;;  %v5791_v46 = vld [vmem:[#allocation2 + $0x1e1] sm:$0xff]  ;;  %v15363_v30 = vld [vmem:[#allocation126_spill] sm:$0xff]  ;;  %v5792_v16 = vld [vmem:[#allocation2 + $0x1e9] sm:$0xff] }
 0x30b   :  { %15354 = vst [vmem:[#allocation71_spill] sm:$0xff] %v13477_v33  ;;  %15356 = vst [vmem:[#allocation139_spill] sm:$0xff] %v13480_v20  ;;  %v13486_v31 = vadd.f32 %v10027_v37, %v2915_v36  ;;  %10372 = vmatprep.mubr.msk.f32.mxu1 %vm741_vm2, %v5789_v52  ;;  %v2916_v52 = vadd.f32 %v15363_v30, %v2200_v12  ;;  %v15368_v12 = vld [vmem:[#allocation130_spill] sm:$0xff] }
 0x30c   :  { %v3545_v44 = vpop.f32.mrf.mxu1  ;;  %v13490_v32 = vpop.f32.mrf.mxu0  ;;  %v5814_v20 = vld [vmem:[#allocation2 + $0x2f1] sm:$0xff] }
 0x30d   :  { %15359 = vst [vmem:[#allocation110_spill] sm:$0xff] %v13490_v32  ;;  %v13492_v3 = vadd.f32 %v3545_v44, %v2914_v11  ;;  %v15366_v11 = vld [vmem:[#allocation128_spill] sm:$0xff] }
 0x30e   :  { %v10030_v39 = vpop.f32.mrf.mxu1  ;;  %v13495_v33 = vpop.f32.mrf.mxu0  ;;  %10373 = vmatmul.mubr.msk.f32.gmra.mxu1 %vm741_vm2, %v5790_v6  ;;  %v4275_v60 = vadd.f32 %v15366_v11, %v12793_v57  ;;  %v5793_v6 = vld [vmem:[#allocation2 + $0x1f9] sm:$0xff]  ;;  %v15370_v57 = vld [vmem:[#allocation132_spill] sm:$0xff] }
 0x30f   :  { %15360 = vst [vmem:[#allocation72_spill] sm:$0xff] %v13492_v3  ;;  %15362 = vst [vmem:[#allocation141_spill] sm:$0xff] %v13495_v33  ;;  %v13498_v40 = vadd.f32 %v10030_v39, %v2917_v63  ;;  %10375 = vmatprep.mubr.msk.f32.mxu1 %vm741_vm2, %v5791_v46  ;;  %v4274_v39 = vadd.f32 %v15368_v12, %v12804_v34  ;;  %v5794_v11 = vld [vmem:[#allocation2 + $0x201] sm:$0xff]  ;;  %v15372_v34 = vld [vmem:[#allocation134_spill] sm:$0xff] }
 0x310   :  { %v3555_v36 = vpop.f32.mrf.mxu1  ;;  %v13502_v37 = vpop.f32.mrf.mxu0  ;;  %v5812_v33 = vld [vmem:[#allocation2 + $0x2d9] sm:$0xff] }
 0x311   :  { %15364 = vst [vmem:[#allocation12_spill] sm:$0xff] %v13502_v37  ;;  %v13504_v29 = vadd.f32 %v3555_v36, %v2916_v52  ;;  %v4277_v36 = vadd.f32 %v15370_v57, %v12819_v1  ;;  %v15374_v1 = vld [vmem:[#allocation136_spill] sm:$0xff]  ;;  %v5796_v57 = vld [vmem:[#allocation2 + $0x219] sm:$0xff] }
 0x312   :  { %v10133_v44 = vpop.f32.mrf.mxu1  ;;  %v13508_v22 = vpop.f32.mrf.mxu0  ;;  %10376 = vmatmul.mubr.msk.f32.gmra.mxu1 %vm741_vm2, %v5792_v16 }
 0x313   :  { %15365 = vst [vmem:[#allocation73_spill] sm:$0xff] %v13504_v29  ;;  %15367 = vst [vmem:[#allocation143_spill] sm:$0xff] %v13508_v22  ;;  %v13511_v63 = vadd.f32 %v10133_v44, %v4275_v60  ;;  %10378 = vmatprep.mubr.msk.f32.mxu1 %vm741_vm2, %v5793_v6  ;;  %v5795_v60 = vld [vmem:[#allocation2 + $0x211] sm:$0xff]  ;;  %v4276_v44 = vadd.f32 %v15372_v34, %v12830_v58  ;;  %v5808_v22 = vld [vmem:[#allocation2 + $0x2a9] sm:$0xff] }
 0x314   :  { %v4665_v46 = vpop.f32.mrf.mxu1  ;;  %v13516_v30 = vpop.f32.mrf.mxu0  ;;  %v15376_v58 = vld [vmem:[#allocation138_spill] sm:$0xff] }
 0x315   :  { %15369 = vst [vmem:[#allocation14_spill] sm:$0xff] %v13516_v30  ;;  %v13518_v52 = vadd.f32 %v4665_v46, %v4274_v39  ;;  %v4279_v46 = vadd.f32 %v15374_v1, %v12845_v8  ;;  %v15378_v8 = vld [vmem:[#allocation140_spill] sm:$0xff]  ;;  %v5798_v1 = vld [vmem:[#allocation2 + $0x231] sm:$0xff] }
 0x316   :  { %v10136_v29 = vpop.f32.mrf.mxu1  ;;  %v13522_v3 = vpop.f32.mrf.mxu0  ;;  %10379 = vmatmul.mubr.msk.f32.gmra.mxu1 %vm741_vm2, %v5794_v11  ;;  %v4278_v11 = vadd.f32 %v15376_v58, %v12856_v15  ;;  %v15380_v15 = vld [vmem:[#allocation142_spill] sm:$0xff] }
 0x317   :  { %15371 = vst [vmem:[#allocation74_spill] sm:$0xff] %v13522_v3  ;;  %v13525_v16 = vadd.f32 %v10136_v29, %v4277_v36  ;;  %10381 = vmatprep.mubr.msk.f32.mxu1 %vm741_vm2, %v5795_v60  ;;  %v5797_v29 = vld [vmem:[#allocation2 + $0x229] sm:$0xff] }
 0x318   :  { %v4675_v6 = vpop.f32.mrf.mxu1  ;;  %v13530_v12 = vpop.f32.mrf.mxu0 }
 0x319   :  { %15373 = vst [vmem:[#allocation145_spill] sm:$0xff] %v13530_v12  ;;  %v13532_v39 = vadd.f32 %v4675_v6, %v4276_v44  ;;  %v4281_v6 = vadd.f32 %v15378_v8, %v12876_v35  ;;  %v15382_v35 = vld [vmem:[#allocation144_spill] sm:$0xff] }
 0x31a   :  { %v10139_v3 = vpop.f32.mrf.mxu1  ;;  %v13536_v30 = vpop.f32.mrf.mxu0  ;;  %10382 = vmatmul.mubr.msk.f32.gmra.mxu1 %vm741_vm2, %v5796_v57  ;;  %v4280_v57 = vadd.f32 %v15380_v15, %v12889_v2  ;;  %v5800_v8 = vld [vmem:[#allocation2 + $0x249] sm:$0xff]  ;;  %v15384_v2 = vld [vmem:[#allocation146_spill] sm:$0xff] }
 0x31b   :  { %15375 = vst [vmem:[#allocation16_spill] sm:$0xff] %v13536_v30  ;;  %v13539_v36 = vadd.f32 %v10139_v3, %v4279_v46  ;;  %10384 = vmatprep.mubr.msk.f32.mxu1 %vm741_vm2, %v5797_v29  ;;  %v5799_v3 = vld [vmem:[#allocation2 + $0x241] sm:$0xff] }
 0x31c   :  { %v4685_v60 = vpop.f32.mrf.mxu1  ;;  %v13544_v34 = vpop.f32.mrf.mxu0 }
 0x31d   :  { %15377 = vst [vmem:[#allocation75_spill] sm:$0xff] %v13544_v34  ;;  %v13546_v44 = vadd.f32 %v4685_v60, %v4278_v11  ;;  %v4283_v60 = vadd.f32 %v15382_v35, %v12904_v7  ;;  %v15386_v7 = vld [vmem:[#allocation148_spill] sm:$0xff] }
 0x31e   :  { %v10142_v30 = vpop.f32.mrf.mxu1  ;;  %v13550_v12 = vpop.f32.mrf.mxu0  ;;  %10385 = vmatmul.mubr.msk.f32.gmra.mxu1 %vm741_vm2, %v5798_v1  ;;  %v4282_v1 = vadd.f32 %v15384_v2, %v12915_v14  ;;  %v5802_v35 = vld [vmem:[#allocation2 + $0x261] sm:$0xff]  ;;  %v15388_v14 = vld [vmem:[#allocation150_spill] sm:$0xff] }
 0x31f   :  { %15379 = vst [vmem:[#allocation147_spill] sm:$0xff] %v13550_v12  ;;  %v13553_v46 = vadd.f32 %v10142_v30, %v4281_v6  ;;  %10387 = vmatprep.mubr.msk.f32.mxu1 %vm741_vm2, %v5799_v3  ;;  %v5801_v30 = vld [vmem:[#allocation2 + $0x259] sm:$0xff] }
 0x320   :  { %v4695_v29 = vpop.f32.mrf.mxu1  ;;  %v13558_v58 = vpop.f32.mrf.mxu0 }
 0x321   :  { %15381 = vst [vmem:[#allocation18_spill] sm:$0xff] %v13558_v58  ;;  %v13560_v11 = vadd.f32 %v4695_v29, %v4280_v57  ;;  %v4285_v29 = vadd.f32 %v15386_v7, %v12930_v21  ;;  %v15390_v21 = vld [vmem:[#allocation152_spill] sm:$0xff]  ;;  %v5804_v7 = vld [vmem:[#allocation2 + $0x279] sm:$0xff] }
 0x322   :  { %v10145_v12 = vpop.f32.mrf.mxu1  ;;  %v13564_v34 = vpop.f32.mrf.mxu0  ;;  %10388 = vmatmul.mubr.msk.f32.gmra.mxu1 %vm741_vm2, %v5800_v8  ;;  %v4284_v8 = vadd.f32 %v15388_v14, %v12941_v10  ;;  %v15392_v10 = vld [vmem:[#allocation154_spill] sm:$0xff] }
 0x323   :  { %15383 = vst [vmem:[#allocation76_spill] sm:$0xff] %v13564_v34  ;;  %v13567_v6 = vadd.f32 %v10145_v12, %v4283_v60  ;;  %10390 = vmatprep.mubr.msk.f32.mxu1 %vm741_vm2, %v5801_v30  ;;  %v5803_v12 = vld [vmem:[#allocation2 + $0x271] sm:$0xff] }
 0x324   :  { %v4705_v3 = vpop.f32.mrf.mxu1  ;;  %v13572_v15 = vpop.f32.mrf.mxu0 }
 0x325   :  { %15385 = vst [vmem:[#allocation149_spill] sm:$0xff] %v13572_v15  ;;  %v13574_v57 = vadd.f32 %v4705_v3, %v4282_v1  ;;  %v4287_v3 = vadd.f32 %v15390_v21, %v12956_v53  ;;  %v15394_v53 = vld [vmem:[#allocation156_spill] sm:$0xff]  ;;  %v5806_v21 = vld [vmem:[#allocation2 + $0x291] sm:$0xff] }
 0x326   :  { %v10148_v34 = vpop.f32.mrf.mxu1  ;;  %v13578_v58 = vpop.f32.mrf.mxu0  ;;  %10391 = vmatmul.mubr.msk.f32.gmra.mxu1 %vm741_vm2, %v5802_v35  ;;  %v4286_v35 = vadd.f32 %v15392_v10, %v12967_v55  ;;  %v15396_v55 = vld [vmem:[#allocation43_spill] sm:$0xff] }
 0x327   :  { %15387 = vst [vmem:[#allocation20_spill] sm:$0xff] %v13578_v58  ;;  %v13581_v60 = vadd.f32 %v10148_v34, %v4285_v29  ;;  %10393 = vmatprep.mubr.msk.f32.mxu1 %vm741_vm2, %v5803_v12  ;;  %v5805_v34 = vld [vmem:[#allocation2 + $0x289] sm:$0xff] }
 0x328   :  { %v4715_v30 = vpop.f32.mrf.mxu1  ;;  %v13586_v2 = vpop.f32.mrf.mxu0 }
 0x329   :  { %15389 = vst [vmem:[#allocation77_spill] sm:$0xff] %v13586_v2  ;;  %v13588_v1 = vadd.f32 %v4715_v30, %v4284_v8  ;;  %v4289_v30 = vadd.f32 %v15394_v53, %v12982_v18  ;;  %v15399_v18 = vld [vmem:[#allocation82_spill] sm:$0xff]  ;;  %v15400_v53 = vld [vmem:[#allocation160_spill] sm:$0xff] }
 0x32a   :  { %v10151_v58 = vpop.f32.mrf.mxu1  ;;  %v13592_v15 = vpop.f32.mrf.mxu0  ;;  %10394 = vmatmul.mubr.msk.f32.gmra.mxu1 %vm741_vm2, %v5804_v7  ;;  %v15397_v7 = vld [vmem:[#allocation158_spill] sm:$0xff] }
 0x32b   :  { %15391 = vst [vmem:[#allocation151_spill] sm:$0xff] %v13592_v15  ;;  %v13595_v29 = vadd.f32 %v10151_v58, %v4287_v3  ;;  %10396 = vmatprep.mubr.msk.f32.mxu1 %vm741_vm2, %v5805_v34  ;;  %v5807_v58 = vld [vmem:[#allocation2 + $0x2a1] sm:$0xff]  ;;  %v4288_v34 = vadd.f32 %v15397_v7, %v15396_v55  ;;  %v15403_v55 = vld [vmem:[#allocation174_spill] sm:$0xff] }
 0x32c   :  { %v4725_v12 = vpop.f32.mrf.mxu1  ;;  %v13600_v14 = vpop.f32.mrf.mxu0  ;;  %v15404_v7 = vld [vmem:[#allocation164_spill] sm:$0xff] }
 0x32d   :  { %15393 = vst [vmem:[#allocation22_spill] sm:$0xff] %v13600_v14  ;;  %v13602_v8 = vadd.f32 %v4725_v12, %v4286_v35  ;;  %v4291_v14 = vadd.f32 %v15400_v53, %v15399_v18 }
 0x32e   :  { %v10154_v15 = vpop.f32.mrf.mxu1  ;;  %v13606_v2 = vpop.f32.mrf.mxu0  ;;  %10397 = vmatmul.mubr.msk.f32.gmra.mxu1 %vm741_vm2, %v5806_v21 }
 0x32f   :  { %15395 = vst [vmem:[#allocation78_spill] sm:$0xff] %v13606_v2  ;;  %v13609_v3 = vadd.f32 %v10154_v15, %v4289_v30  ;;  %10399 = vmatprep.mubr.msk.f32.mxu1 %vm741_vm2, %v5807_v58  ;;  %v5809_v15 = vld [vmem:[#allocation2 + $0x2b9] sm:$0xff] }
 0x330   :  { %v4735_v10 = vpop.f32.mrf.mxu1  ;;  %v13614_v35 = vpop.f32.mrf.mxu0 }
 0x331   :  { %15398 = vst [vmem:[#allocation153_spill] sm:$0xff] %v13614_v35  ;;  %v13616_v12 = vadd.f32 %v4735_v10, %v4288_v34  ;;  %v4293_v34 = vadd.f32 %v15404_v7, %v15403_v55  ;;  %v5810_v10 = vld [vmem:[#allocation2 + $0x2c1] sm:$0xff] }
 0x332   :  { %v10157_v2 = vpop.f32.mrf.mxu1  ;;  %v13620_v37 = vpop.f32.mrf.mxu0  ;;  %10400 = vmatmul.mubr.msk.f32.gmra.mxu1 %vm741_vm2, %v5808_v22 }
 0x333   :  { %15401 = vst [vmem:[#allocation24_spill] sm:$0xff] %v13620_v37  ;;  %v13623_v30 = vadd.f32 %v10157_v2, %v4291_v14  ;;  %10402 = vmatprep.mubr.msk.f32.mxu1 %vm741_vm2, %v5809_v15  ;;  %v5811_v37 = vld [vmem:[#allocation2 + $0x2d1] sm:$0xff] }
 0x334   :  { %v13626_v21 = vpop.f32.mrf.mxu1  ;;  %v13628_v58 = vpop.f32.mrf.mxu0  ;;  %v15409_v15 = vld [vmem:[#allocation86_spill] sm:$0xff] }
 0x335   :  { %15402 = vst [vmem:[#allocation79_spill] sm:$0xff] %v13628_v58  ;;  %v15410_v58 = vld [vmem:[#allocation168_spill] sm:$0xff] }
 0x336   :  { %v10160_v18 = vpop.f32.mrf.mxu1  ;;  %v13632_v53 = vpop.f32.mrf.mxu0  ;;  %10403 = vmatmul.mubr.msk.f32.gmra.mxu1 %vm741_vm2, %v5810_v10  ;;  %v4295_v35 = vadd.f32 %v15410_v58, %v15409_v15 }
 0x337   :  { %15405 = vst [vmem:[#allocation155_spill] sm:$0xff] %v13632_v53  ;;  %v13635_v22 = vadd.f32 %v10160_v18, %v4293_v34  ;;  %10405 = vmatprep.mubr.msk.f32.mxu1 %vm741_vm2, %v5811_v37  ;;  %v5813_v53 = vld [vmem:[#allocation2 + $0x2e9] sm:$0xff] }
 0x338   :  { %v13638_v2 = vpop.f32.mrf.mxu1  ;;  %v13640_v14 = vpop.f32.mrf.mxu0  ;;  %v15415_v18 = vld [vmem:[#allocation88_spill] sm:$0xff] }
 0x339   :  { %15406 = vst [vmem:[#allocation26_spill] sm:$0xff] %v13635_v22  ;;  %15407 = vst [vmem:[#allocation80_spill] sm:$0xff] %v13638_v2 }
 0x33a   :  { %15408 = vst [vmem:[#allocation157_spill] sm:$0xff] %v13640_v14  ;;  %v10163_v55 = vpop.f32.mrf.mxu1  ;;  %v13644_v7 = vpop.f32.mrf.mxu0  ;;  %10406 = vmatmul.mubr.msk.f32.gmra.mxu1 %vm741_vm2, %v5812_v33  ;;  %v15416_v14 = vld [vmem:[#allocation173_spill] sm:$0xff] }
 0x33b   :  { %15411 = vst [vmem:[#allocation28_spill] sm:$0xff] %v13644_v7  ;;  %v13647_v10 = vadd.f32 %v10163_v55, %v4295_v35  ;;  %10408 = vmatprep.mubr.msk.f32.mxu1 %vm741_vm2, %v5813_v53  ;;  %v4297_v32 = vadd.f32 %v15416_v14, %v15415_v18  ;;  %v5815_v7 = vld [vmem:[#allocation2 + $0x301] sm:$0xff]  ;;  %v15421_v55 = vld [vmem:[#allocation182_spill] sm:$0xff] }
 0x33c   :  { %v13650_v34 = vpop.f32.mrf.mxu1  ;;  %v13652_v37 = vpop.f32.mrf.mxu0 }
 0x33d   :  { %15412 = vst [vmem:[#allocation81_spill] sm:$0xff] %v13647_v10  ;;  %15413 = vst [vmem:[#allocation159_spill] sm:$0xff] %v13650_v34 }
 0x33e   :  { %15414 = vst [vmem:[#allocation30_spill] sm:$0xff] %v13652_v37  ;;  %v10166_v58 = vpop.f32.mrf.mxu1  ;;  %v13656_v15 = vpop.f32.mrf.mxu0  ;;  %10409 = vmatmul.mubr.msk.f32.gmra.mxu1 %vm741_vm2, %v5814_v20  ;;  %v15422_v37 = vld [vmem:[#allocation179_spill] sm:$0xff] }
 0x33f   :  { %15417 = vst [vmem:[#allocation83_spill] sm:$0xff] %v13656_v15  ;;  %v13659_v33 = vadd.f32 %v10166_v58, %v4297_v32  ;;  %10411 = vmatprep.mubr.msk.f32.mxu1 %vm741_vm2, %v5815_v7  ;;  %v4299_v17 = vadd.f32 %v15422_v37, %v15421_v55  ;;  %v5817_v15 = vld [vmem:[#allocation2 + $0x319] sm:$0xff]  ;;  %v15427_v58 = vld [vmem:[#allocation92_spill] sm:$0xff] }
 0x340   :  { %v13662_v35 = vpop.f32.mrf.mxu1  ;;  %v13664_v53 = vpop.f32.mrf.mxu0 }
 0x341   :  { %15418 = vst [vmem:[#allocation161_spill] sm:$0xff] %v13659_v33  ;;  %15419 = vst [vmem:[#allocation32_spill] sm:$0xff] %v13662_v35  ;;  %v5818_v35 = vld [vmem:[#allocation2 + $0x321] sm:$0xff] }
 0x342   :  { %15420 = vst [vmem:[#allocation85_spill] sm:$0xff] %v13664_v53  ;;  %v10169_v14 = vpop.f32.mrf.mxu1  ;;  %v13668_v18 = vpop.f32.mrf.mxu0  ;;  %10412 = vmatmul.mubr.msk.f32.gmra.mxu1 %vm741_vm2, %v5816_v24  ;;  %v15428_v53 = vld [vmem:[#allocation184_spill] sm:$0xff] }
 0x343   :  { %15423 = vst [vmem:[#allocation163_spill] sm:$0xff] %v13668_v18  ;;  %v13671_v20 = vadd.f32 %v10169_v14, %v4299_v17  ;;  %10414 = vmatprep.mubr.msk.f32.mxu1 %vm741_vm2, %v5817_v15  ;;  %v4301_v33 = vadd.f32 %v15428_v53, %v15427_v58  ;;  %v5819_v18 = vld [vmem:[#allocation2 + $0x331] sm:$0xff]  ;;  %v5821_v14 = vld [vmem:[#allocation2 + $0x349] sm:$0xff]  ;;  %v5820_v53 = vld [vmem:[#allocation2 + $0x339] sm:$0xff] }
 0x344   :  { %v13674_v32 = vpop.f32.mrf.mxu1  ;;  %v13676_v7 = vpop.f32.mrf.mxu0 }
 0x345   :  { %15424 = vst [vmem:[#allocation34_spill] sm:$0xff] %v13671_v20  ;;  %15425 = vst [vmem:[#allocation87_spill] sm:$0xff] %v13674_v32  ;;  %v15434_v20 = vld [vmem:[#allocation190_spill] sm:$0xff] }
 0x346   :  { %15426 = vst [vmem:[#allocation165_spill] sm:$0xff] %v13676_v7  ;;  %v10172_v37 = vpop.f32.mrf.mxu1  ;;  %v13680_v55 = vpop.f32.mrf.mxu0  ;;  %10415 = vmatmul.mubr.msk.f32.gmra.mxu1 %vm741_vm2, %v5818_v35  ;;  %v15433_v7 = vld [vmem:[#allocation188_spill] sm:$0xff] }
 0x347   :  { %15429 = vst [vmem:[#allocation36_spill] sm:$0xff] %v13680_v55  ;;  %v13683_v24 = vadd.f32 %v10172_v37, %v4301_v33  ;;  %10417 = vmatprep.mubr.msk.f32.mxu1 %vm741_vm2, %v5819_v18  ;;  %v4303_v32 = vadd.f32 %v15434_v20, %v15433_v7  ;;  %v5822_v33 = vld [vmem:[#allocation2 + $0x351] sm:$0xff] }
 0x348   :  { %v13686_v17 = vpop.f32.mrf.mxu1  ;;  %v13688_v15 = vpop.f32.mrf.mxu0 }
 0x349   :  { %15430 = vst [vmem:[#allocation89_spill] sm:$0xff] %v13683_v24  ;;  %15431 = vst [vmem:[#allocation167_spill] sm:$0xff] %v13686_v17 }
 0x34a   :  { %15432 = vst [vmem:[#allocation38_spill] sm:$0xff] %v13688_v15  ;;  %v10175_v58 = vpop.f32.mrf.mxu1  ;;  %v13692_v10 = vpop.f32.mrf.mxu0  ;;  %10418 = vmatmul.mubr.msk.f32.gmra.mxu1 %vm741_vm2, %v5820_v53  ;;  %v15439_v15 = vld [vmem:[#allocation196_spill] sm:$0xff] }
 0x34b   :  { %15435 = vst [vmem:[#allocation91_spill] sm:$0xff] %v13692_v10  ;;  %v13695_v35 = vadd.f32 %v10175_v58, %v4303_v32  ;;  %10420 = vmatprep.mubr.msk.f32.mxu1 %vm741_vm2, %v5821_v14  ;;  %v4305_v55 = vadd.f32 %v15439_v15, %v13186_v38  ;;  %v15442_v14 = vld [vmem:[#allocation201_spill] sm:$0xff] }
 0x34c   :  { %v13698_v18 = vpop.f32.mrf.mxu1  ;;  %v13700_v37 = vpop.f32.mrf.mxu0  ;;  %v4307_v58 = vadd.f32 %v15442_v14, %v13206_v28  ;;  %v15448_v14 = vld [vmem:[#allocation15_spill] sm:$0xff] }
 0x34d   :  { %15436 = vst [vmem:[#allocation169_spill] sm:$0xff] %v13695_v35  ;;  %15437 = vst [vmem:[#allocation40_spill] sm:$0xff] %v13698_v18 }
 0x34e   :  { %15438 = vst [vmem:[#allocation93_spill] sm:$0xff] %v13700_v37  ;;  %v10178_v24 = vpop.f32.mrf.mxu1  ;;  %10421 = vmatmul.mubr.msk.f32.gmra.mxu1 %vm741_vm2, %v5822_v33  ;;  %v13705_v20 = vpop.f32.mrf.mxu0  ;;  %v15445_v33 = vld [vmem:[#allocation13_spill] sm:$0xff] }
 0x34f   :  { %v13707_v7 = vadd.f32 %v10178_v24, %v4305_v55  ;;  %v4309_v55 = vadd.f32 %v15445_v33, %v13228_v62  ;;  %v15451_v33 = vld [vmem:[#allocation19_spill] sm:$0xff] }
 0x350   :  { %v13709_v53 = vpop.f32.mrf.mxu1  ;;  %v13711_v32 = vpop.f32.mrf.mxu0 }
 0x351   :  { %15440 = vst [vmem:[#allocation172_spill] sm:$0xff] %v13707_v7  ;;  %15441 = vst [vmem:[#allocation42_spill] sm:$0xff] %v13709_v53 }
 0x352   :  { %v10181_v10 = vpop.f32.mrf.mxu1  ;;  %v13715_v35 = vpop.f32.mrf.mxu0 }
 0x353   :  { %v13717_v37 = vadd.f32 %v10181_v10, %v4307_v58  ;;  %v4311_v10 = vadd.f32 %v15448_v14, %v13248_v48  ;;  %v15454_v14 = vld [vmem:[#allocation23_spill] sm:$0xff] }
 0x354   :  { %v13719_v38 = vpop.f32.mrf.mxu1  ;;  %v13721_v15 = vpop.f32.mrf.mxu0 }
 0x355   :  { %15443 = vst [vmem:[#allocation95_spill] sm:$0xff] %v13717_v37  ;;  %15444 = vst [vmem:[#allocation175_spill] sm:$0xff] %v13719_v38 }
 0x356   :  { %v10184_v24 = vpop.f32.mrf.mxu1  ;;  %v13725_v7 = vpop.f32.mrf.mxu0 }
 0x357   :  { %v13727_v53 = vadd.f32 %v10184_v24, %v4309_v55  ;;  %v4313_v55 = vadd.f32 %v15451_v33, %v13268_v54  ;;  %v15457_v33 = vld [vmem:[#allocation27_spill] sm:$0xff] }
 0x358   :  { %v13729_v18 = vpop.f32.mrf.mxu1  ;;  %v13731_v28 = vpop.f32.mrf.mxu0 }
 0x359   :  { %15446 = vst [vmem:[#allocation44_spill] sm:$0xff] %v13727_v53  ;;  %15447 = vst [vmem:[#allocation97_spill] sm:$0xff] %v13729_v18 }
 0x35a   :  { %v10187_v58 = vpop.f32.mrf.mxu1  ;;  %v13735_v37 = vpop.f32.mrf.mxu0 }
 0x35b   :  { %v13737_v38 = vadd.f32 %v10187_v58, %v4311_v10  ;;  %v4315_v10 = vadd.f32 %v15454_v14, %v13288_v50  ;;  %v15460_v14 = vld [vmem:[#allocation31_spill] sm:$0xff] }
 0x35c   :  { %v13739_v17 = vpop.f32.mrf.mxu1  ;;  %v13741_v62 = vpop.f32.mrf.mxu0 }
 0x35d   :  { %15449 = vst [vmem:[#allocation178_spill] sm:$0xff] %v13737_v38  ;;  %15450 = vst [vmem:[#allocation46_spill] sm:$0xff] %v13739_v17 }
 0x35e   :  { %v10190_v24 = vpop.f32.mrf.mxu1  ;;  %v13745_v53 = vpop.f32.mrf.mxu0 }
 0x35f   :  { %v13747_v18 = vadd.f32 %v10190_v24, %v4313_v55  ;;  %v4317_v55 = vadd.f32 %v15457_v33, %v13308_v56  ;;  %v15464_v33 = vld [vmem:[#allocation35_spill] sm:$0xff] }
 0x360   :  { %v13749_v13 = vpop.f32.mrf.mxu1  ;;  %v13751_v48 = vpop.f32.mrf.mxu0 }
 0x361   :  { %15452 = vst [vmem:[#allocation99_spill] sm:$0xff] %v13747_v18  ;;  %15453 = vst [vmem:[#allocation180_spill] sm:$0xff] %v13749_v13 }
 0x362   :  { %v10193_v58 = vpop.f32.mrf.mxu1  ;;  %v13755_v38 = vpop.f32.mrf.mxu0 }
 0x363   :  { %v13757_v17 = vadd.f32 %v10193_v58, %v4315_v10  ;;  %v4319_v10 = vadd.f32 %v15460_v14, %v13328_v27  ;;  %v15468_v14 = vld [vmem:[#allocation39_spill] sm:$0xff] }
 0x364   :  { %v13759_v34 = vpop.f32.mrf.mxu1  ;;  %v13761_v54 = vpop.f32.mrf.mxu0 }
 0x365   :  { %15455 = vst [vmem:[#allocation50_spill] sm:$0xff] %v13757_v17  ;;  %15456 = vst [vmem:[#allocation101_spill] sm:$0xff] %v13759_v34 }
 0x366   :  { %v10196_v24 = vpop.f32.mrf.mxu1  ;;  %v13765_v18 = vpop.f32.mrf.mxu0 }
 0x367   :  { %v13767_v13 = vadd.f32 %v10196_v24, %v4317_v55  ;;  %v4321_v55 = vadd.f32 %v15464_v33, %v13348_v47  ;;  %v15472_v33 = vld [vmem:[#allocation45_spill] sm:$0xff] }
 0x368   :  { %v13769_v22 = vpop.f32.mrf.mxu1  ;;  %v13771_v50 = vpop.f32.mrf.mxu0 }
 0x369   :  { %15458 = vst [vmem:[#allocation183_spill] sm:$0xff] %v13767_v13  ;;  %15459 = vst [vmem:[#allocation112_spill] sm:$0xff] %v13769_v22 }
 0x36a   :  { %v10199_v58 = vpop.f32.mrf.mxu1  ;;  %v13775_v17 = vpop.f32.mrf.mxu0 }
 0x36b   :  { %v13777_v34 = vadd.f32 %v10199_v58, %v4319_v10  ;;  %v4323_v10 = vadd.f32 %v15468_v14, %v13368_v41  ;;  %v15476_v14 = vld [vmem:[#allocation48_spill] sm:$0xff] }
 0x36c   :  { %v13779_v2 = vpop.f32.mrf.mxu1  ;;  %v13781_v56 = vpop.f32.mrf.mxu0 }
 0x36d   :  { %15461 = vst [vmem:[#allocation5_spill] sm:$0xff] %v13777_v34  ;;  %15462 = vst [vmem:[#allocation186_spill] sm:$0xff] %v13779_v2 }
 0x36e   :  { %15463 = vst [vmem:[#allocation113_spill] sm:$0xff] %v13781_v56  ;;  %v10202_v24 = vpop.f32.mrf.mxu1  ;;  %v13785_v13 = vpop.f32.mrf.mxu0 }
 0x36f   :  { %v13787_v22 = vadd.f32 %v10202_v24, %v4321_v55  ;;  %v4325_v55 = vadd.f32 %v15472_v33, %v13388_v51  ;;  %v15480_v33 = vld [vmem:[#allocation111_spill] sm:$0xff] }
 0x370   :  { %v13789_v59 = vpop.f32.mrf.mxu1  ;;  %v13791_v27 = vpop.f32.mrf.mxu0 }
 0x371   :  { %15465 = vst [vmem:[#allocation103_spill] sm:$0xff] %v13787_v22  ;;  %15466 = vst [vmem:[#allocation189_spill] sm:$0xff] %v13789_v59 }
 0x372   :  { %15467 = vst [vmem:[#allocation115_spill] sm:$0xff] %v13791_v27  ;;  %v10205_v58 = vpop.f32.mrf.mxu1  ;;  %v13795_v34 = vpop.f32.mrf.mxu0 }
 0x373   :  { %v13797_v2 = vadd.f32 %v10205_v58, %v4323_v10  ;;  %v4327_v10 = vadd.f32 %v15476_v14, %v13408_v26  ;;  %v15484_v14 = vld [vmem:[#allocation53_spill] sm:$0xff] }
 0x374   :  { %v13799_v56 = vpop.f32.mrf.mxu1  ;;  %v13801_v47 = vpop.f32.mrf.mxu0 }
 0x375   :  { %15469 = vst [vmem:[#allocation6_spill] sm:$0xff] %v13797_v2  ;;  %15470 = vst [vmem:[#allocation192_spill] sm:$0xff] %v13799_v56 }
 0x376   :  { %15471 = vst [vmem:[#allocation57_spill] sm:$0xff] %v13801_v47  ;;  %v10208_v24 = vpop.f32.mrf.mxu1  ;;  %v13805_v22 = vpop.f32.mrf.mxu0 }
 0x377   :  { %v13807_v59 = vadd.f32 %v10208_v24, %v4325_v55  ;;  %v4329_v55 = vadd.f32 %v15480_v33, %v13428_v9  ;;  %v15488_v33 = vld [vmem:[#allocation90_spill] sm:$0xff] }
 0x378   :  { %v13809_v27 = vpop.f32.mrf.mxu1  ;;  %v13811_v41 = vpop.f32.mrf.mxu0 }
 0x379   :  { %15473 = vst [vmem:[#allocation7_spill] sm:$0xff] %v13807_v59  ;;  %15474 = vst [vmem:[#allocation195_spill] sm:$0xff] %v13809_v27 }
 0x37a   :  { %15475 = vst [vmem:[#allocation117_spill] sm:$0xff] %v13811_v41  ;;  %v10211_v58 = vpop.f32.mrf.mxu1  ;;  %v13815_v2 = vpop.f32.mrf.mxu0 }
 0x37b   :  { %v13817_v56 = vadd.f32 %v10211_v58, %v4327_v10  ;;  %v4331_v10 = vadd.f32 %v15484_v14, %v13448_v19  ;;  %v15491_v19 = vld [vmem:[#allocation185_spill] sm:$0xff] }
 0x37c   :  { %v13819_v47 = vpop.f32.mrf.mxu1  ;;  %v13821_v51 = vpop.f32.mrf.mxu0  ;;  %v4335_v14 = vadd.f32 %v15491_v19, %v13486_v31 }
 0x37d   :  { %15477 = vst [vmem:[#allocation8_spill] sm:$0xff] %v13817_v56  ;;  %15478 = vst [vmem:[#allocation198_spill] sm:$0xff] %v13819_v47 }
 0x37e   :  { %15479 = vst [vmem:[#allocation118_spill] sm:$0xff] %v13821_v51  ;;  %v10214_v24 = vpop.f32.mrf.mxu1  ;;  %v13825_v59 = vpop.f32.mrf.mxu0 }
 0x37f   :  { %v13827_v27 = vadd.f32 %v10214_v24, %v4329_v55  ;;  %v4333_v55 = vadd.f32 %v15488_v33, %v13468_v0 }
 0x380   :  { %v13829_v41 = vpop.f32.mrf.mxu1  ;;  %v13831_v26 = vpop.f32.mrf.mxu0 }
 0x381   :  { %15481 = vst [vmem:[#allocation107_spill] sm:$0xff] %v13827_v27  ;;  %15482 = vst [vmem:[#allocation200_spill] sm:$0xff] %v13829_v41 }
 0x382   :  { %15483 = vst [vmem:[#allocation120_spill] sm:$0xff] %v13831_v26  ;;  %v10217_v58 = vpop.f32.mrf.mxu1  ;;  %v13835_v56 = vpop.f32.mrf.mxu0 }
 0x383   :  { %15485 = vst [vmem:[#allocation10_spill] sm:$0xff] %v13835_v56  ;;  %v13837_v47 = vadd.f32 %v10217_v58, %v4331_v10 }
 0x384   :  { %v13839_v51 = vpop.f32.mrf.mxu1  ;;  %v13841_v9 = vpop.f32.mrf.mxu0 }
 0x385   :  { %15486 = vst [vmem:[#allocation122_spill] sm:$0xff] %v13837_v47  ;;  %15487 = vst [vmem:[#allocation124_spill] sm:$0xff] %v13839_v51  ;;  %v15494_v51 = vld [vmem:[#allocation94_spill] sm:$0xff] }
 0x386   :  { %v10220_v24 = vpop.f32.mrf.mxu1  ;;  %v13847_v41 = vpop.f32.mrf.mxu0  ;;  %v4337_v0 = vadd.f32 %v15494_v51, %v13498_v40  ;;  %v13877_v51 = vld [vmem:[%s14805_s4] ss:$0 sm:$0xff] }
 0x387   :  { %v13845_v27 = vadd.f32 %v10220_v24, %v4333_v55 }
 0x388   :  { %v13849_v26 = vpop.f32.mrf.mxu1  ;;  %v13855_v58 = vpop.f32.mrf.mxu0 }
 0x389   :  { %15489 = vst [vmem:[#allocation126_spill] sm:$0xff] %v13845_v27  ;;  %15490 = vst [vmem:[#allocation128_spill] sm:$0xff] %v13849_v26  ;;  %v15497_v26 = vld [vmem:[#allocation191_spill] sm:$0xff] }
 0x38a   :  { %v10223_v56 = vpop.f32.mrf.mxu1  ;;  %v13863_v24 = vpop.f32.mrf.mxu0  ;;  %v5696_v31 = vadd.f32 %v15497_v26, %v13511_v63 }
 0x38b   :  { %v13853_v10 = vadd.f32 %v10223_v56, %v4335_v14  ;;  %v5695_v14 = vadd.f32 %v13192_v23, %v13518_v52  ;;  %v5697_v23 = vadd.f32 %v13212_v42, %v13532_v39  ;;  %v5699_v42 = vadd.f32 %v13234_v43, %v13546_v44 }
 0x38c   :  { %v13857_v47 = vpop.f32.mrf.mxu1 }
 0x38d   :  { %15492 = vst [vmem:[#allocation130_spill] sm:$0xff] %v13853_v10  ;;  %15493 = vst [vmem:[#allocation132_spill] sm:$0xff] %v13857_v47  ;;  %v13871_v10 = vpop.f32.mrf.mxu0 }
 0x38e   :  { %v10226_v33 = vpop.f32.mrf.mxu1 }
 0x38f   :  { %v13861_v55 = vadd.f32 %v10226_v33, %v4337_v0  ;;  %v5698_v33 = vadd.f32 %v13199_v4, %v13525_v16  ;;  %v13884_v52 = vpop.f32.mrf.mxu0 }
 0x390   :  { %v13865_v27 = vpop.f32.mrf.mxu1 }
 0x391   :  { %15495 = vst [vmem:[#allocation134_spill] sm:$0xff] %v13861_v55  ;;  %15496 = vst [vmem:[#allocation136_spill] sm:$0xff] %v13865_v27  ;;  %v13894_v39 = vpop.f32.mrf.mxu0 }
 0x392   :  { %v10329_v19 = vpop.f32.mrf.mxu1 }
 0x393   :  { %v6406_v56 = vadd.f32 %v10329_v19, %v5696_v31 }
 0x394   :  { %v6086_v47 = vpop.f32.mrf.mxu1 }
 0x395   :  { %v7116_v40 = vadd.f32 %v13705_v20, %v6406_v56  ;;  %v6405_v0 = vadd.f32 %v6086_v47, %v5695_v14  ;;  %v15498_v14 = vld [vmem:[#allocation119_spill] sm:$0xff] }
 0x396   :  { %v10332_v63 = vpop.f32.mrf.mxu1  ;;  %v5700_v4 = vadd.f32 %v15498_v14, %v13539_v36  ;;  %v15499_v36 = vld [vmem:[#allocation194_spill] sm:$0xff] }
 0x397   :  { %v7115_v26 = vadd.f32 %v13711_v32, %v6405_v0  ;;  %v6408_v31 = vadd.f32 %v10332_v63, %v5698_v33  ;;  %v7187_v20 = vadd.f32 %v13877_v51, %v7116_v40 }
 0x398   :  { %v6096_v19 = vpop.f32.mrf.mxu1 }
 0x399   :  { %v7186_v56 = vadd.f32 %v13877_v51, %v7115_v26  ;;  %v7118_v55 = vadd.f32 %v13715_v35, %v6408_v31  ;;  %v6407_v47 = vadd.f32 %v6096_v19, %v5697_v23  ;;  %v7251_v40 = vmax.f32 %v7187_v20, 0.0  ;;  %v13906_v19 = vpop.f32.mrf.mxu0 }
 0x39a   :  { %v10335_v16 = vpop.f32.mrf.mxu1 }
 0x39b   :  { %v7250_v27 = vmax.f32 %v7186_v56, 0.0  ;;  %v7117_v32 = vadd.f32 %v13721_v15, %v6407_v47  ;;  %v6410_v0 = vadd.f32 %v10335_v16, %v5700_v4  ;;  %v7189_v33 = vadd.f32 %v13877_v51, %v7118_v55  ;;  %v15500_v4 = vld [vmem:[#allocation121_spill] sm:$0xff] }
 0x39c   :  { %v6106_v63 = vpop.f32.mrf.mxu1  ;;  %v5702_v15 = vadd.f32 %v15499_v36, %v13553_v46  ;;  %v5701_v55 = vadd.f32 %v13254_v61, %v13560_v11 }
 0x39d   :  { %v7188_v35 = vadd.f32 %v13877_v51, %v7117_v32  ;;  %v7120_v26 = vadd.f32 %v13725_v7, %v6410_v0  ;;  %v6409_v31 = vadd.f32 %v6106_v63, %v5699_v42  ;;  %10523 = vmatprep.mubr.msk.f32.mxu1 %vm741_vm2, %v7250_v27  ;;  %v7253_v56 = vmax.f32 %v7189_v33, 0.0  ;;  %v13918_v42 = vpop.f32.mrf.mxu0 }
 0x39e   :  { %v10338_v23 = vpop.f32.mrf.mxu1  ;;  %10524 = vmatmul.mubr.msk.f32.vlgmr.msra.gmra.mxu1 %vm741_vm2, %v7251_v40  ;;  %v5703_v0 = vadd.f32 %v13274_v5, %v13574_v57 }
 0x39f   :  { %v7252_v43 = vmax.f32 %v7188_v35, 0.0  ;;  %v7119_v44 = vadd.f32 %v13731_v28, %v6409_v31  ;;  %v6412_v20 = vadd.f32 %v10338_v23, %v5702_v15  ;;  %v7191_v7 = vadd.f32 %v13877_v51, %v7120_v26  ;;  %v15501_v26 = vld [vmem:[#allocation100_spill] sm:$0xff]  ;;  %v13930_v23 = vpop.f32.mrf.mxu0 }
 0x3a0   :  { %v6116_v47 = vpop.f32.mrf.mxu1  ;;  %v5704_v28 = vadd.f32 %v15500_v4, %v13567_v6  ;;  %v5705_v15 = vadd.f32 %v13294_v25, %v13588_v1 }
 0x3a1   :  { %v7190_v27 = vadd.f32 %v13877_v51, %v7119_v44  ;;  %v7122_v46 = vadd.f32 %v13735_v37, %v6412_v20  ;;  %v6411_v14 = vadd.f32 %v6116_v47, %v5701_v55  ;;  %10526 = vmatprep.mubr.msk.f32.mxu1 %vm741_vm2, %v7252_v43  ;;  %v7255_v40 = vmax.f32 %v7191_v7, 0.0 }
 0x3a2   :  { %v10341_v16 = vpop.f32.mrf.mxu1  ;;  %10527 = vmatmul.mubr.msk.f32.gmra.mxu1 %vm741_vm2, %v7253_v56  ;;  %v15502_v56 = vld [vmem:[#allocation123_spill] sm:$0xff] }
 0x3a3   :  { %v7254_v61 = vmax.f32 %v7190_v27, 0.0  ;;  %v7121_v11 = vadd.f32 %v13741_v62, %v6411_v14  ;;  %v6414_v32 = vadd.f32 %v10341_v16, %v5704_v28  ;;  %v7193_v37 = vadd.f32 %v13877_v51, %v7122_v46  ;;  %v15503_v46 = vld [vmem:[#allocation47_spill] sm:$0xff]  ;;  %v15504_v14 = vld [vmem:[#allocation162_spill] sm:$0xff] }
 0x3a4   :  { %v6126_v33 = vpop.f32.mrf.mxu1  ;;  %v5706_v62 = vadd.f32 %v15501_v26, %v13581_v60  ;;  %v5707_v27 = vadd.f32 %v13314_v49, %v13602_v8  ;;  %v4290_v4 = vadd.f32 %v15504_v14, %v15503_v46  ;;  %v15514_v14 = vld [vmem:[#allocation26_spill] sm:$0xff] }
 0x3a5   :  { %v7192_v63 = vadd.f32 %v13877_v51, %v7121_v11  ;;  %v7124_v6 = vadd.f32 %v13745_v53, %v6414_v32  ;;  %v6413_v35 = vadd.f32 %v6126_v33, %v5703_v0  ;;  %10529 = vmatprep.mubr.msk.f32.mxu1 %vm741_vm2, %v7254_v61  ;;  %v7257_v43 = vmax.f32 %v7193_v37, 0.0 }
 0x3a6   :  { %v10344_v31 = vpop.f32.mrf.mxu1  ;;  %10530 = vmatmul.mubr.msk.f32.gmra.mxu1 %vm741_vm2, %v7255_v40  ;;  %v5000_v49 = vadd.f32 %v13626_v21, %v4290_v4  ;;  %v15515_v4 = vld [vmem:[#allocation127_spill] sm:$0xff] }
 0x3a7   :  { %v7256_v5 = vmax.f32 %v7192_v63, 0.0  ;;  %v7123_v57 = vadd.f32 %v13751_v48, %v6413_v35  ;;  %v6416_v36 = vadd.f32 %v10344_v31, %v5706_v62  ;;  %v7195_v53 = vadd.f32 %v13877_v51, %v7124_v6  ;;  %v15506_v6 = vld [vmem:[#allocation49_spill] sm:$0xff] }
 0x3a8   :  { %v6136_v44 = vpop.f32.mrf.mxu1  ;;  %v5708_v48 = vadd.f32 %v15502_v56, %v13595_v29  ;;  %v5709_v63 = vadd.f32 %v13334_v45, %v13616_v12  ;;  %v15509_v12 = vld [vmem:[#allocation3_spill] sm:$0xff] }
 0x3a9   :  { %v7194_v20 = vadd.f32 %v13877_v51, %v7123_v57  ;;  %v7126_v60 = vadd.f32 %v13755_v38, %v6416_v36  ;;  %v6415_v55 = vadd.f32 %v6136_v44, %v5705_v15  ;;  %10532 = vmatprep.mubr.msk.f32.mxu1 %vm741_vm2, %v7256_v5  ;;  %v13944_v38 = vpop.f32.mrf.mxu0  ;;  %v7259_v28 = vmax.f32 %v7195_v53, 0.0  ;;  %v15512_v56 = vld [vmem:[#allocation51_spill] sm:$0xff] }
 0x3aa   :  { %v10347_v7 = vpop.f32.mrf.mxu1  ;;  %10533 = vmatmul.mubr.msk.f32.gmra.mxu1 %vm741_vm2, %v7257_v43  ;;  %v5711_v15 = vadd.f32 %v15509_v12, %v5000_v49  ;;  %v15510_v43 = vld [vmem:[#allocation80_spill] sm:$0xff] }
 0x3ab   :  { %v7258_v25 = vmax.f32 %v7194_v20, 0.0  ;;  %v7125_v1 = vadd.f32 %v13761_v54, %v6415_v55  ;;  %v6418_v47 = vadd.f32 %v10347_v7, %v5708_v48  ;;  %v7197_v16 = vadd.f32 %v13877_v51, %v7126_v60  ;;  %v15505_v54 = vld [vmem:[#allocation9_spill] sm:$0xff]  ;;  %v13959_v26 = vpop.f32.mrf.mxu0  ;;  %v15513_v48 = vld [vmem:[#allocation170_spill] sm:$0xff]  ;;  %v15518_v49 = vld [vmem:[#allocation104_spill] sm:$0xff] }
 0x3ac   :  { %v6146_v61 = vpop.f32.mrf.mxu1  ;;  %v5710_v0 = vadd.f32 %v15505_v54, %v13609_v3  ;;  %v15511_v20 = vld [vmem:[#allocation113_spill] sm:$0xff] }
 0x3ad   :  { %v7196_v29 = vadd.f32 %v13877_v51, %v7125_v1  ;;  %v7128_v11 = vadd.f32 %v13765_v18, %v6418_v47  ;;  %v6417_v32 = vadd.f32 %v6146_v61, %v5707_v27  ;;  %10535 = vmatprep.mubr.msk.f32.mxu1 %vm741_vm2, %v7258_v25  ;;  %v15507_v18 = vld [vmem:[#allocation166_spill] sm:$0xff]  ;;  %v7261_v62 = vmax.f32 %v7197_v16, 0.0  ;;  %v13973_v7 = vpop.f32.mrf.mxu0  ;;  %v15516_v16 = vld [vmem:[#allocation159_spill] sm:$0xff] }
 0x3ae   :  { %v10350_v8 = vpop.f32.mrf.mxu1  ;;  %10536 = vmatmul.mubr.msk.f32.gmra.mxu1 %vm741_vm2, %v7259_v28  ;;  %v4292_v35 = vadd.f32 %v15507_v18, %v15506_v6  ;;  %v5714_v28 = vadd.f32 %v15515_v4, %v15514_v14  ;;  %v15530_v14 = vld [vmem:[#allocation87_spill] sm:$0xff] }
 0x3af   :  { %v7260_v40 = vmax.f32 %v7196_v29, 0.0  ;;  %v7127_v37 = vadd.f32 %v13771_v50, %v6417_v32  ;;  %v6420_v33 = vadd.f32 %v10350_v8, %v5710_v0  ;;  %v7199_v3 = vadd.f32 %v13877_v51, %v7128_v11  ;;  %v15508_v50 = vld [vmem:[#allocation125_spill] sm:$0xff]  ;;  %v15517_v32 = vld [vmem:[#allocation115_spill] sm:$0xff] }
 0x3b0   :  { %v6156_v31 = vpop.f32.mrf.mxu1  ;;  %v5712_v36 = vadd.f32 %v15508_v50, %v13623_v30  ;;  %v5002_v53 = vadd.f32 %v15510_v43, %v4292_v35  ;;  %v15523_v50 = vld [vmem:[#allocation4_spill] sm:$0xff]  ;;  %v15525_v43 = vld [vmem:[#allocation57_spill] sm:$0xff] }
 0x3b1   :  { %v7198_v21 = vadd.f32 %v13877_v51, %v7127_v37  ;;  %v7130_v5 = vadd.f32 %v13775_v17, %v6420_v33  ;;  %v6419_v57 = vadd.f32 %v6156_v31, %v5709_v63  ;;  %10538 = vmatprep.mubr.msk.f32.mxu1 %vm741_vm2, %v7260_v40  ;;  %v4294_v17 = vadd.f32 %v15513_v48, %v15512_v56  ;;  %v15519_v40 = vld [vmem:[#allocation114_spill] sm:$0xff]  ;;  %v15520_v37 = vld [vmem:[#allocation176_spill] sm:$0xff]  ;;  %v13987_v33 = vpop.f32.mrf.mxu0  ;;  %v15521_v31 = vld [vmem:[#allocation81_spill] sm:$0xff] }
 0x3b2   :  { %v10353_v45 = vpop.f32.mrf.mxu1  ;;  %10539 = vmatmul.mubr.msk.f32.gmra.mxu1 %vm741_vm2, %v7261_v62  ;;  %v7263_v25 = vmax.f32 %v7199_v3, 0.0  ;;  %v5713_v8 = vadd.f32 %v15518_v49, %v5002_v53  ;;  %v15534_v49 = vld [vmem:[#allocation187_spill] sm:$0xff] }
 0x3b3   :  { %v7262_v44 = vmax.f32 %v7198_v21, 0.0  ;;  %v7129_v60 = vadd.f32 %v15511_v20, %v6419_v57  ;;  %v6422_v55 = vadd.f32 %v10353_v45, %v5712_v36  ;;  %v7201_v1 = vadd.f32 %v13877_v51, %v7130_v5  ;;  %v15522_v21 = vld [vmem:[#allocation129_spill] sm:$0xff]  ;;  %v15524_v45 = vld [vmem:[#allocation32_spill] sm:$0xff]  ;;  %v15526_v20 = vld [vmem:[#allocation55_spill] sm:$0xff] }
 0x3b4   :  { %v6166_v30 = vpop.f32.mrf.mxu1  ;;  %v5004_v61 = vadd.f32 %v15516_v16, %v4294_v17  ;;  %v5716_v5 = vadd.f32 %v15522_v21, %v15521_v31  ;;  %v15537_v21 = vld [vmem:[#allocation106_spill] sm:$0xff] }
 0x3b5   :  { %v7200_v47 = vadd.f32 %v13877_v51, %v7129_v60  ;;  %v7132_v27 = vadd.f32 %v13785_v13, %v6422_v55  ;;  %v6421_v46 = vadd.f32 %v6166_v30, %v5711_v15  ;;  %10541 = vmatprep.mubr.msk.f32.mxu1 %vm741_vm2, %v7262_v44  ;;  %v4296_v13 = vadd.f32 %v15520_v37, %v15519_v40  ;;  %v15527_v60 = vld [vmem:[#allocation181_spill] sm:$0xff]  ;;  %v14001_v55 = vpop.f32.mrf.mxu0 }
 0x3b6   :  { %v10356_v29 = vpop.f32.mrf.mxu1  ;;  %10542 = vmatmul.mubr.msk.f32.gmra.mxu1 %vm741_vm2, %v7263_v25  ;;  %v7265_v63 = vmax.f32 %v7201_v1, 0.0  ;;  %v5715_v36 = vadd.f32 %v15523_v50, %v5004_v61  ;;  %v15531_v61 = vld [vmem:[#allocation117_spill] sm:$0xff] }
 0x3b7   :  { %v7264_v11 = vmax.f32 %v7200_v47, 0.0  ;;  %v7131_v54 = vadd.f32 %v15517_v32, %v6421_v46  ;;  %v6424_v0 = vadd.f32 %v10356_v29, %v5714_v28  ;;  %v7203_v6 = vadd.f32 %v13877_v51, %v7132_v27  ;;  %v15528_v47 = vld [vmem:[#allocation161_spill] sm:$0xff]  ;;  %v15529_v27 = vld [vmem:[#allocation131_spill] sm:$0xff] }
 0x3b8   :  { %v6176_v18 = vpop.f32.mrf.mxu1  ;;  %v5006_v12 = vadd.f32 %v15524_v45, %v4296_v13  ;;  %v5718_v46 = vadd.f32 %v15529_v27, %v15528_v47  ;;  %v15532_v32 = vld [vmem:[#allocation105_spill] sm:$0xff]  ;;  %v15539_v45 = vld [vmem:[#allocation118_spill] sm:$0xff]  ;;  %v15544_v47 = vld [vmem:[#allocation40_spill] sm:$0xff] }
 0x3b9   :  { %v7202_v35 = vadd.f32 %v13877_v51, %v7131_v54  ;;  %v7134_v62 = vadd.f32 %v13795_v34, %v6424_v0  ;;  %v6423_v3 = vadd.f32 %v6176_v18, %v5713_v8  ;;  %10544 = vmatprep.mubr.msk.f32.mxu1 %vm741_vm2, %v7264_v11  ;;  %v4298_v34 = vadd.f32 %v15527_v60, %v15526_v20  ;;  %v15533_v0 = vld [vmem:[#allocation116_spill] sm:$0xff]  ;;  %v14015_v8 = vpop.f32.mrf.mxu0 }
 0x3ba   :  { %v10359_v57 = vpop.f32.mrf.mxu1  ;;  %10545 = vmatmul.mubr.msk.f32.gmra.mxu1 %vm741_vm2, %v7265_v63  ;;  %v7267_v56 = vmax.f32 %v7203_v6, 0.0  ;;  %v5717_v54 = vadd.f32 %v15532_v32, %v5006_v12  ;;  %v15548_v32 = vld [vmem:[#allocation199_spill] sm:$0xff] }
 0x3bb   :  { %v7266_v15 = vmax.f32 %v7202_v35, 0.0  ;;  %v7133_v53 = vadd.f32 %v15525_v43, %v6423_v3  ;;  %v6426_v44 = vadd.f32 %v10359_v57, %v5716_v5  ;;  %v7205_v48 = vadd.f32 %v13877_v51, %v7134_v62  ;;  %v15535_v35 = vld [vmem:[#allocation34_spill] sm:$0xff]  ;;  %v15536_v62 = vld [vmem:[#allocation133_spill] sm:$0xff]  ;;  %v15538_v57 = vld [vmem:[#allocation167_spill] sm:$0xff] }
 0x3bc   :  { %v6186_v17 = vpop.f32.mrf.mxu1  ;;  %v5008_v4 = vadd.f32 %v15530_v14, %v4298_v34  ;;  %v5720_v3 = vadd.f32 %v15536_v62, %v15535_v35  ;;  %v15540_v43 = vld [vmem:[#allocation60_spill] sm:$0xff] }
 0x3bd   :  { %v7204_v25 = vadd.f32 %v13877_v51, %v7133_v53  ;;  %v7136_v1 = vadd.f32 %v13805_v22, %v6426_v44  ;;  %v6425_v30 = vadd.f32 %v6186_v17, %v5715_v36  ;;  %10547 = vmatprep.mubr.msk.f32.mxu1 %vm741_vm2, %v7266_v15  ;;  %v4300_v22 = vadd.f32 %v15534_v49, %v15533_v0  ;;  %v15541_v53 = vld [vmem:[#allocation193_spill] sm:$0xff]  ;;  %v14029_v44 = vpop.f32.mrf.mxu0 }
 0x3be   :  { %v10362_v28 = vpop.f32.mrf.mxu1  ;;  %10548 = vmatmul.mubr.msk.f32.gmra.mxu1 %vm741_vm2, %v7267_v56  ;;  %v7269_v40 = vmax.f32 %v7205_v48, 0.0  ;;  %v5719_v5 = vadd.f32 %v15537_v21, %v5008_v4  ;;  %v15545_v4 = vld [vmem:[#allocation120_spill] sm:$0xff]  ;;  %v15553_v21 = vld [vmem:[#allocation42_spill] sm:$0xff] }
 0x3bf   :  { %v7268_v16 = vmax.f32 %v7204_v25, 0.0  ;;  %v7135_v29 = vadd.f32 %v15531_v61, %v6425_v30  ;;  %v6428_v11 = vadd.f32 %v10362_v28, %v5718_v46  ;;  %v7207_v37 = vadd.f32 %v13877_v51, %v7136_v1  ;;  %v15542_v25 = vld [vmem:[#allocation89_spill] sm:$0xff]  ;;  %v15543_v1 = vld [vmem:[#allocation135_spill] sm:$0xff]  ;;  %v15546_v61 = vld [vmem:[#allocation108_spill] sm:$0xff] }
 0x3c0   :  { %v6196_v13 = vpop.f32.mrf.mxu1  ;;  %v5010_v50 = vadd.f32 %v15538_v57, %v4300_v22  ;;  %v5722_v30 = vadd.f32 %v15543_v1, %v15542_v25  ;;  %v15558_v25 = vld [vmem:[#allocation175_spill] sm:$0xff] }
 0x3c1   :  { %v7206_v63 = vadd.f32 %v13877_v51, %v7135_v29  ;;  %v7138_v6 = vadd.f32 %v13815_v2, %v6428_v11  ;;  %v6427_v18 = vadd.f32 %v6196_v13, %v5717_v54  ;;  %10550 = vmatprep.mubr.msk.f32.mxu1 %vm741_vm2, %v7268_v16  ;;  %v4302_v2 = vadd.f32 %v15541_v53, %v15540_v43  ;;  %v15547_v11 = vld [vmem:[#allocation96_spill] sm:$0xff]  ;;  %v14043_v54 = vpop.f32.mrf.mxu0 }
 0x3c2   :  { %v10365_v31 = vpop.f32.mrf.mxu1  ;;  %10551 = vmatmul.mubr.msk.f32.gmra.mxu1 %vm741_vm2, %v7269_v40  ;;  %v7271_v20 = vmax.f32 %v7207_v37, 0.0  ;;  %v5721_v29 = vadd.f32 %v15546_v61, %v5010_v50  ;;  %v15549_v37 = vld [vmem:[#allocation10_spill] sm:$0xff] }
 0x3c3   :  { %v7270_v36 = vmax.f32 %v7206_v63, 0.0  ;;  %v7137_v12 = vadd.f32 %v15539_v45, %v6427_v18  ;;  %v6430_v15 = vadd.f32 %v10365_v31, %v5720_v3  ;;  %v7209_v60 = vadd.f32 %v13877_v51, %v7138_v6  ;;  %v15550_v6 = vld [vmem:[#allocation169_spill] sm:$0xff]  ;;  %v15554_v45 = vld [vmem:[#allocation59_spill] sm:$0xff]  ;;  %v14057_v43 = vpop.f32.mrf.mxu0 }
 0x3c4   :  { %v6206_v34 = vpop.f32.mrf.mxu1  ;;  %v5012_v27 = vadd.f32 %v15544_v47, %v4302_v2  ;;  %v15551_v18 = vld [vmem:[#allocation137_spill] sm:$0xff] }
 0x3c5   :  { %v7208_v56 = vadd.f32 %v13877_v51, %v7137_v12  ;;  %v7140_v48 = vadd.f32 %v13825_v59, %v6430_v15  ;;  %v6429_v17 = vadd.f32 %v6206_v34, %v5719_v5  ;;  %10553 = vmatprep.mubr.msk.f32.mxu1 %vm741_vm2, %v7270_v36  ;;  %v4304_v59 = vadd.f32 %v15548_v32, %v15547_v11  ;;  %v15552_v3 = vld [vmem:[#allocation109_spill] sm:$0xff]  ;;  %v15555_v12 = vld [vmem:[#allocation11_spill] sm:$0xff]  ;;  %v14071_v61 = vpop.f32.mrf.mxu0 }
 0x3c6   :  { %v10368_v46 = vpop.f32.mrf.mxu1  ;;  %10554 = vmatmul.mubr.msk.f32.gmra.mxu1 %vm741_vm2, %v7271_v20  ;;  %v7273_v0 = vmax.f32 %v7209_v60, 0.0  ;;  %v5724_v35 = vadd.f32 %v15551_v18, %v15550_v6  ;;  %v5723_v31 = vadd.f32 %v15552_v3, %v5012_v27  ;;  %v4306_v15 = vadd.f32 %v15555_v12, %v15554_v45  ;;  %v15565_v6 = vld [vmem:[#allocation97_spill] sm:$0xff] }
 0x3c7   :  { %v7272_v14 = vmax.f32 %v7208_v56, 0.0  ;;  %v7139_v28 = vadd.f32 %v15545_v4, %v6429_v17  ;;  %v6432_v16 = vadd.f32 %v10368_v46, %v5722_v30  ;;  %v7211_v49 = vadd.f32 %v13877_v51, %v7140_v48  ;;  %v15556_v48 = vld [vmem:[#allocation172_spill] sm:$0xff]  ;;  %v15557_v17 = vld [vmem:[#allocation139_spill] sm:$0xff] }
 0x3c8   :  { %v6216_v22 = vpop.f32.mrf.mxu1  ;;  %v5014_v5 = vadd.f32 %v15553_v21, %v4304_v59  ;;  %v5016_v1 = vadd.f32 %v15558_v25, %v4306_v15  ;;  %v15567_v21 = vld [vmem:[#allocation17_spill] sm:$0xff] }
 0x3c9   :  { %v7210_v40 = vadd.f32 %v13877_v51, %v7139_v28  ;;  %v7142_v13 = vadd.f32 %v15549_v37, %v6432_v16  ;;  %v6431_v63 = vadd.f32 %v6216_v22, %v5721_v29  ;;  %10556 = vmatprep.mubr.msk.f32.mxu1 %vm741_vm2, %v7272_v14  ;;  %v7275_v53 = vmax.f32 %v7211_v49, 0.0  ;;  %v15559_v14 = vld [vmem:[#allocation110_spill] sm:$0xff]  ;;  %v15561_v16 = vld [vmem:[#allocation65_spill] sm:$0xff] }
 0x3ca   :  { %v10371_v62 = vpop.f32.mrf.mxu1  ;;  %10557 = vmatmul.mubr.msk.f32.gmra.mxu1 %vm741_vm2, %v7273_v0  ;;  %v5725_v4 = vadd.f32 %v15559_v14, %v5014_v5  ;;  %v15560_v28 = vld [vmem:[#allocation98_spill] sm:$0xff]  ;;  %v15563_v22 = vld [vmem:[#allocation141_spill] sm:$0xff]  ;;  %v14085_v5 = vpop.f32.mrf.mxu0 }
 0x3cb   :  { %v7274_v57 = vmax.f32 %v7210_v40, 0.0  ;;  %v7141_v50 = vadd.f32 %v13841_v9, %v6431_v63  ;;  %v6434_v36 = vadd.f32 %v10371_v62, %v5724_v35  ;;  %v7213_v2 = vadd.f32 %v13877_v51, %v7142_v13  ;;  %v15564_v13 = vld [vmem:[#allocation12_spill] sm:$0xff] }
 0x3cc   :  { %v6226_v20 = vpop.f32.mrf.mxu1  ;;  %v5726_v9 = vadd.f32 %v15557_v17, %v15556_v48  ;;  %v5727_v63 = vadd.f32 %v15564_v13, %v5016_v1  ;;  %v15572_v1 = vld [vmem:[#allocation197_spill] sm:$0xff] }
 0x3cd   :  { %v7212_v60 = vadd.f32 %v13877_v51, %v7141_v50  ;;  %v7144_v34 = vadd.f32 %v13847_v41, %v6434_v36  ;;  %v6433_v56 = vadd.f32 %v6226_v20, %v5723_v31  ;;  %10559 = vmatprep.mubr.msk.f32.mxu1 %vm741_vm2, %v7274_v57  ;;  %v4308_v41 = vadd.f32 %v15561_v16, %v15560_v28  ;;  %v15566_v31 = vld [vmem:[#allocation61_spill] sm:$0xff]  ;;  %v15570_v20 = vld [vmem:[#allocation46_spill] sm:$0xff] }
 0x3ce   :  { %v10374_v30 = vpop.f32.mrf.mxu1  ;;  %10560 = vmatmul.mubr.msk.f32.gmra.mxu1 %vm741_vm2, %v7275_v53  ;;  %v7277_v29 = vmax.f32 %v7213_v2, 0.0  ;;  %v15568_v53 = vld [vmem:[#allocation44_spill] sm:$0xff]  ;;  %v15569_v2 = vld [vmem:[#allocation143_spill] sm:$0xff]  ;;  %v15579_v13 = vld [vmem:[#allocation25_spill] sm:$0xff] }
 0x3cf   :  { %v7276_v47 = vmax.f32 %v7212_v60, 0.0  ;;  %v7143_v27 = vadd.f32 %v13855_v58, %v6433_v56  ;;  %v6436_v46 = vadd.f32 %v10374_v30, %v5726_v9  ;;  %v7215_v11 = vadd.f32 %v13877_v51, %v7144_v34  ;;  %v15562_v58 = vld [vmem:[#allocation95_spill] sm:$0xff]  ;;  %v15571_v9 = vld [vmem:[#allocation14_spill] sm:$0xff]  ;;  %v15573_v30 = vld [vmem:[#allocation21_spill] sm:$0xff] }
 0x3d0   :  { %v6236_v32 = vpop.f32.mrf.mxu1  ;;  %v5728_v40 = vadd.f32 %v15563_v22, %v15562_v58  ;;  %v5018_v18 = vadd.f32 %v15565_v6, %v4308_v41  ;;  %v15575_v41 = vld [vmem:[#allocation74_spill] sm:$0xff] }
 0x3d1   :  { %v7214_v59 = vadd.f32 %v13877_v51, %v7143_v27  ;;  %v7146_v0 = vadd.f32 %v13863_v24, %v6436_v46  ;;  %v6435_v49 = vadd.f32 %v6236_v32, %v5725_v4  ;;  %10562 = vmatprep.mubr.msk.f32.mxu1 %vm741_vm2, %v7276_v47  ;;  %v4310_v24 = vadd.f32 %v15567_v21, %v15566_v31  ;;  %v14099_v47 = vpop.f32.mrf.mxu0  ;;  %v15576_v32 = vld [vmem:[#allocation145_spill] sm:$0xff]  ;;  %v15580_v21 = vld [vmem:[#allocation99_spill] sm:$0xff] }
 0x3d2   :  { %v10377_v37 = vpop.f32.mrf.mxu1  ;;  %10563 = vmatmul.mubr.msk.f32.gmra.mxu1 %vm741_vm2, %v7277_v29  ;;  %v7279_v57 = vmax.f32 %v7215_v11, 0.0  ;;  %v5729_v25 = vadd.f32 %v15571_v9, %v5018_v18 }
 0x3d3   :  { %v7278_v35 = vmax.f32 %v7214_v59, 0.0  ;;  %v7145_v62 = vadd.f32 %v13871_v10, %v6435_v49  ;;  %v6438_v3 = vadd.f32 %v10377_v37, %v5728_v40  ;;  %v7217_v50 = vadd.f32 %v13877_v51, %v7146_v0  ;;  %v15577_v0 = vld [vmem:[#allocation180_spill] sm:$0xff]  ;;  %v15578_v37 = vld [vmem:[#allocation62_spill] sm:$0xff] }
 0x3d4   :  { %v6246_v36 = vpop.f32.mrf.mxu1  ;;  %v5730_v10 = vadd.f32 %v15569_v2, %v15568_v53  ;;  %v5020_v60 = vadd.f32 %v15570_v20, %v4310_v24  ;;  %v15581_v24 = vld [vmem:[#allocation16_spill] sm:$0xff]  ;;  %v15583_v53 = vld [vmem:[#allocation75_spill] sm:$0xff]  ;;  %v15585_v20 = vld [vmem:[#allocation29_spill] sm:$0xff] }
 0x3d5   :  { %v7216_v45 = vadd.f32 %v13877_v51, %v7145_v62  ;;  %v7148_v12 = vadd.f32 %v13884_v52, %v6438_v3  ;;  %v6437_v15 = vadd.f32 %v6246_v36, %v5727_v63  ;;  %10565 = vmatprep.mubr.msk.f32.mxu1 %vm741_vm2, %v7278_v35  ;;  %v4312_v52 = vadd.f32 %v15573_v30, %v15572_v1  ;;  %v14113_v63 = vpop.f32.mrf.mxu0  ;;  %v15587_v1 = vld [vmem:[#allocation147_spill] sm:$0xff] }
 0x3d6   :  { %v10380_v34 = vpop.f32.mrf.mxu1  ;;  %10566 = vmatmul.mubr.msk.f32.gmra.mxu1 %vm741_vm2, %v7279_v57  ;;  %v7281_v27 = vmax.f32 %v7217_v50, 0.0  ;;  %v5731_v59 = vadd.f32 %v15576_v32, %v5020_v60  ;;  %v15582_v57 = vld [vmem:[#allocation101_spill] sm:$0xff] }
 0x3d7   :  { %v7280_v56 = vmax.f32 %v7216_v45, 0.0  ;;  %v7147_v48 = vadd.f32 %v13894_v39, %v6437_v15  ;;  %v6440_v17 = vadd.f32 %v10380_v34, %v5730_v10  ;;  %v7219_v46 = vadd.f32 %v13877_v51, %v7148_v12  ;;  %v15574_v39 = vld [vmem:[#allocation178_spill] sm:$0xff]  ;;  %v14127_v60 = vpop.f32.mrf.mxu0 }
 0x3d8   :  { %v6256_v14 = vpop.f32.mrf.mxu1  ;;  %v5732_v29 = vadd.f32 %v15575_v41, %v15574_v39  ;;  %v5022_v49 = vadd.f32 %v15577_v0, %v4312_v52  ;;  %v15584_v10 = vld [vmem:[#allocation102_spill] sm:$0xff]  ;;  %v15590_v41 = vld [vmem:[#allocation63_spill] sm:$0xff] }
 0x3d9   :  { %v7218_v4 = vadd.f32 %v13877_v51, %v7147_v48  ;;  %v7150_v28 = vadd.f32 %v13906_v19, %v6440_v17  ;;  %v6439_v16 = vadd.f32 %v6256_v14, %v5729_v25  ;;  %10568 = vmatprep.mubr.msk.f32.mxu1 %vm741_vm2, %v7280_v56  ;;  %v4314_v19 = vadd.f32 %v15579_v13, %v15578_v37  ;;  %v15589_v14 = vld [vmem:[#allocation112_spill] sm:$0xff]  ;;  %v15594_v13 = vld [vmem:[#allocation186_spill] sm:$0xff] }
 0x3da   :  { %v10383_v11 = vpop.f32.mrf.mxu1  ;;  %10569 = vmatmul.mubr.msk.f32.gmra.mxu1 %vm741_vm2, %v7281_v27  ;;  %v7283_v6 = vmax.f32 %v7219_v46, 0.0  ;;  %v5733_v2 = vadd.f32 %v15583_v53, %v5022_v49  ;;  %v15588_v27 = vld [vmem:[#allocation18_spill] sm:$0xff]  ;;  %v15593_v37 = vld [vmem:[#allocation76_spill] sm:$0xff] }
 0x3db   :  { %v7282_v58 = vmax.f32 %v7218_v4, 0.0  ;;  %v7149_v22 = vadd.f32 %v13918_v42, %v6439_v16  ;;  %v6442_v40 = vadd.f32 %v10383_v11, %v5732_v29  ;;  %v7221_v18 = vadd.f32 %v13877_v51, %v7150_v28  ;;  %v15591_v29 = vld [vmem:[#allocation33_spill] sm:$0xff]  ;;  %v14141_v11 = vpop.f32.mrf.mxu0  ;;  %v15599_v53 = vld [vmem:[#allocation20_spill] sm:$0xff] }
 0x3dc   :  { %v6266_v35 = vpop.f32.mrf.mxu1  ;;  %v5734_v42 = vadd.f32 %v15581_v24, %v15580_v21  ;;  %v5024_v50 = vadd.f32 %v15582_v57, %v4314_v19  ;;  %v15596_v21 = vld [vmem:[#allocation64_spill] sm:$0xff]  ;;  %v15597_v24 = vld [vmem:[#allocation37_spill] sm:$0xff] }
 0x3dd   :  { %v7220_v62 = vadd.f32 %v13877_v51, %v7149_v22  ;;  %v7152_v3 = vadd.f32 %v13930_v23, %v6442_v40  ;;  %v6441_v31 = vadd.f32 %v6266_v35, %v5731_v59  ;;  %10571 = vmatprep.mubr.msk.f32.mxu1 %vm741_vm2, %v7282_v58  ;;  %v4316_v23 = vadd.f32 %v15585_v20, %v15584_v10  ;;  %v15592_v40 = vld [vmem:[#allocation183_spill] sm:$0xff]  ;;  %v15600_v20 = vld [vmem:[#allocation77_spill] sm:$0xff] }
 0x3de   :  { %v10386_v36 = vpop.f32.mrf.mxu1  ;;  %10572 = vmatmul.mubr.msk.f32.gmra.mxu1 %vm741_vm2, %v7283_v6  ;;  %v7285_v34 = vmax.f32 %v7221_v18, 0.0  ;;  %v5735_v46 = vadd.f32 %v15588_v27, %v5024_v50 }
 0x3df   :  { %v7284_v45 = vmax.f32 %v7220_v62, 0.0  ;;  %v7151_v12 = vadd.f32 %v13944_v38, %v6441_v31  ;;  %v6444_v15 = vadd.f32 %v10386_v36, %v5734_v42  ;;  %v7223_v56 = vadd.f32 %v13877_v51, %v7152_v3  ;;  %v15586_v38 = vld [vmem:[#allocation50_spill] sm:$0xff]  ;;  %v15595_v3 = vld [vmem:[#allocation149_spill] sm:$0xff]  ;;  %v14155_v42 = vpop.f32.mrf.mxu0 }
 0x3e0   :  { %v6276_v48 = vpop.f32.mrf.mxu1  ;;  %v5736_v30 = vadd.f32 %v15587_v1, %v15586_v38  ;;  %v5026_v4 = vadd.f32 %v15589_v14, %v4316_v23  ;;  %v15603_v38 = vld [vmem:[#allocation41_spill] sm:$0xff] }
 0x3e1   :  { %v7222_v17 = vadd.f32 %v13877_v51, %v7151_v12  ;;  %v7154_v9 = vadd.f32 %v13959_v26, %v6444_v15  ;;  %v6443_v25 = vadd.f32 %v6276_v48, %v5733_v2  ;;  %10574 = vmatprep.mubr.msk.f32.mxu1 %vm741_vm2, %v7284_v45  ;;  %v4318_v26 = vadd.f32 %v15591_v29, %v15590_v41  ;;  %v14169_v1 = vpop.f32.mrf.mxu0 }
 0x3e2   :  { %v10389_v52 = vpop.f32.mrf.mxu1  ;;  %10575 = vmatmul.mubr.msk.f32.gmra.mxu1 %vm741_vm2, %v7285_v34  ;;  %v7287_v32 = vmax.f32 %v7223_v56, 0.0  ;;  %v5737_v31 = vadd.f32 %v15595_v3, %v5026_v4  ;;  %v15601_v34 = vld [vmem:[#allocation189_spill] sm:$0xff] }
 0x3e3   :  { %v7286_v28 = vmax.f32 %v7222_v17, 0.0  ;;  %v7153_v16 = vadd.f32 %v13973_v7, %v6443_v25  ;;  %v6446_v39 = vadd.f32 %v10389_v52, %v5736_v30  ;;  %v7225_v59 = vadd.f32 %v13877_v51, %v7154_v9  ;;  %v15602_v25 = vld [vmem:[#allocation66_spill] sm:$0xff] }
 0x3e4   :  { %v6286_v0 = vpop.f32.mrf.mxu1  ;;  %v5738_v7 = vadd.f32 %v15593_v37, %v15592_v40  ;;  %v5028_v19 = vadd.f32 %v15594_v13, %v4318_v26  ;;  %v14183_v40 = vpop.f32.mrf.mxu0 }
 0x3e5   :  { %v7224_v49 = vadd.f32 %v13877_v51, %v7153_v16  ;;  %v7156_v58 = vadd.f32 %v13987_v33, %v6446_v39  ;;  %v6445_v22 = vadd.f32 %v6286_v0, %v5735_v46  ;;  %10577 = vmatprep.mubr.msk.f32.mxu1 %vm741_vm2, %v7286_v28  ;;  %v4320_v33 = vadd.f32 %v15597_v24, %v15596_v21  ;;  %v15604_v28 = vld [vmem:[#allocation103_spill] sm:$0xff]  ;;  %v15606_v39 = vld [vmem:[#allocation192_spill] sm:$0xff]  ;;  %v15607_v0 = vld [vmem:[#allocation22_spill] sm:$0xff] }
 0x3e6   :  { %v10392_v6 = vpop.f32.mrf.mxu1  ;;  %10578 = vmatmul.mubr.msk.f32.gmra.mxu1 %vm741_vm2, %v7287_v32  ;;  %v7289_v57 = vmax.f32 %v7225_v59, 0.0  ;;  %v5739_v23 = vadd.f32 %v15600_v20, %v5028_v19  ;;  %v15605_v16 = vld [vmem:[#allocation151_spill] sm:$0xff] }
 0x3e7   :  { %v7288_v18 = vmax.f32 %v7224_v49, 0.0  ;;  %v7155_v35 = vadd.f32 %v14001_v55, %v6445_v22  ;;  %v6448_v62 = vadd.f32 %v10392_v6, %v5738_v7  ;;  %v7227_v50 = vadd.f32 %v13877_v51, %v7156_v58  ;;  %v15598_v55 = vld [vmem:[#allocation5_spill] sm:$0xff]  ;;  %v15608_v58 = vld [vmem:[#allocation67_spill] sm:$0xff] }
 0x3e8   :  { %v6296_v36 = vpop.f32.mrf.mxu1  ;;  %v5740_v2 = vadd.f32 %v15599_v53, %v15598_v55  ;;  %v5030_v56 = vadd.f32 %v15601_v34, %v4320_v33  ;;  %v15609_v22 = vld [vmem:[#allocation171_spill] sm:$0xff] }
 0x3e9   :  { %v7226_v45 = vadd.f32 %v13877_v51, %v7155_v35  ;;  %v7158_v12 = vadd.f32 %v14015_v8, %v6448_v62  ;;  %v6447_v15 = vadd.f32 %v6296_v36, %v5737_v31  ;;  %10580 = vmatprep.mubr.msk.f32.mxu1 %vm741_vm2, %v7288_v18  ;;  %v4322_v8 = vadd.f32 %v15603_v38, %v15602_v25  ;;  %v15611_v35 = vld [vmem:[#allocation78_spill] sm:$0xff]  ;;  %v15612_v31 = vld [vmem:[#allocation153_spill] sm:$0xff]  ;;  %v15613_v24 = vld [vmem:[#allocation195_spill] sm:$0xff] }
 0x3ea   :  { %v10395_v10 = vpop.f32.mrf.mxu1  ;;  %10581 = vmatmul.mubr.msk.f32.gmra.mxu1 %vm741_vm2, %v7289_v57  ;;  %v7291_v30 = vmax.f32 %v7227_v50, 0.0  ;;  %v5741_v49 = vadd.f32 %v15607_v0, %v5030_v56  ;;  %v15616_v34 = vld [vmem:[#allocation7_spill] sm:$0xff]  ;;  %v15617_v56 = vld [vmem:[#allocation24_spill] sm:$0xff] }
 0x3eb   :  { %v7290_v48 = vmax.f32 %v7226_v45, 0.0  ;;  %v7157_v17 = vadd.f32 %v14029_v44, %v6447_v15  ;;  %v6450_v9 = vadd.f32 %v10395_v10, %v5740_v2  ;;  %v7229_v52 = vadd.f32 %v13877_v51, %v7158_v12  ;;  %v15614_v45 = vld [vmem:[#allocation68_spill] sm:$0xff]  ;;  %v14197_v15 = vpop.f32.mrf.mxu0 }
 0x3ec   :  { %v6306_v27 = vpop.f32.mrf.mxu1  ;;  %v5742_v44 = vadd.f32 %v15605_v16, %v15604_v28  ;;  %v5032_v41 = vadd.f32 %v15606_v39, %v4322_v8  ;;  %v15615_v12 = vld [vmem:[#allocation84_spill] sm:$0xff] }
 0x3ed   :  { %v7228_v46 = vadd.f32 %v13877_v51, %v7157_v17  ;;  %v7160_v14 = vadd.f32 %v14043_v54, %v6450_v9  ;;  %v6449_v4 = vadd.f32 %v6306_v27, %v5739_v23  ;;  %10583 = vmatprep.mubr.msk.f32.mxu1 %vm741_vm2, %v7290_v48  ;;  %v4324_v54 = vadd.f32 %v15609_v22, %v15608_v58  ;;  %v15618_v48 = vld [vmem:[#allocation198_spill] sm:$0xff]  ;;  %v15620_v27 = vld [vmem:[#allocation69_spill] sm:$0xff] }
 0x3ee   :  { %v10398_v29 = vpop.f32.mrf.mxu1  ;;  %10584 = vmatmul.mubr.msk.f32.gmra.mxu1 %vm741_vm2, %v7291_v30  ;;  %v7293_v37 = vmax.f32 %v7229_v52, 0.0  ;;  %v5743_v21 = vadd.f32 %v15612_v31, %v5032_v41  ;;  %v15619_v30 = vld [vmem:[#allocation79_spill] sm:$0xff] }
 0x3ef   :  { %v7292_v26 = vmax.f32 %v7228_v46, 0.0  ;;  %v7159_v32 = vadd.f32 %v14057_v43, %v6449_v4  ;;  %v6452_v59 = vadd.f32 %v10398_v29, %v5742_v44  ;;  %v7231_v7 = vadd.f32 %v13877_v51, %v7160_v14  ;;  %v15610_v43 = vld [vmem:[#allocation6_spill] sm:$0xff]  ;;  %v15621_v46 = vld [vmem:[#allocation177_spill] sm:$0xff]  ;;  %v10511_v14 = vpop.f32.mrf.mxu0  ;;  %v15622_v29 = vld [vmem:[#allocation8_spill] sm:$0xff] }
 0x3f0   :  { %v6316_v13 = vpop.f32.mrf.mxu1  ;;  %v5744_v62 = vadd.f32 %v15611_v35, %v15610_v43  ;;  %v5034_v33 = vadd.f32 %v15613_v24, %v4324_v54  ;;  %v15628_v31 = vld [vmem:[#allocation107_spill] sm:$0xff] }
 0x3f1   :  { %v7230_v19 = vadd.f32 %v13877_v51, %v7159_v32  ;;  %v7162_v6 = vadd.f32 %v14071_v61, %v6452_v59  ;;  %v6451_v18 = vadd.f32 %v6316_v13, %v5741_v49  ;;  %10586 = vmatprep.mubr.msk.f32.mxu1 %vm741_vm2, %v7292_v26  ;;  %v4326_v61 = vadd.f32 %v15615_v12, %v15614_v45  ;;  %v15624_v59 = vld [vmem:[#allocation157_spill] sm:$0xff]  ;;  %v15625_v49 = vld [vmem:[#allocation200_spill] sm:$0xff]  ;;  %v15631_v12 = vld [vmem:[#allocation30_spill] sm:$0xff] }
 0x3f2   :  { %v10401_v3 = vpop.f32.mrf.mxu1  ;;  %10587 = vmatmul.mubr.msk.f32.gmra.mxu1 %vm741_vm2, %v7293_v37  ;;  %v7295_v55 = vmax.f32 %v7231_v7, 0.0  ;;  %v5745_v52 = vadd.f32 %v15619_v30, %v5034_v33  ;;  %v15626_v7 = vld [vmem:[#allocation70_spill] sm:$0xff]  ;;  %v15627_v13 = vld [vmem:[#allocation52_spill] sm:$0xff] }
 0x3f3   :  { %v7294_v57 = vmax.f32 %v7230_v19, 0.0  ;;  %v7161_v50 = vadd.f32 %v14085_v5, %v6451_v18  ;;  %v6454_v36 = vadd.f32 %v10401_v3, %v5744_v62  ;;  %v7233_v53 = vadd.f32 %v13877_v51, %v7162_v6  ;;  %v7076_v19 = vpop.f32.mrf.mxu0 }
 0x3f4   :  { %v6326_v2 = vpop.f32.mrf.mxu1  ;;  %v5746_v5 = vadd.f32 %v15617_v56, %v15616_v34  ;;  %v5036_v17 = vadd.f32 %v15618_v48, %v4326_v61  ;;  %v15634_v48 = vld [vmem:[#allocation122_spill] sm:$0xff] }
 0x3f5   :  { %v7232_v10 = vadd.f32 %v13877_v51, %v7161_v50  ;;  %v7164_v20 = vadd.f32 %v14099_v47, %v6454_v36  ;;  %v6453_v23 = vadd.f32 %v6326_v2, %v5743_v21  ;;  %10589 = vmatprep.mubr.msk.f32.mxu1 %vm741_vm2, %v7294_v57  ;;  %v4328_v47 = vadd.f32 %v15621_v46, %v15620_v27  ;;  %v15629_v21 = vld [vmem:[#allocation28_spill] sm:$0xff]  ;;  %v10514_v2 = vpop.f32.mrf.mxu0 }
 0x3f6   :  { %v10404_v9 = vpop.f32.mrf.mxu1  ;;  %10590 = vmatmul.mubr.msk.f32.gmra.mxu1 %vm741_vm2, %v7295_v55  ;;  %v7297_v4 = vmax.f32 %v7233_v53, 0.0  ;;  %v5747_v0 = vadd.f32 %v15624_v59, %v5036_v17  ;;  %v5750_v24 = vadd.f32 %v15629_v21, %v15628_v31  ;;  %v15632_v55 = vld [vmem:[#allocation71_spill] sm:$0xff]  ;;  %v15633_v53 = vld [vmem:[#allocation54_spill] sm:$0xff] }
 0x3f7   :  { %v7296_v25 = vmax.f32 %v7232_v10, 0.0  ;;  %v7163_v38 = vadd.f32 %v14113_v63, %v6453_v23  ;;  %v6456_v8 = vadd.f32 %v10404_v9, %v5746_v5  ;;  %v7235_v28 = vadd.f32 %v13877_v51, %v7164_v20  ;;  %v15623_v63 = vld [vmem:[#allocation155_spill] sm:$0xff]  ;;  %v15646_v21 = vld [vmem:[#allocation130_spill] sm:$0xff] }
 0x3f8   :  { %v6336_v16 = vpop.f32.mrf.mxu1  ;;  %v5748_v26 = vadd.f32 %v15623_v63, %v15622_v29  ;;  %v5038_v58 = vadd.f32 %v15625_v49, %v4328_v47  ;;  %v15638_v47 = vld [vmem:[#allocation72_spill] sm:$0xff] }
 0x3f9   :  { %v7234_v44 = vadd.f32 %v13877_v51, %v7163_v38  ;;  %v7166_v39 = vadd.f32 %v14127_v60, %v6456_v8  ;;  %v6455_v41 = vadd.f32 %v6336_v16, %v5745_v52  ;;  %10592 = vmatprep.mubr.msk.f32.mxu1 %vm741_vm2, %v7296_v25  ;;  %v4330_v60 = vadd.f32 %v15627_v13, %v15626_v7  ;;  %v15636_v25 = vld [vmem:[#allocation85_spill] sm:$0xff]  ;;  %v15637_v8 = vld [vmem:[#allocation128_spill] sm:$0xff] }
 0x3fa   :  { %v10407_v32 = vpop.f32.mrf.mxu1  ;;  %10593 = vmatmul.mubr.msk.f32.gmra.mxu1 %vm741_vm2, %v7297_v4  ;;  %v7299_v6 = vmax.f32 %v7235_v28, 0.0  ;;  %v5749_v61 = vadd.f32 %v15631_v12, %v5038_v58  ;;  %v15639_v4 = vld [vmem:[#allocation56_spill] sm:$0xff]  ;;  %v7086_v28 = vpop.f32.mrf.mxu0  ;;  %v15644_v13 = vld [vmem:[#allocation73_spill] sm:$0xff] }
 0x3fb   :  { %v7298_v22 = vmax.f32 %v7234_v44, 0.0  ;;  %v7165_v54 = vadd.f32 %v14141_v11, %v6455_v41  ;;  %v6458_v37 = vadd.f32 %v10407_v32, %v5748_v26  ;;  %v7237_v18 = vadd.f32 %v13877_v51, %v7166_v39  ;;  %v15630_v11 = vld [vmem:[#allocation124_spill] sm:$0xff]  ;;  %v15640_v26 = vld [vmem:[#allocation126_spill] sm:$0xff]  ;;  %v15641_v32 = vld [vmem:[#allocation163_spill] sm:$0xff] }
 0x3fc   :  { %v6346_v43 = vpop.f32.mrf.mxu1  ;;  %v5040_v33 = vadd.f32 %v15630_v11, %v4330_v60  ;;  %v5754_v59 = vadd.f32 %v15641_v32, %v15640_v26  ;;  %v15645_v60 = vld [vmem:[#allocation58_spill] sm:$0xff]  ;;  %v14286_v26 = vld [vmem:[%s14806_s6] ss:$0 sm:$0xff] }
 0x3fd   :  { %v7236_v35 = vadd.f32 %v13877_v51, %v7165_v54  ;;  %v7168_v62 = vadd.f32 %v14155_v42, %v6458_v37  ;;  %v6457_v3 = vadd.f32 %v6346_v43, %v5747_v0  ;;  %10595 = vmatprep.mubr.msk.f32.mxu1 %vm741_vm2, %v7298_v22  ;;  %v4332_v42 = vadd.f32 %v15633_v53, %v15632_v55  ;;  %v15642_v0 = vld [vmem:[#allocation132_spill] sm:$0xff]  ;;  %v15643_v37 = vld [vmem:[#allocation165_spill] sm:$0xff] }
 0x3fe   :  { %v10410_v57 = vpop.f32.mrf.mxu1  ;;  %10596 = vmatmul.mubr.msk.f32.gmra.mxu1 %vm741_vm2, %v7299_v6  ;;  %v7301_v10 = vmax.f32 %v7237_v18, 0.0  ;;  %v5751_v38 = vadd.f32 %v15636_v25, %v5040_v33  ;;  %v4336_v6 = vadd.f32 %v15645_v60, %v15644_v13  ;;  %v15648_v33 = vld [vmem:[#allocation38_spill] sm:$0xff] }
 0x3ff   :  { %v7300_v50 = vmax.f32 %v7236_v35, 0.0  ;;  %v7167_v36 = vadd.f32 %v14169_v1, %v6457_v3  ;;  %v6460_v45 = vadd.f32 %v10410_v57, %v5750_v24  ;;  %v7239_v20 = vadd.f32 %v13877_v51, %v7168_v62  ;;  %v15635_v1 = vld [vmem:[#allocation83_spill] sm:$0xff]  ;;  %v15647_v24 = vld [vmem:[#allocation36_spill] sm:$0xff] }
 0x400   :  { %v6356_v23 = vpop.f32.mrf.mxu1  ;;  %v5752_v17 = vadd.f32 %v15635_v1, %v15634_v48  ;;  %v5042_v30 = vadd.f32 %v15637_v8, %v4332_v42 }
 0x401   :  { %v7238_v34 = vadd.f32 %v13877_v51, %v7167_v36  ;;  %v7170_v56 = vadd.f32 %v14183_v40, %v6460_v45  ;;  %v6459_v5 = vadd.f32 %v6356_v23, %v5749_v61  ;;  %10598 = vmatprep.mubr.msk.f32.mxu1 %vm741_vm2, %v7300_v50  ;;  %v4334_v40 = vadd.f32 %v15639_v4, %v15638_v47  ;;  %v15649_v50 = vld [vmem:[#allocation136_spill] sm:$0xff] }
 0x402   :  { %v10413_v9 = vpop.f32.mrf.mxu1  ;;  %10599 = vmatmul.mubr.msk.f32.gmra.mxu1 %vm741_vm2, %v7301_v10  ;;  %v7303_v16 = vmax.f32 %v7239_v20, 0.0  ;;  %v5753_v7 = vadd.f32 %v15643_v37, %v5042_v30  ;;  %v5046_v36 = vadd.f32 %v15649_v50, %v4336_v6  ;;  %v10625_v37 = vld [vmem:[%s14801_s0] sm:$0xff] }
 0x403   :  { %v7302_v52 = vmax.f32 %v7238_v34, 0.0  ;;  %v7169_v27 = vadd.f32 %v14197_v15, %v6459_v5  ;;  %v6462_v46 = vadd.f32 %v10413_v9, %v5752_v17  ;;  %v7241_v44 = vadd.f32 %v13877_v51, %v7170_v56  ;;  %v15650_v34 = vld [vmem:[#allocation134_spill] sm:$0xff]  ;;  %v15651_v56 = vld [vmem:[#allocation91_spill] sm:$0xff] }
 0x404   :  { %v6366_v39 = vpop.f32.mrf.mxu1  ;;  %v5044_v15 = vadd.f32 %v15642_v0, %v4334_v40  ;;  %v5758_v5 = vadd.f32 %v15651_v56, %v15650_v34  ;;  %v10631_v34 = vld [vmem:[%s14801_s0 + $0x30] sm:$0xff] }
 0x405   :  { %v7240_v41 = vadd.f32 %v13877_v51, %v7169_v27  ;;  %v7172_v29 = vadd.f32 %v10511_v14, %v6462_v46  ;;  %v6461_v63 = vadd.f32 %v6366_v39, %v5751_v38  ;;  %10601 = vmatprep.mubr.msk.f32.mxu1 %vm741_vm2, %v7302_v52  ;;  %v10517_v14 = vpop.f32.mrf.mxu0  ;;  %v7305_v18 = vmax.f32 %v7241_v44, 0.0  ;;  %v15652_v38 = vld [vmem:[#allocation93_spill] sm:$0xff]  ;;  %v10623_v39 = vld [vmem:[%s14805_s4] ss:$0 sm:$0xff] }
 0x406   :  { %v10416_v49 = vpop.f32.mrf.mxu1  ;;  %10602 = vmatmul.mubr.msk.f32.gmra.mxu1 %vm741_vm2, %v7303_v16  ;;  %v5755_v57 = vadd.f32 %v15648_v33, %v5044_v15  ;;  %v5757_v8 = vadd.f32 %v15652_v38, %v5046_v36  ;;  %v10624_v15 = vld [vmem:[%s14801_s0 + $0x8] sm:$0xff] }
 0x407   :  { %v7304_v58 = vmax.f32 %v7240_v41, 0.0  ;;  %v7171_v22 = vadd.f32 %v7076_v19, %v6461_v63  ;;  %v6464_v54 = vadd.f32 %v10416_v49, %v5754_v59  ;;  %v7243_v43 = vadd.f32 %v13877_v51, %v7172_v29  ;;  %v7096_v55 = vpop.f32.mrf.mxu0 }
 0x408   :  { %v6376_v35 = vpop.f32.mrf.mxu1  ;;  %v5756_v19 = vadd.f32 %v15647_v24, %v15646_v21 }
 0x409   :  { %v7242_v62 = vadd.f32 %v13877_v51, %v7171_v22  ;;  %v7174_v3 = vadd.f32 %v10514_v2, %v6464_v54  ;;  %v6463_v31 = vadd.f32 %v6376_v35, %v5753_v7  ;;  %10604 = vmatprep.mubr.msk.f32.mxu1 %vm741_vm2, %v7304_v58  ;;  %v7307_v53 = vmax.f32 %v7243_v43, 0.0  ;;  %v10520_v1 = vpop.f32.mrf.mxu0 }
 0x40a   :  { %v10419_v11 = vpop.f32.mrf.mxu1  ;;  %10605 = vmatmul.mubr.msk.f32.gmra.mxu1 %vm741_vm2, %v7305_v18 }
 0x40b   :  { %v7306_v45 = vmax.f32 %v7242_v62, 0.0  ;;  %v7173_v12 = vadd.f32 %v7086_v28, %v6463_v31  ;;  %v6466_v61 = vadd.f32 %v10419_v11, %v5756_v19  ;;  %v7245_v42 = vadd.f32 %v13877_v51, %v7174_v3  ;;  %v7106_v40 = vpop.f32.mrf.mxu0  ;;  %v10627_v3 = vld [vmem:[%s14801_s0 + $0x10] sm:$0xff]  ;;  %v10628_v11 = vld [vmem:[%s14801_s0 + $0x28] sm:$0xff] }
 0x40c   :  { %v6386_v2 = vpop.f32.mrf.mxu1 }
 0x40d   :  { %v7244_v10 = vadd.f32 %v13877_v51, %v7173_v12  ;;  %v7176_v20 = vadd.f32 %v10517_v14, %v6466_v61  ;;  %v6465_v23 = vadd.f32 %v6386_v2, %v5755_v57  ;;  %10607 = vmatprep.mubr.msk.f32.mxu1 %vm741_vm2, %v7306_v45  ;;  %v7309_v30 = vmax.f32 %v7245_v42, 0.0  ;;  %v10626_v14 = vld [vmem:[%s14801_s0 + $0x18] sm:$0xff]  ;;  %v10629_v45 = vld [vmem:[%s14801_s0 + $0x20] sm:$0xff] }
 0x40e   :  { %v10422_v48 = vpop.f32.mrf.mxu1  ;;  %10608 = vmatmul.mubr.msk.f32.gmra.mxu1 %vm741_vm2, %v7307_v53  ;;  %v10630_v42 = vld [vmem:[%s14801_s0 + $0x38] sm:$0xff] }
 0x40f   :  { %v7308_v17 = vmax.f32 %v7244_v10, 0.0  ;;  %v7175_v9 = vadd.f32 %v7096_v55, %v6465_v23  ;;  %v6468_v25 = vadd.f32 %v10422_v48, %v5758_v5  ;;  %v7247_v52 = vadd.f32 %v13877_v51, %v7176_v20 }
 0x410   :  { %v6396_v27 = vpop.f32.mrf.mxu1 }
 0x411   :  { %v7246_v46 = vadd.f32 %v13877_v51, %v7175_v9  ;;  %v7178_v47 = vadd.f32 %v10520_v1, %v6468_v25  ;;  %v6467_v4 = vadd.f32 %v6396_v27, %v5757_v8  ;;  %10610 = vmatprep.mubr.msk.f32.mxu1 %vm741_vm2, %v7308_v17  ;;  %v7311_v44 = vmax.f32 %v7247_v52, 0.0  ;;  %v10632_v17 = vld [vmem:[%s14801_s0 + $0x48] sm:$0xff] }
 0x412   :  { %10611 = vmatmul.mubr.msk.f32.gmra.mxu1 %vm741_vm2, %v7309_v30  ;;  %v10633_v30 = vld [vmem:[%s14801_s0 + $0x40] sm:$0xff] }
 0x413   :  { %v7310_v28 = vmax.f32 %v7246_v46, 0.0  ;;  %v7177_v16 = vadd.f32 %v7106_v40, %v6467_v4  ;;  %v7249_v41 = vadd.f32 %v10623_v39, %v7178_v47  ;;  %v10634_v4 = vld [vmem:[%s14801_s0 + $0x58] sm:$0xff] }
 0x415   :  { %v7248_v29 = vadd.f32 %v10623_v39, %v7177_v16  ;;  %10613 = vmatprep.mubr.msk.f32.mxu1 %vm741_vm2, %v7310_v28  ;;  %v7313_v63 = vmax.f32 %v7249_v41, 0.0  ;;  %v10635_v39 = vld [vmem:[%s14801_s0 + $0x50] sm:$0xff] }
 0x416   :  { %10614 = vmatmul.mubr.msk.f32.gmra.mxu1 %vm741_vm2, %v7311_v44 }
 0x417   :  { %v7312_v51 = vmax.f32 %v7248_v29, 0.0 }
 0x419   :  { %10616 = vmatprep.mubr.msk.f32.mxu1 %vm741_vm2, %v7312_v51 }
 0x41a   :  { %10617 = vmatmul.mubr.msk.f32.gmra.mxu1 %vm741_vm2, %v7313_v63 }
 0x45e   :  { %v10525_v32 = vpop.f32.mrf.mxu1 }
 0x45f   :  { %v7589_v59 = vadd.f32 %v10525_v32, %v14286_v26  ;;  %v10636_v32 = vld [vmem:[%s14801_s0 + $0x68] sm:$0xff] }
 0x460   :  { %v7583_v0 = vpop.f32.mrf.mxu1 }
 0x461   :  { %v7903_v49 = vadd.f32 %v10624_v15, %v7589_v59  ;;  %v7584_v58 = vadd.f32 %v14286_v26, %v7583_v0 }
 0x462   :  { %v10528_v22 = vpop.f32.mrf.mxu1 }
 0x463   :  { %v7967_v54 = vmax.f32 %v7903_v49, 0.0  ;;  %v7902_v7 = vadd.f32 %v10625_v37, %v7584_v58  ;;  %v7599_v13 = vadd.f32 %v10528_v22, %v14286_v26  ;;  %v10637_v58 = vld [vmem:[%s14801_s0 + $0x60] sm:$0xff] }
 0x464   :  { %v7593_v60 = vpop.f32.mrf.mxu1 }
 0x465   :  { %8031 = vst.msk [vmem:[%s14807_s7 + $0x8] sm:$0xff] %vm99_vm0, %v7967_v54  ;;  %v7966_v6 = vmax.f32 %v7902_v7, 0.0  ;;  %v7905_v18 = vadd.f32 %v10626_v14, %v7599_v13  ;;  %v7594_v43 = vadd.f32 %v14286_v26, %v7593_v60  ;;  %v10638_v13 = vld [vmem:[%s14801_s0 + $0x78] sm:$0xff] }
 0x466   :  { %v10531_v35 = vpop.f32.mrf.mxu1 }
 0x467   :  { %8030 = vst.msk [vmem:[%s14807_s7] sm:$0xff] %vm99_vm0, %v7966_v6  ;;  %v7969_v62 = vmax.f32 %v7905_v18, 0.0  ;;  %v7904_v31 = vadd.f32 %v10627_v3, %v7594_v43  ;;  %v7609_v21 = vadd.f32 %v10531_v35, %v14286_v26  ;;  %v10639_v43 = vld [vmem:[%s14801_s0 + $0x70] sm:$0xff] }
 0x468   :  { %v7603_v24 = vpop.f32.mrf.mxu1 }
 0x469   :  { %8033 = vst.msk [vmem:[%s14807_s7 + $0x18] sm:$0xff] %vm99_vm0, %v7969_v62  ;;  %v7968_v19 = vmax.f32 %v7904_v31, 0.0  ;;  %v7907_v33 = vadd.f32 %v10628_v11, %v7609_v21  ;;  %v7604_v57 = vadd.f32 %v14286_v26, %v7603_v24  ;;  %v10640_v21 = vld [vmem:[%s14801_s0 + $0x88] sm:$0xff] }
 0x46a   :  { %v10534_v50 = vpop.f32.mrf.mxu1 }
 0x46b   :  { %8032 = vst.msk [vmem:[%s14807_s7 + $0x10] sm:$0xff] %vm99_vm0, %v7968_v19  ;;  %v7971_v36 = vmax.f32 %v7907_v33, 0.0  ;;  %v7906_v12 = vadd.f32 %v10629_v45, %v7604_v57  ;;  %v7619_v61 = vadd.f32 %v10534_v50, %v14286_v26  ;;  %v10641_v57 = vld [vmem:[%s14801_s0 + $0x80] sm:$0xff] }
 0x46c   :  { %v7613_v55 = vpop.f32.mrf.mxu1 }
 0x46d   :  { %8035 = vst.msk [vmem:[%s14807_s7 + $0x28] sm:$0xff] %vm99_vm0, %v7971_v36  ;;  %v7970_v53 = vmax.f32 %v7906_v12, 0.0  ;;  %v7909_v2 = vadd.f32 %v10630_v42, %v7619_v61  ;;  %v7614_v10 = vadd.f32 %v14286_v26, %v7613_v55  ;;  %v10642_v61 = vld [vmem:[%s14801_s0 + $0x98] sm:$0xff] }
 0x46e   :  { %v10537_v20 = vpop.f32.mrf.mxu1 }
 0x46f   :  { %8034 = vst.msk [vmem:[%s14807_s7 + $0x20] sm:$0xff] %vm99_vm0, %v7970_v53  ;;  %v7973_v23 = vmax.f32 %v7909_v2, 0.0  ;;  %v7908_v56 = vadd.f32 %v10631_v34, %v7614_v10  ;;  %v7629_v5 = vadd.f32 %v10537_v20, %v14286_v26  ;;  %v10643_v10 = vld [vmem:[%s14801_s0 + $0x90] sm:$0xff] }
 0x470   :  { %v7623_v48 = vpop.f32.mrf.mxu1 }
 0x471   :  { %8037 = vst.msk [vmem:[%s14807_s7 + $0x38] sm:$0xff] %vm99_vm0, %v7973_v23  ;;  %v7972_v1 = vmax.f32 %v7908_v56, 0.0  ;;  %v7911_v9 = vadd.f32 %v10632_v17, %v7629_v5  ;;  %v7624_v25 = vadd.f32 %v14286_v26, %v7623_v48  ;;  %v10644_v5 = vld [vmem:[%s14801_s0 + $0xa8] sm:$0xff] }
 0x472   :  { %v10540_v38 = vpop.f32.mrf.mxu1 }
 0x473   :  { %8036 = vst.msk [vmem:[%s14807_s7 + $0x30] sm:$0xff] %vm99_vm0, %v7972_v1  ;;  %v7975_v8 = vmax.f32 %v7911_v9, 0.0  ;;  %v7910_v52 = vadd.f32 %v10633_v30, %v7624_v25  ;;  %v7639_v27 = vadd.f32 %v10540_v38, %v14286_v26  ;;  %v10645_v25 = vld [vmem:[%s14801_s0 + $0xa0] sm:$0xff] }
 0x474   :  { %v7633_v46 = vpop.f32.mrf.mxu1 }
 0x475   :  { %8039 = vst.msk [vmem:[%s14807_s7 + $0x48] sm:$0xff] %vm99_vm0, %v7975_v8  ;;  %v7974_v47 = vmax.f32 %v7910_v52, 0.0  ;;  %v7913_v40 = vadd.f32 %v10634_v4, %v7639_v27  ;;  %v7634_v28 = vadd.f32 %v14286_v26, %v7633_v46  ;;  %v10646_v27 = vld [vmem:[%s14801_s0 + $0xb8] sm:$0xff] }
 0x476   :  { %v10543_v16 = vpop.f32.mrf.mxu1 }
 0x477   :  { %8038 = vst.msk [vmem:[%s14807_s7 + $0x40] sm:$0xff] %vm99_vm0, %v7974_v47  ;;  %v7977_v44 = vmax.f32 %v7913_v40, 0.0  ;;  %v7912_v41 = vadd.f32 %v10635_v39, %v7634_v28  ;;  %v7649_v29 = vadd.f32 %v10543_v16, %v14286_v26  ;;  %v10647_v28 = vld [vmem:[%s14801_s0 + $0xb0] sm:$0xff] }
 0x478   :  { %v7643_v51 = vpop.f32.mrf.mxu1 }
 0x479   :  { %8041 = vst.msk [vmem:[%s14807_s7 + $0x58] sm:$0xff] %vm99_vm0, %v7977_v44  ;;  %v7976_v63 = vmax.f32 %v7912_v41, 0.0  ;;  %v7915_v59 = vadd.f32 %v10636_v32, %v7649_v29  ;;  %v7644_v0 = vadd.f32 %v14286_v26, %v7643_v51  ;;  %v10648_v29 = vld [vmem:[%s14801_s0 + $0xc8] sm:$0xff] }
 0x47a   :  { %v10546_v15 = vpop.f32.mrf.mxu1 }
 0x47b   :  { %8040 = vst.msk [vmem:[%s14807_s7 + $0x50] sm:$0xff] %vm99_vm0, %v7976_v63  ;;  %v7979_v49 = vmax.f32 %v7915_v59, 0.0  ;;  %v7914_v22 = vadd.f32 %v10637_v58, %v7644_v0  ;;  %v7659_v54 = vadd.f32 %v10546_v15, %v14286_v26  ;;  %v10649_v0 = vld [vmem:[%s14801_s0 + $0xc0] sm:$0xff] }
 0x47c   :  { %v7653_v37 = vpop.f32.mrf.mxu1 }
 0x47d   :  { %8043 = vst.msk [vmem:[%s14807_s7 + $0x68] sm:$0xff] %vm99_vm0, %v7979_v49  ;;  %v7978_v7 = vmax.f32 %v7914_v22, 0.0  ;;  %v7917_v60 = vadd.f32 %v10638_v13, %v7659_v54  ;;  %v7654_v6 = vadd.f32 %v14286_v26, %v7653_v37  ;;  %v10650_v54 = vld [vmem:[%s14801_s0 + $0xd8] sm:$0xff] }
 0x47e   :  { %v10549_v14 = vpop.f32.mrf.mxu1 }
 0x47f   :  { %8042 = vst.msk [vmem:[%s14807_s7 + $0x60] sm:$0xff] %vm99_vm0, %v7978_v7  ;;  %v7981_v18 = vmax.f32 %v7917_v60, 0.0  ;;  %v7916_v35 = vadd.f32 %v10639_v43, %v7654_v6  ;;  %v7669_v62 = vadd.f32 %v10549_v14, %v14286_v26  ;;  %v10651_v6 = vld [vmem:[%s14801_s0 + $0xd0] sm:$0xff] }
 0x480   :  { %v7663_v3 = vpop.f32.mrf.mxu1 }
 0x481   :  { %8045 = vst.msk [vmem:[%s14807_s7 + $0x78] sm:$0xff] %vm99_vm0, %v7981_v18  ;;  %v7980_v31 = vmax.f32 %v7916_v35, 0.0  ;;  %v7919_v24 = vadd.f32 %v10640_v21, %v7669_v62  ;;  %v7664_v19 = vadd.f32 %v14286_v26, %v7663_v3  ;;  %v10652_v62 = vld [vmem:[%s14801_s0 + $0xe8] sm:$0xff] }
 0x482   :  { %v10552_v11 = vpop.f32.mrf.mxu1 }
 0x483   :  { %8044 = vst.msk [vmem:[%s14807_s7 + $0x70] sm:$0xff] %vm99_vm0, %v7980_v31  ;;  %v7983_v33 = vmax.f32 %v7919_v24, 0.0  ;;  %v7918_v50 = vadd.f32 %v10641_v57, %v7664_v19  ;;  %v7679_v36 = vadd.f32 %v10552_v11, %v14286_v26  ;;  %v10653_v19 = vld [vmem:[%s14801_s0 + $0xe0] sm:$0xff] }
 0x484   :  { %v7673_v45 = vpop.f32.mrf.mxu1 }
 0x485   :  { %8047 = vst.msk [vmem:[%s14807_s7 + $0x88] sm:$0xff] %vm99_vm0, %v7983_v33  ;;  %v7982_v12 = vmax.f32 %v7918_v50, 0.0  ;;  %v7921_v55 = vadd.f32 %v10642_v61, %v7679_v36  ;;  %v7674_v53 = vadd.f32 %v14286_v26, %v7673_v45  ;;  %v10654_v36 = vld [vmem:[%s14801_s0 + $0xf8] sm:$0xff] }
 0x486   :  { %v10555_v42 = vpop.f32.mrf.mxu1 }
 0x487   :  { %8046 = vst.msk [vmem:[%s14807_s7 + $0x80] sm:$0xff] %vm99_vm0, %v7982_v12  ;;  %v7985_v2 = vmax.f32 %v7921_v55, 0.0  ;;  %v7920_v20 = vadd.f32 %v10643_v10, %v7674_v53  ;;  %v7689_v23 = vadd.f32 %v10555_v42, %v14286_v26  ;;  %v10655_v53 = vld [vmem:[%s14801_s0 + $0xf0] sm:$0xff] }
 0x488   :  { %v7683_v34 = vpop.f32.mrf.mxu1 }
 0x489   :  { %8049 = vst.msk [vmem:[%s14807_s7 + $0x98] sm:$0xff] %vm99_vm0, %v7985_v2  ;;  %v7984_v56 = vmax.f32 %v7920_v20, 0.0  ;;  %v7923_v48 = vadd.f32 %v10644_v5, %v7689_v23  ;;  %v7684_v1 = vadd.f32 %v14286_v26, %v7683_v34  ;;  %v10656_v23 = vld [vmem:[%s14801_s0 + $0x108] sm:$0xff] }
 0x48a   :  { %v10558_v17 = vpop.f32.mrf.mxu1 }
 0x48b   :  { %8048 = vst.msk [vmem:[%s14807_s7 + $0x90] sm:$0xff] %vm99_vm0, %v7984_v56  ;;  %v7987_v9 = vmax.f32 %v7923_v48, 0.0  ;;  %v7922_v38 = vadd.f32 %v10645_v25, %v7684_v1  ;;  %v7699_v8 = vadd.f32 %v10558_v17, %v14286_v26  ;;  %v10657_v1 = vld [vmem:[%s14801_s0 + $0x100] sm:$0xff] }
 0x48c   :  { %v7693_v30 = vpop.f32.mrf.mxu1 }
 0x48d   :  { %8051 = vst.msk [vmem:[%s14807_s7 + $0xa8] sm:$0xff] %vm99_vm0, %v7987_v9  ;;  %v7986_v52 = vmax.f32 %v7922_v38, 0.0  ;;  %v7925_v46 = vadd.f32 %v10646_v27, %v7699_v8  ;;  %v7694_v47 = vadd.f32 %v14286_v26, %v7693_v30  ;;  %v10658_v8 = vld [vmem:[%s14801_s0 + $0x118] sm:$0xff] }
 0x48e   :  { %v10561_v4 = vpop.f32.mrf.mxu1 }
 0x48f   :  { %8050 = vst.msk [vmem:[%s14807_s7 + $0xa0] sm:$0xff] %vm99_vm0, %v7986_v52  ;;  %v7989_v40 = vmax.f32 %v7925_v46, 0.0  ;;  %v7924_v16 = vadd.f32 %v10647_v28, %v7694_v47  ;;  %v7709_v44 = vadd.f32 %v10561_v4, %v14286_v26  ;;  %v10659_v47 = vld [vmem:[%s14801_s0 + $0x110] sm:$0xff] }
 0x490   :  { %v7703_v39 = vpop.f32.mrf.mxu1 }
 0x491   :  { %8053 = vst.msk [vmem:[%s14807_s7 + $0xb8] sm:$0xff] %vm99_vm0, %v7989_v40  ;;  %v7988_v41 = vmax.f32 %v7924_v16, 0.0  ;;  %v7927_v51 = vadd.f32 %v10648_v29, %v7709_v44  ;;  %v7704_v63 = vadd.f32 %v14286_v26, %v7703_v39  ;;  %v10660_v44 = vld [vmem:[%s14801_s0 + $0x128] sm:$0xff] }
 0x492   :  { %v10564_v32 = vpop.f32.mrf.mxu1 }
 0x493   :  { %8052 = vst.msk [vmem:[%s14807_s7 + $0xb0] sm:$0xff] %vm99_vm0, %v7988_v41  ;;  %v7991_v59 = vmax.f32 %v7927_v51, 0.0  ;;  %v7926_v15 = vadd.f32 %v10649_v0, %v7704_v63  ;;  %v7719_v49 = vadd.f32 %v10564_v32, %v14286_v26  ;;  %v10661_v63 = vld [vmem:[%s14801_s0 + $0x120] sm:$0xff] }
 0x494   :  { %v7713_v58 = vpop.f32.mrf.mxu1 }
 0x495   :  { %8055 = vst.msk [vmem:[%s14807_s7 + $0xc8] sm:$0xff] %vm99_vm0, %v7991_v59  ;;  %v7990_v22 = vmax.f32 %v7926_v15, 0.0  ;;  %v7929_v37 = vadd.f32 %v10650_v54, %v7719_v49  ;;  %v7714_v7 = vadd.f32 %v14286_v26, %v7713_v58  ;;  %v10662_v49 = vld [vmem:[%s14801_s0 + $0x138] sm:$0xff] }
 0x496   :  { %v10567_v13 = vpop.f32.mrf.mxu1 }
 0x497   :  { %8054 = vst.msk [vmem:[%s14807_s7 + $0xc0] sm:$0xff] %vm99_vm0, %v7990_v22  ;;  %v7993_v60 = vmax.f32 %v7929_v37, 0.0  ;;  %v7928_v14 = vadd.f32 %v10651_v6, %v7714_v7  ;;  %v7729_v18 = vadd.f32 %v10567_v13, %v14286_v26  ;;  %v10663_v7 = vld [vmem:[%s14801_s0 + $0x130] sm:$0xff] }
 0x498   :  { %v7723_v43 = vpop.f32.mrf.mxu1 }
 0x499   :  { %8057 = vst.msk [vmem:[%s14807_s7 + $0xd8] sm:$0xff] %vm99_vm0, %v7993_v60  ;;  %v7992_v35 = vmax.f32 %v7928_v14, 0.0  ;;  %v7931_v3 = vadd.f32 %v10652_v62, %v7729_v18  ;;  %v7724_v31 = vadd.f32 %v14286_v26, %v7723_v43  ;;  %v10664_v18 = vld [vmem:[%s14801_s0 + $0x148] sm:$0xff] }
 0x49a   :  { %v10570_v21 = vpop.f32.mrf.mxu1 }
 0x49b   :  { %8056 = vst.msk [vmem:[%s14807_s7 + $0xd0] sm:$0xff] %vm99_vm0, %v7992_v35  ;;  %v7995_v24 = vmax.f32 %v7931_v3, 0.0  ;;  %v7930_v11 = vadd.f32 %v10653_v19, %v7724_v31  ;;  %v7739_v33 = vadd.f32 %v10570_v21, %v14286_v26  ;;  %v10665_v31 = vld [vmem:[%s14801_s0 + $0x140] sm:$0xff] }
 0x49c   :  { %v7733_v57 = vpop.f32.mrf.mxu1 }
 0x49d   :  { %8059 = vst.msk [vmem:[%s14807_s7 + $0xe8] sm:$0xff] %vm99_vm0, %v7995_v24  ;;  %v7994_v50 = vmax.f32 %v7930_v11, 0.0  ;;  %v7933_v45 = vadd.f32 %v10654_v36, %v7739_v33  ;;  %v7734_v12 = vadd.f32 %v14286_v26, %v7733_v57  ;;  %v10666_v33 = vld [vmem:[%s14801_s0 + $0x158] sm:$0xff] }
 0x49e   :  { %v10573_v61 = vpop.f32.mrf.mxu1 }
 0x49f   :  { %8058 = vst.msk [vmem:[%s14807_s7 + $0xe0] sm:$0xff] %vm99_vm0, %v7994_v50  ;;  %v7997_v55 = vmax.f32 %v7933_v45, 0.0  ;;  %v7932_v42 = vadd.f32 %v10655_v53, %v7734_v12  ;;  %v7749_v2 = vadd.f32 %v10573_v61, %v14286_v26  ;;  %v10667_v12 = vld [vmem:[%s14801_s0 + $0x150] sm:$0xff] }
 0x4a0   :  { %v7743_v10 = vpop.f32.mrf.mxu1 }
 0x4a1   :  { %8061 = vst.msk [vmem:[%s14807_s7 + $0xf8] sm:$0xff] %vm99_vm0, %v7997_v55  ;;  %v7996_v20 = vmax.f32 %v7932_v42, 0.0  ;;  %v7935_v34 = vadd.f32 %v10656_v23, %v7749_v2  ;;  %v7744_v56 = vadd.f32 %v14286_v26, %v7743_v10  ;;  %v10668_v2 = vld [vmem:[%s14801_s0 + $0x168] sm:$0xff] }
 0x4a2   :  { %v10576_v5 = vpop.f32.mrf.mxu1 }
 0x4a3   :  { %8060 = vst.msk [vmem:[%s14807_s7 + $0xf0] sm:$0xff] %vm99_vm0, %v7996_v20  ;;  %v7999_v48 = vmax.f32 %v7935_v34, 0.0  ;;  %v7934_v17 = vadd.f32 %v10657_v1, %v7744_v56  ;;  %v7759_v9 = vadd.f32 %v10576_v5, %v14286_v26  ;;  %v10669_v56 = vld [vmem:[%s14801_s0 + $0x160] sm:$0xff] }
 0x4a4   :  { %v7753_v25 = vpop.f32.mrf.mxu1 }
 0x4a5   :  { %8063 = vst.msk [vmem:[%s14807_s7 + $0x108] sm:$0xff] %vm99_vm0, %v7999_v48  ;;  %v7998_v38 = vmax.f32 %v7934_v17, 0.0  ;;  %v7937_v30 = vadd.f32 %v10658_v8, %v7759_v9  ;;  %v7754_v52 = vadd.f32 %v14286_v26, %v7753_v25  ;;  %v10670_v9 = vld [vmem:[%s14801_s0 + $0x178] sm:$0xff] }
 0x4a6   :  { %v10579_v27 = vpop.f32.mrf.mxu1 }
 0x4a7   :  { %8062 = vst.msk [vmem:[%s14807_s7 + $0x100] sm:$0xff] %vm99_vm0, %v7998_v38  ;;  %v8001_v46 = vmax.f32 %v7937_v30, 0.0  ;;  %v7936_v4 = vadd.f32 %v10659_v47, %v7754_v52  ;;  %v7769_v40 = vadd.f32 %v10579_v27, %v14286_v26  ;;  %v10671_v52 = vld [vmem:[%s14801_s0 + $0x170] sm:$0xff] }
 0x4a8   :  { %v7763_v28 = vpop.f32.mrf.mxu1 }
 0x4a9   :  { %8065 = vst.msk [vmem:[%s14807_s7 + $0x118] sm:$0xff] %vm99_vm0, %v8001_v46  ;;  %v8000_v16 = vmax.f32 %v7936_v4, 0.0  ;;  %v7939_v39 = vadd.f32 %v10660_v44, %v7769_v40  ;;  %v7764_v41 = vadd.f32 %v14286_v26, %v7763_v28  ;;  %v10672_v40 = vld [vmem:[%s14801_s0 + $0x188] sm:$0xff] }
 0x4aa   :  { %v10582_v29 = vpop.f32.mrf.mxu1 }
 0x4ab   :  { %8064 = vst.msk [vmem:[%s14807_s7 + $0x110] sm:$0xff] %vm99_vm0, %v8000_v16  ;;  %v8003_v51 = vmax.f32 %v7939_v39, 0.0  ;;  %v7938_v32 = vadd.f32 %v10661_v63, %v7764_v41  ;;  %v7779_v59 = vadd.f32 %v10582_v29, %v14286_v26  ;;  %v10673_v41 = vld [vmem:[%s14801_s0 + $0x180] sm:$0xff] }
 0x4ac   :  { %v7773_v0 = vpop.f32.mrf.mxu1 }
 0x4ad   :  { %8067 = vst.msk [vmem:[%s14807_s7 + $0x128] sm:$0xff] %vm99_vm0, %v8003_v51  ;;  %v8002_v15 = vmax.f32 %v7938_v32, 0.0  ;;  %v7941_v58 = vadd.f32 %v10662_v49, %v7779_v59  ;;  %v7774_v22 = vadd.f32 %v14286_v26, %v7773_v0  ;;  %v10674_v59 = vld [vmem:[%s14801_s0 + $0x198] sm:$0xff] }
 0x4ae   :  { %v10585_v54 = vpop.f32.mrf.mxu1 }
 0x4af   :  { %8066 = vst.msk [vmem:[%s14807_s7 + $0x120] sm:$0xff] %vm99_vm0, %v8002_v15  ;;  %v8005_v37 = vmax.f32 %v7941_v58, 0.0  ;;  %v7940_v13 = vadd.f32 %v10663_v7, %v7774_v22  ;;  %v7789_v60 = vadd.f32 %v10585_v54, %v14286_v26  ;;  %v10675_v22 = vld [vmem:[%s14801_s0 + $0x190] sm:$0xff] }
 0x4b0   :  { %v7783_v6 = vpop.f32.mrf.mxu1 }
 0x4b1   :  { %8069 = vst.msk [vmem:[%s14807_s7 + $0x138] sm:$0xff] %vm99_vm0, %v8005_v37  ;;  %v8004_v14 = vmax.f32 %v7940_v13, 0.0  ;;  %v7943_v43 = vadd.f32 %v10664_v18, %v7789_v60  ;;  %v7784_v35 = vadd.f32 %v14286_v26, %v7783_v6  ;;  %v10676_v60 = vld [vmem:[%s14801_s0 + $0x1a8] sm:$0xff] }
 0x4b2   :  { %v10588_v62 = vpop.f32.mrf.mxu1 }
 0x4b3   :  { %8068 = vst.msk [vmem:[%s14807_s7 + $0x130] sm:$0xff] %vm99_vm0, %v8004_v14  ;;  %v8007_v3 = vmax.f32 %v7943_v43, 0.0  ;;  %v7942_v21 = vadd.f32 %v10665_v31, %v7784_v35  ;;  %v7799_v24 = vadd.f32 %v10588_v62, %v14286_v26  ;;  %v10677_v35 = vld [vmem:[%s14801_s0 + $0x1a0] sm:$0xff] }
 0x4b4   :  { %v7793_v19 = vpop.f32.mrf.mxu1 }
 0x4b5   :  { %8071 = vst.msk [vmem:[%s14807_s7 + $0x148] sm:$0xff] %vm99_vm0, %v8007_v3  ;;  %v8006_v11 = vmax.f32 %v7942_v21, 0.0  ;;  %v7945_v57 = vadd.f32 %v10666_v33, %v7799_v24  ;;  %v7794_v50 = vadd.f32 %v14286_v26, %v7793_v19  ;;  %v10678_v24 = vld [vmem:[%s14801_s0 + $0x1b8] sm:$0xff] }
 0x4b6   :  { %v10591_v36 = vpop.f32.mrf.mxu1 }
 0x4b7   :  { %8070 = vst.msk [vmem:[%s14807_s7 + $0x140] sm:$0xff] %vm99_vm0, %v8006_v11  ;;  %v8009_v45 = vmax.f32 %v7945_v57, 0.0  ;;  %v7944_v61 = vadd.f32 %v10667_v12, %v7794_v50  ;;  %v7809_v55 = vadd.f32 %v10591_v36, %v14286_v26  ;;  %v10679_v50 = vld [vmem:[%s14801_s0 + $0x1b0] sm:$0xff] }
 0x4b8   :  { %v7803_v53 = vpop.f32.mrf.mxu1 }
 0x4b9   :  { %8073 = vst.msk [vmem:[%s14807_s7 + $0x158] sm:$0xff] %vm99_vm0, %v8009_v45  ;;  %v8008_v42 = vmax.f32 %v7944_v61, 0.0  ;;  %v7947_v10 = vadd.f32 %v10668_v2, %v7809_v55  ;;  %v7804_v20 = vadd.f32 %v14286_v26, %v7803_v53  ;;  %v10680_v55 = vld [vmem:[%s14801_s0 + $0x1c8] sm:$0xff] }
 0x4ba   :  { %v10594_v23 = vpop.f32.mrf.mxu1 }
 0x4bb   :  { %8072 = vst.msk [vmem:[%s14807_s7 + $0x150] sm:$0xff] %vm99_vm0, %v8008_v42  ;;  %v8011_v34 = vmax.f32 %v7947_v10, 0.0  ;;  %v7946_v5 = vadd.f32 %v10669_v56, %v7804_v20  ;;  %v7819_v48 = vadd.f32 %v10594_v23, %v14286_v26  ;;  %v10681_v20 = vld [vmem:[%s14801_s0 + $0x1c0] sm:$0xff] }
 0x4bc   :  { %v7813_v1 = vpop.f32.mrf.mxu1 }
 0x4bd   :  { %8075 = vst.msk [vmem:[%s14807_s7 + $0x168] sm:$0xff] %vm99_vm0, %v8011_v34  ;;  %v8010_v17 = vmax.f32 %v7946_v5, 0.0  ;;  %v7949_v25 = vadd.f32 %v10670_v9, %v7819_v48  ;;  %v7814_v38 = vadd.f32 %v14286_v26, %v7813_v1  ;;  %v10682_v48 = vld [vmem:[%s14801_s0 + $0x1d8] sm:$0xff] }
 0x4be   :  { %v10597_v8 = vpop.f32.mrf.mxu1 }
 0x4bf   :  { %8074 = vst.msk [vmem:[%s14807_s7 + $0x160] sm:$0xff] %vm99_vm0, %v8010_v17  ;;  %v8013_v30 = vmax.f32 %v7949_v25, 0.0  ;;  %v7948_v27 = vadd.f32 %v10671_v52, %v7814_v38  ;;  %v7829_v46 = vadd.f32 %v10597_v8, %v14286_v26  ;;  %v10683_v38 = vld [vmem:[%s14801_s0 + $0x1d0] sm:$0xff] }
 0x4c0   :  { %v7823_v47 = vpop.f32.mrf.mxu1 }
 0x4c1   :  { %8077 = vst.msk [vmem:[%s14807_s7 + $0x178] sm:$0xff] %vm99_vm0, %v8013_v30  ;;  %v8012_v4 = vmax.f32 %v7948_v27, 0.0  ;;  %v7951_v28 = vadd.f32 %v10672_v40, %v7829_v46  ;;  %v7824_v16 = vadd.f32 %v14286_v26, %v7823_v47  ;;  %v10684_v46 = vld [vmem:[%s14801_s0 + $0x1e8] sm:$0xff] }
 0x4c2   :  { %v10600_v44 = vpop.f32.mrf.mxu1 }
 0x4c3   :  { %8076 = vst.msk [vmem:[%s14807_s7 + $0x170] sm:$0xff] %vm99_vm0, %v8012_v4  ;;  %v8015_v39 = vmax.f32 %v7951_v28, 0.0  ;;  %v7950_v29 = vadd.f32 %v10673_v41, %v7824_v16  ;;  %v7839_v51 = vadd.f32 %v10600_v44, %v14286_v26  ;;  %v10685_v16 = vld [vmem:[%s14801_s0 + $0x1e0] sm:$0xff] }
 0x4c4   :  { %v7833_v63 = vpop.f32.mrf.mxu1 }
 0x4c5   :  { %8079 = vst.msk [vmem:[%s14807_s7 + $0x188] sm:$0xff] %vm99_vm0, %v8015_v39  ;;  %v8014_v32 = vmax.f32 %v7950_v29, 0.0  ;;  %v7953_v0 = vadd.f32 %v10674_v59, %v7839_v51  ;;  %v7834_v15 = vadd.f32 %v14286_v26, %v7833_v63  ;;  %v10686_v51 = vld [vmem:[%s14801_s0 + $0x1f8] sm:$0xff] }
 0x4c6   :  { %v10603_v49 = vpop.f32.mrf.mxu1 }
 0x4c7   :  { %8078 = vst.msk [vmem:[%s14807_s7 + $0x180] sm:$0xff] %vm99_vm0, %v8014_v32  ;;  %v8017_v58 = vmax.f32 %v7953_v0, 0.0  ;;  %v7952_v54 = vadd.f32 %v10675_v22, %v7834_v15  ;;  %v7849_v37 = vadd.f32 %v10603_v49, %v14286_v26  ;;  %v10687_v0 = vld [vmem:[%s14801_s0 + $0x1f0] sm:$0xff] }
 0x4c8   :  { %v7843_v7 = vpop.f32.mrf.mxu1 }
 0x4c9   :  { %8081 = vst.msk [vmem:[%s14807_s7 + $0x198] sm:$0xff] %vm99_vm0, %v8017_v58  ;;  %v8016_v13 = vmax.f32 %v7952_v54, 0.0  ;;  %v7955_v6 = vadd.f32 %v10676_v60, %v7849_v37  ;;  %v7844_v14 = vadd.f32 %v14286_v26, %v7843_v7 }
 0x4ca   :  { %v10606_v18 = vpop.f32.mrf.mxu1 }
 0x4cb   :  { %8080 = vst.msk [vmem:[%s14807_s7 + $0x190] sm:$0xff] %vm99_vm0, %v8016_v13  ;;  %v8019_v43 = vmax.f32 %v7955_v6, 0.0  ;;  %v7954_v62 = vadd.f32 %v10677_v35, %v7844_v14  ;;  %v7859_v3 = vadd.f32 %v10606_v18, %v14286_v26 }
 0x4cc   :  { %v7853_v31 = vpop.f32.mrf.mxu1 }
 0x4cd   :  { %8083 = vst.msk [vmem:[%s14807_s7 + $0x1a8] sm:$0xff] %vm99_vm0, %v8019_v43  ;;  %v8018_v21 = vmax.f32 %v7954_v62, 0.0  ;;  %v7957_v19 = vadd.f32 %v10678_v24, %v7859_v3  ;;  %v7854_v11 = vadd.f32 %v14286_v26, %v7853_v31 }
 0x4ce   :  { %v10609_v33 = vpop.f32.mrf.mxu1 }
 0x4cf   :  { %8082 = vst.msk [vmem:[%s14807_s7 + $0x1a0] sm:$0xff] %vm99_vm0, %v8018_v21  ;;  %v8021_v57 = vmax.f32 %v7957_v19, 0.0  ;;  %v7956_v36 = vadd.f32 %v10679_v50, %v7854_v11  ;;  %v7869_v45 = vadd.f32 %v10609_v33, %v14286_v26 }
 0x4d0   :  { %v7863_v12 = vpop.f32.mrf.mxu1 }
 0x4d1   :  { %8085 = vst.msk [vmem:[%s14807_s7 + $0x1b8] sm:$0xff] %vm99_vm0, %v8021_v57  ;;  %v8020_v61 = vmax.f32 %v7956_v36, 0.0  ;;  %v7959_v53 = vadd.f32 %v10680_v55, %v7869_v45  ;;  %v7864_v42 = vadd.f32 %v14286_v26, %v7863_v12 }
 0x4d2   :  { %v10612_v2 = vpop.f32.mrf.mxu1 }
 0x4d3   :  { %8084 = vst.msk [vmem:[%s14807_s7 + $0x1b0] sm:$0xff] %vm99_vm0, %v8020_v61  ;;  %v8023_v10 = vmax.f32 %v7959_v53, 0.0  ;;  %v7958_v23 = vadd.f32 %v10681_v20, %v7864_v42  ;;  %v7879_v34 = vadd.f32 %v10612_v2, %v14286_v26 }
 0x4d4   :  { %v7873_v56 = vpop.f32.mrf.mxu1 }
 0x4d5   :  { %8087 = vst.msk [vmem:[%s14807_s7 + $0x1c8] sm:$0xff] %vm99_vm0, %v8023_v10  ;;  %v8022_v5 = vmax.f32 %v7958_v23, 0.0  ;;  %v7961_v1 = vadd.f32 %v10682_v48, %v7879_v34  ;;  %v7874_v17 = vadd.f32 %v14286_v26, %v7873_v56 }
 0x4d6   :  { %v10615_v9 = vpop.f32.mrf.mxu1 }
 0x4d7   :  { %8086 = vst.msk [vmem:[%s14807_s7 + $0x1c0] sm:$0xff] %vm99_vm0, %v8022_v5  ;;  %v8025_v25 = vmax.f32 %v7961_v1, 0.0  ;;  %v7960_v8 = vadd.f32 %v10683_v38, %v7874_v17  ;;  %v7889_v30 = vadd.f32 %v10615_v9, %v14286_v26 }
 0x4d8   :  { %v7883_v52 = vpop.f32.mrf.mxu1 }
 0x4d9   :  { %8089 = vst.msk [vmem:[%s14807_s7 + $0x1d8] sm:$0xff] %vm99_vm0, %v8025_v25  ;;  %v8024_v27 = vmax.f32 %v7960_v8, 0.0  ;;  %v7963_v47 = vadd.f32 %v10684_v46, %v7889_v30  ;;  %v7884_v4 = vadd.f32 %v14286_v26, %v7883_v52 }
 0x4da   :  { %v10618_v40 = vpop.f32.mrf.mxu1 }
 0x4db   :  { %8088 = vst.msk [vmem:[%s14807_s7 + $0x1d0] sm:$0xff] %vm99_vm0, %v8024_v27  ;;  %v8027_v28 = vmax.f32 %v7963_v47, 0.0  ;;  %v7962_v44 = vadd.f32 %v10685_v16, %v7884_v4  ;;  %v7899_v39 = vadd.f32 %v10618_v40, %v14286_v26 }
 0x4dc   :  { %v7893_v41 = vpop.f32.mrf.mxu1 }
 0x4dd   :  { %8091 = vst.msk [vmem:[%s14807_s7 + $0x1e8] sm:$0xff] %vm99_vm0, %v8027_v28  ;;  %v8026_v29 = vmax.f32 %v7962_v44, 0.0  ;;  %v7965_v63 = vadd.f32 %v10686_v51, %v7899_v39  ;;  %v7894_v32 = vadd.f32 %v14286_v26, %v7893_v41 }
 0x4df   :  { %8090 = vst.msk [vmem:[%s14807_s7 + $0x1e0] sm:$0xff] %vm99_vm0, %v8026_v29  ;;  %v8029_v59 = vmax.f32 %v7965_v63, 0.0  ;;  %v7964_v15 = vadd.f32 %v10687_v0, %v7894_v32 }
 0x4e1   :  { %8093 = vst.msk [vmem:[%s14807_s7 + $0x1f8] sm:$0xff] %vm99_vm0, %v8029_v59  ;;  %v8028_v49 = vmax.f32 %v7964_v15, 0.0 }
 0x4e3   :  { %8092 = vst.msk [vmem:[%s14807_s7 + $0x1f0] sm:$0xff] %vm99_vm0, %v8028_v49 }

</bundles_post_ra>
